<compile_context>
chip_gen: v7x
topology: tpu7x:2x2x1
jax: 0.10.0
libtpu: 0.0.40
codegen_flags: <defaults>
</compile_context>

<pallas_src>
import functools

import jax
import jax.numpy as jnp
from jax.experimental import pallas as pl
from jax.experimental.pallas import tpu as pltpu


def _fused_autoencoder_kernel(x_ref, style_ref, w1_ref, w2_ref, wd1_ref,
                              wd2_ref, bias_ref, o_ref,
                              pad1_ref, padc_ref, patch1_ref, patchc_ref,
                              *, H, W, BT):
    """Fused forward pass for BT images (grid iterates over batch blocks).

    x_ref     : (BT, H, W, 3)          NHWC images
    style_ref : (BT, 1, 16)            gathered style embedding rows
    w1_ref    : (27, 32)               conv1 weights, rows ordered (ky, kx, ci)
    w2_ref    : (288, 16)              conv2 weights
    wd1_ref   : (288, 32)              deconv1 weights
    wd2_ref   : (288, 12)              deconv2+upsample merged weights
                                        (cols ordered (phase=2p+q, ch))
    bias_ref  : (4, 32)                packed biases [b1 | b2 | bd1 | bd2*4]
    o_ref     : (BT, Hh*Wh, 12)        out[b, a*Wh+c, 3*(2p+q)+ch]
    pad1_ref  : (BT, H+2, W+2, 3)      VMEM scratch (padded conv1 input)
    padc_ref  : (BT, Hh+2, Wh+2, 32)   VMEM scratch (shared padded 32-ch input)
    patch1_ref: (BT*H*W, 27)           VMEM scratch (conv1 im2col patch)
    patchc_ref: (BT*Hh*Wh, 288)        VMEM scratch (shared 32-ch im2col patch)
    """
    f32 = jnp.float32
    Hh, Wh = H // 2, W // 2
    HW, HWh = H * W, Hh * Wh
    M1, Mc = BT * HW, BT * HWh

    b1 = bias_ref[0:1, 0:32]
    b2 = bias_ref[1:2, 0:16]
    bd1 = bias_ref[2:3, 0:32]
    bd2 = bias_ref[3:4, 0:12]

    # ---- zero only the 1-pixel halos (interiors are always overwritten) -----
    pad1_ref[:, 0:1, :, :] = jnp.zeros((BT, 1, W + 2, 3), f32)
    pad1_ref[:, H + 1:H + 2, :, :] = jnp.zeros((BT, 1, W + 2, 3), f32)
    pad1_ref[:, :, 0:1, :] = jnp.zeros((BT, H + 2, 1, 3), f32)
    pad1_ref[:, :, W + 1:W + 2, :] = jnp.zeros((BT, H + 2, 1, 3), f32)
    padc_ref[:, 0:1, :, :] = jnp.zeros((BT, 1, Wh + 2, 32), f32)
    padc_ref[:, Hh + 1:Hh + 2, :, :] = jnp.zeros((BT, 1, Wh + 2, 32), f32)
    padc_ref[:, :, 0:1, :] = jnp.zeros((BT, Hh + 2, 1, 32), f32)
    padc_ref[:, :, Wh + 1:Wh + 2, :] = jnp.zeros((BT, Hh + 2, 1, 32), f32)

    def build_patch_c():
        # In-place im2col of the current padc interior into the shared patch.
        t = 0
        for ky in range(3):
            for kx in range(3):
                patchc_ref[:, 32 * t:32 * (t + 1)] = (
                    padc_ref[:, ky:ky + Hh, kx:kx + Wh, :].reshape(Mc, 32))
                t += 1

    # ---------------- conv1 (3 -> 32); x/255 folded post-matmul; ReLU --------
    pad1_ref[:, 1:H + 1, 1:W + 1, :] = x_ref[...].astype(f32)
    t = 0
    for ky in range(3):
        for kx in range(3):
            patch1_ref[:, 3 * t:3 * (t + 1)] = (
                pad1_ref[:, ky:ky + H, kx:kx + W, :].reshape(M1, 3))
            t += 1
    a1 = jnp.dot(patch1_ref[...], w1_ref[...], preferred_element_type=f32)
    a1 = jnp.maximum(a1 * (1.0 / 255.0) + b1, 0.0)                   # (M1, 32)

    # ---------------- 2x2 max pool --------------------------------------------
    # Pool h-pairs first via a layout-trivial leading split, then pool w-pairs
    # (the relayout-y (.., 2, 32) step) on half the data.
    v = a1.reshape(BT * Hh, 2, W, 32)
    ah = jnp.maximum(v[:, 0], v[:, 1])                               # (BT*Hh, W, 32)
    pooled = jnp.max(ah.reshape(Mc, 2, 32), axis=1)                  # (Mc, 32)

    # ---------------- conv2 (32 -> 16) ----------------------------------------
    padc_ref[:, 1:Hh + 1, 1:Wh + 1, :] = pooled.reshape(BT, Hh, Wh, 32)
    build_patch_c()
    encoded = jnp.dot(patchc_ref[...], w2_ref[...],
                      preferred_element_type=f32) + b2               # (Mc, 16)

    # ---------------- style broadcast + channel concat (written into pad) -----
    padc_ref[:, 1:Hh + 1, 1:Wh + 1, 0:16] = encoded.reshape(BT, Hh, Wh, 16)
    style = style_ref[...].reshape(BT, 1, 1, 16)
    padc_ref[:, 1:Hh + 1, 1:Wh + 1, 16:32] = jnp.broadcast_to(
        style, (BT, Hh, Wh, 16))

    # ---------------- deconv1 (32 -> 32); ReLU --------------------------------
    build_patch_c()
    d = jnp.maximum(
        jnp.dot(patchc_ref[...], wd1_ref[...], preferred_element_type=f32)
        + bd1, 0.0)                                                  # (Mc, 32)

    # ------- deconv2 (32 -> 3) with the nearest 2x upsample folded in ---------
    # All four output phases (p, q) come out of ONE matmul against the ordinary
    # 3x3 im2col patch of padded d; the per-phase weights are zero-embedded
    # into a single (288, 12) matrix in the wrapper.
    padc_ref[:, 1:Hh + 1, 1:Wh + 1, :] = d.reshape(BT, Hh, Wh, 32)
    build_patch_c()
    y = jnp.dot(patchc_ref[...], wd2_ref[...], preferred_element_type=f32)
    y = jax.nn.sigmoid(y + bd2) * 255.0                              # (Mc, 12)
    o_ref[...] = y.reshape(BT, HWh, 12)


def _merged_deconv2_weights(w_hwio, b):
    """Fold nearest-2x-upsample + 3x3 conv into a single (288, 12) matrix.

    Column block 3*(2p+q) holds output phase (p, q) expressed against the
    ordinary 3x3 im2col patch (taps KY, KX in {0,1,2}) of the zero-padded
    deconv1 output: original tap (ky, kx) contributes to merged tap
    (KY, KX) = ((ky+1+p)//2, (kx+1+q)//2).
    """
    cin, cout = w_hwio.shape[2], w_hwio.shape[3]
    w = jnp.zeros((9, cin, 4, cout), w_hwio.dtype)
    for p in range(2):
        for q in range(2):
            for ky in range(3):
                for kx in range(3):
                    KY = (ky + 1 + p) // 2
                    KX = (kx + 1 + q) // 2
                    w = w.at[3 * KY + KX, :, 2 * p + q, :].add(w_hwio[ky, kx])
    return w.reshape(9 * cin, 4 * cout), jnp.tile(b, 4)


def _pick_images_per_step(B, H, W):
    """Largest batch block that divides B, fits a rough VMEM budget, and keeps
    >=2 grid steps when possible (so megacore 'parallel' still helps)."""
    Hh, Wh = H // 2, W // 2
    per_img = 4 * ((H + 2) * (W + 2) * 128 + (Hh + 2) * (Wh + 2) * 128
                   + H * W * (128 + 64) + Hh * Wh * (384 + 512)
                   + 2 * H * W * 128 + 2 * Hh * Wh * 128)
    cap = max(1, (24 * 1024 * 1024) // per_img)
    divs = [d for d in range(1, B + 1) if B % d == 0 and d <= cap]
    multi = [d for d in divs if B // d >= 2]
    return max(multi) if multi else max(divs)


def init_params(key, num_classes):
    """Deterministic synthetic parameters (HWIO conv weights)."""
    ks = jax.random.split(key, 9)

    def conv_w(k, cin, cout):
        scale = 1.0 / jnp.sqrt(cin * 9.0)
        return jax.random.uniform(k, (3, 3, cin, cout), jnp.float32, -1.0, 1.0) * scale

    def conv_b(k, cin, cout):
        scale = 1.0 / jnp.sqrt(cin * 9.0)
        return jax.random.uniform(k, (cout,), jnp.float32, -1.0, 1.0) * scale

    return dict(
        w1=conv_w(ks[0], 3, 32),   b1=conv_b(ks[1], 3, 32),
        w2=conv_w(ks[2], 32, 16),  b2=conv_b(ks[3], 32, 16),
        wd1=conv_w(ks[4], 32, 32), bd1=conv_b(ks[5], 32, 32),
        wd2=conv_w(ks[6], 32, 3),  bd2=conv_b(ks[7], 32, 3),
        emb=jax.random.normal(ks[8], (num_classes, 16), jnp.float32),
    )


def forward(params, x_nchw, style_idx):
    """Single fused Pallas kernel matching AugmentedAutoencoder.forward."""
    B, C, H, W = x_nchw.shape
    assert C == 3 and H % 2 == 0 and W % 2 == 0
    Hh, Wh = H // 2, W // 2

    x = jnp.transpose(x_nchw, (0, 2, 3, 1)).astype(jnp.float32)      # NCHW -> NHWC
    style = params["emb"][style_idx].astype(jnp.float32).reshape(B, 1, 16)

    w1 = params["w1"].reshape(27, 32).astype(jnp.float32)
    w2 = params["w2"].reshape(288, 16).astype(jnp.float32)
    wd1 = params["wd1"].reshape(288, 32).astype(jnp.float32)
    wd2, bd2m = _merged_deconv2_weights(params["wd2"], params["bd2"])

    biases = jnp.zeros((4, 32), jnp.float32)
    biases = biases.at[0, :32].set(params["b1"])
    biases = biases.at[1, :16].set(params["b2"])
    biases = biases.at[2, :32].set(params["bd1"])
    biases = biases.at[3, :12].set(bd2m)

    bt = _pick_images_per_step(B, H, W)
    grid = (B // bt,)

    kernel = functools.partial(_fused_autoencoder_kernel, H=H, W=W, BT=bt)

    flops = 2 * B * (H * W * 27 * 32 + Hh * Wh * 288 * (16 + 32 + 12))
    bytes_accessed = 4 * (x.size + style.size + w1.size + w2.size + wd1.size
                          + wd2.size + biases.size + B * Hh * Wh * 12)

    out = pl.pallas_call(
        kernel,
        out_shape=jax.ShapeDtypeStruct((B, Hh * Wh, 12), jnp.float32),
        grid_spec=pltpu.PrefetchScalarGridSpec(
            num_scalar_prefetch=0,
            grid=grid,
            in_specs=[
                pl.BlockSpec((bt, H, W, 3), lambda b: (b, 0, 0, 0)),
                pl.BlockSpec((bt, 1, 16), lambda b: (b, 0, 0)),
                pl.BlockSpec((27, 32), lambda b: (0, 0)),
                pl.BlockSpec((288, 16), lambda b: (0, 0)),
                pl.BlockSpec((288, 32), lambda b: (0, 0)),
                pl.BlockSpec((288, 12), lambda b: (0, 0)),
                pl.BlockSpec((4, 32), lambda b: (0, 0)),
            ],
            out_specs=pl.BlockSpec((bt, Hh * Wh, 12), lambda b: (b, 0, 0)),
            scratch_shapes=[
                pltpu.VMEM((bt, H + 2, W + 2, 3), jnp.float32),
                pltpu.VMEM((bt, Hh + 2, Wh + 2, 32), jnp.float32),
                pltpu.VMEM((bt * H * W, 27), jnp.float32),
                pltpu.VMEM((bt * Hh * Wh, 288), jnp.float32),
            ],
        ),
        compiler_params=pltpu.CompilerParams(
            dimension_semantics=("parallel",),
            vmem_limit_bytes=32 * 1024 * 1024,
        ),
        cost_estimate=pl.CostEstimate(
            flops=flops,
            transcendentals=B * H * W * 3,
            bytes_accessed=bytes_accessed,
        ),
    )(x, style, w1, w2, wd1, wd2, biases)

    # out[b, a*Wh + c, 3*(2p+q) + ch] == decoded_nhwc[b, 2a+p, 2c+q, ch]
    out = out.reshape(B, Hh, Wh, 2, 2, 3)                            # (b, a, c, p, q, ch)
    decoded = jnp.transpose(out, (0, 5, 1, 3, 2, 4)).reshape(B, 3, H, W)
    return decoded                                                    # NCHW


def reference(params, x_nchw, style_idx):
    """Pure-JAX reference of the same forward pass (for correctness check)."""
    def conv(x, w, b):
        y = jax.lax.conv_general_dilated(
            x, w, (1, 1), "SAME", dimension_numbers=("NHWC", "HWIO", "NHWC"))
        return y + b

    x = jnp.transpose(x_nchw, (0, 2, 3, 1)).astype(jnp.float32) / 255.0
    h = jax.nn.relu(conv(x, params["w1"], params["b1"]))
    h = jax.lax.reduce_window(h, -jnp.inf, jax.lax.max,
                              (1, 2, 2, 1), (1, 2, 2, 1), "VALID")
    encoded = conv(h, params["w2"], params["b2"])
    style = params["emb"][style_idx]
    B, Hh, Wh, _ = encoded.shape
    style = jnp.broadcast_to(style[:, None, None, :], (B, Hh, Wh, 16))
    combined = jnp.concatenate([encoded, style], axis=-1)
    d = jax.nn.relu(conv(combined, params["wd1"], params["bd1"]))
    d = jnp.repeat(jnp.repeat(d, 2, axis=1), 2, axis=2)
    decoded = jax.nn.sigmoid(conv(d, params["wd2"], params["bd2"])) * 255.0
    return jnp.transpose(decoded, (0, 3, 1, 2))


if __name__ == "__main__":
    key = jax.random.PRNGKey(0)
    k_params, k_x, k_idx = jax.random.split(key, 3)

    num_classes = 10
    B, C, H, W = 4, 3, 16, 16

    params = init_params(k_params, num_classes)
    x = jax.random.uniform(k_x, (B, C, H, W), jnp.float32, 0.0, 255.0)
    style_idx = jax.random.randint(k_idx, (B,), 0, num_classes)

    out = jax.jit(forward)(params, x, style_idx)
    out = jax.block_until_ready(out)

    ref = reference(params, x, style_idx)
    assert out.shape == (B, C, H, W), out.shape
    max_err = float(jnp.max(jnp.abs(out - ref)))
    assert jnp.allclose(out, ref, atol=1e-2, rtol=1e-3), f"max_err={max_err}"

    print("KERNEL_OK")
</pallas_src>

<mosaic_0001>
module attributes {stable_mosaic.version = 11 : i64} {
  func.func @_fused_autoencoder_kernel(%arg0: i32, %arg1: memref<2x16x16x3xf32, #tpu.memory_space<vmem>>, %arg2: memref<2x1x16xf32, #tpu.memory_space<vmem>>, %arg3: memref<27x32xf32, #tpu.memory_space<vmem>>, %arg4: memref<288x16xf32, #tpu.memory_space<vmem>>, %arg5: memref<288x32xf32, #tpu.memory_space<vmem>>, %arg6: memref<288x12xf32, #tpu.memory_space<vmem>>, %arg7: memref<4x32xf32, #tpu.memory_space<vmem>>, %arg8: memref<2x64x12xf32, #tpu.memory_space<vmem>>, %arg9: memref<2x18x18x3xf32, #tpu.memory_space<vmem>>, %arg10: memref<2x10x10x32xf32, #tpu.memory_space<vmem>>, %arg11: memref<512x27xf32, #tpu.memory_space<vmem>>, %arg12: memref<128x288xf32, #tpu.memory_space<vmem>>) attributes {dimension_semantics = [#tpu.dimension_semantics<parallel>], iteration_bounds = array<i64: 2>, scalar_prefetch = 0 : i64, scratch_operands = 4 : i64, tpu.core_type = #tpu.core_type<tc>, window_params = [{transform_indices = @transform_0, window_bounds = array<i64: 2, 16, 16, 3>}, {transform_indices = @transform_1, window_bounds = array<i64: 2, 1, 16>}, {pipeline_mode = #tpu.pipeline_mode<synchronous>, transform_indices = @transform_2, window_bounds = array<i64: 27, 32>}, {pipeline_mode = #tpu.pipeline_mode<synchronous>, transform_indices = @transform_3, window_bounds = array<i64: 288, 16>}, {pipeline_mode = #tpu.pipeline_mode<synchronous>, transform_indices = @transform_4, window_bounds = array<i64: 288, 32>}, {pipeline_mode = #tpu.pipeline_mode<synchronous>, transform_indices = @transform_5, window_bounds = array<i64: 288, 12>}, {pipeline_mode = #tpu.pipeline_mode<synchronous>, transform_indices = @transform_6, window_bounds = array<i64: 4, 32>}, {transform_indices = @transform_7, window_bounds = array<i64: 2, 64, 12>}]} {
    %c0 = arith.constant 0 : index
    %c0_0 = arith.constant 0 : index
    %0 = vector.load %arg7[%c0, %c0_0] : memref<4x32xf32, #tpu.memory_space<vmem>>, vector<1x32xf32>
    %c1 = arith.constant 1 : index
    %c0_1 = arith.constant 0 : index
    %1 = vector.load %arg7[%c1, %c0_1] : memref<4x32xf32, #tpu.memory_space<vmem>>, vector<1x16xf32>
    %c2 = arith.constant 2 : index
    %c0_2 = arith.constant 0 : index
    %2 = vector.load %arg7[%c2, %c0_2] : memref<4x32xf32, #tpu.memory_space<vmem>>, vector<1x32xf32>
    %c3 = arith.constant 3 : index
    %c0_3 = arith.constant 0 : index
    %3 = vector.load %arg7[%c3, %c0_3] : memref<4x32xf32, #tpu.memory_space<vmem>>, vector<1x12xf32>
    %cst = arith.constant 0.000000e+00 : f32
    %4 = vector.broadcast %cst : f32 to vector<2x1x18x3xf32>
    %c0_4 = arith.constant 0 : index
    %c0_5 = arith.constant 0 : index
    %c0_6 = arith.constant 0 : index
    %c0_7 = arith.constant 0 : index
    %5 = vector.load %arg9[%c0_4, %c0_5, %c0_6, %c0_7] : memref<2x18x18x3xf32, #tpu.memory_space<vmem>>, vector<2x1x18x3xf32>
    tpu.vector_store %arg9[%c0_4, %c0_5, %c0_6, %c0_7], %4 {strides = array<i32>} : memref<2x18x18x3xf32, #tpu.memory_space<vmem>>, vector<2x1x18x3xf32>,
    %cst_8 = arith.constant 0.000000e+00 : f32
    %6 = vector.broadcast %cst_8 : f32 to vector<2x1x18x3xf32>
    %c0_9 = arith.constant 0 : index
    %c17 = arith.constant 17 : index
    %c0_10 = arith.constant 0 : index
    %c0_11 = arith.constant 0 : index
    %7 = vector.load %arg9[%c0_9, %c17, %c0_10, %c0_11] : memref<2x18x18x3xf32, #tpu.memory_space<vmem>>, vector<2x1x18x3xf32>
    tpu.vector_store %arg9[%c0_9, %c17, %c0_10, %c0_11], %6 {strides = array<i32>} : memref<2x18x18x3xf32, #tpu.memory_space<vmem>>, vector<2x1x18x3xf32>,
    %cst_12 = arith.constant 0.000000e+00 : f32
    %8 = vector.broadcast %cst_12 : f32 to vector<2x18x1x3xf32>
    %c0_13 = arith.constant 0 : index
    %c0_14 = arith.constant 0 : index
    %c0_15 = arith.constant 0 : index
    %c0_16 = arith.constant 0 : index
    %9 = vector.load %arg9[%c0_13, %c0_14, %c0_15, %c0_16] : memref<2x18x18x3xf32, #tpu.memory_space<vmem>>, vector<2x18x1x3xf32>
    tpu.vector_store %arg9[%c0_13, %c0_14, %c0_15, %c0_16], %8 {strides = array<i32>} : memref<2x18x18x3xf32, #tpu.memory_space<vmem>>, vector<2x18x1x3xf32>,
    %cst_17 = arith.constant 0.000000e+00 : f32
    %10 = vector.broadcast %cst_17 : f32 to vector<2x18x1x3xf32>
    %c0_18 = arith.constant 0 : index
    %c0_19 = arith.constant 0 : index
    %c17_20 = arith.constant 17 : index
    %c0_21 = arith.constant 0 : index
    %11 = vector.load %arg9[%c0_18, %c0_19, %c17_20, %c0_21] : memref<2x18x18x3xf32, #tpu.memory_space<vmem>>, vector<2x18x1x3xf32>
    tpu.vector_store %arg9[%c0_18, %c0_19, %c17_20, %c0_21], %10 {strides = array<i32>} : memref<2x18x18x3xf32, #tpu.memory_space<vmem>>, vector<2x18x1x3xf32>,
    %cst_22 = arith.constant 0.000000e+00 : f32
    %12 = vector.broadcast %cst_22 : f32 to vector<2x1x10x32xf32>
    %c0_23 = arith.constant 0 : index
    %c0_24 = arith.constant 0 : index
    %c0_25 = arith.constant 0 : index
    %c0_26 = arith.constant 0 : index
    %13 = vector.load %arg10[%c0_23, %c0_24, %c0_25, %c0_26] : memref<2x10x10x32xf32, #tpu.memory_space<vmem>>, vector<2x1x10x32xf32>
    tpu.vector_store %arg10[%c0_23, %c0_24, %c0_25, %c0_26], %12 {strides = array<i32>} : memref<2x10x10x32xf32, #tpu.memory_space<vmem>>, vector<2x1x10x32xf32>,
    %cst_27 = arith.constant 0.000000e+00 : f32
    %14 = vector.broadcast %cst_27 : f32 to vector<2x1x10x32xf32>
    %c0_28 = arith.constant 0 : index
    %c9 = arith.constant 9 : index
    %c0_29 = arith.constant 0 : index
    %c0_30 = arith.constant 0 : index
    %15 = vector.load %arg10[%c0_28, %c9, %c0_29, %c0_30] : memref<2x10x10x32xf32, #tpu.memory_space<vmem>>, vector<2x1x10x32xf32>
    tpu.vector_store %arg10[%c0_28, %c9, %c0_29, %c0_30], %14 {strides = array<i32>} : memref<2x10x10x32xf32, #tpu.memory_space<vmem>>, vector<2x1x10x32xf32>,
    %cst_31 = arith.constant 0.000000e+00 : f32
    %16 = vector.broadcast %cst_31 : f32 to vector<2x10x1x32xf32>
    %c0_32 = arith.constant 0 : index
    %c0_33 = arith.constant 0 : index
    %c0_34 = arith.constant 0 : index
    %c0_35 = arith.constant 0 : index
    %17 = vector.load %arg10[%c0_32, %c0_33, %c0_34, %c0_35] : memref<2x10x10x32xf32, #tpu.memory_space<vmem>>, vector<2x10x1x32xf32>
    tpu.vector_store %arg10[%c0_32, %c0_33, %c0_34, %c0_35], %16 {strides = array<i32>} : memref<2x10x10x32xf32, #tpu.memory_space<vmem>>, vector<2x10x1x32xf32>,
    %cst_36 = arith.constant 0.000000e+00 : f32
    %18 = vector.broadcast %cst_36 : f32 to vector<2x10x1x32xf32>
    %c0_37 = arith.constant 0 : index
    %c0_38 = arith.constant 0 : index
    %c9_39 = arith.constant 9 : index
    %c0_40 = arith.constant 0 : index
    %19 = vector.load %arg10[%c0_37, %c0_38, %c9_39, %c0_40] : memref<2x10x10x32xf32, #tpu.memory_space<vmem>>, vector<2x10x1x32xf32>
    tpu.vector_store %arg10[%c0_37, %c0_38, %c9_39, %c0_40], %18 {strides = array<i32>} : memref<2x10x10x32xf32, #tpu.memory_space<vmem>>, vector<2x10x1x32xf32>,
    %c0_41 = arith.constant 0 : index
    %c0_42 = arith.constant 0 : index
    %c0_43 = arith.constant 0 : index
    %c0_44 = arith.constant 0 : index
    %20 = vector.load %arg1[%c0_41, %c0_42, %c0_43, %c0_44] : memref<2x16x16x3xf32, #tpu.memory_space<vmem>>, vector<2x16x16x3xf32>
    %c0_45 = arith.constant 0 : index
    %c1_46 = arith.constant 1 : index
    %c1_47 = arith.constant 1 : index
    %c0_48 = arith.constant 0 : index
    %21 = vector.load %arg9[%c0_45, %c1_46, %c1_47, %c0_48] : memref<2x18x18x3xf32, #tpu.memory_space<vmem>>, vector<2x16x16x3xf32>
    tpu.vector_store %arg9[%c0_45, %c1_46, %c1_47, %c0_48], %20 {strides = array<i32>} : memref<2x18x18x3xf32, #tpu.memory_space<vmem>>, vector<2x16x16x3xf32>,
    %c0_49 = arith.constant 0 : index
    %c0_50 = arith.constant 0 : index
    %c0_51 = arith.constant 0 : index
    %c0_52 = arith.constant 0 : index
    %22 = vector.load %arg9[%c0_49, %c0_50, %c0_51, %c0_52] : memref<2x18x18x3xf32, #tpu.memory_space<vmem>>, vector<2x16x16x3xf32>
    %23 = vector.shape_cast %22 : vector<2x16x16x3xf32> to vector<512x3xf32>
    %c0_53 = arith.constant 0 : index
    %c0_54 = arith.constant 0 : index
    %24 = vector.load %arg11[%c0_53, %c0_54] : memref<512x27xf32, #tpu.memory_space<vmem>>, vector<512x3xf32>
    tpu.vector_store %arg11[%c0_53, %c0_54], %23 {strides = array<i32>} : memref<512x27xf32, #tpu.memory_space<vmem>>, vector<512x3xf32>,
    %c0_55 = arith.constant 0 : index
    %c0_56 = arith.constant 0 : index
    %c1_57 = arith.constant 1 : index
    %c0_58 = arith.constant 0 : index
    %25 = vector.load %arg9[%c0_55, %c0_56, %c1_57, %c0_58] : memref<2x18x18x3xf32, #tpu.memory_space<vmem>>, vector<2x16x16x3xf32>
    %26 = vector.shape_cast %25 : vector<2x16x16x3xf32> to vector<512x3xf32>
    %c0_59 = arith.constant 0 : index
    %c3_60 = arith.constant 3 : index
    %27 = vector.load %arg11[%c0_59, %c3_60] : memref<512x27xf32, #tpu.memory_space<vmem>>, vector<512x3xf32>
    tpu.vector_store %arg11[%c0_59, %c3_60], %26 {strides = array<i32>} : memref<512x27xf32, #tpu.memory_space<vmem>>, vector<512x3xf32>,
    %c0_61 = arith.constant 0 : index
    %c0_62 = arith.constant 0 : index
    %c2_63 = arith.constant 2 : index
    %c0_64 = arith.constant 0 : index
    %28 = vector.load %arg9[%c0_61, %c0_62, %c2_63, %c0_64] : memref<2x18x18x3xf32, #tpu.memory_space<vmem>>, vector<2x16x16x3xf32>
    %29 = vector.shape_cast %28 : vector<2x16x16x3xf32> to vector<512x3xf32>
    %c0_65 = arith.constant 0 : index
    %c6 = arith.constant 6 : index
    %30 = vector.load %arg11[%c0_65, %c6] : memref<512x27xf32, #tpu.memory_space<vmem>>, vector<512x3xf32>
    tpu.vector_store %arg11[%c0_65, %c6], %29 {strides = array<i32>} : memref<512x27xf32, #tpu.memory_space<vmem>>, vector<512x3xf32>,
    %c0_66 = arith.constant 0 : index
    %c1_67 = arith.constant 1 : index
    %c0_68 = arith.constant 0 : index
    %c0_69 = arith.constant 0 : index
    %31 = vector.load %arg9[%c0_66, %c1_67, %c0_68, %c0_69] : memref<2x18x18x3xf32, #tpu.memory_space<vmem>>, vector<2x16x16x3xf32>
    %32 = vector.shape_cast %31 : vector<2x16x16x3xf32> to vector<512x3xf32>
    %c0_70 = arith.constant 0 : index
    %c9_71 = arith.constant 9 : index
    %33 = vector.load %arg11[%c0_70, %c9_71] : memref<512x27xf32, #tpu.memory_space<vmem>>, vector<512x3xf32>
    tpu.vector_store %arg11[%c0_70, %c9_71], %32 {strides = array<i32>} : memref<512x27xf32, #tpu.memory_space<vmem>>, vector<512x3xf32>,
    %c0_72 = arith.constant 0 : index
    %c1_73 = arith.constant 1 : index
    %c1_74 = arith.constant 1 : index
    %c0_75 = arith.constant 0 : index
    %34 = vector.load %arg9[%c0_72, %c1_73, %c1_74, %c0_75] : memref<2x18x18x3xf32, #tpu.memory_space<vmem>>, vector<2x16x16x3xf32>
    %35 = vector.shape_cast %34 : vector<2x16x16x3xf32> to vector<512x3xf32>
    %c0_76 = arith.constant 0 : index
    %c12 = arith.constant 12 : index
    %36 = vector.load %arg11[%c0_76, %c12] : memref<512x27xf32, #tpu.memory_space<vmem>>, vector<512x3xf32>
    tpu.vector_store %arg11[%c0_76, %c12], %35 {strides = array<i32>} : memref<512x27xf32, #tpu.memory_space<vmem>>, vector<512x3xf32>,
    %c0_77 = arith.constant 0 : index
    %c1_78 = arith.constant 1 : index
    %c2_79 = arith.constant 2 : index
    %c0_80 = arith.constant 0 : index
    %37 = vector.load %arg9[%c0_77, %c1_78, %c2_79, %c0_80] : memref<2x18x18x3xf32, #tpu.memory_space<vmem>>, vector<2x16x16x3xf32>
    %38 = vector.shape_cast %37 : vector<2x16x16x3xf32> to vector<512x3xf32>
    %c0_81 = arith.constant 0 : index
    %c15 = arith.constant 15 : index
    %39 = vector.load %arg11[%c0_81, %c15] : memref<512x27xf32, #tpu.memory_space<vmem>>, vector<512x3xf32>
    tpu.vector_store %arg11[%c0_81, %c15], %38 {strides = array<i32>} : memref<512x27xf32, #tpu.memory_space<vmem>>, vector<512x3xf32>,
    %c0_82 = arith.constant 0 : index
    %c2_83 = arith.constant 2 : index
    %c0_84 = arith.constant 0 : index
    %c0_85 = arith.constant 0 : index
    %40 = vector.load %arg9[%c0_82, %c2_83, %c0_84, %c0_85] : memref<2x18x18x3xf32, #tpu.memory_space<vmem>>, vector<2x16x16x3xf32>
    %41 = vector.shape_cast %40 : vector<2x16x16x3xf32> to vector<512x3xf32>
    %c0_86 = arith.constant 0 : index
    %c18 = arith.constant 18 : index
    %42 = vector.load %arg11[%c0_86, %c18] : memref<512x27xf32, #tpu.memory_space<vmem>>, vector<512x3xf32>
    tpu.vector_store %arg11[%c0_86, %c18], %41 {strides = array<i32>} : memref<512x27xf32, #tpu.memory_space<vmem>>, vector<512x3xf32>,
    %c0_87 = arith.constant 0 : index
    %c2_88 = arith.constant 2 : index
    %c1_89 = arith.constant 1 : index
    %c0_90 = arith.constant 0 : index
    %43 = vector.load %arg9[%c0_87, %c2_88, %c1_89, %c0_90] : memref<2x18x18x3xf32, #tpu.memory_space<vmem>>, vector<2x16x16x3xf32>
    %44 = vector.shape_cast %43 : vector<2x16x16x3xf32> to vector<512x3xf32>
    %c0_91 = arith.constant 0 : index
    %c21 = arith.constant 21 : index
    %45 = vector.load %arg11[%c0_91, %c21] : memref<512x27xf32, #tpu.memory_space<vmem>>, vector<512x3xf32>
    tpu.vector_store %arg11[%c0_91, %c21], %44 {strides = array<i32>} : memref<512x27xf32, #tpu.memory_space<vmem>>, vector<512x3xf32>,
    %c0_92 = arith.constant 0 : index
    %c2_93 = arith.constant 2 : index
    %c2_94 = arith.constant 2 : index
    %c0_95 = arith.constant 0 : index
    %46 = vector.load %arg9[%c0_92, %c2_93, %c2_94, %c0_95] : memref<2x18x18x3xf32, #tpu.memory_space<vmem>>, vector<2x16x16x3xf32>
    %47 = vector.shape_cast %46 : vector<2x16x16x3xf32> to vector<512x3xf32>
    %c0_96 = arith.constant 0 : index
    %c24 = arith.constant 24 : index
    %48 = vector.load %arg11[%c0_96, %c24] : memref<512x27xf32, #tpu.memory_space<vmem>>, vector<512x3xf32>
    tpu.vector_store %arg11[%c0_96, %c24], %47 {strides = array<i32>} : memref<512x27xf32, #tpu.memory_space<vmem>>, vector<512x3xf32>,
    %c0_97 = arith.constant 0 : index
    %c0_98 = arith.constant 0 : index
    %49 = vector.load %arg11[%c0_97, %c0_98] : memref<512x27xf32, #tpu.memory_space<vmem>>, vector<512x27xf32>
    %c0_99 = arith.constant 0 : index
    %c0_100 = arith.constant 0 : index
    %50 = vector.load %arg3[%c0_99, %c0_100] : memref<27x32xf32, #tpu.memory_space<vmem>>, vector<27x32xf32>
    %cst_101 = arith.constant dense<0.000000e+00> : vector<512x32xf32>
    %51 = tpu.matmul %49, %50, %cst_101 {dimension_numbers = #tpu.dot_dimension_numbers<[1], [0], [0], [1], [0, 0, 1, 1], [], []>} : vector<512x27xf32>, vector<27x32xf32>, vector<512x32xf32> -> vector<512x32xf32>
    %cst_102 = arith.constant 0.00392156886 : f32
    %52 = vector.broadcast %cst_102 : f32 to vector<512x32xf32>
    %53 = arith.mulf %51, %52 : vector<512x32xf32>
    %54 = vector.broadcast %0 : vector<1x32xf32> to vector<512x32xf32>
    %55 = arith.addf %53, %54 : vector<512x32xf32>
    %cst_103 = arith.constant 0.000000e+00 : f32
    %56 = vector.broadcast %cst_103 : f32 to vector<512x32xf32>
    %57 = arith.maximumf %55, %56 : vector<512x32xf32>
    %58 = vector.shape_cast %57 : vector<512x32xf32> to vector<16x2x16x32xf32>
    %59 = vector.extract_strided_slice %58 {offsets = [0, 0, 0, 0], sizes = [16, 1, 16, 32], strides = [1, 1, 1, 1]} : vector<16x2x16x32xf32> to vector<16x1x16x32xf32>
    %60 = vector.shape_cast %59 : vector<16x1x16x32xf32> to vector<16x16x32xf32>
    %61 = vector.extract_strided_slice %58 {offsets = [0, 1, 0, 0], sizes = [16, 1, 16, 32], strides = [1, 1, 1, 1]} : vector<16x2x16x32xf32> to vector<16x1x16x32xf32>
    %62 = vector.shape_cast %61 : vector<16x1x16x32xf32> to vector<16x16x32xf32>
    %63 = arith.maximumf %60, %62 : vector<16x16x32xf32>
    %64 = vector.shape_cast %63 : vector<16x16x32xf32> to vector<128x2x32xf32>
    %cst_104 = arith.constant dense<0xFF800000> : vector<128x32xf32>
    %65 = vector.multi_reduction <maximumf>, %64, %cst_104 [1] : vector<128x2x32xf32> to vector<128x32xf32>
    %66 = vector.shape_cast %65 : vector<128x32xf32> to vector<2x8x8x32xf32>
    %c0_105 = arith.constant 0 : index
    %c1_106 = arith.constant 1 : index
    %c1_107 = arith.constant 1 : index
    %c0_108 = arith.constant 0 : index
    %67 = vector.load %arg10[%c0_105, %c1_106, %c1_107, %c0_108] : memref<2x10x10x32xf32, #tpu.memory_space<vmem>>, vector<2x8x8x32xf32>
    tpu.vector_store %arg10[%c0_105, %c1_106, %c1_107, %c0_108], %66 {strides = array<i32>} : memref<2x10x10x32xf32, #tpu.memory_space<vmem>>, vector<2x8x8x32xf32>,
    %c0_109 = arith.constant 0 : index
    %c0_110 = arith.constant 0 : index
    %c0_111 = arith.constant 0 : index
    %c0_112 = arith.constant 0 : index
    %68 = vector.load %arg10[%c0_109, %c0_110, %c0_111, %c0_112] : memref<2x10x10x32xf32, #tpu.memory_space<vmem>>, vector<2x8x8x32xf32>
    %69 = vector.shape_cast %68 : vector<2x8x8x32xf32> to vector<128x32xf32>
    %c0_113 = arith.constant 0 : index
    %c0_114 = arith.constant 0 : index
    %70 = vector.load %arg12[%c0_113, %c0_114] : memref<128x288xf32, #tpu.memory_space<vmem>>, vector<128x32xf32>
    tpu.vector_store %arg12[%c0_113, %c0_114], %69 {strides = array<i32>} : memref<128x288xf32, #tpu.memory_space<vmem>>, vector<128x32xf32>,
    %c0_115 = arith.constant 0 : index
    %c0_116 = arith.constant 0 : index
    %c1_117 = arith.constant 1 : index
    %c0_118 = arith.constant 0 : index
    %71 = vector.load %arg10[%c0_115, %c0_116, %c1_117, %c0_118] : memref<2x10x10x32xf32, #tpu.memory_space<vmem>>, vector<2x8x8x32xf32>
    %72 = vector.shape_cast %71 : vector<2x8x8x32xf32> to vector<128x32xf32>
    %c0_119 = arith.constant 0 : index
    %c32 = arith.constant 32 : index
    %73 = vector.load %arg12[%c0_119, %c32] : memref<128x288xf32, #tpu.memory_space<vmem>>, vector<128x32xf32>
    tpu.vector_store %arg12[%c0_119, %c32], %72 {strides = array<i32>} : memref<128x288xf32, #tpu.memory_space<vmem>>, vector<128x32xf32>,
    %c0_120 = arith.constant 0 : index
    %c0_121 = arith.constant 0 : index
    %c2_122 = arith.constant 2 : index
    %c0_123 = arith.constant 0 : index
    %74 = vector.load %arg10[%c0_120, %c0_121, %c2_122, %c0_123] : memref<2x10x10x32xf32, #tpu.memory_space<vmem>>, vector<2x8x8x32xf32>
    %75 = vector.shape_cast %74 : vector<2x8x8x32xf32> to vector<128x32xf32>
    %c0_124 = arith.constant 0 : index
    %c64 = arith.constant 64 : index
    %76 = vector.load %arg12[%c0_124, %c64] : memref<128x288xf32, #tpu.memory_space<vmem>>, vector<128x32xf32>
    tpu.vector_store %arg12[%c0_124, %c64], %75 {strides = array<i32>} : memref<128x288xf32, #tpu.memory_space<vmem>>, vector<128x32xf32>,
    %c0_125 = arith.constant 0 : index
    %c1_126 = arith.constant 1 : index
    %c0_127 = arith.constant 0 : index
    %c0_128 = arith.constant 0 : index
    %77 = vector.load %arg10[%c0_125, %c1_126, %c0_127, %c0_128] : memref<2x10x10x32xf32, #tpu.memory_space<vmem>>, vector<2x8x8x32xf32>
    %78 = vector.shape_cast %77 : vector<2x8x8x32xf32> to vector<128x32xf32>
    %c0_129 = arith.constant 0 : index
    %c96 = arith.constant 96 : index
    %79 = vector.load %arg12[%c0_129, %c96] : memref<128x288xf32, #tpu.memory_space<vmem>>, vector<128x32xf32>
    tpu.vector_store %arg12[%c0_129, %c96], %78 {strides = array<i32>} : memref<128x288xf32, #tpu.memory_space<vmem>>, vector<128x32xf32>,
    %c0_130 = arith.constant 0 : index
    %c1_131 = arith.constant 1 : index
    %c1_132 = arith.constant 1 : index
    %c0_133 = arith.constant 0 : index
    %80 = vector.load %arg10[%c0_130, %c1_131, %c1_132, %c0_133] : memref<2x10x10x32xf32, #tpu.memory_space<vmem>>, vector<2x8x8x32xf32>
    %81 = vector.shape_cast %80 : vector<2x8x8x32xf32> to vector<128x32xf32>
    %c0_134 = arith.constant 0 : index
    %c128 = arith.constant 128 : index
    %82 = vector.load %arg12[%c0_134, %c128] : memref<128x288xf32, #tpu.memory_space<vmem>>, vector<128x32xf32>
    tpu.vector_store %arg12[%c0_134, %c128], %81 {strides = array<i32>} : memref<128x288xf32, #tpu.memory_space<vmem>>, vector<128x32xf32>,
    %c0_135 = arith.constant 0 : index
    %c1_136 = arith.constant 1 : index
    %c2_137 = arith.constant 2 : index
    %c0_138 = arith.constant 0 : index
    %83 = vector.load %arg10[%c0_135, %c1_136, %c2_137, %c0_138] : memref<2x10x10x32xf32, #tpu.memory_space<vmem>>, vector<2x8x8x32xf32>
    %84 = vector.shape_cast %83 : vector<2x8x8x32xf32> to vector<128x32xf32>
    %c0_139 = arith.constant 0 : index
    %c160 = arith.constant 160 : index
    %85 = vector.load %arg12[%c0_139, %c160] : memref<128x288xf32, #tpu.memory_space<vmem>>, vector<128x32xf32>
    tpu.vector_store %arg12[%c0_139, %c160], %84 {strides = array<i32>} : memref<128x288xf32, #tpu.memory_space<vmem>>, vector<128x32xf32>,
    %c0_140 = arith.constant 0 : index
    %c2_141 = arith.constant 2 : index
    %c0_142 = arith.constant 0 : index
    %c0_143 = arith.constant 0 : index
    %86 = vector.load %arg10[%c0_140, %c2_141, %c0_142, %c0_143] : memref<2x10x10x32xf32, #tpu.memory_space<vmem>>, vector<2x8x8x32xf32>
    %87 = vector.shape_cast %86 : vector<2x8x8x32xf32> to vector<128x32xf32>
    %c0_144 = arith.constant 0 : index
    %c192 = arith.constant 192 : index
    %88 = vector.load %arg12[%c0_144, %c192] : memref<128x288xf32, #tpu.memory_space<vmem>>, vector<128x32xf32>
    tpu.vector_store %arg12[%c0_144, %c192], %87 {strides = array<i32>} : memref<128x288xf32, #tpu.memory_space<vmem>>, vector<128x32xf32>,
    %c0_145 = arith.constant 0 : index
    %c2_146 = arith.constant 2 : index
    %c1_147 = arith.constant 1 : index
    %c0_148 = arith.constant 0 : index
    %89 = vector.load %arg10[%c0_145, %c2_146, %c1_147, %c0_148] : memref<2x10x10x32xf32, #tpu.memory_space<vmem>>, vector<2x8x8x32xf32>
    %90 = vector.shape_cast %89 : vector<2x8x8x32xf32> to vector<128x32xf32>
    %c0_149 = arith.constant 0 : index
    %c224 = arith.constant 224 : index
    %91 = vector.load %arg12[%c0_149, %c224] : memref<128x288xf32, #tpu.memory_space<vmem>>, vector<128x32xf32>
    tpu.vector_store %arg12[%c0_149, %c224], %90 {strides = array<i32>} : memref<128x288xf32, #tpu.memory_space<vmem>>, vector<128x32xf32>,
    %c0_150 = arith.constant 0 : index
    %c2_151 = arith.constant 2 : index
    %c2_152 = arith.constant 2 : index
    %c0_153 = arith.constant 0 : index
    %92 = vector.load %arg10[%c0_150, %c2_151, %c2_152, %c0_153] : memref<2x10x10x32xf32, #tpu.memory_space<vmem>>, vector<2x8x8x32xf32>
    %93 = vector.shape_cast %92 : vector<2x8x8x32xf32> to vector<128x32xf32>
    %c0_154 = arith.constant 0 : index
    %c256 = arith.constant 256 : index
    %94 = vector.load %arg12[%c0_154, %c256] : memref<128x288xf32, #tpu.memory_space<vmem>>, vector<128x32xf32>
    tpu.vector_store %arg12[%c0_154, %c256], %93 {strides = array<i32>} : memref<128x288xf32, #tpu.memory_space<vmem>>, vector<128x32xf32>,
    %c0_155 = arith.constant 0 : index
    %c0_156 = arith.constant 0 : index
    %95 = vector.load %arg12[%c0_155, %c0_156] : memref<128x288xf32, #tpu.memory_space<vmem>>, vector<128x288xf32>
    %c0_157 = arith.constant 0 : index
    %c0_158 = arith.constant 0 : index
    %96 = vector.load %arg4[%c0_157, %c0_158] : memref<288x16xf32, #tpu.memory_space<vmem>>, vector<288x16xf32>
    %cst_159 = arith.constant dense<0.000000e+00> : vector<128x16xf32>
    %97 = tpu.matmul %95, %96, %cst_159 {dimension_numbers = #tpu.dot_dimension_numbers<[1], [0], [0], [1], [0, 0, 1, 1], [], []>} : vector<128x288xf32>, vector<288x16xf32>, vector<128x16xf32> -> vector<128x16xf32>
    %98 = vector.broadcast %1 : vector<1x16xf32> to vector<128x16xf32>
    %99 = arith.addf %97, %98 : vector<128x16xf32>
    %100 = vector.shape_cast %99 : vector<128x16xf32> to vector<2x8x8x16xf32>
    %c0_160 = arith.constant 0 : index
    %c1_161 = arith.constant 1 : index
    %c1_162 = arith.constant 1 : index
    %c0_163 = arith.constant 0 : index
    %101 = vector.load %arg10[%c0_160, %c1_161, %c1_162, %c0_163] : memref<2x10x10x32xf32, #tpu.memory_space<vmem>>, vector<2x8x8x16xf32>
    tpu.vector_store %arg10[%c0_160, %c1_161, %c1_162, %c0_163], %100 {strides = array<i32>} : memref<2x10x10x32xf32, #tpu.memory_space<vmem>>, vector<2x8x8x16xf32>,
    %c0_164 = arith.constant 0 : index
    %c0_165 = arith.constant 0 : index
    %c0_166 = arith.constant 0 : index
    %102 = vector.load %arg2[%c0_164, %c0_165, %c0_166] : memref<2x1x16xf32, #tpu.memory_space<vmem>>, vector<2x1x16xf32>
    %103 = vector.shape_cast %102 : vector<2x1x16xf32> to vector<2x1x1x16xf32>
    %104 = vector.shape_cast %103 : vector<2x1x1x16xf32> to vector<2x1x1x16xf32>
    %105 = vector.broadcast %104 : vector<2x1x1x16xf32> to vector<2x8x8x16xf32>
    %c0_167 = arith.constant 0 : index
    %c1_168 = arith.constant 1 : index
    %c1_169 = arith.constant 1 : index
    %c16 = arith.constant 16 : index
    %106 = vector.load %arg10[%c0_167, %c1_168, %c1_169, %c16] : memref<2x10x10x32xf32, #tpu.memory_space<vmem>>, vector<2x8x8x16xf32>
    tpu.vector_store %arg10[%c0_167, %c1_168, %c1_169, %c16], %105 {strides = array<i32>} : memref<2x10x10x32xf32, #tpu.memory_space<vmem>>, vector<2x8x8x16xf32>,
    %c0_170 = arith.constant 0 : index
    %c0_171 = arith.constant 0 : index
    %c0_172 = arith.constant 0 : index
    %c0_173 = arith.constant 0 : index
    %107 = vector.load %arg10[%c0_170, %c0_171, %c0_172, %c0_173] : memref<2x10x10x32xf32, #tpu.memory_space<vmem>>, vector<2x8x8x32xf32>
    %108 = vector.shape_cast %107 : vector<2x8x8x32xf32> to vector<128x32xf32>
    %c0_174 = arith.constant 0 : index
    %c0_175 = arith.constant 0 : index
    %109 = vector.load %arg12[%c0_174, %c0_175] : memref<128x288xf32, #tpu.memory_space<vmem>>, vector<128x32xf32>
    tpu.vector_store %arg12[%c0_174, %c0_175], %108 {strides = array<i32>} : memref<128x288xf32, #tpu.memory_space<vmem>>, vector<128x32xf32>,
    %c0_176 = arith.constant 0 : index
    %c0_177 = arith.constant 0 : index
    %c1_178 = arith.constant 1 : index
    %c0_179 = arith.constant 0 : index
    %110 = vector.load %arg10[%c0_176, %c0_177, %c1_178, %c0_179] : memref<2x10x10x32xf32, #tpu.memory_space<vmem>>, vector<2x8x8x32xf32>
    %111 = vector.shape_cast %110 : vector<2x8x8x32xf32> to vector<128x32xf32>
    %c0_180 = arith.constant 0 : index
    %c32_181 = arith.constant 32 : index
    %112 = vector.load %arg12[%c0_180, %c32_181] : memref<128x288xf32, #tpu.memory_space<vmem>>, vector<128x32xf32>
    tpu.vector_store %arg12[%c0_180, %c32_181], %111 {strides = array<i32>} : memref<128x288xf32, #tpu.memory_space<vmem>>, vector<128x32xf32>,
    %c0_182 = arith.constant 0 : index
    %c0_183 = arith.constant 0 : index
    %c2_184 = arith.constant 2 : index
    %c0_185 = arith.constant 0 : index
    %113 = vector.load %arg10[%c0_182, %c0_183, %c2_184, %c0_185] : memref<2x10x10x32xf32, #tpu.memory_space<vmem>>, vector<2x8x8x32xf32>
    %114 = vector.shape_cast %113 : vector<2x8x8x32xf32> to vector<128x32xf32>
    %c0_186 = arith.constant 0 : index
    %c64_187 = arith.constant 64 : index
    %115 = vector.load %arg12[%c0_186, %c64_187] : memref<128x288xf32, #tpu.memory_space<vmem>>, vector<128x32xf32>
    tpu.vector_store %arg12[%c0_186, %c64_187], %114 {strides = array<i32>} : memref<128x288xf32, #tpu.memory_space<vmem>>, vector<128x32xf32>,
    %c0_188 = arith.constant 0 : index
    %c1_189 = arith.constant 1 : index
    %c0_190 = arith.constant 0 : index
    %c0_191 = arith.constant 0 : index
    %116 = vector.load %arg10[%c0_188, %c1_189, %c0_190, %c0_191] : memref<2x10x10x32xf32, #tpu.memory_space<vmem>>, vector<2x8x8x32xf32>
    %117 = vector.shape_cast %116 : vector<2x8x8x32xf32> to vector<128x32xf32>
    %c0_192 = arith.constant 0 : index
    %c96_193 = arith.constant 96 : index
    %118 = vector.load %arg12[%c0_192, %c96_193] : memref<128x288xf32, #tpu.memory_space<vmem>>, vector<128x32xf32>
    tpu.vector_store %arg12[%c0_192, %c96_193], %117 {strides = array<i32>} : memref<128x288xf32, #tpu.memory_space<vmem>>, vector<128x32xf32>,
    %c0_194 = arith.constant 0 : index
    %c1_195 = arith.constant 1 : index
    %c1_196 = arith.constant 1 : index
    %c0_197 = arith.constant 0 : index
    %119 = vector.load %arg10[%c0_194, %c1_195, %c1_196, %c0_197] : memref<2x10x10x32xf32, #tpu.memory_space<vmem>>, vector<2x8x8x32xf32>
    %120 = vector.shape_cast %119 : vector<2x8x8x32xf32> to vector<128x32xf32>
    %c0_198 = arith.constant 0 : index
    %c128_199 = arith.constant 128 : index
    %121 = vector.load %arg12[%c0_198, %c128_199] : memref<128x288xf32, #tpu.memory_space<vmem>>, vector<128x32xf32>
    tpu.vector_store %arg12[%c0_198, %c128_199], %120 {strides = array<i32>} : memref<128x288xf32, #tpu.memory_space<vmem>>, vector<128x32xf32>,
    %c0_200 = arith.constant 0 : index
    %c1_201 = arith.constant 1 : index
    %c2_202 = arith.constant 2 : index
    %c0_203 = arith.constant 0 : index
    %122 = vector.load %arg10[%c0_200, %c1_201, %c2_202, %c0_203] : memref<2x10x10x32xf32, #tpu.memory_space<vmem>>, vector<2x8x8x32xf32>
    %123 = vector.shape_cast %122 : vector<2x8x8x32xf32> to vector<128x32xf32>
    %c0_204 = arith.constant 0 : index
    %c160_205 = arith.constant 160 : index
    %124 = vector.load %arg12[%c0_204, %c160_205] : memref<128x288xf32, #tpu.memory_space<vmem>>, vector<128x32xf32>
    tpu.vector_store %arg12[%c0_204, %c160_205], %123 {strides = array<i32>} : memref<128x288xf32, #tpu.memory_space<vmem>>, vector<128x32xf32>,
    %c0_206 = arith.constant 0 : index
    %c2_207 = arith.constant 2 : index
    %c0_208 = arith.constant 0 : index
    %c0_209 = arith.constant 0 : index
    %125 = vector.load %arg10[%c0_206, %c2_207, %c0_208, %c0_209] : memref<2x10x10x32xf32, #tpu.memory_space<vmem>>, vector<2x8x8x32xf32>
    %126 = vector.shape_cast %125 : vector<2x8x8x32xf32> to vector<128x32xf32>
    %c0_210 = arith.constant 0 : index
    %c192_211 = arith.constant 192 : index
    %127 = vector.load %arg12[%c0_210, %c192_211] : memref<128x288xf32, #tpu.memory_space<vmem>>, vector<128x32xf32>
    tpu.vector_store %arg12[%c0_210, %c192_211], %126 {strides = array<i32>} : memref<128x288xf32, #tpu.memory_space<vmem>>, vector<128x32xf32>,
    %c0_212 = arith.constant 0 : index
    %c2_213 = arith.constant 2 : index
    %c1_214 = arith.constant 1 : index
    %c0_215 = arith.constant 0 : index
    %128 = vector.load %arg10[%c0_212, %c2_213, %c1_214, %c0_215] : memref<2x10x10x32xf32, #tpu.memory_space<vmem>>, vector<2x8x8x32xf32>
    %129 = vector.shape_cast %128 : vector<2x8x8x32xf32> to vector<128x32xf32>
    %c0_216 = arith.constant 0 : index
    %c224_217 = arith.constant 224 : index
    %130 = vector.load %arg12[%c0_216, %c224_217] : memref<128x288xf32, #tpu.memory_space<vmem>>, vector<128x32xf32>
    tpu.vector_store %arg12[%c0_216, %c224_217], %129 {strides = array<i32>} : memref<128x288xf32, #tpu.memory_space<vmem>>, vector<128x32xf32>,
    %c0_218 = arith.constant 0 : index
    %c2_219 = arith.constant 2 : index
    %c2_220 = arith.constant 2 : index
    %c0_221 = arith.constant 0 : index
    %131 = vector.load %arg10[%c0_218, %c2_219, %c2_220, %c0_221] : memref<2x10x10x32xf32, #tpu.memory_space<vmem>>, vector<2x8x8x32xf32>
    %132 = vector.shape_cast %131 : vector<2x8x8x32xf32> to vector<128x32xf32>
    %c0_222 = arith.constant 0 : index
    %c256_223 = arith.constant 256 : index
    %133 = vector.load %arg12[%c0_222, %c256_223] : memref<128x288xf32, #tpu.memory_space<vmem>>, vector<128x32xf32>
    tpu.vector_store %arg12[%c0_222, %c256_223], %132 {strides = array<i32>} : memref<128x288xf32, #tpu.memory_space<vmem>>, vector<128x32xf32>,
    %c0_224 = arith.constant 0 : index
    %c0_225 = arith.constant 0 : index
    %134 = vector.load %arg12[%c0_224, %c0_225] : memref<128x288xf32, #tpu.memory_space<vmem>>, vector<128x288xf32>
    %c0_226 = arith.constant 0 : index
    %c0_227 = arith.constant 0 : index
    %135 = vector.load %arg5[%c0_226, %c0_227] : memref<288x32xf32, #tpu.memory_space<vmem>>, vector<288x32xf32>
    %cst_228 = arith.constant dense<0.000000e+00> : vector<128x32xf32>
    %136 = tpu.matmul %134, %135, %cst_228 {dimension_numbers = #tpu.dot_dimension_numbers<[1], [0], [0], [1], [0, 0, 1, 1], [], []>} : vector<128x288xf32>, vector<288x32xf32>, vector<128x32xf32> -> vector<128x32xf32>
    %137 = vector.broadcast %2 : vector<1x32xf32> to vector<128x32xf32>
    %138 = arith.addf %136, %137 : vector<128x32xf32>
    %cst_229 = arith.constant 0.000000e+00 : f32
    %139 = vector.broadcast %cst_229 : f32 to vector<128x32xf32>
    %140 = arith.maximumf %138, %139 : vector<128x32xf32>
    %141 = vector.shape_cast %140 : vector<128x32xf32> to vector<2x8x8x32xf32>
    %c0_230 = arith.constant 0 : index
    %c1_231 = arith.constant 1 : index
    %c1_232 = arith.constant 1 : index
    %c0_233 = arith.constant 0 : index
    %142 = vector.load %arg10[%c0_230, %c1_231, %c1_232, %c0_233] : memref<2x10x10x32xf32, #tpu.memory_space<vmem>>, vector<2x8x8x32xf32>
    tpu.vector_store %arg10[%c0_230, %c1_231, %c1_232, %c0_233], %141 {strides = array<i32>} : memref<2x10x10x32xf32, #tpu.memory_space<vmem>>, vector<2x8x8x32xf32>,
    %c0_234 = arith.constant 0 : index
    %c0_235 = arith.constant 0 : index
    %c0_236 = arith.constant 0 : index
    %c0_237 = arith.constant 0 : index
    %143 = vector.load %arg10[%c0_234, %c0_235, %c0_236, %c0_237] : memref<2x10x10x32xf32, #tpu.memory_space<vmem>>, vector<2x8x8x32xf32>
    %144 = vector.shape_cast %143 : vector<2x8x8x32xf32> to vector<128x32xf32>
    %c0_238 = arith.constant 0 : index
    %c0_239 = arith.constant 0 : index
    %145 = vector.load %arg12[%c0_238, %c0_239] : memref<128x288xf32, #tpu.memory_space<vmem>>, vector<128x32xf32>
    tpu.vector_store %arg12[%c0_238, %c0_239], %144 {strides = array<i32>} : memref<128x288xf32, #tpu.memory_space<vmem>>, vector<128x32xf32>,
    %c0_240 = arith.constant 0 : index
    %c0_241 = arith.constant 0 : index
    %c1_242 = arith.constant 1 : index
    %c0_243 = arith.constant 0 : index
    %146 = vector.load %arg10[%c0_240, %c0_241, %c1_242, %c0_243] : memref<2x10x10x32xf32, #tpu.memory_space<vmem>>, vector<2x8x8x32xf32>
    %147 = vector.shape_cast %146 : vector<2x8x8x32xf32> to vector<128x32xf32>
    %c0_244 = arith.constant 0 : index
    %c32_245 = arith.constant 32 : index
    %148 = vector.load %arg12[%c0_244, %c32_245] : memref<128x288xf32, #tpu.memory_space<vmem>>, vector<128x32xf32>
    tpu.vector_store %arg12[%c0_244, %c32_245], %147 {strides = array<i32>} : memref<128x288xf32, #tpu.memory_space<vmem>>, vector<128x32xf32>,
    %c0_246 = arith.constant 0 : index
    %c0_247 = arith.constant 0 : index
    %c2_248 = arith.constant 2 : index
    %c0_249 = arith.constant 0 : index
    %149 = vector.load %arg10[%c0_246, %c0_247, %c2_248, %c0_249] : memref<2x10x10x32xf32, #tpu.memory_space<vmem>>, vector<2x8x8x32xf32>
    %150 = vector.shape_cast %149 : vector<2x8x8x32xf32> to vector<128x32xf32>
    %c0_250 = arith.constant 0 : index
    %c64_251 = arith.constant 64 : index
    %151 = vector.load %arg12[%c0_250, %c64_251] : memref<128x288xf32, #tpu.memory_space<vmem>>, vector<128x32xf32>
    tpu.vector_store %arg12[%c0_250, %c64_251], %150 {strides = array<i32>} : memref<128x288xf32, #tpu.memory_space<vmem>>, vector<128x32xf32>,
    %c0_252 = arith.constant 0 : index
    %c1_253 = arith.constant 1 : index
    %c0_254 = arith.constant 0 : index
    %c0_255 = arith.constant 0 : index
    %152 = vector.load %arg10[%c0_252, %c1_253, %c0_254, %c0_255] : memref<2x10x10x32xf32, #tpu.memory_space<vmem>>, vector<2x8x8x32xf32>
    %153 = vector.shape_cast %152 : vector<2x8x8x32xf32> to vector<128x32xf32>
    %c0_256 = arith.constant 0 : index
    %c96_257 = arith.constant 96 : index
    %154 = vector.load %arg12[%c0_256, %c96_257] : memref<128x288xf32, #tpu.memory_space<vmem>>, vector<128x32xf32>
    tpu.vector_store %arg12[%c0_256, %c96_257], %153 {strides = array<i32>} : memref<128x288xf32, #tpu.memory_space<vmem>>, vector<128x32xf32>,
    %c0_258 = arith.constant 0 : index
    %c1_259 = arith.constant 1 : index
    %c1_260 = arith.constant 1 : index
    %c0_261 = arith.constant 0 : index
    %155 = vector.load %arg10[%c0_258, %c1_259, %c1_260, %c0_261] : memref<2x10x10x32xf32, #tpu.memory_space<vmem>>, vector<2x8x8x32xf32>
    %156 = vector.shape_cast %155 : vector<2x8x8x32xf32> to vector<128x32xf32>
    %c0_262 = arith.constant 0 : index
    %c128_263 = arith.constant 128 : index
    %157 = vector.load %arg12[%c0_262, %c128_263] : memref<128x288xf32, #tpu.memory_space<vmem>>, vector<128x32xf32>
    tpu.vector_store %arg12[%c0_262, %c128_263], %156 {strides = array<i32>} : memref<128x288xf32, #tpu.memory_space<vmem>>, vector<128x32xf32>,
    %c0_264 = arith.constant 0 : index
    %c1_265 = arith.constant 1 : index
    %c2_266 = arith.constant 2 : index
    %c0_267 = arith.constant 0 : index
    %158 = vector.load %arg10[%c0_264, %c1_265, %c2_266, %c0_267] : memref<2x10x10x32xf32, #tpu.memory_space<vmem>>, vector<2x8x8x32xf32>
    %159 = vector.shape_cast %158 : vector<2x8x8x32xf32> to vector<128x32xf32>
    %c0_268 = arith.constant 0 : index
    %c160_269 = arith.constant 160 : index
    %160 = vector.load %arg12[%c0_268, %c160_269] : memref<128x288xf32, #tpu.memory_space<vmem>>, vector<128x32xf32>
    tpu.vector_store %arg12[%c0_268, %c160_269], %159 {strides = array<i32>} : memref<128x288xf32, #tpu.memory_space<vmem>>, vector<128x32xf32>,
    %c0_270 = arith.constant 0 : index
    %c2_271 = arith.constant 2 : index
    %c0_272 = arith.constant 0 : index
    %c0_273 = arith.constant 0 : index
    %161 = vector.load %arg10[%c0_270, %c2_271, %c0_272, %c0_273] : memref<2x10x10x32xf32, #tpu.memory_space<vmem>>, vector<2x8x8x32xf32>
    %162 = vector.shape_cast %161 : vector<2x8x8x32xf32> to vector<128x32xf32>
    %c0_274 = arith.constant 0 : index
    %c192_275 = arith.constant 192 : index
    %163 = vector.load %arg12[%c0_274, %c192_275] : memref<128x288xf32, #tpu.memory_space<vmem>>, vector<128x32xf32>
    tpu.vector_store %arg12[%c0_274, %c192_275], %162 {strides = array<i32>} : memref<128x288xf32, #tpu.memory_space<vmem>>, vector<128x32xf32>,
    %c0_276 = arith.constant 0 : index
    %c2_277 = arith.constant 2 : index
    %c1_278 = arith.constant 1 : index
    %c0_279 = arith.constant 0 : index
    %164 = vector.load %arg10[%c0_276, %c2_277, %c1_278, %c0_279] : memref<2x10x10x32xf32, #tpu.memory_space<vmem>>, vector<2x8x8x32xf32>
    %165 = vector.shape_cast %164 : vector<2x8x8x32xf32> to vector<128x32xf32>
    %c0_280 = arith.constant 0 : index
    %c224_281 = arith.constant 224 : index
    %166 = vector.load %arg12[%c0_280, %c224_281] : memref<128x288xf32, #tpu.memory_space<vmem>>, vector<128x32xf32>
    tpu.vector_store %arg12[%c0_280, %c224_281], %165 {strides = array<i32>} : memref<128x288xf32, #tpu.memory_space<vmem>>, vector<128x32xf32>,
    %c0_282 = arith.constant 0 : index
    %c2_283 = arith.constant 2 : index
    %c2_284 = arith.constant 2 : index
    %c0_285 = arith.constant 0 : index
    %167 = vector.load %arg10[%c0_282, %c2_283, %c2_284, %c0_285] : memref<2x10x10x32xf32, #tpu.memory_space<vmem>>, vector<2x8x8x32xf32>
    %168 = vector.shape_cast %167 : vector<2x8x8x32xf32> to vector<128x32xf32>
    %c0_286 = arith.constant 0 : index
    %c256_287 = arith.constant 256 : index
    %169 = vector.load %arg12[%c0_286, %c256_287] : memref<128x288xf32, #tpu.memory_space<vmem>>, vector<128x32xf32>
    tpu.vector_store %arg12[%c0_286, %c256_287], %168 {strides = array<i32>} : memref<128x288xf32, #tpu.memory_space<vmem>>, vector<128x32xf32>,
    %c0_288 = arith.constant 0 : index
    %c0_289 = arith.constant 0 : index
    %170 = vector.load %arg12[%c0_288, %c0_289] : memref<128x288xf32, #tpu.memory_space<vmem>>, vector<128x288xf32>
    %c0_290 = arith.constant 0 : index
    %c0_291 = arith.constant 0 : index
    %171 = vector.load %arg6[%c0_290, %c0_291] : memref<288x12xf32, #tpu.memory_space<vmem>>, vector<288x12xf32>
    %cst_292 = arith.constant dense<0.000000e+00> : vector<128x12xf32>
    %172 = tpu.matmul %170, %171, %cst_292 {dimension_numbers = #tpu.dot_dimension_numbers<[1], [0], [0], [1], [0, 0, 1, 1], [], []>} : vector<128x288xf32>, vector<288x12xf32>, vector<128x12xf32> -> vector<128x12xf32>
    %173 = vector.broadcast %3 : vector<1x12xf32> to vector<128x12xf32>
    %174 = arith.addf %172, %173 : vector<128x12xf32>
    %175 = arith.negf %174 : vector<128x12xf32>
    %176 = math.exp %175 : vector<128x12xf32>
    %cst_293 = arith.constant 1.000000e+00 : f32
    %177 = vector.broadcast %cst_293 : f32 to vector<128x12xf32>
    %178 = arith.addf %177, %176 : vector<128x12xf32>
    %179 = arith.divf %177, %178 : vector<128x12xf32>
    %cst_294 = arith.constant 2.550000e+02 : f32
    %180 = vector.broadcast %cst_294 : f32 to vector<128x12xf32>
    %181 = arith.mulf %179, %180 : vector<128x12xf32>
    %182 = vector.shape_cast %181 : vector<128x12xf32> to vector<2x64x12xf32>
    %c0_295 = arith.constant 0 : index
    %c0_296 = arith.constant 0 : index
    %c0_297 = arith.constant 0 : index
    %183 = vector.load %arg8[%c0_295, %c0_296, %c0_297] : memref<2x64x12xf32, #tpu.memory_space<vmem>>, vector<2x64x12xf32>
    tpu.vector_store %arg8[%c0_295, %c0_296, %c0_297], %182 {strides = array<i32>} : memref<2x64x12xf32, #tpu.memory_space<vmem>>, vector<2x64x12xf32>,
    return
  }
  func.func @transform_0(%arg0: i32) -> (i32, i32, i32, i32) {
    %c0_i32 = arith.constant 0 : i32
    %c0_i32_0 = arith.constant 0 : i32
    %c0_i32_1 = arith.constant 0 : i32
    %c0_i32_2 = arith.constant 0 : i32
    return %arg0, %c0_i32, %c0_i32_0, %c0_i32_1 : i32, i32, i32, i32
  }
  func.func @transform_1(%arg0: i32) -> (i32, i32, i32) {
    %c0_i32 = arith.constant 0 : i32
    %c0_i32_0 = arith.constant 0 : i32
    %c0_i32_1 = arith.constant 0 : i32
    return %arg0, %c0_i32, %c0_i32_0 : i32, i32, i32
  }
  func.func @transform_2(%arg0: i32) -> (i32, i32) {
    %c0_i32 = arith.constant 0 : i32
    %c0_i32_0 = arith.constant 0 : i32
    %c0_i32_1 = arith.constant 0 : i32
    return %c0_i32, %c0_i32_0 : i32, i32
  }
  func.func @transform_3(%arg0: i32) -> (i32, i32) {
    %c0_i32 = arith.constant 0 : i32
    %c0_i32_0 = arith.constant 0 : i32
    %c0_i32_1 = arith.constant 0 : i32
    return %c0_i32, %c0_i32_0 : i32, i32
  }
  func.func @transform_4(%arg0: i32) -> (i32, i32) {
    %c0_i32 = arith.constant 0 : i32
    %c0_i32_0 = arith.constant 0 : i32
    %c0_i32_1 = arith.constant 0 : i32
    return %c0_i32, %c0_i32_0 : i32, i32
  }
  func.func @transform_5(%arg0: i32) -> (i32, i32) {
    %c0_i32 = arith.constant 0 : i32
    %c0_i32_0 = arith.constant 0 : i32
    %c0_i32_1 = arith.constant 0 : i32
    return %c0_i32, %c0_i32_0 : i32, i32
  }
  func.func @transform_6(%arg0: i32) -> (i32, i32) {
    %c0_i32 = arith.constant 0 : i32
    %c0_i32_0 = arith.constant 0 : i32
    %c0_i32_1 = arith.constant 0 : i32
    return %c0_i32, %c0_i32_0 : i32, i32
  }
  func.func @transform_7(%arg0: i32) -> (i32, i32, i32) {
    %c0_i32 = arith.constant 0 : i32
    %c0_i32_0 = arith.constant 0 : i32
    %c0_i32_1 = arith.constant 0 : i32
    return %arg0, %c0_i32, %c0_i32_0 : i32, i32, i32
  }
}

</mosaic_0001>

<bundles_post_ra>
// kernel: tile.8
= control target key start
LH: loop header
LB: loop body
LE: loop exit
PB: predicated region body
PF: predicated region fallthrough
CT: control target
= control target key end

     0   :  { %s22_s0 = inlined_call_operand.vmem [shape: f32[3], index: 0, kind: input, shape index: {}]   ;;  %s23_s1 = inlined_call_operand.vmem [shape: f32[4,3], index: 1, kind: output, shape index: {}]  }
   0x1   :  { %v4_v0 = vld [vmem:[%s22_s0] ss:$0 sm:$0xff] }
   0x2   :  { %5 = vst [vmem:[%s23_s1] sm:$0xf] %v4_v0 }

// kernel: forward.1
= control target key start
LH: loop header
LB: loop body
LE: loop exit
PB: predicated region body
PF: predicated region fallthrough
CT: control target
= control target key end

     0   :  { %s11127_s24 = smov 0   ;;  %s15107_s0 = inlined_call_operand.vmem [shape: f32[4,16,16,3], index: 0, kind: input, shape index: {}]   ;;  %s15108_s1 = inlined_call_operand.vmem [shape: f32[4,1,16], index: 1, kind: input, shape index: {}]   ;;  %s15109_s2 = inlined_call_operand.vmem [shape: f32[27,32], index: 2, kind: input, shape index: {}]   ;;  %s15110_s3 = inlined_call_operand.vmem [shape: f32[288,16], index: 3, kind: input, shape index: {}]   ;;  %s15111_s4 = inlined_call_operand.vmem [shape: f32[288,32], index: 4, kind: input, shape index: {}]   ;;  %s15112_s5 = inlined_call_operand.vmem [shape: f32[288,12], index: 5, kind: input, shape index: {}]   ;;  %s15113_s6 = inlined_call_operand.vmem [shape: f32[4,32], index: 6, kind: input, shape index: {}]   ;;  %s15114_s7 = inlined_call_operand.vmem [shape: f32[4,64,12], index: 7, kind: output, shape index: {}]  }
   0x1 LB: > { %s10124_s25 = sadd.s32 4294967295, %s11070_s24   ;;  %p10128_p0 = scmp.ge.s32.totalorder %s11070_s24, 1  ;;  %s11070_s24 = sphi %s11127_s24, %s17_s24  }
   0x2   : > { %p249_p1 = scmp.lt.s32.totalorder %s11070_s24, 3 }
   0x4   : > { %p250_p2 = pnand %p10128_p0, %p249_p1 }
   0x5   : > { %vm15115_vm0 = vcmask (!%p250_p2), 23552   ;;  %vm325_vm1 = vcmask (!%p250_p2), 16384   ;;  %vm313_vm2 = vcmask (!%p250_p2), 17408   ;;  %s11135_s26 = sshll.u32 (!%p250_p2), %s10124_s25, 1  ;;  %v11072_v0 = vmov (!%p250_p2), 0.0   ;;  %s11073_s8 = smov (!%p250_p2), 3  }
   0x6   : > { %253 = sbr.rel (%p250_p2) target bundleno = 2751 (0xabf), region = 48  ;;  %311 = vst.msk [vmem:[#allocation2] sm:$0xff] (!%p250_p2), %vm15115_vm0, %v11072_v0  ;;  %312 = vst.msk [vmem:[#allocation2 + $0x8] sm:$0xff] (!%p250_p2), %vm15115_vm0, %v11072_v0  ;;  %p288_p3 = scmp.lt.s32.totalorder (!%p250_p2), %s11135_s26, 3  ;;  %vm1027_vm3 = vcmask (!%p250_p2), 48152   ;;  %vm4049_vm4 = vcmask (!%p250_p2), 1042432  }
   0x7   : > { %315 = vst.msk [vmem:[#allocation2 + $0x1b0] sm:$0xff] (!%p250_p2), %vm15115_vm0, %v11072_v0  ;;  %316 = vst.msk [vmem:[#allocation2 + $0x1b8] sm:$0xff] (!%p250_p2), %vm15115_vm0, %v11072_v0  ;;  %s11074_s9 = smov (!%p250_p2), 6   ;;  %s11075_s10 = smov (!%p250_p2), 9   ;;  %vm11081_vm5 = vmmov (!%p250_p2), 1   ;;  %vm1412_vm7 = vcmask (!%p250_p2), 72752  }
   0x8   : > { %319 = vst.msk [vmem:[#allocation2 + $0x198] sm:$0xff] (!%p250_p2), %vm15115_vm0, %v11072_v0  ;;  %320 = vst.msk [vmem:[#allocation2 + $0x1a0] sm:$0xff] (!%p250_p2), %vm15115_vm0, %v11072_v0  ;;  %s11076_s11 = smov (!%p250_p2), 12   ;;  %s11077_s12 = smov (!%p250_p2), 15   ;;  %vm1797_vm8 = vcmask (!%p250_p2), 97352   ;;  %vm2182_vm9 = vcmask (!%p250_p2), 121952  }
   0x9   : > { %322 = vst.msk [vmem:[#allocation2 + $0x348] sm:$0xff] (!%p250_p2), %vm15115_vm0, %v11072_v0  ;;  %323 = vst.msk [vmem:[#allocation2 + $0x350] sm:$0xff] (!%p250_p2), %vm15115_vm0, %v11072_v0  ;;  %s11078_s13 = smov (!%p250_p2), 18   ;;  %s11079_s14 = smov (!%p250_p2), 21   ;;  %vm15119_vm10 = vcmask (!%p250_p2), 146552   ;;  %vm2953_vm11 = vcmask (!%p250_p2), 171152  }
   0xa   : > { %327 = vst.msk [vmem:[#allocation2 + $0x18] sm:$0x1] (!%p250_p2), %vm325_vm1, %v11072_v0  ;;  %328 = vst.msk [vmem:[#allocation2 + $0x30] sm:$0x1] (!%p250_p2), %vm325_vm1, %v11072_v0  ;;  %s11080_s23 = smov (!%p250_p2), 24   ;;  %vm3338_vm12 = vcmask (!%p250_p2), 195752  }
   0xb   : > { %329 = vst.msk [vmem:[#allocation2 + $0x48] sm:$0x1] (!%p250_p2), %vm325_vm1, %v11072_v0  ;;  %330 = vst.msk [vmem:[#allocation2 + $0x60] sm:$0x1] (!%p250_p2), %vm325_vm1, %v11072_v0  ;;  %vm15121_vm13 = vcmask (!%p250_p2), 220352   ;;  %vm3856_vm14 = vcmask (!%p250_p2), 220160  }
   0xc   : > { %331 = vst.msk [vmem:[#allocation2 + $0x78] sm:$0x1] (!%p250_p2), %vm325_vm1, %v11072_v0  ;;  %332 = vst.msk [vmem:[#allocation2 + $0x90] sm:$0x1] (!%p250_p2), %vm325_vm1, %v11072_v0  ;;  %vm15117_vm15 = vcmask (!%p250_p2), 254976   ;;  %s11084_s15 = smov (!%p250_p2), 64  }
   0xd   : > { %333 = vst.msk [vmem:[#allocation2 + $0xa8] sm:$0x1] %vm325_vm1, %v11072_v0  ;;  %334 = vst.msk [vmem:[#allocation2 + $0xc0] sm:$0x1] %vm325_vm1, %v11072_v0  ;;  %s15519_s26 = smov (!%p288_p3, %s11135_s26), 3  ;;  %v707_v4 = vld [vmem:[#allocation2 + $0x1] sm:$0xff] }
   0xe   : > { %335 = vst.msk [vmem:[#allocation2 + $0xd8] sm:$0x1] %vm325_vm1, %v11072_v0  ;;  %336 = vst.msk [vmem:[#allocation2 + $0xf0] sm:$0x1] %vm325_vm1, %v11072_v0  ;;  %s10273_s27 = sshll.u32 %s15519_s26, 8  ;;  %835 = vrot.lane.b32.xlu0 %v707_v4, %s11073_s8  ;;  %s11085_s22 = smov 96  }
   0xf   : > { %337 = vst.msk [vmem:[#allocation2 + $0x108] sm:$0x1] %vm325_vm1, %v11072_v0  ;;  %338 = vst.msk [vmem:[#allocation2 + $0x120] sm:$0x1] %vm325_vm1, %v11072_v0  ;;  %s11313_s30 = scalar_lea.vmem %s15107_s0, %s10273_s27  ;;  %s11083_s27 = smov 32  }
  0x10   : > { %339 = vst.msk [vmem:[#allocation2 + $0x138] sm:$0x1] %vm325_vm1, %v11072_v0  ;;  %340 = vst.msk [vmem:[#allocation2 + $0x150] sm:$0x1] %vm325_vm1, %v11072_v0  ;;  %v450_v1 = vld [vmem:[%s11313_s30] sm:$0xff]  ;;  %v452_v2 = vld [vmem:[%s11313_s30 + $0x10] sm:$0xff]  ;;  %s13843_s18 = scalar_lea.vmem %s15108_s1, %s15519_s26 }
  0x11   : > { %341 = vst.msk [vmem:[#allocation2 + $0x168] sm:$0x1] %vm325_vm1, %v11072_v0  ;;  %342 = vst.msk [vmem:[#allocation2 + $0x180] sm:$0x1] %vm325_vm1, %v11072_v0  ;;  %v451_v3 = vld [vmem:[%s11313_s30 + $0x8] sm:$0xff]  ;;  %v454_v6 = vld [vmem:[%s11313_s30 + $0x20] sm:$0xff] }
  0x12   : > { %345 = vst.msk [vmem:[#allocation2 + $0x1c8] sm:$0x1] %vm325_vm1, %v11072_v0  ;;  %346 = vst.msk [vmem:[#allocation2 + $0x1e0] sm:$0x1] %vm325_vm1, %v11072_v0  ;;  %v453_v7 = vld [vmem:[%s11313_s30 + $0x18] sm:$0xff]  ;;  %v456_v8 = vld [vmem:[%s11313_s30 + $0x30] sm:$0xff] }
  0x13   : > { %347 = vst.msk [vmem:[#allocation2 + $0x1f8] sm:$0x1] %vm325_vm1, %v11072_v0  ;;  %348 = vst.msk [vmem:[#allocation2 + $0x210] sm:$0x1] %vm325_vm1, %v11072_v0  ;;  %v455_v9 = vld [vmem:[%s11313_s30 + $0x28] sm:$0xff]  ;;  %v458_v10 = vld [vmem:[%s11313_s30 + $0x40] sm:$0xff] }
  0x14   : > { %349 = vst.msk [vmem:[#allocation2 + $0x228] sm:$0x1] %vm325_vm1, %v11072_v0  ;;  %350 = vst.msk [vmem:[#allocation2 + $0x240] sm:$0x1] %vm325_vm1, %v11072_v0  ;;  %v457_v11 = vld [vmem:[%s11313_s30 + $0x38] sm:$0xff]  ;;  %v460_v12 = vld [vmem:[%s11313_s30 + $0x50] sm:$0xff] }
  0x15   : > { %351 = vst.msk [vmem:[#allocation2 + $0x258] sm:$0x1] %vm325_vm1, %v11072_v0  ;;  %352 = vst.msk [vmem:[#allocation2 + $0x270] sm:$0x1] %vm325_vm1, %v11072_v0  ;;  %v459_v13 = vld [vmem:[%s11313_s30 + $0x48] sm:$0xff]  ;;  %v462_v14 = vld [vmem:[%s11313_s30 + $0x60] sm:$0xff] }
  0x16   : > { %353 = vst.msk [vmem:[#allocation2 + $0x288] sm:$0x1] %vm325_vm1, %v11072_v0  ;;  %354 = vst.msk [vmem:[#allocation2 + $0x2a0] sm:$0x1] %vm325_vm1, %v11072_v0  ;;  %v461_v15 = vld [vmem:[%s11313_s30 + $0x58] sm:$0xff]  ;;  %v464_v16 = vld [vmem:[%s11313_s30 + $0x70] sm:$0xff] }
  0x17   : > { %355 = vst.msk [vmem:[#allocation2 + $0x2b8] sm:$0x1] %vm325_vm1, %v11072_v0  ;;  %356 = vst.msk [vmem:[#allocation2 + $0x2d0] sm:$0x1] %vm325_vm1, %v11072_v0  ;;  %v463_v17 = vld [vmem:[%s11313_s30 + $0x68] sm:$0xff]  ;;  %v466_v18 = vld [vmem:[%s11313_s30 + $0x80] sm:$0xff] }
  0x18   : > { %357 = vst.msk [vmem:[#allocation2 + $0x2e8] sm:$0x1] %vm325_vm1, %v11072_v0  ;;  %358 = vst.msk [vmem:[#allocation2 + $0x300] sm:$0x1] %vm325_vm1, %v11072_v0  ;;  %v465_v19 = vld [vmem:[%s11313_s30 + $0x78] sm:$0xff]  ;;  %v468_v20 = vld [vmem:[%s11313_s30 + $0x90] sm:$0xff] }
  0x19   : > { %359 = vst.msk [vmem:[#allocation2 + $0x318] sm:$0x1] %vm325_vm1, %v11072_v0  ;;  %360 = vst.msk [vmem:[#allocation2 + $0x330] sm:$0x1] %vm325_vm1, %v11072_v0  ;;  %v467_v21 = vld [vmem:[%s11313_s30 + $0x88] sm:$0xff]  ;;  %v470_v22 = vld [vmem:[%s11313_s30 + $0xa0] sm:$0xff] }
  0x1a   : > { %363 = vst.msk [vmem:[#allocation2 + $0x29] sm:$0x1] %vm325_vm1, %v11072_v0  ;;  %364 = vst.msk [vmem:[#allocation2 + $0x41] sm:$0x1] %vm325_vm1, %v11072_v0  ;;  %v469_v23 = vld [vmem:[%s11313_s30 + $0x98] sm:$0xff]  ;;  %v472_v24 = vld [vmem:[%s11313_s30 + $0xb0] sm:$0xff] }
  0x1b   : > { %365 = vst.msk [vmem:[#allocation2 + $0x59] sm:$0x1] %vm325_vm1, %v11072_v0  ;;  %366 = vst.msk [vmem:[#allocation2 + $0x71] sm:$0x1] %vm325_vm1, %v11072_v0  ;;  %v471_v27 = vld [vmem:[%s11313_s30 + $0xa8] sm:$0xff]  ;;  %v474_v28 = vld [vmem:[%s11313_s30 + $0xc0] sm:$0xff] }
  0x1c   : > { %367 = vst.msk [vmem:[#allocation2 + $0x89] sm:$0x1] %vm325_vm1, %v11072_v0  ;;  %368 = vst.msk [vmem:[#allocation2 + $0xa1] sm:$0x1] %vm325_vm1, %v11072_v0  ;;  %v473_v33 = vld [vmem:[%s11313_s30 + $0xb8] sm:$0xff]  ;;  %v476_v34 = vld [vmem:[%s11313_s30 + $0xd0] sm:$0xff] }
  0x1d   : > { %369 = vst.msk [vmem:[#allocation2 + $0xb9] sm:$0x1] %vm325_vm1, %v11072_v0  ;;  %370 = vst.msk [vmem:[#allocation2 + $0xd1] sm:$0x1] %vm325_vm1, %v11072_v0  ;;  %v475_v35 = vld [vmem:[%s11313_s30 + $0xc8] sm:$0xff]  ;;  %v478_v36 = vld [vmem:[%s11313_s30 + $0xe0] sm:$0xff] }
  0x1e   : > { %371 = vst.msk [vmem:[#allocation2 + $0xe9] sm:$0x1] %vm325_vm1, %v11072_v0  ;;  %372 = vst.msk [vmem:[#allocation2 + $0x101] sm:$0x1] %vm325_vm1, %v11072_v0  ;;  %v477_v38 = vld [vmem:[%s11313_s30 + $0xd8] sm:$0xff]  ;;  %v479_v39 = vld [vmem:[%s11313_s30 + $0xe8] sm:$0xff] }
  0x1f   : > { %373 = vst.msk [vmem:[#allocation2 + $0x119] sm:$0x1] %vm325_vm1, %v11072_v0  ;;  %374 = vst.msk [vmem:[#allocation2 + $0x131] sm:$0x1] %vm325_vm1, %v11072_v0  ;;  %v482_v41 = vld [vmem:[%s11313_s30 + $0x100] sm:$0xff]  ;;  %v484_v42 = vld [vmem:[%s11313_s30 + $0x110] sm:$0xff] }
  0x20   : > { %375 = vst.msk [vmem:[#allocation2 + $0x149] sm:$0x1] %vm325_vm1, %v11072_v0  ;;  %376 = vst.msk [vmem:[#allocation2 + $0x161] sm:$0x1] %vm325_vm1, %v11072_v0  ;;  %v483_v44 = vld [vmem:[%s11313_s30 + $0x108] sm:$0xff]  ;;  %v486_v45 = vld [vmem:[%s11313_s30 + $0x120] sm:$0xff] }
  0x21   : > { %377 = vst.msk [vmem:[#allocation2 + $0x179] sm:$0x1] %vm325_vm1, %v11072_v0  ;;  %378 = vst.msk [vmem:[#allocation2 + $0x191] sm:$0x1] %vm325_vm1, %v11072_v0  ;;  %v485_v46 = vld [vmem:[%s11313_s30 + $0x118] sm:$0xff]  ;;  %v488_v48 = vld [vmem:[%s11313_s30 + $0x130] sm:$0xff] }
  0x22   : > { %381 = vst.msk [vmem:[#allocation2 + $0x1d9] sm:$0x1] %vm325_vm1, %v11072_v0  ;;  %382 = vst.msk [vmem:[#allocation2 + $0x1f1] sm:$0x1] %vm325_vm1, %v11072_v0  ;;  %v487_v49 = vld [vmem:[%s11313_s30 + $0x128] sm:$0xff]  ;;  %v490_v50 = vld [vmem:[%s11313_s30 + $0x140] sm:$0xff] }
  0x23   : > { %383 = vst.msk [vmem:[#allocation2 + $0x209] sm:$0x1] %vm325_vm1, %v11072_v0  ;;  %384 = vst.msk [vmem:[#allocation2 + $0x221] sm:$0x1] %vm325_vm1, %v11072_v0  ;;  %v489_v51 = vld [vmem:[%s11313_s30 + $0x138] sm:$0xff]  ;;  %v492_v52 = vld [vmem:[%s11313_s30 + $0x150] sm:$0xff] }
  0x24   : > { %385 = vst.msk [vmem:[#allocation2 + $0x239] sm:$0x1] %vm325_vm1, %v11072_v0  ;;  %386 = vst.msk [vmem:[#allocation2 + $0x251] sm:$0x1] %vm325_vm1, %v11072_v0  ;;  %v491_v53 = vld [vmem:[%s11313_s30 + $0x148] sm:$0xff]  ;;  %v494_v54 = vld [vmem:[%s11313_s30 + $0x160] sm:$0xff] }
  0x25   : > { %387 = vst.msk [vmem:[#allocation2 + $0x269] sm:$0x1] %vm325_vm1, %v11072_v0  ;;  %388 = vst.msk [vmem:[#allocation2 + $0x281] sm:$0x1] %vm325_vm1, %v11072_v0  ;;  %v493_v55 = vld [vmem:[%s11313_s30 + $0x158] sm:$0xff]  ;;  %v496_v56 = vld [vmem:[%s11313_s30 + $0x170] sm:$0xff] }
  0x26   : > { %389 = vst.msk [vmem:[#allocation2 + $0x299] sm:$0x1] %vm325_vm1, %v11072_v0  ;;  %390 = vst.msk [vmem:[#allocation2 + $0x2b1] sm:$0x1] %vm325_vm1, %v11072_v0  ;;  %v495_v57 = vld [vmem:[%s11313_s30 + $0x168] sm:$0xff]  ;;  %v498_v58 = vld [vmem:[%s11313_s30 + $0x180] sm:$0xff] }
  0x27   : > { %391 = vst.msk [vmem:[#allocation2 + $0x2c9] sm:$0x1] %vm325_vm1, %v11072_v0  ;;  %392 = vst.msk [vmem:[#allocation2 + $0x2e1] sm:$0x1] %vm325_vm1, %v11072_v0  ;;  %v497_v60 = vld [vmem:[%s11313_s30 + $0x178] sm:$0xff]  ;;  %v500_v62 = vld [vmem:[%s11313_s30 + $0x190] sm:$0xff] }
  0x28   : > { %393 = vst.msk [vmem:[#allocation2 + $0x2f9] sm:$0x1] %vm325_vm1, %v11072_v0  ;;  %394 = vst.msk [vmem:[#allocation2 + $0x311] sm:$0x1] %vm325_vm1, %v11072_v0  ;;  %v501_v4 = vld [vmem:[%s11313_s30 + $0x198] sm:$0xff]  ;;  %s11086_s19 = smov 16  }
  0x29   : > { %395 = vst.msk [vmem:[#allocation2 + $0x329] sm:$0x1] %vm325_vm1, %v11072_v0  ;;  %396 = vst.msk [vmem:[#allocation2 + $0x341] sm:$0x1] %vm325_vm1, %v11072_v0 }
  0x2a   : > { %314 = vst.msk [vmem:[#allocation2 + $0x10] sm:$0x3] %vm313_vm2, %v11072_v0  ;;  %317 = vst.msk [vmem:[#allocation2 + $0x1c0] sm:$0x3] %vm313_vm2, %v11072_v0 }
  0x2b   : > { %321 = vst.msk [vmem:[#allocation2 + $0x1a8] sm:$0x3] %vm313_vm2, %v11072_v0  ;;  %324 = vst.msk [vmem:[#allocation2 + $0x358] sm:$0x3] %vm313_vm2, %v11072_v0  ;;  %vm409_vm2 = vcmask 253952  }
  0x2c   : > { %326 = vst.msk [vmem:[#allocation2] sm:$0x1] %vm325_vm1, %v11072_v0  ;;  %343 = vst.msk [vmem:[#allocation2 + $0x198] sm:$0x1] %vm325_vm1, %v11072_v0 }
  0x2d   : > { %344 = vst.msk [vmem:[#allocation2 + $0x1b0] sm:$0x1] %vm325_vm1, %v11072_v0  ;;  %361 = vst.msk [vmem:[#allocation2 + $0x348] sm:$0x1] %vm325_vm1, %v11072_v0 }
  0x2e   : > { %362 = vst.msk [vmem:[#allocation2 + $0x11] sm:$0x1] %vm325_vm1, %v11072_v0  ;;  %379 = vst.msk [vmem:[#allocation2 + $0x1a9] sm:$0x1] %vm325_vm1, %v11072_v0 }
  0x2f   : > { %380 = vst.msk [vmem:[#allocation2 + $0x1c1] sm:$0x1] %vm325_vm1, %v11072_v0  ;;  %397 = vst.msk [vmem:[#allocation2 + $0x359] sm:$0x1] %vm325_vm1, %v11072_v0  ;;  %vm15118_vm1 = vcmask 261120  }
  0x30   : > { %515 = vst.msk [vmem:[#allocation2 + $0x19] sm:$0xff] %vm15115_vm0, %v450_v1  ;;  %517 = vst.msk [vmem:[#allocation2 + $0x31] sm:$0xff] %vm15115_vm0, %v452_v2  ;;  %v499_v2 = vld [vmem:[%s11313_s30 + $0x188] sm:$0xff] }
  0x31   : > { %v708_v5 = vld [vmem:[#allocation2 + $0x9] sm:$0xff]  ;;  %516 = vst.msk [vmem:[#allocation2 + $0x21] sm:$0xff] %vm15115_vm0, %v451_v3  ;;  %519 = vst.msk [vmem:[#allocation2 + $0x49] sm:$0xff] %vm15115_vm0, %v454_v6  ;;  %v502_v3 = vld [vmem:[%s11313_s30 + $0x1a0] sm:$0xff] }
  0x32   : > { %518 = vst.msk [vmem:[#allocation2 + $0x39] sm:$0xff] %vm15115_vm0, %v453_v7  ;;  %521 = vst.msk [vmem:[#allocation2 + $0x61] sm:$0xff] %vm15115_vm0, %v456_v8  ;;  %837 = vrot.lane.b32.xlu0 %v708_v5, %s11073_s8  ;;  %v504_v5 = vld [vmem:[%s11313_s30 + $0x1b0] sm:$0xff]  ;;  %v503_v8 = vld [vmem:[%s11313_s30 + $0x1a8] sm:$0xff] }
  0x33   : > { %520 = vst.msk [vmem:[#allocation2 + $0x51] sm:$0xff] %vm15115_vm0, %v455_v9  ;;  %523 = vst.msk [vmem:[#allocation2 + $0x79] sm:$0xff] %vm15115_vm0, %v458_v10  ;;  %v579_v7 = vld [vmem:[#allocation2] sm:$0xff] }
  0x34   : > { %522 = vst.msk [vmem:[#allocation2 + $0x69] sm:$0xff] %vm15115_vm0, %v457_v11  ;;  %525 = vst.msk [vmem:[#allocation2 + $0x91] sm:$0xff] %vm15115_vm0, %v460_v12  ;;  %v506_v10 = vld [vmem:[%s11313_s30 + $0x1c0] sm:$0xff]  ;;  %v580_v11 = vld [vmem:[#allocation2 + $0x8] sm:$0xff] }
  0x35   : > { %524 = vst.msk [vmem:[#allocation2 + $0x81] sm:$0xff] %vm15115_vm0, %v459_v13  ;;  %527 = vst.msk [vmem:[#allocation2 + $0xa9] sm:$0xff] %vm15115_vm0, %v462_v14  ;;  %v505_v13 = vld [vmem:[%s11313_s30 + $0x1b8] sm:$0xff]  ;;  %v508_v14 = vld [vmem:[%s11313_s30 + $0x1d0] sm:$0xff] }
  0x36   : > { %526 = vst.msk [vmem:[#allocation2 + $0x99] sm:$0xff] %vm15115_vm0, %v461_v15  ;;  %529 = vst.msk [vmem:[#allocation2 + $0xc1] sm:$0xff] %vm15115_vm0, %v464_v16 }
  0x37   : > { %528 = vst.msk [vmem:[#allocation2 + $0xb1] sm:$0xff] %vm15115_vm0, %v463_v17  ;;  %531 = vst.msk [vmem:[#allocation2 + $0xd9] sm:$0xff] %vm15115_vm0, %v466_v18  ;;  %v11358_v25 = vld [vmem:[#allocation2 + $0x19] sm:$0xff]  ;;  %v11360_v26 = vld [vmem:[#allocation2 + $0x31] sm:$0xff] }
  0x38   : > { %530 = vst.msk [vmem:[#allocation2 + $0xc9] sm:$0xff] %vm15115_vm0, %v465_v19  ;;  %533 = vst.msk [vmem:[#allocation2 + $0xf1] sm:$0xff] %vm15115_vm0, %v468_v20  ;;  %839 = vrot.lane.b32.xlu1 %v11358_v25, %s11073_s8  ;;  %843 = vrot.lane.b32.xlu0 %v11360_v26, %s11073_s8  ;;  %v11371_v29 = vld [vmem:[#allocation2 + $0x21] sm:$0xff]  ;;  %v713_v30 = vld [vmem:[#allocation2 + $0x49] sm:$0xff] }
  0x39   : > { %532 = vst.msk [vmem:[#allocation2 + $0xe1] sm:$0xff] %vm15115_vm0, %v467_v21  ;;  %535 = vst.msk [vmem:[#allocation2 + $0x109] sm:$0xff] %vm15115_vm0, %v470_v22  ;;  %v11378_v31 = vld [vmem:[#allocation2 + $0x39] sm:$0xff]  ;;  %v715_v32 = vld [vmem:[#allocation2 + $0x61] sm:$0xff] }
  0x3a   : > { %534 = vst.msk [vmem:[#allocation2 + $0xf9] sm:$0xff] %vm15115_vm0, %v469_v23  ;;  %537 = vst.msk [vmem:[#allocation2 + $0x121] sm:$0xff] %vm15115_vm0, %v472_v24  ;;  %v714_v37 = vld [vmem:[#allocation2 + $0x51] sm:$0xff]  ;;  %v717_v40 = vld [vmem:[#allocation2 + $0x79] sm:$0xff] }
  0x3b   : > { %536 = vst.msk [vmem:[#allocation2 + $0x111] sm:$0xff] %vm15115_vm0, %v471_v27  ;;  %539 = vst.msk [vmem:[#allocation2 + $0x139] sm:$0xff] %vm15115_vm0, %v474_v28  ;;  %v716_v43 = vld [vmem:[#allocation2 + $0x69] sm:$0xff]  ;;  %v719_v47 = vld [vmem:[#allocation2 + $0x91] sm:$0xff] }
  0x3c   : > { %841 = vrot.lane.b32.xlu1 %v11371_v29, %s11073_s8  ;;  %847 = vrot.lane.b32.xlu0 %v713_v30, %s11073_s8  ;;  %538 = vst.msk [vmem:[#allocation2 + $0x129] sm:$0xff] %vm15115_vm0, %v473_v33  ;;  %541 = vst.msk [vmem:[#allocation2 + $0x151] sm:$0xff] %vm15115_vm0, %v476_v34  ;;  %v718_v59 = vld [vmem:[#allocation2 + $0x81] sm:$0xff]  ;;  %v721_v61 = vld [vmem:[#allocation2 + $0xa9] sm:$0xff] }
  0x3d   : > { %540 = vst.msk [vmem:[#allocation2 + $0x141] sm:$0xff] %vm15115_vm0, %v475_v35  ;;  %543 = vst.msk [vmem:[#allocation2 + $0x169] sm:$0xff] %vm15115_vm0, %v478_v36  ;;  %v720_v63 = vld [vmem:[#allocation2 + $0x99] sm:$0xff]  ;;  %v723_v1 = vld [vmem:[#allocation2 + $0xc1] sm:$0xff] }
  0x3e   : > { %542 = vst.msk [vmem:[#allocation2 + $0x159] sm:$0xff] %vm15115_vm0, %v477_v38  ;;  %544 = vst.msk [vmem:[#allocation2 + $0x171] sm:$0xff] %vm15115_vm0, %v479_v39  ;;  %v722_v6 = vld [vmem:[#allocation2 + $0xb1] sm:$0xff]  ;;  %v725_v9 = vld [vmem:[#allocation2 + $0xd9] sm:$0xff] }
  0x3f   : > { %547 = vst.msk [vmem:[#allocation2 + $0x1c9] sm:$0xff] %vm15115_vm0, %v482_v41  ;;  %549 = vst.msk [vmem:[#allocation2 + $0x1e1] sm:$0xff] %vm15115_vm0, %v484_v42  ;;  %v724_v12 = vld [vmem:[#allocation2 + $0xc9] sm:$0xff]  ;;  %v11455_v15 = vld [vmem:[#allocation2 + $0x18] sm:$0xff] }
  0x40   : > { %845 = vrot.lane.b32.xlu1 %v11378_v31, %s11073_s8  ;;  %851 = vrot.lane.b32.xlu0 %v715_v32, %s11073_s8  ;;  %548 = vst.msk [vmem:[#allocation2 + $0x1d1] sm:$0xff] %vm15115_vm0, %v483_v44  ;;  %551 = vst.msk [vmem:[#allocation2 + $0x1f9] sm:$0xff] %vm15115_vm0, %v486_v45  ;;  %v11462_v16 = vld [vmem:[#allocation2 + $0x30] sm:$0xff]  ;;  %v507_v17 = vld [vmem:[%s11313_s30 + $0x1c8] sm:$0xff] }
  0x41   : > { %550 = vst.msk [vmem:[#allocation2 + $0x1e9] sm:$0xff] %vm15115_vm0, %v485_v46  ;;  %553 = vst.msk [vmem:[#allocation2 + $0x211] sm:$0xff] %vm15115_vm0, %v488_v48  ;;  %v510_v18 = vld [vmem:[%s11313_s30 + $0x1e0] sm:$0xff]  ;;  %v11473_v20 = vld [vmem:[#allocation2 + $0x48] sm:$0xff] }
  0x42   : > { %552 = vst.msk [vmem:[#allocation2 + $0x201] sm:$0xff] %vm15115_vm0, %v487_v49  ;;  %555 = vst.msk [vmem:[#allocation2 + $0x229] sm:$0xff] %vm15115_vm0, %v490_v50  ;;  %v11471_v19 = vld [vmem:[#allocation2 + $0x20] sm:$0xff]  ;;  %v509_v21 = vld [vmem:[%s11313_s30 + $0x1d8] sm:$0xff] }
  0x43   : > { %554 = vst.msk [vmem:[#allocation2 + $0x219] sm:$0xff] %vm15115_vm0, %v489_v51  ;;  %557 = vst.msk [vmem:[#allocation2 + $0x241] sm:$0xff] %vm15115_vm0, %v492_v52  ;;  %v727_v22 = vld [vmem:[#allocation2 + $0xf1] sm:$0xff]  ;;  %v11483_v24 = vld [vmem:[#allocation2 + $0x60] sm:$0xff] }
  0x44   : > { %849 = vrot.lane.b32.xlu1 %v714_v37, %s11073_s8  ;;  %855 = vrot.lane.b32.xlu0 %v717_v40, %s11073_s8  ;;  %556 = vst.msk [vmem:[#allocation2 + $0x231] sm:$0xff] %vm15115_vm0, %v491_v53  ;;  %559 = vst.msk [vmem:[#allocation2 + $0x259] sm:$0xff] %vm15115_vm0, %v494_v54  ;;  %v11481_v23 = vld [vmem:[#allocation2 + $0x38] sm:$0xff]  ;;  %v511_v27 = vld [vmem:[%s11313_s30 + $0x1e8] sm:$0xff] }
  0x45   : > { %558 = vst.msk [vmem:[#allocation2 + $0x249] sm:$0xff] %vm15115_vm0, %v493_v55  ;;  %561 = vst.msk [vmem:[#allocation2 + $0x271] sm:$0xff] %vm15115_vm0, %v496_v56  ;;  %v726_v28 = vld [vmem:[#allocation2 + $0xe1] sm:$0xff]  ;;  %v11493_v30 = vld [vmem:[#allocation2 + $0x50] sm:$0xff] }
  0x46   : > { %560 = vst.msk [vmem:[#allocation2 + $0x261] sm:$0xff] %vm15115_vm0, %v495_v57  ;;  %563 = vst.msk [vmem:[#allocation2 + $0x289] sm:$0xff] %vm15115_vm0, %v498_v58  ;;  %v11495_v32 = vld [vmem:[#allocation2 + $0x78] sm:$0xff]  ;;  %v729_v33 = vld [vmem:[#allocation2 + $0x109] sm:$0xff] }
  0x47   : > { %562 = vst.msk [vmem:[#allocation2 + $0x279] sm:$0xff] %vm15115_vm0, %v497_v60  ;;  %565 = vst.msk [vmem:[#allocation2 + $0x2a1] sm:$0xff] %vm15115_vm0, %v500_v62  ;;  %v11501_v34 = vld [vmem:[#allocation2 + $0x68] sm:$0xff]  ;;  %v11506_v35 = vld [vmem:[#allocation2 + $0x90] sm:$0xff] }
  0x48   : > { %853 = vrot.lane.b32.xlu1 %v716_v43, %s11073_s8  ;;  %859 = vrot.lane.b32.xlu0 %v719_v47, %s11073_s8  ;;  %564 = vst.msk [vmem:[#allocation2 + $0x291] sm:$0xff] %vm15115_vm0, %v499_v2  ;;  %567 = vst.msk [vmem:[#allocation2 + $0x2b9] sm:$0xff] %vm15115_vm0, %v502_v3  ;;  %v728_v36 = vld [vmem:[#allocation2 + $0xf9] sm:$0xff]  ;;  %v731_v37 = vld [vmem:[#allocation2 + $0x121] sm:$0xff] }
  0x49   : > { %566 = vst.msk [vmem:[#allocation2 + $0x2a9] sm:$0xff] %vm15115_vm0, %v501_v4  ;;  %569 = vst.msk [vmem:[#allocation2 + $0x2d1] sm:$0xff] %vm15115_vm0, %v504_v5  ;;  %v11511_v38 = vld [vmem:[#allocation2 + $0x80] sm:$0xff]  ;;  %v11513_v39 = vld [vmem:[#allocation2 + $0xa8] sm:$0xff] }
  0x4a   : > { %643 = vst.msk [vmem:[#allocation4] sm:$0xff] %vm15115_vm0, %v579_v7  ;;  %568 = vst.msk [vmem:[#allocation2 + $0x2c1] sm:$0xff] %vm15115_vm0, %v503_v8  ;;  %v11519_v40 = vld [vmem:[#allocation2 + $0x98] sm:$0xff]  ;;  %v11521_v41 = vld [vmem:[#allocation2 + $0xc0] sm:$0xff] }
  0x4b   : > { %571 = vst.msk [vmem:[#allocation2 + $0x2e9] sm:$0xff] %vm15115_vm0, %v506_v10  ;;  %644 = vst.msk [vmem:[#allocation4 + $0x8] sm:$0xff] %vm15115_vm0, %v580_v11  ;;  %v730_v42 = vld [vmem:[#allocation2 + $0x111] sm:$0xff]  ;;  %v733_v45 = vld [vmem:[#allocation2 + $0x139] sm:$0xff] }
  0x4c   : > { %857 = vrot.lane.b32.xlu1 %v718_v59, %s11073_s8  ;;  %863 = vrot.lane.b32.xlu0 %v721_v61, %s11073_s8  ;;  %570 = vst.msk [vmem:[#allocation2 + $0x2d9] sm:$0xff] %vm15115_vm0, %v505_v13  ;;  %573 = vst.msk [vmem:[#allocation2 + $0x301] sm:$0xff] %vm15115_vm0, %v508_v14  ;;  %v11529_v43 = vld [vmem:[#allocation2 + $0xb0] sm:$0xff]  ;;  %v597_v44 = vld [vmem:[#allocation2 + $0xd8] sm:$0xff] }
  0x4d   : > { %645 = vst.msk [vmem:[#allocation4 + $0x10] sm:$0xff] %vm15115_vm0, %v11455_v15  ;;  %647 = vst.msk [vmem:[#allocation4 + $0x20] sm:$0xff] %vm15115_vm0, %v11462_v16  ;;  %v11534_v46 = vld [vmem:[#allocation2 + $0xc8] sm:$0xff]  ;;  %v599_v47 = vld [vmem:[#allocation2 + $0xf0] sm:$0xff] }
  0x4e   : > { %572 = vst.msk [vmem:[#allocation2 + $0x2f1] sm:$0xff] %vm15115_vm0, %v507_v17  ;;  %575 = vst.msk [vmem:[#allocation2 + $0x319] sm:$0xff] %vm15115_vm0, %v510_v18  ;;  %v598_v48 = vld [vmem:[#allocation2 + $0xe0] sm:$0xff]  ;;  %v601_v49 = vld [vmem:[#allocation2 + $0x108] sm:$0xff] }
  0x4f   : > { %646 = vst.msk [vmem:[#allocation4 + $0x18] sm:$0xff] %vm15115_vm0, %v11471_v19  ;;  %649 = vst.msk [vmem:[#allocation4 + $0x30] sm:$0xff] %vm15115_vm0, %v11473_v20  ;;  %v732_v50 = vld [vmem:[#allocation2 + $0x129] sm:$0xff]  ;;  %v600_v51 = vld [vmem:[#allocation2 + $0xf8] sm:$0xff] }
  0x50   : > { %861 = vrot.lane.b32.xlu1 %v720_v63, %s11073_s8  ;;  %867 = vrot.lane.b32.xlu0 %v723_v1, %s11073_s8  ;;  %574 = vst.msk [vmem:[#allocation2 + $0x309] sm:$0xff] %vm15115_vm0, %v509_v21  ;;  %648 = vst.msk [vmem:[#allocation4 + $0x28] sm:$0xff] %vm15115_vm0, %v11481_v23  ;;  %v603_v52 = vld [vmem:[#allocation2 + $0x120] sm:$0xff]  ;;  %v735_v53 = vld [vmem:[#allocation2 + $0x151] sm:$0xff] }
  0x51   : > { %651 = vst.msk [vmem:[#allocation4 + $0x40] sm:$0xff] %vm15115_vm0, %v11483_v24  ;;  %576 = vst.msk [vmem:[#allocation2 + $0x321] sm:$0xff] %vm15115_vm0, %v511_v27  ;;  %v602_v54 = vld [vmem:[#allocation2 + $0x110] sm:$0xff]  ;;  %v605_v55 = vld [vmem:[#allocation2 + $0x138] sm:$0xff] }
  0x52   : > { %650 = vst.msk [vmem:[#allocation4 + $0x38] sm:$0xff] %vm15115_vm0, %v11493_v30  ;;  %653 = vst.msk [vmem:[#allocation4 + $0x50] sm:$0xff] %vm15115_vm0, %v11495_v32  ;;  %v604_v56 = vld [vmem:[#allocation2 + $0x128] sm:$0xff]  ;;  %v607_v57 = vld [vmem:[#allocation2 + $0x150] sm:$0xff] }
  0x53   : > { %652 = vst.msk [vmem:[#allocation4 + $0x48] sm:$0xff] %vm15115_vm0, %v11501_v34  ;;  %655 = vst.msk [vmem:[#allocation4 + $0x60] sm:$0xff] %vm15115_vm0, %v11506_v35  ;;  %v734_v58 = vld [vmem:[#allocation2 + $0x141] sm:$0xff]  ;;  %v737_v61 = vld [vmem:[#allocation2 + $0x169] sm:$0xff] }
  0x54   : > { %865 = vrot.lane.b32.xlu1 %v722_v6, %s11073_s8  ;;  %871 = vrot.lane.b32.xlu0 %v725_v9, %s11073_s8  ;;  %654 = vst.msk [vmem:[#allocation4 + $0x58] sm:$0xff] %vm15115_vm0, %v11511_v38  ;;  %657 = vst.msk [vmem:[#allocation4 + $0x70] sm:$0xff] %vm15115_vm0, %v11513_v39  ;;  %v606_v59 = vld [vmem:[#allocation2 + $0x140] sm:$0xff]  ;;  %v609_v60 = vld [vmem:[#allocation2 + $0x168] sm:$0xff] }
  0x55   : > { %656 = vst.msk [vmem:[#allocation4 + $0x68] sm:$0xff] %vm15115_vm0, %v11519_v40  ;;  %659 = vst.msk [vmem:[#allocation4 + $0x80] sm:$0xff] %vm15115_vm0, %v11521_v41  ;;  %v608_v62 = vld [vmem:[#allocation2 + $0x158] sm:$0xff]  ;;  %v611_v63 = vld [vmem:[#allocation2 + $0x1b0] sm:$0xff] }
  0x56   : > { %658 = vst.msk [vmem:[#allocation4 + $0x78] sm:$0xff] %vm15115_vm0, %v11529_v43  ;;  %661 = vst.msk [vmem:[#allocation4 + $0x90] sm:$0xff] %vm15115_vm0, %v597_v44  ;;  %v610_v1 = vld [vmem:[#allocation2 + $0x170] sm:$0xff]  ;;  %v613_v2 = vld [vmem:[#allocation2 + $0x1c8] sm:$0xff] }
  0x57   : > { %660 = vst.msk [vmem:[#allocation4 + $0x88] sm:$0xff] %vm15115_vm0, %v11534_v46  ;;  %663 = vst.msk [vmem:[#allocation4 + $0xa0] sm:$0xff] %vm15115_vm0, %v599_v47  ;;  %v612_v3 = vld [vmem:[#allocation2 + $0x1b8] sm:$0xff]  ;;  %v615_v4 = vld [vmem:[#allocation2 + $0x1e0] sm:$0xff] }
  0x58   : > { %869 = vrot.lane.b32.xlu1 %v724_v12, %s11073_s8  ;;  %875 = vrot.lane.b32.xlu0 %v727_v22, %s11073_s8  ;;  %662 = vst.msk [vmem:[#allocation4 + $0x98] sm:$0xff] %vm15115_vm0, %v598_v48  ;;  %665 = vst.msk [vmem:[#allocation4 + $0xb0] sm:$0xff] %vm15115_vm0, %v601_v49  ;;  %v736_v5 = vld [vmem:[#allocation2 + $0x159] sm:$0xff]  ;;  %v614_v6 = vld [vmem:[#allocation2 + $0x1d0] sm:$0xff] }
  0x59   : > { %664 = vst.msk [vmem:[#allocation4 + $0xa8] sm:$0xff] %vm15115_vm0, %v600_v51  ;;  %667 = vst.msk [vmem:[#allocation4 + $0xc0] sm:$0xff] %vm15115_vm0, %v603_v52  ;;  %v739_v7 = vld [vmem:[#allocation2 + $0x1b1] sm:$0xff]  ;;  %v616_v10 = vld [vmem:[#allocation2 + $0x1e8] sm:$0xff] }
  0x5a   : > { %666 = vst.msk [vmem:[#allocation4 + $0xb8] sm:$0xff] %vm15115_vm0, %v602_v54  ;;  %669 = vst.msk [vmem:[#allocation4 + $0xd0] sm:$0xff] %vm15115_vm0, %v605_v55  ;;  %v617_v8 = vld [vmem:[#allocation2 + $0x1f8] sm:$0xff]  ;;  %v741_v11 = vld [vmem:[#allocation2 + $0x1c9] sm:$0xff] }
  0x5b   : > { %668 = vst.msk [vmem:[#allocation4 + $0xc8] sm:$0xff] %vm15115_vm0, %v604_v56  ;;  %671 = vst.msk [vmem:[#allocation4 + $0xe0] sm:$0xff] %vm15115_vm0, %v607_v57  ;;  %v738_v9 = vld [vmem:[#allocation2 + $0x171] sm:$0xff]  ;;  %v740_v13 = vld [vmem:[#allocation2 + $0x1b9] sm:$0xff] }
  0x5c   : > { %873 = vrot.lane.b32.xlu1 %v726_v28, %s11073_s8  ;;  %879 = vrot.lane.b32.xlu0 %v729_v33, %s11073_s8  ;;  %670 = vst.msk [vmem:[#allocation4 + $0xd8] sm:$0xff] %vm15115_vm0, %v606_v59  ;;  %673 = vst.msk [vmem:[#allocation4 + $0xf0] sm:$0xff] %vm15115_vm0, %v609_v60  ;;  %v619_v12 = vld [vmem:[#allocation2 + $0x210] sm:$0xff]  ;;  %v618_v14 = vld [vmem:[#allocation2 + $0x200] sm:$0xff] }
  0x5d   : > { %672 = vst.msk [vmem:[#allocation4 + $0xe8] sm:$0xff] %vm15115_vm0, %v608_v62  ;;  %675 = vst.msk [vmem:[#allocation4 + $0x100] sm:$0xff] %vm15115_vm0, %v611_v63  ;;  %v743_v17 = vld [vmem:[#allocation2 + $0x1e1] sm:$0xff]  ;;  %v742_v21 = vld [vmem:[#allocation2 + $0x1d1] sm:$0xff] }
  0x5e   : > { %674 = vst.msk [vmem:[#allocation4 + $0xf8] sm:$0xff] %vm15115_vm0, %v610_v1  ;;  %677 = vst.msk [vmem:[#allocation4 + $0x110] sm:$0xff] %vm15115_vm0, %v613_v2  ;;  %v621_v18 = vld [vmem:[#allocation2 + $0x228] sm:$0xff]  ;;  %v620_v22 = vld [vmem:[#allocation2 + $0x218] sm:$0xff] }
  0x5f   : > { %676 = vst.msk [vmem:[#allocation4 + $0x108] sm:$0xff] %vm15115_vm0, %v612_v3  ;;  %679 = vst.msk [vmem:[#allocation4 + $0x120] sm:$0xff] %vm15115_vm0, %v615_v4  ;;  %v745_v27 = vld [vmem:[#allocation2 + $0x1f9] sm:$0xff]  ;;  %v744_v33 = vld [vmem:[#allocation2 + $0x1e9] sm:$0xff] }
  0x60   : > { %877 = vrot.lane.b32.xlu1 %v728_v36, %s11073_s8  ;;  %883 = vrot.lane.b32.xlu0 %v731_v37, %s11073_s8  ;;  %678 = vst.msk [vmem:[#allocation4 + $0x118] sm:$0xff] %vm15115_vm0, %v614_v6  ;;  %681 = vst.msk [vmem:[#allocation4 + $0x130] sm:$0xff] %vm15115_vm0, %v617_v8  ;;  %v623_v28 = vld [vmem:[#allocation2 + $0x240] sm:$0xff]  ;;  %v622_v36 = vld [vmem:[#allocation2 + $0x230] sm:$0xff] }
  0x61   : > { %680 = vst.msk [vmem:[#allocation4 + $0x128] sm:$0xff] %vm15115_vm0, %v616_v10  ;;  %683 = vst.msk [vmem:[#allocation4 + $0x140] sm:$0xff] %vm15115_vm0, %v619_v12  ;;  %v747_v37 = vld [vmem:[#allocation2 + $0x211] sm:$0xff]  ;;  %v746_v44 = vld [vmem:[#allocation2 + $0x201] sm:$0xff] }
  0x62   : > { %682 = vst.msk [vmem:[#allocation4 + $0x138] sm:$0xff] %vm15115_vm0, %v618_v14  ;;  %685 = vst.msk [vmem:[#allocation4 + $0x150] sm:$0xff] %vm15115_vm0, %v621_v18  ;;  %v749_v47 = vld [vmem:[#allocation2 + $0x229] sm:$0xff]  ;;  %v748_v49 = vld [vmem:[#allocation2 + $0x219] sm:$0xff] }
  0x63   : > { %684 = vst.msk [vmem:[#allocation4 + $0x148] sm:$0xff] %vm15115_vm0, %v620_v22  ;;  %687 = vst.msk [vmem:[#allocation4 + $0x160] sm:$0xff] %vm15115_vm0, %v623_v28  ;;  %v627_v48 = vld [vmem:[#allocation2 + $0x270] sm:$0xff]  ;;  %v751_v51 = vld [vmem:[#allocation2 + $0x241] sm:$0xff] }
  0x64   : > { %881 = vrot.lane.b32.xlu1 %v730_v42, %s11073_s8  ;;  %887 = vrot.lane.b32.xlu0 %v733_v45, %s11073_s8  ;;  %686 = vst.msk [vmem:[#allocation4 + $0x158] sm:$0xff] %vm15115_vm0, %v622_v36  ;;  %v625_v42 = vld [vmem:[#allocation2 + $0x258] sm:$0xff]  ;;  %v624_v45 = vld [vmem:[#allocation2 + $0x248] sm:$0xff]  ;;  %691 = vst.msk [vmem:[#allocation4 + $0x180] sm:$0xff] %vm15115_vm0, %v627_v48 }
  0x65   : > { %689 = vst.msk [vmem:[#allocation4 + $0x170] sm:$0xff] %vm15115_vm0, %v625_v42  ;;  %688 = vst.msk [vmem:[#allocation4 + $0x168] sm:$0xff] %vm15115_vm0, %v624_v45  ;;  %v629_v52 = vld [vmem:[#allocation2 + $0x288] sm:$0xff]  ;;  %v628_v54 = vld [vmem:[#allocation2 + $0x278] sm:$0xff] }
  0x66   : > { %693 = vst.msk [vmem:[#allocation4 + $0x190] sm:$0xff] %vm15115_vm0, %v629_v52  ;;  %v753_v55 = vld [vmem:[#allocation2 + $0x259] sm:$0xff]  ;;  %692 = vst.msk [vmem:[#allocation4 + $0x188] sm:$0xff] %vm15115_vm0, %v628_v54  ;;  %v752_v57 = vld [vmem:[#allocation2 + $0x249] sm:$0xff] }
  0x67   : > { %v631_v56 = vld [vmem:[#allocation2 + $0x2a0] sm:$0xff]  ;;  %v755_v59 = vld [vmem:[#allocation2 + $0x271] sm:$0xff]  ;;  %v632_v62 = vld [vmem:[#allocation2 + $0x2a8] sm:$0xff]  ;;  %401 = vst.msk [vmem:[#allocation3 + $0x8] sm:$0x3] %vm15117_vm15, %v11072_v0 }
  0x68   : > { %885 = vrot.lane.b32.xlu1 %v732_v50, %s11073_s8  ;;  %891 = vrot.lane.b32.xlu0 %v735_v53, %s11073_s8  ;;  %v626_v50 = vld [vmem:[#allocation2 + $0x260] sm:$0xff]  ;;  %v750_v53 = vld [vmem:[#allocation2 + $0x231] sm:$0xff]  ;;  %695 = vst.msk [vmem:[#allocation4 + $0x1a0] sm:$0xff] %vm15115_vm0, %v631_v56  ;;  %v757_v63 = vld [vmem:[#allocation2 + $0x289] sm:$0xff] }
  0x69   : > { %690 = vst.msk [vmem:[#allocation4 + $0x178] sm:$0xff] %vm15115_vm0, %v626_v50  ;;  %v633_v60 = vld [vmem:[#allocation2 + $0x2b8] sm:$0xff]  ;;  %696 = vst.msk [vmem:[#allocation4 + $0x1a8] sm:$0xff] %vm15115_vm0, %v632_v62  ;;  %v635_v1 = vld [vmem:[#allocation2 + $0x2d0] sm:$0xff] }
  0x6a   : > { %697 = vst.msk [vmem:[#allocation4 + $0x1b0] sm:$0xff] %vm15115_vm0, %v633_v60  ;;  %699 = vst.msk [vmem:[#allocation4 + $0x1c0] sm:$0xff] %vm15115_vm0, %v635_v1  ;;  %v756_v2 = vld [vmem:[#allocation2 + $0x279] sm:$0xff]  ;;  %v759_v4 = vld [vmem:[#allocation2 + $0x2a1] sm:$0xff] }
  0x6b   : > { %v634_v3 = vld [vmem:[#allocation2 + $0x2c0] sm:$0xff]  ;;  %v758_v6 = vld [vmem:[#allocation2 + $0x291] sm:$0xff]  ;;  %v760_v10 = vld [vmem:[#allocation2 + $0x2a9] sm:$0xff]  ;;  %403 = vst.msk [vmem:[#allocation3 + $0xa8] sm:$0x3] %vm15117_vm15, %v11072_v0 }
  0x6c   : > { %889 = vrot.lane.b32.xlu1 %v734_v58, %s11073_s8  ;;  %895 = vrot.lane.b32.xlu0 %v737_v61, %s11073_s8  ;;  %v630_v58 = vld [vmem:[#allocation2 + $0x290] sm:$0xff]  ;;  %v754_v61 = vld [vmem:[#allocation2 + $0x261] sm:$0xff]  ;;  %698 = vst.msk [vmem:[#allocation4 + $0x1b8] sm:$0xff] %vm15115_vm0, %v634_v3  ;;  %v761_v8 = vld [vmem:[#allocation2 + $0x2b9] sm:$0xff] }
  0x6d   : > { %694 = vst.msk [vmem:[#allocation4 + $0x198] sm:$0xff] %vm15115_vm0, %v630_v58  ;;  %v763_v12 = vld [vmem:[#allocation2 + $0x2d1] sm:$0xff]  ;;  %v762_v14 = vld [vmem:[#allocation2 + $0x2c1] sm:$0xff]  ;;  %v765_v18 = vld [vmem:[#allocation2 + $0x2e9] sm:$0xff] }
  0x6e   : > { %v764_v22 = vld [vmem:[#allocation2 + $0x2d9] sm:$0xff]  ;;  %v767_v28 = vld [vmem:[#allocation2 + $0x301] sm:$0xff]  ;;  %v766_v36 = vld [vmem:[#allocation2 + $0x2f1] sm:$0xff]  ;;  %406 = vst.msk [vmem:[#allocation3 + $0x98] sm:$0x3] %vm15117_vm15, %v11072_v0 }
  0x6f   : > { %v769_v42 = vld [vmem:[#allocation2 + $0x319] sm:$0xff]  ;;  %v768_v45 = vld [vmem:[#allocation2 + $0x309] sm:$0xff]  ;;  %v770_v50 = vld [vmem:[#allocation2 + $0x321] sm:$0xff]  ;;  %408 = vst.msk [vmem:[#allocation3 + $0x138] sm:$0x3] %vm15117_vm15, %v11072_v0 }
  0x70   : > { %893 = vrot.lane.b32.xlu1 %v736_v5, %s11073_s8  ;;  %899 = vrot.lane.b32.xlu0 %v739_v7, %s11073_s8  ;;  %v637_v5 = vld [vmem:[#allocation2 + $0x2e8] sm:$0xff]  ;;  %v636_v7 = vld [vmem:[#allocation2 + $0x2d8] sm:$0xff]  ;;  %vm10848_vm6 = vmpackc.low %vm4049_vm4, %vm11081_vm5  ;;  %399 = vst.msk [vmem:[#allocation3] sm:$0xff] %vm15118_vm1, %v11072_v0  ;;  %vm6396_vm4 = vcmask 1042434   ;;  %vm6398_vm5 = vcmask 1043459  }
  0x71   : > { %701 = vst.msk [vmem:[#allocation4 + $0x1d0] sm:$0xff] %vm15115_vm0, %v637_v5  ;;  %700 = vst.msk [vmem:[#allocation4 + $0x1c8] sm:$0xff] %vm15115_vm0, %v636_v7  ;;  %v1092_v48 = vld [vmem:[#allocation2 + $0x2] sm:$0xff]  ;;  %v11629_v52 = vld [vmem:[#allocation2 + $0x1a] sm:$0xff] }
  0x72   : > { %v1093_v54 = vld [vmem:[#allocation2 + $0xa] sm:$0xff]  ;;  %v11636_v56 = vld [vmem:[#allocation2 + $0x32] sm:$0xff]  ;;  %v11643_v58 = vld [vmem:[#allocation2 + $0x22] sm:$0xff]  ;;  %402 = vst.msk [vmem:[#allocation3 + $0xa0] sm:$0xff] %vm15118_vm1, %v11072_v0 }
  0x73   : > { %v11645_v60 = vld [vmem:[#allocation2 + $0x4a] sm:$0xff]  ;;  %v11653_v62 = vld [vmem:[#allocation2 + $0x3a] sm:$0xff]  ;;  %v11655_v1 = vld [vmem:[#allocation2 + $0x62] sm:$0xff]  ;;  %405 = vst.msk [vmem:[#allocation3 + $0x90] sm:$0xff] %vm15118_vm1, %v11072_v0 }
  0x74   : > { %897 = vrot.lane.b32.xlu1 %v738_v9, %s11073_s8  ;;  %903 = vrot.lane.b32.xlu0 %v741_v11, %s11073_s8  ;;  %v639_v9 = vld [vmem:[#allocation2 + $0x300] sm:$0xff]  ;;  %v638_v11 = vld [vmem:[#allocation2 + $0x2f0] sm:$0xff]  ;;  %407 = vst.msk [vmem:[#allocation3 + $0x130] sm:$0xff] %vm15118_vm1, %v11072_v0 }
  0x75   : > { %703 = vst.msk [vmem:[#allocation4 + $0x1e0] sm:$0xff] %vm15115_vm0, %v639_v9  ;;  %702 = vst.msk [vmem:[#allocation4 + $0x1d8] sm:$0xff] %vm15115_vm0, %v638_v11  ;;  %v11663_v3 = vld [vmem:[#allocation2 + $0x52] sm:$0xff]  ;;  %v11665_v5 = vld [vmem:[#allocation2 + $0x7a] sm:$0xff] }
  0x76   : > { %v11673_v7 = vld [vmem:[#allocation2 + $0x6a] sm:$0xff]  ;;  %v11675_v9 = vld [vmem:[#allocation2 + $0x92] sm:$0xff]  ;;  %v11683_v11 = vld [vmem:[#allocation2 + $0x82] sm:$0xff]  ;;  %431 = vst.msk [vmem:[#allocation3 + $0x19] sm:$0x1] %vm409_vm2, %v11072_v0 }
  0x77   : > { %410 = vst.msk [vmem:[#allocation3] sm:$0x1] %vm409_vm2, %v11072_v0  ;;  %411 = vst.msk [vmem:[#allocation3 + $0x10] sm:$0x1] %vm409_vm2, %v11072_v0 }
  0x78   : > { %901 = vrot.lane.b32.xlu1 %v740_v13, %s11073_s8  ;;  %907 = vrot.lane.b32.xlu0 %v743_v17, %s11073_s8  ;;  %v641_v13 = vld [vmem:[#allocation2 + $0x318] sm:$0xff]  ;;  %v640_v17 = vld [vmem:[#allocation2 + $0x308] sm:$0xff]  ;;  %412 = vst.msk [vmem:[#allocation3 + $0x20] sm:$0x1] %vm409_vm2, %v11072_v0  ;;  %413 = vst.msk [vmem:[#allocation3 + $0x30] sm:$0x1] %vm409_vm2, %v11072_v0 }
  0x79   : > { %705 = vst.msk [vmem:[#allocation4 + $0x1f0] sm:$0xff] %vm15115_vm0, %v641_v13  ;;  %704 = vst.msk [vmem:[#allocation4 + $0x1e8] sm:$0xff] %vm15115_vm0, %v640_v17  ;;  %v11685_v13 = vld [vmem:[#allocation2 + $0xaa] sm:$0xff]  ;;  %v11693_v17 = vld [vmem:[#allocation2 + $0x9a] sm:$0xff] }
  0x7a   : > { %414 = vst.msk [vmem:[#allocation3 + $0x40] sm:$0x1] %vm409_vm2, %v11072_v0  ;;  %415 = vst.msk [vmem:[#allocation3 + $0x50] sm:$0x1] %vm409_vm2, %v11072_v0 }
  0x7b   : > { %416 = vst.msk [vmem:[#allocation3 + $0x60] sm:$0x1] %vm409_vm2, %v11072_v0  ;;  %417 = vst.msk [vmem:[#allocation3 + $0x70] sm:$0x1] %vm409_vm2, %v11072_v0 }
  0x7c   : > { %905 = vrot.lane.b32.xlu1 %v742_v21, %s11073_s8  ;;  %911 = vrot.lane.b32.xlu0 %v745_v27, %s11073_s8  ;;  %v642_v27 = vld [vmem:[#allocation2 + $0x320] sm:$0xff]  ;;  %418 = vst.msk [vmem:[#allocation3 + $0x80] sm:$0x1] %vm409_vm2, %v11072_v0  ;;  %419 = vst.msk [vmem:[#allocation3 + $0x90] sm:$0x1] %vm409_vm2, %v11072_v0 }
  0x7d   : > { %706 = vst.msk [vmem:[#allocation4 + $0x1f8] sm:$0xff] %vm15115_vm0, %v642_v27  ;;  %v11703_v27 = vld [vmem:[#allocation2 + $0xb2] sm:$0xff] }
  0x7e   : > { %420 = vst.msk [vmem:[#allocation3 + $0xa0] sm:$0x1] %vm409_vm2, %v11072_v0  ;;  %421 = vst.msk [vmem:[#allocation3 + $0xb0] sm:$0x1] %vm409_vm2, %v11072_v0 }
  0x7f   : > { %422 = vst.msk [vmem:[#allocation3 + $0xc0] sm:$0x1] %vm409_vm2, %v11072_v0  ;;  %423 = vst.msk [vmem:[#allocation3 + $0xd0] sm:$0x1] %vm409_vm2, %v11072_v0 }
  0x80   : > { %909 = vrot.lane.b32.xlu1 %v744_v33, %s11073_s8  ;;  %915 = vrot.lane.b32.xlu0 %v747_v37, %s11073_s8  ;;  %v836_v21 = vpop.permute.xlu0 %835  ;;  %424 = vst.msk [vmem:[#allocation3 + $0xe0] sm:$0x1] %vm409_vm2, %v11072_v0  ;;  %425 = vst.msk [vmem:[#allocation3 + $0xf0] sm:$0x1] %vm409_vm2, %v11072_v0 }
  0x81   : > { %1028 = vst.msk [vmem:[#allocation4] sm:$0xff] %vm1027_vm3, %v836_v21  ;;  %v11695_v21 = vld [vmem:[#allocation2 + $0xc2] sm:$0xff] }
  0x82   : > { %426 = vst.msk [vmem:[#allocation3 + $0x100] sm:$0x1] %vm409_vm2, %v11072_v0  ;;  %427 = vst.msk [vmem:[#allocation3 + $0x110] sm:$0x1] %vm409_vm2, %v11072_v0 }
  0x83   : > { %428 = vst.msk [vmem:[#allocation3 + $0x120] sm:$0x1] %vm409_vm2, %v11072_v0  ;;  %429 = vst.msk [vmem:[#allocation3 + $0x130] sm:$0x1] %vm409_vm2, %v11072_v0 }
  0x84   : > { %913 = vrot.lane.b32.xlu1 %v746_v44, %s11073_s8  ;;  %919 = vrot.lane.b32.xlu0 %v749_v47, %s11073_s8  ;;  %430 = vst.msk [vmem:[#allocation3 + $0x9] sm:$0x1] %vm409_vm2, %v11072_v0  ;;  %432 = vst.msk [vmem:[#allocation3 + $0x29] sm:$0x1] %vm409_vm2, %v11072_v0 }
  0x85   : > { %433 = vst.msk [vmem:[#allocation3 + $0x39] sm:$0x1] %vm409_vm2, %v11072_v0  ;;  %434 = vst.msk [vmem:[#allocation3 + $0x49] sm:$0x1] %vm409_vm2, %v11072_v0 }
  0x86   : > { %435 = vst.msk [vmem:[#allocation3 + $0x59] sm:$0x1] %vm409_vm2, %v11072_v0  ;;  %436 = vst.msk [vmem:[#allocation3 + $0x69] sm:$0x1] %vm409_vm2, %v11072_v0 }
  0x87   : > { %437 = vst.msk [vmem:[#allocation3 + $0x79] sm:$0x1] %vm409_vm2, %v11072_v0  ;;  %438 = vst.msk [vmem:[#allocation3 + $0x89] sm:$0x1] %vm409_vm2, %v11072_v0 }
  0x88   : > { %917 = vrot.lane.b32.xlu1 %v748_v49, %s11073_s8  ;;  %923 = vrot.lane.b32.xlu0 %v751_v51, %s11073_s8  ;;  %439 = vst.msk [vmem:[#allocation3 + $0x99] sm:$0x1] %vm409_vm2, %v11072_v0  ;;  %440 = vst.msk [vmem:[#allocation3 + $0xa9] sm:$0x1] %vm409_vm2, %v11072_v0 }
  0x89   : > { %441 = vst.msk [vmem:[#allocation3 + $0xb9] sm:$0x1] %vm409_vm2, %v11072_v0  ;;  %442 = vst.msk [vmem:[#allocation3 + $0xc9] sm:$0x1] %vm409_vm2, %v11072_v0 }
  0x8a   : > { %443 = vst.msk [vmem:[#allocation3 + $0xd9] sm:$0x1] %vm409_vm2, %v11072_v0  ;;  %444 = vst.msk [vmem:[#allocation3 + $0xe9] sm:$0x1] %vm409_vm2, %v11072_v0 }
  0x8b   : > { %445 = vst.msk [vmem:[#allocation3 + $0xf9] sm:$0x1] %vm409_vm2, %v11072_v0  ;;  %446 = vst.msk [vmem:[#allocation3 + $0x109] sm:$0x1] %vm409_vm2, %v11072_v0 }
  0x8c   : > { %921 = vrot.lane.b32.xlu1 %v750_v53, %s11073_s8  ;;  %927 = vrot.lane.b32.xlu0 %v753_v55, %s11073_s8  ;;  %447 = vst.msk [vmem:[#allocation3 + $0x119] sm:$0x1] %vm409_vm2, %v11072_v0  ;;  %448 = vst.msk [vmem:[#allocation3 + $0x129] sm:$0x1] %vm409_vm2, %v11072_v0 }
  0x8d   : > { %449 = vst.msk [vmem:[#allocation3 + $0x139] sm:$0x1] %vm409_vm2, %v11072_v0  ;;  %vm6402_vm2 = vcmask 1045509  }
  0x90   : > { %925 = vrot.lane.b32.xlu1 %v752_v57, %s11073_s8  ;;  %931 = vrot.lane.b32.xlu0 %v755_v59, %s11073_s8 }
  0x94   : > { %929 = vrot.lane.b32.xlu1 %v754_v61, %s11073_s8  ;;  %935 = vrot.lane.b32.xlu0 %v757_v63, %s11073_s8 }
  0x98   : > { %933 = vrot.lane.b32.xlu1 %v756_v2, %s11073_s8  ;;  %939 = vrot.lane.b32.xlu0 %v759_v4, %s11073_s8 }
  0x9c   : > { %937 = vrot.lane.b32.xlu1 %v758_v6, %s11073_s8  ;;  %943 = vrot.lane.b32.xlu0 %v761_v8, %s11073_s8 }
  0xa0   : > { %941 = vrot.lane.b32.xlu1 %v760_v10, %s11073_s8  ;;  %947 = vrot.lane.b32.xlu0 %v763_v12, %s11073_s8 }
  0xa4   : > { %945 = vrot.lane.b32.xlu1 %v762_v14, %s11073_s8  ;;  %951 = vrot.lane.b32.xlu0 %v765_v18, %s11073_s8  ;;  %v838_v33 = vpop.permute.xlu0 %837 }
  0xa5   : > { %1029 = vst.msk [vmem:[#allocation4 + $0x8] sm:$0xff] %vm1027_vm3, %v838_v33  ;;  %v1110_v33 = vld [vmem:[#allocation2 + $0xda] sm:$0xff] }
  0xa8   : > { %949 = vrot.lane.b32.xlu1 %v764_v22, %s11073_s8  ;;  %955 = vrot.lane.b32.xlu0 %v767_v28, %s11073_s8 }
  0xaa   : > { %v840_v37 = vpop.permute.xlu1 %839  ;;  %v844_v44 = vpop.permute.xlu0 %843 }
  0xab   : > { %1030 = vst.msk [vmem:[#allocation4 + $0x10] sm:$0xff] %vm1027_vm3, %v840_v37  ;;  %1032 = vst.msk [vmem:[#allocation4 + $0x20] sm:$0xff] %vm1027_vm3, %v844_v44  ;;  %v11710_v37 = vld [vmem:[#allocation2 + $0xca] sm:$0xff]  ;;  %v1112_v44 = vld [vmem:[#allocation2 + $0xf2] sm:$0xff] }
  0xac   : > { %953 = vrot.lane.b32.xlu1 %v766_v36, %s11073_s8  ;;  %959 = vrot.lane.b32.xlu0 %v769_v42, %s11073_s8 }
  0xae   : > { %v842_v47 = vpop.permute.xlu1 %841  ;;  %v848_v49 = vpop.permute.xlu0 %847 }
  0xaf   : > { %1031 = vst.msk [vmem:[#allocation4 + $0x18] sm:$0xff] %vm1027_vm3, %v842_v47  ;;  %1034 = vst.msk [vmem:[#allocation4 + $0x30] sm:$0xff] %vm1027_vm3, %v848_v49  ;;  %v1111_v47 = vld [vmem:[#allocation2 + $0xe2] sm:$0xff]  ;;  %v1114_v49 = vld [vmem:[#allocation2 + $0x10a] sm:$0xff] }
  0xb0   : > { %957 = vrot.lane.b32.xlu1 %v768_v45, %s11073_s8  ;;  %1220 = vrot.lane.b32.xlu0 %v1092_v48, %s11074_s9 }
  0xb2   : > { %v846_v51 = vpop.permute.xlu1 %845  ;;  %v852_v53 = vpop.permute.xlu0 %851 }
  0xb3   : > { %1033 = vst.msk [vmem:[#allocation4 + $0x28] sm:$0xff] %vm1027_vm3, %v846_v51  ;;  %1036 = vst.msk [vmem:[#allocation4 + $0x40] sm:$0xff] %vm1027_vm3, %v852_v53  ;;  %v1113_v51 = vld [vmem:[#allocation2 + $0xfa] sm:$0xff] }
  0xb4   : > { %961 = vrot.lane.b32.xlu1 %v770_v50, %s11073_s8  ;;  %1224 = vrot.lane.b32.xlu0 %v11629_v52, %s11074_s9 }
  0xb6   : > { %v850_v55 = vpop.permute.xlu1 %849  ;;  %v856_v57 = vpop.permute.xlu0 %855 }
  0xb7   : > { %1035 = vst.msk [vmem:[#allocation4 + $0x38] sm:$0xff] %vm1027_vm3, %v850_v55  ;;  %1038 = vst.msk [vmem:[#allocation4 + $0x50] sm:$0xff] %vm1027_vm3, %v856_v57  ;;  %v1115_v57 = vld [vmem:[#allocation2 + $0x112] sm:$0xff] }
  0xb8   : > { %1222 = vrot.lane.b32.xlu1 %v1093_v54, %s11074_s9  ;;  %1228 = vrot.lane.b32.xlu0 %v11636_v56, %s11074_s9  ;;  %v1116_v54 = vld [vmem:[#allocation2 + $0x122] sm:$0xff] }
  0xba   : > { %v854_v59 = vpop.permute.xlu1 %853  ;;  %v860_v61 = vpop.permute.xlu0 %859 }
  0xbb   : > { %1037 = vst.msk [vmem:[#allocation4 + $0x48] sm:$0xff] %vm1027_vm3, %v854_v59  ;;  %1040 = vst.msk [vmem:[#allocation4 + $0x60] sm:$0xff] %vm1027_vm3, %v860_v61 }
  0xbc   : > { %1226 = vrot.lane.b32.xlu1 %v11643_v58, %s11074_s9  ;;  %1232 = vrot.lane.b32.xlu0 %v11645_v60, %s11074_s9 }
  0xbe   : > { %v858_v63 = vpop.permute.xlu1 %857  ;;  %v864_v2 = vpop.permute.xlu0 %863 }
  0xbf   : > { %1039 = vst.msk [vmem:[#allocation4 + $0x58] sm:$0xff] %vm1027_vm3, %v858_v63  ;;  %1042 = vst.msk [vmem:[#allocation4 + $0x70] sm:$0xff] %vm1027_vm3, %v864_v2 }
  0xc0   : > { %1230 = vrot.lane.b32.xlu1 %v11653_v62, %s11074_s9  ;;  %1236 = vrot.lane.b32.xlu0 %v11655_v1, %s11074_s9 }
  0xc2   : > { %v862_v4 = vpop.permute.xlu1 %861  ;;  %v868_v6 = vpop.permute.xlu0 %867 }
  0xc3   : > { %1041 = vst.msk [vmem:[#allocation4 + $0x68] sm:$0xff] %vm1027_vm3, %v862_v4  ;;  %1044 = vst.msk [vmem:[#allocation4 + $0x80] sm:$0xff] %vm1027_vm3, %v868_v6 }
  0xc4   : > { %1234 = vrot.lane.b32.xlu1 %v11663_v3, %s11074_s9  ;;  %1240 = vrot.lane.b32.xlu0 %v11665_v5, %s11074_s9 }
  0xc6   : > { %v866_v8 = vpop.permute.xlu1 %865  ;;  %v872_v10 = vpop.permute.xlu0 %871 }
  0xc7   : > { %1043 = vst.msk [vmem:[#allocation4 + $0x78] sm:$0xff] %vm1027_vm3, %v866_v8  ;;  %1046 = vst.msk [vmem:[#allocation4 + $0x90] sm:$0xff] %vm1027_vm3, %v872_v10  ;;  %v3852_v8 = vld [vmem:[%s15109_s2] sm:$0xff] }
  0xc8   : > { %1238 = vrot.lane.b32.xlu1 %v11673_v7, %s11074_s9  ;;  %1244 = vrot.lane.b32.xlu0 %v11675_v9, %s11074_s9 }
  0xca   : > { %v870_v12 = vpop.permute.xlu1 %869  ;;  %v876_v14 = vpop.permute.xlu0 %875 }
  0xcb   : > { %1045 = vst.msk [vmem:[#allocation4 + $0x88] sm:$0xff] %vm1027_vm3, %v870_v12  ;;  %1048 = vst.msk [vmem:[#allocation4 + $0xa0] sm:$0xff] %vm1027_vm3, %v876_v14 }
  0xcc   : > { %1242 = vrot.lane.b32.xlu1 %v11683_v11, %s11074_s9  ;;  %1248 = vrot.lane.b32.xlu0 %v11685_v13, %s11074_s9 }
  0xce   : > { %v874_v18 = vpop.permute.xlu1 %873  ;;  %v880_v22 = vpop.permute.xlu0 %879 }
  0xcf   : > { %1047 = vst.msk [vmem:[#allocation4 + $0x98] sm:$0xff] %vm1027_vm3, %v874_v18  ;;  %1050 = vst.msk [vmem:[#allocation4 + $0xb0] sm:$0xff] %vm1027_vm3, %v880_v22  ;;  %v3854_v18 = vld [vmem:[%s15109_s2 + $0x10] sm:$0xff] }
  0xd0   : > { %1246 = vrot.lane.b32.xlu1 %v11693_v17, %s11074_s9  ;;  %1252 = vrot.lane.b32.xlu0 %v11695_v21, %s11074_s9 }
  0xd2   : > { %v878_v28 = vpop.permute.xlu1 %877  ;;  %v884_v36 = vpop.permute.xlu0 %883 }
  0xd3   : > { %1049 = vst.msk [vmem:[#allocation4 + $0xa8] sm:$0xff] %vm1027_vm3, %v878_v28  ;;  %1052 = vst.msk [vmem:[#allocation4 + $0xc0] sm:$0xff] %vm1027_vm3, %v884_v36 }
  0xd4   : > { %1250 = vrot.lane.b32.xlu1 %v11703_v27, %s11074_s9  ;;  %1256 = vrot.lane.b32.xlu0 %v1110_v33, %s11074_s9 }
  0xd6   : > { %v882_v42 = vpop.permute.xlu1 %881  ;;  %v888_v45 = vpop.permute.xlu0 %887 }
  0xd7   : > { %1051 = vst.msk [vmem:[#allocation4 + $0xb8] sm:$0xff] %vm1027_vm3, %v882_v42  ;;  %1054 = vst.msk [vmem:[#allocation4 + $0xd0] sm:$0xff] %vm1027_vm3, %v888_v45  ;;  %v3020_v45 = vld [vmem:[#allocation2 + $0x49] sm:$0xff] }
  0xd8   : > { %1254 = vrot.lane.b32.xlu1 %v11710_v37, %s11074_s9  ;;  %1260 = vrot.lane.b32.xlu0 %v1112_v44, %s11074_s9 }
  0xda   : > { %v886_v48 = vpop.permute.xlu1 %885  ;;  %v892_v50 = vpop.permute.xlu0 %891 }
  0xdb   : > { %1053 = vst.msk [vmem:[#allocation4 + $0xc8] sm:$0xff] %vm1027_vm3, %v886_v48  ;;  %1056 = vst.msk [vmem:[#allocation4 + $0xe0] sm:$0xff] %vm1027_vm3, %v892_v50 }
  0xdc   : > { %1258 = vrot.lane.b32.xlu1 %v1111_v47, %s11074_s9  ;;  %1264 = vrot.lane.b32.xlu0 %v1114_v49, %s11074_s9 }
  0xde   : > { %v890_v53 = vpop.permute.xlu1 %889  ;;  %v896_v55 = vpop.permute.xlu0 %895 }
  0xdf   : > { %1055 = vst.msk [vmem:[#allocation4 + $0xd8] sm:$0xff] %vm1027_vm3, %v890_v53  ;;  %1058 = vst.msk [vmem:[#allocation4 + $0xf0] sm:$0xff] %vm1027_vm3, %v896_v55 }
  0xe0   : > { %1262 = vrot.lane.b32.xlu1 %v1113_v51, %s11074_s9  ;;  %1268 = vrot.lane.b32.xlu0 %v1116_v54, %s11074_s9 }
  0xe2   : > { %v894_v59 = vpop.permute.xlu1 %893  ;;  %v900_v61 = vpop.permute.xlu0 %899 }
  0xe3   : > { %1057 = vst.msk [vmem:[#allocation4 + $0xe8] sm:$0xff] %vm1027_vm3, %v894_v59  ;;  %1060 = vst.msk [vmem:[#allocation4 + $0x100] sm:$0xff] %vm1027_vm3, %v900_v61 }
  0xe4   : > { %1266 = vrot.lane.b32.xlu1 %v1115_v57, %s11074_s9  ;;  %1607 = vrot.lane.b32.xlu0 %v11471_v19, %s11075_s10  ;;  %v3022_v57 = vld [vmem:[#allocation2 + $0x61] sm:$0xff] }
  0xe6   : > { %v898_v63 = vpop.permute.xlu1 %897  ;;  %v904_v2 = vpop.permute.xlu0 %903 }
  0xe7   : > { %1059 = vst.msk [vmem:[#allocation4 + $0xf8] sm:$0xff] %vm1027_vm3, %v898_v63  ;;  %1062 = vst.msk [vmem:[#allocation4 + $0x110] sm:$0xff] %vm1027_vm3, %v904_v2 }
  0xe8   : > { %1605 = vrot.lane.b32.xlu1 %v11455_v15, %s11075_s10  ;;  %1992 = vrot.lane.b32.xlu0 %v11371_v29, %s11076_s11 }
  0xea   : > { %v902_v4 = vpop.permute.xlu1 %901  ;;  %v908_v6 = vpop.permute.xlu0 %907 }
  0xeb   : > { %1061 = vst.msk [vmem:[#allocation4 + $0x108] sm:$0xff] %vm1027_vm3, %v902_v4  ;;  %1064 = vst.msk [vmem:[#allocation4 + $0x120] sm:$0xff] %vm1027_vm3, %v908_v6 }
  0xec   : > { %1990 = vrot.lane.b32.xlu1 %v11358_v25, %s11076_s11  ;;  %2377 = vrot.lane.b32.xlu0 %v11643_v58, %s11077_s12 }
  0xee   : > { %v906_v19 = vpop.permute.xlu1 %905  ;;  %v912_v15 = vpop.permute.xlu0 %911 }
  0xef   : > { %1063 = vst.msk [vmem:[#allocation4 + $0x118] sm:$0xff] %vm1027_vm3, %v906_v19  ;;  %1066 = vst.msk [vmem:[#allocation4 + $0x130] sm:$0xff] %vm1027_vm3, %v912_v15 }
  0xf0   : > { %2375 = vrot.lane.b32.xlu1 %v11629_v52, %s11077_s12  ;;  %1609 = vrot.lane.b32.xlu0 %v11462_v16, %s11075_s10 }
  0xf2   : > { %v910_v29 = vpop.permute.xlu1 %909  ;;  %v916_v25 = vpop.permute.xlu0 %915 }
  0xf3   : > { %1065 = vst.msk [vmem:[#allocation4 + $0x128] sm:$0xff] %vm1027_vm3, %v910_v29  ;;  %1068 = vst.msk [vmem:[#allocation4 + $0x140] sm:$0xff] %vm1027_vm3, %v916_v25  ;;  %v3024_v25 = vld [vmem:[#allocation2 + $0x79] sm:$0xff] }
  0xf4   : > { %2761 = vrot.lane.b32.xlu1 %v11462_v16, %s11078_s13  ;;  %3146 = vrot.lane.b32.xlu0 %v11360_v26, %s11079_s14  ;;  %v3853_v16 = vld [vmem:[%s15109_s2 + $0x8] sm:$0xff] }
  0xf5   : > { %v10843_v10 = vpack.c.bf16 %v3853_v16, %v3852_v8 }
  0xf6   : > { %v914_v58 = vpop.permute.xlu1 %913  ;;  %v920_v52 = vpop.permute.xlu0 %919 }
  0xf7   : > { %1067 = vst.msk [vmem:[#allocation4 + $0x138] sm:$0xff] %vm1027_vm3, %v914_v58  ;;  %1070 = vst.msk [vmem:[#allocation4 + $0x150] sm:$0xff] %vm1027_vm3, %v920_v52  ;;  %10844 = vmatprep.subr.bf16.mxu0 %v10843_v10 }
  0xf8   : > { %2763 = vrot.lane.b32.xlu1 %v11481_v23, %s11078_s13  ;;  %1994 = vrot.lane.b32.xlu0 %v11360_v26, %s11076_s11  ;;  %v3855_v26 = vld [vmem:[%s15109_s2 + $0x18] sm:$0x7] }
  0xf9   : > { %10846 = vmatpush3.bf16.msra.mxu0 %v10843_v10  ;;  %v10847_v22 = vpack.c.bf16 %v3855_v26, %v3854_v18 }
  0xfa   : > { %v918_v12 = vpop.permute.xlu1 %917  ;;  %v924_v14 = vpop.permute.xlu0 %923 }
  0xfb   : > { %1069 = vst.msk [vmem:[#allocation4 + $0x148] sm:$0xff] %vm1027_vm3, %v918_v12  ;;  %1072 = vst.msk [vmem:[#allocation4 + $0x160] sm:$0xff] %vm1027_vm3, %v924_v14  ;;  %10849 = vmatprep.subr.msk.bf16.mxu0 %vm10848_vm6, %v10847_v22 }
  0xfc   : > { %1611 = vrot.lane.b32.xlu1 %v11481_v23, %s11075_s10  ;;  %3531 = vrot.lane.b32.xlu0 %v11636_v56, %s11080_s23 }
  0xfd   : > { %10852 = vmatpush3.bf16.msk.msra.mxu0 %vm10848_vm6, %v10847_v22  ;;  %v3026_v22 = vld [vmem:[#allocation2 + $0x91] sm:$0xff]  ;;  %vm6400_vm6 = vcmask 1044484  }
  0xfe   : > { %v922_v28 = vpop.permute.xlu1 %921  ;;  %v928_v23 = vpop.permute.xlu0 %927 }
  0xff   : > { %1071 = vst.msk [vmem:[#allocation4 + $0x158] sm:$0xff] %vm1027_vm3, %v922_v28  ;;  %1074 = vst.msk [vmem:[#allocation4 + $0x170] sm:$0xff] %vm1027_vm3, %v928_v23 }
 0x100   : > { %3148 = vrot.lane.b32.xlu1 %v11378_v31, %s11079_s14  ;;  %2379 = vrot.lane.b32.xlu0 %v11636_v56, %s11077_s12 }
 0x102   : > { %v926_v33 = vpop.permute.xlu1 %925  ;;  %v932_v36 = vpop.permute.xlu0 %931 }
 0x103   : > { %1073 = vst.msk [vmem:[#allocation4 + $0x168] sm:$0xff] %vm1027_vm3, %v926_v33  ;;  %1076 = vst.msk [vmem:[#allocation4 + $0x180] sm:$0xff] %vm1027_vm3, %v932_v36 }
 0x104   : > { %1996 = vrot.lane.b32.xlu1 %v11378_v31, %s11076_s11  ;;  %2381 = vrot.lane.b32.xlu0 %v11653_v62, %s11077_s12 }
 0x106   : > { %v930_v42 = vpop.permute.xlu1 %929  ;;  %v936_v44 = vpop.permute.xlu0 %935 }
 0x107   : > { %1075 = vst.msk [vmem:[#allocation4 + $0x178] sm:$0xff] %vm1027_vm3, %v930_v42  ;;  %1078 = vst.msk [vmem:[#allocation4 + $0x190] sm:$0xff] %vm1027_vm3, %v936_v44 }
 0x108   : > { %3533 = vrot.lane.b32.xlu1 %v11653_v62, %s11080_s23  ;;  %1613 = vrot.lane.b32.xlu0 %v11473_v20, %s11075_s10 }
 0x10a   : > { %v934_v56 = vpop.permute.xlu1 %933  ;;  %v940_v31 = vpop.permute.xlu0 %939 }
 0x10b   : > { %1077 = vst.msk [vmem:[#allocation4 + $0x188] sm:$0xff] %vm1027_vm3, %v934_v56  ;;  %1080 = vst.msk [vmem:[#allocation4 + $0x1a0] sm:$0xff] %vm1027_vm3, %v940_v31 }
 0x10c   : > { %2765 = vrot.lane.b32.xlu1 %v11473_v20, %s11078_s13  ;;  %3150 = vrot.lane.b32.xlu0 %v3020_v45, %s11079_s14  ;;  %v3021_v20 = vld [vmem:[#allocation2 + $0x51] sm:$0xff] }
 0x10e   : > { %v938_v47 = vpop.permute.xlu1 %937  ;;  %v944_v48 = vpop.permute.xlu0 %943 }
 0x10f   : > { %1079 = vst.msk [vmem:[#allocation4 + $0x198] sm:$0xff] %vm1027_vm3, %v938_v47  ;;  %1082 = vst.msk [vmem:[#allocation4 + $0x1b0] sm:$0xff] %vm1027_vm3, %v944_v48  ;;  %v3028_v47 = vld [vmem:[#allocation2 + $0xa9] sm:$0xff] }
 0x110   : > { %2767 = vrot.lane.b32.xlu1 %v11493_v30, %s11078_s13  ;;  %1998 = vrot.lane.b32.xlu0 %v3020_v45, %s11076_s11 }
 0x112   : > { %v942_v62 = vpop.permute.xlu1 %941  ;;  %v948_v49 = vpop.permute.xlu0 %947 }
 0x113   : > { %1081 = vst.msk [vmem:[#allocation4 + $0x1a8] sm:$0xff] %vm1027_vm3, %v942_v62  ;;  %1084 = vst.msk [vmem:[#allocation4 + $0x1c0] sm:$0xff] %vm1027_vm3, %v948_v49 }
 0x114   : > { %1615 = vrot.lane.b32.xlu1 %v11493_v30, %s11075_s10  ;;  %3535 = vrot.lane.b32.xlu0 %v11645_v60, %s11080_s23 }
 0x116   : > { %v946_v50 = vpop.permute.xlu1 %945  ;;  %v952_v51 = vpop.permute.xlu0 %951 }
 0x117   : > { %1083 = vst.msk [vmem:[#allocation4 + $0x1b8] sm:$0xff] %vm1027_vm3, %v946_v50  ;;  %1086 = vst.msk [vmem:[#allocation4 + $0x1d0] sm:$0xff] %vm1027_vm3, %v952_v51 }
 0x118   : > { %3152 = vrot.lane.b32.xlu1 %v3021_v20, %s11079_s14  ;;  %2383 = vrot.lane.b32.xlu0 %v11645_v60, %s11077_s12 }
 0x11a   : > { %v950_v53 = vpop.permute.xlu1 %949  ;;  %v956_v54 = vpop.permute.xlu0 %955 }
 0x11b   : > { %1085 = vst.msk [vmem:[#allocation4 + $0x1c8] sm:$0xff] %vm1027_vm3, %v950_v53  ;;  %1088 = vst.msk [vmem:[#allocation4 + $0x1e0] sm:$0xff] %vm1027_vm3, %v956_v54 }
 0x11c   : > { %2000 = vrot.lane.b32.xlu1 %v3021_v20, %s11076_s11  ;;  %2385 = vrot.lane.b32.xlu0 %v11663_v3, %s11077_s12 }
 0x11e   : > { %v954_v30 = vpop.permute.xlu1 %953  ;;  %v960_v55 = vpop.permute.xlu0 %959 }
 0x11f   : > { %1087 = vst.msk [vmem:[#allocation4 + $0x1d8] sm:$0xff] %vm1027_vm3, %v954_v30  ;;  %1090 = vst.msk [vmem:[#allocation4 + $0x1f0] sm:$0xff] %vm1027_vm3, %v960_v55 }
 0x120   : > { %3537 = vrot.lane.b32.xlu1 %v11663_v3, %s11080_s23  ;;  %1617 = vrot.lane.b32.xlu0 %v11483_v24, %s11075_s10 }
 0x122   : > { %v958_v60 = vpop.permute.xlu1 %957  ;;  %v1221_v59 = vpop.permute.xlu0 %1220 }
 0x123   : > { %1089 = vst.msk [vmem:[#allocation4 + $0x1e8] sm:$0xff] %vm1027_vm3, %v958_v60 }
 0x124   : > { %1413 = vst.msk [vmem:[#allocation4] sm:$0xff] %vm1412_vm7, %v1221_v59  ;;  %2769 = vrot.lane.b32.xlu1 %v11483_v24, %s11078_s13  ;;  %3154 = vrot.lane.b32.xlu0 %v3022_v57, %s11079_s14  ;;  %v3023_v24 = vld [vmem:[#allocation2 + $0x69] sm:$0xff]  ;;  %v3030_v59 = vld [vmem:[#allocation2 + $0xc1] sm:$0xff] }
 0x126   : > { %v962_v61 = vpop.permute.xlu1 %961  ;;  %v1225_v3 = vpop.permute.xlu0 %1224 }
 0x127   : > { %1091 = vst.msk [vmem:[#allocation4 + $0x1f8] sm:$0xff] %vm1027_vm3, %v962_v61  ;;  %vm15116_vm3 = vcmask 1041409  }
 0x128   : > { %1415 = vst.msk [vmem:[#allocation4 + $0x10] sm:$0xff] %vm1412_vm7, %v1225_v3  ;;  %2771 = vrot.lane.b32.xlu1 %v11501_v34, %s11078_s13  ;;  %2002 = vrot.lane.b32.xlu0 %v3022_v57, %s11076_s11 }
 0x12a   : > { %v1223_v63 = vpop.permute.xlu1 %1222  ;;  %v1229_v2 = vpop.permute.xlu0 %1228 }
 0x12b   : > { %1414 = vst.msk [vmem:[#allocation4 + $0x8] sm:$0xff] %vm1412_vm7, %v1223_v63  ;;  %1417 = vst.msk [vmem:[#allocation4 + $0x20] sm:$0xff] %vm1412_vm7, %v1229_v2  ;;  %v3031_v2 = vld [vmem:[#allocation2 + $0xc9] sm:$0xff] }
 0x12c   : > { %1619 = vrot.lane.b32.xlu1 %v11501_v34, %s11075_s10  ;;  %3539 = vrot.lane.b32.xlu0 %v11655_v1, %s11080_s23 }
 0x12e   : > { %v1227_v4 = vpop.permute.xlu1 %1226  ;;  %v1233_v6 = vpop.permute.xlu0 %1232 }
 0x12f   : > { %1416 = vst.msk [vmem:[#allocation4 + $0x18] sm:$0xff] %vm1412_vm7, %v1227_v4  ;;  %1419 = vst.msk [vmem:[#allocation4 + $0x30] sm:$0xff] %vm1412_vm7, %v1233_v6 }
 0x130   : > { %3156 = vrot.lane.b32.xlu1 %v3023_v24, %s11079_s14  ;;  %2387 = vrot.lane.b32.xlu0 %v11655_v1, %s11077_s12 }
 0x132   : > { %v1231_v19 = vpop.permute.xlu1 %1230  ;;  %v1237_v15 = vpop.permute.xlu0 %1236 }
 0x133   : > { %1418 = vst.msk [vmem:[#allocation4 + $0x28] sm:$0xff] %vm1412_vm7, %v1231_v19  ;;  %1421 = vst.msk [vmem:[#allocation4 + $0x40] sm:$0xff] %vm1412_vm7, %v1237_v15 }
 0x134   : > { %2004 = vrot.lane.b32.xlu1 %v3023_v24, %s11076_s11  ;;  %2389 = vrot.lane.b32.xlu0 %v11673_v7, %s11077_s12 }
 0x136   : > { %v1235_v34 = vpop.permute.xlu1 %1234  ;;  %v1241_v29 = vpop.permute.xlu0 %1240 }
 0x137   : > { %1420 = vst.msk [vmem:[#allocation4 + $0x38] sm:$0xff] %vm1412_vm7, %v1235_v34  ;;  %1423 = vst.msk [vmem:[#allocation4 + $0x50] sm:$0xff] %vm1412_vm7, %v1241_v29  ;;  %v1493_v34 = vld [vmem:[#allocation2 + $0xd8] sm:$0xff] }
 0x138   : > { %3541 = vrot.lane.b32.xlu1 %v11673_v7, %s11080_s23  ;;  %1621 = vrot.lane.b32.xlu0 %v11495_v32, %s11075_s10 }
 0x13a   : > { %v1239_v1 = vpop.permute.xlu1 %1238  ;;  %v1245_v58 = vpop.permute.xlu0 %1244 }
 0x13b   : > { %1422 = vst.msk [vmem:[#allocation4 + $0x48] sm:$0xff] %vm1412_vm7, %v1239_v1  ;;  %1425 = vst.msk [vmem:[#allocation4 + $0x60] sm:$0xff] %vm1412_vm7, %v1245_v58 }
 0x13c   : > { %2773 = vrot.lane.b32.xlu1 %v11495_v32, %s11078_s13  ;;  %3158 = vrot.lane.b32.xlu0 %v3024_v25, %s11079_s14  ;;  %v3025_v32 = vld [vmem:[#allocation2 + $0x81] sm:$0xff] }
 0x13e   : > { %v1243_v52 = vpop.permute.xlu1 %1242  ;;  %v1249_v8 = vpop.permute.xlu0 %1248 }
 0x13f   : > { %1424 = vst.msk [vmem:[#allocation4 + $0x58] sm:$0xff] %vm1412_vm7, %v1243_v52  ;;  %1427 = vst.msk [vmem:[#allocation4 + $0x70] sm:$0xff] %vm1412_vm7, %v1249_v8  ;;  %v2648_v52 = vld [vmem:[#allocation2 + $0xe0] sm:$0xff] }
 0x140   : > { %2775 = vrot.lane.b32.xlu1 %v11511_v38, %s11078_s13  ;;  %2006 = vrot.lane.b32.xlu0 %v3024_v25, %s11076_s11  ;;  %v3032_v25 = vld [vmem:[#allocation2 + $0xd9] sm:$0xff] }
 0x142   : > { %v1247_v7 = vpop.permute.xlu1 %1246  ;;  %v1253_v16 = vpop.permute.xlu0 %1252 }
 0x143   : > { %1426 = vst.msk [vmem:[#allocation4 + $0x68] sm:$0xff] %vm1412_vm7, %v1247_v7  ;;  %1429 = vst.msk [vmem:[#allocation4 + $0x80] sm:$0xff] %vm1412_vm7, %v1253_v16  ;;  %v3417_v16 = vld [vmem:[#allocation2 + $0xda] sm:$0xff] }
 0x144   : > { %1623 = vrot.lane.b32.xlu1 %v11511_v38, %s11075_s10  ;;  %3543 = vrot.lane.b32.xlu0 %v11665_v5, %s11080_s23 }
 0x146   : > { %v1251_v10 = vpop.permute.xlu1 %1250  ;;  %v1257_v12 = vpop.permute.xlu0 %1256 }
 0x147   : > { %1428 = vst.msk [vmem:[#allocation4 + $0x78] sm:$0xff] %vm1412_vm7, %v1251_v10  ;;  %1431 = vst.msk [vmem:[#allocation4 + $0x90] sm:$0xff] %vm1412_vm7, %v1257_v12  ;;  %v3033_v10 = vld [vmem:[#allocation2 + $0xe1] sm:$0xff] }
 0x148   : > { %3160 = vrot.lane.b32.xlu1 %v3025_v32, %s11079_s14  ;;  %2391 = vrot.lane.b32.xlu0 %v11665_v5, %s11077_s12 }
 0x14a   : > { %v1255_v14 = vpop.permute.xlu1 %1254  ;;  %v1261_v18 = vpop.permute.xlu0 %1260 }
 0x14b   : > { %1430 = vst.msk [vmem:[#allocation4 + $0x88] sm:$0xff] %vm1412_vm7, %v1255_v14  ;;  %1433 = vst.msk [vmem:[#allocation4 + $0xa0] sm:$0xff] %vm1412_vm7, %v1261_v18 }
 0x14c   : > { %2008 = vrot.lane.b32.xlu1 %v3025_v32, %s11076_s11  ;;  %2393 = vrot.lane.b32.xlu0 %v11683_v11, %s11077_s12 }
 0x14e   : > { %v1259_v38 = vpop.permute.xlu1 %1258  ;;  %v1265_v26 = vpop.permute.xlu0 %1264 }
 0x14f   : > { %1432 = vst.msk [vmem:[#allocation4 + $0x98] sm:$0xff] %vm1412_vm7, %v1259_v38  ;;  %1435 = vst.msk [vmem:[#allocation4 + $0xb0] sm:$0xff] %vm1412_vm7, %v1265_v26  ;;  %v2264_v26 = vld [vmem:[#allocation2 + $0xe2] sm:$0xff] }
 0x150   : > { %3545 = vrot.lane.b32.xlu1 %v11683_v11, %s11080_s23  ;;  %1625 = vrot.lane.b32.xlu0 %v11506_v35, %s11075_s10 }
 0x152   : > { %v1263_v5 = vpop.permute.xlu1 %1262  ;;  %v1269_v28 = vpop.permute.xlu0 %1268 }
 0x153   : > { %1434 = vst.msk [vmem:[#allocation4 + $0xa8] sm:$0xff] %vm1412_vm7, %v1263_v5  ;;  %1437 = vst.msk [vmem:[#allocation4 + $0xc0] sm:$0xff] %vm1412_vm7, %v1269_v28  ;;  %v1495_v28 = vld [vmem:[#allocation2 + $0xf0] sm:$0xff] }
 0x154   : > { %2777 = vrot.lane.b32.xlu1 %v11506_v35, %s11078_s13  ;;  %3162 = vrot.lane.b32.xlu0 %v3026_v22, %s11079_s14  ;;  %v3027_v35 = vld [vmem:[#allocation2 + $0x99] sm:$0xff] }
 0x156   : > { %v1267_v23 = vpop.permute.xlu1 %1266  ;;  %v1608_v11 = vpop.permute.xlu0 %1607 }
 0x157   : > { %1436 = vst.msk [vmem:[#allocation4 + $0xb8] sm:$0xff] %vm1412_vm7, %v1267_v23 }
 0x158   : > { %1799 = vst.msk [vmem:[#allocation4 + $0x8] sm:$0xff] %vm1797_vm8, %v1608_v11  ;;  %2779 = vrot.lane.b32.xlu1 %v11519_v40, %s11078_s13  ;;  %2010 = vrot.lane.b32.xlu0 %v3026_v22, %s11076_s11 }
 0x15a   : > { %v1606_v33 = vpop.permute.xlu1 %1605  ;;  %v1993_v36 = vpop.permute.xlu0 %1992 }
 0x15b   : > { %1798 = vst.msk [vmem:[#allocation4] sm:$0xff] %vm1797_vm8, %v1606_v33 }
 0x15c   : > { %2184 = vst.msk [vmem:[#allocation4 + $0x8] sm:$0xff] %vm2182_vm9, %v1993_v36  ;;  %1627 = vrot.lane.b32.xlu1 %v11519_v40, %s11075_s10  ;;  %3547 = vrot.lane.b32.xlu0 %v11675_v9, %s11080_s23  ;;  %v3034_v36 = vld [vmem:[#allocation2 + $0xf1] sm:$0xff] }
 0x15e   : > { %v1991_v42 = vpop.permute.xlu1 %1990  ;;  %v2378_v44 = vpop.permute.xlu0 %2377 }
 0x15f   : > { %2183 = vst.msk [vmem:[#allocation4] sm:$0xff] %vm2182_vm9, %v1991_v42  ;;  %v2650_v42 = vld [vmem:[#allocation2 + $0xf8] sm:$0xff] }
 0x160   : > { %2569 = vst.msk [vmem:[#allocation4 + $0x8] sm:$0xff] %vm15119_vm10, %v2378_v44  ;;  %3164 = vrot.lane.b32.xlu1 %v3027_v35, %s11079_s14  ;;  %2395 = vrot.lane.b32.xlu0 %v11675_v9, %s11077_s12 }
 0x162   : > { %v2376_v56 = vpop.permute.xlu1 %2375  ;;  %v1610_v40 = vpop.permute.xlu0 %1609 }
 0x163   : > { %2568 = vst.msk [vmem:[#allocation4] sm:$0xff] %vm15119_vm10, %v2376_v56 }
 0x164   : > { %1800 = vst.msk [vmem:[#allocation4 + $0x10] sm:$0xff] %vm1797_vm8, %v1610_v40  ;;  %2012 = vrot.lane.b32.xlu1 %v3027_v35, %s11076_s11  ;;  %2397 = vrot.lane.b32.xlu0 %v11693_v17, %s11077_s12 }
 0x166   : > { %v2762_v45 = vpop.permute.xlu1 %2761  ;;  %v3147_v31 = vpop.permute.xlu0 %3146 }
 0x167   : > { %2954 = vst.msk [vmem:[#allocation4] sm:$0xff] %vm2953_vm11, %v2762_v45  ;;  %v3419_v45 = vld [vmem:[#allocation2 + $0xf2] sm:$0xff] }
 0x168   : > { %3339 = vst.msk [vmem:[#allocation4] sm:$0xff] %vm3338_vm12, %v3147_v31  ;;  %3549 = vrot.lane.b32.xlu1 %v11693_v17, %s11080_s23  ;;  %1629 = vrot.lane.b32.xlu0 %v11513_v39, %s11075_s10 }
 0x16a   : > { %v2764_v9 = vpop.permute.xlu1 %2763  ;;  %v1995_v48 = vpop.permute.xlu0 %1994 }
 0x16b   : > { %2955 = vst.msk [vmem:[#allocation4 + $0x8] sm:$0xff] %vm2953_vm11, %v2764_v9  ;;  %v3035_v9 = vld [vmem:[#allocation2 + $0xf9] sm:$0xff] }
 0x16c   : > { %2185 = vst.msk [vmem:[#allocation4 + $0x10] sm:$0xff] %vm2182_vm9, %v1995_v48  ;;  %2781 = vrot.lane.b32.xlu1 %v11513_v39, %s11078_s13  ;;  %3166 = vrot.lane.b32.xlu0 %v3028_v47, %s11079_s14  ;;  %v3029_v39 = vld [vmem:[#allocation2 + $0xb1] sm:$0xff] }
 0x16e   : > { %v1612_v62 = vpop.permute.xlu1 %1611  ;;  %v3532_v17 = vpop.permute.xlu0 %3531 }
 0x16f   : > { %1801 = vst.msk [vmem:[#allocation4 + $0x18] sm:$0xff] %vm1797_vm8, %v1612_v62 }
 0x170   : > { %3724 = vst.msk [vmem:[#allocation4] sm:$0xff] %vm15121_vm13, %v3532_v17  ;;  %2783 = vrot.lane.b32.xlu1 %v11529_v43, %s11078_s13  ;;  %2014 = vrot.lane.b32.xlu0 %v3028_v47, %s11076_s11 }
 0x172   : > { %v3149_v49 = vpop.permute.xlu1 %3148  ;;  %v2380_v20 = vpop.permute.xlu0 %2379 }
 0x173   : > { %3340 = vst.msk [vmem:[#allocation4 + $0x8] sm:$0xff] %vm3338_vm12, %v3149_v49  ;;  %v2266_v49 = vld [vmem:[#allocation2 + $0xfa] sm:$0xff] }
 0x174   : > { %2570 = vst.msk [vmem:[#allocation4 + $0x10] sm:$0xff] %vm15119_vm10, %v2380_v20  ;;  %1631 = vrot.lane.b32.xlu1 %v11529_v43, %s11075_s10  ;;  %3551 = vrot.lane.b32.xlu0 %v11685_v13, %s11080_s23 }
 0x176   : > { %v1997_v50 = vpop.permute.xlu1 %1996  ;;  %v2382_v51 = vpop.permute.xlu0 %2381 }
 0x177   : > { %2186 = vst.msk [vmem:[#allocation4 + $0x18] sm:$0xff] %vm2182_vm9, %v1997_v50  ;;  %v3788_v53 = vld [vmem:[#allocation4] sm:$0xff]  ;;  %v1497_v50 = vld [vmem:[#allocation2 + $0x108] sm:$0xff] }
 0x178   : > { %2571 = vst.msk [vmem:[#allocation4 + $0x18] sm:$0xff] %vm15119_vm10, %v2382_v51  ;;  %3168 = vrot.lane.b32.xlu1 %v3029_v39, %s11079_s14  ;;  %10651 = vmatprep.mubr.msk.f32.mxu0 %vm3856_vm14, %v3788_v53  ;;  %v480_v53 = vld [vmem:[%s11313_s30 + $0xf0] sm:$0xff] }
 0x179   : > { %2399 = vrot.lane.b32.xlu0 %v11685_v13, %s11077_s12  ;;  %v2645_v13 = vld [vmem:[#allocation2 + $0xc0] sm:$0xff]  ;;  %545 = vst.msk [vmem:[#allocation2 + $0x181] sm:$0xff] %vm15115_vm0, %v480_v53 }
 0x17a   : > { %v3534_v43 = vpop.permute.xlu1 %3533  ;;  %v1614_v54 = vpop.permute.xlu0 %1613 }
 0x17b   : > { %3725 = vst.msk [vmem:[#allocation4 + $0x8] sm:$0xff] %vm15121_vm13, %v3534_v43  ;;  %v481_v43 = vld [vmem:[%s11313_s30 + $0xf8] sm:$0xff] }
 0x17c   : > { %1802 = vst.msk [vmem:[#allocation4 + $0x20] sm:$0xff] %vm1797_vm8, %v1614_v54  ;;  %2016 = vrot.lane.b32.xlu1 %v3029_v39, %s11076_s11 }
 0x17d   : > { %2401 = vrot.lane.b32.xlu0 %v11703_v27, %s11077_s12  ;;  %546 = vst.msk [vmem:[#allocation2 + $0x189] sm:$0xff] %vm15115_vm0, %v481_v43  ;;  %v2657_v43 = vld [vmem:[#allocation2 + $0x150] sm:$0xff]  ;;  %vm6404_vm0 = vcmask 1046534  }
 0x17e   : > { %v2766_v30 = vpop.permute.xlu1 %2765  ;;  %v3151_v55 = vpop.permute.xlu0 %3150 }
 0x17f   : > { %2956 = vst.msk [vmem:[#allocation4 + $0x10] sm:$0xff] %vm2953_vm11, %v2766_v30 }
 0x180   : > { %3341 = vst.msk [vmem:[#allocation4 + $0x10] sm:$0xff] %vm3338_vm12, %v3151_v55  ;;  %3553 = vrot.lane.b32.xlu1 %v11703_v27, %s11080_s23  ;;  %v3036_v55 = vld [vmem:[#allocation2 + $0x109] sm:$0xff] }
 0x181   : > { %1633 = vrot.lane.b32.xlu0 %v11521_v41, %s11075_s10 }
 0x182   : > { %v2768_v60 = vpop.permute.xlu1 %2767  ;;  %v3789_v57 = vld [vmem:[#allocation4 + $0x8] sm:$0xff]  ;;  %v1999_v61 = vpop.permute.xlu0 %1998 }
 0x183   : > { %2957 = vst.msk [vmem:[#allocation4 + $0x18] sm:$0xff] %vm2953_vm11, %v2768_v60  ;;  %10652 = vmatmul.mubr.msk.f32.vlgmr.msra.gmra.mrb[0].mxu0 %vm3856_vm14, %v3789_v57  ;;  %v2652_v60 = vld [vmem:[#allocation2 + $0x110] sm:$0xff] }
 0x184   : > { %2187 = vst.msk [vmem:[#allocation4 + $0x20] sm:$0xff] %vm2182_vm9, %v1999_v61  ;;  %2785 = vrot.lane.b32.xlu1 %v2645_v13, %s11078_s13 }
 0x185   : > { %3170 = vrot.lane.b32.xlu0 %v3030_v59, %s11079_s14 }
 0x186   : > { %v1616_v3 = vpop.permute.xlu1 %1615  ;;  %v3536_v27 = vpop.permute.xlu0 %3535 }
 0x187   : > { %1803 = vst.msk [vmem:[#allocation4 + $0x28] sm:$0xff] %vm1797_vm8, %v1616_v3  ;;  %v3421_v3 = vld [vmem:[#allocation2 + $0x10a] sm:$0xff] }
 0x188   : > { %3726 = vst.msk [vmem:[#allocation4 + $0x10] sm:$0xff] %vm15121_vm13, %v3536_v27  ;;  %2787 = vrot.lane.b32.xlu1 %v11534_v46, %s11078_s13 }
 0x189   : > { %2018 = vrot.lane.b32.xlu0 %v3030_v59, %s11076_s11 }
 0x18a   : > { %v3153_v41 = vpop.permute.xlu1 %3152  ;;  %v2384_v63 = vpop.permute.xlu0 %2383 }
 0x18b   : > { %3342 = vst.msk [vmem:[#allocation4 + $0x18] sm:$0xff] %vm3338_vm12, %v3153_v41  ;;  %v3037_v41 = vld [vmem:[#allocation2 + $0x111] sm:$0xff] }
 0x18c   : > { %2572 = vst.msk [vmem:[#allocation4 + $0x20] sm:$0xff] %vm15119_vm10, %v2384_v63  ;;  %1635 = vrot.lane.b32.xlu1 %v11534_v46, %s11075_s10 }
 0x18d   : > { %3555 = vrot.lane.b32.xlu0 %v11695_v21, %s11080_s23 }
 0x18e   : > { %v2001_v24 = vpop.permute.xlu1 %2000  ;;  %v2386_v4 = vpop.permute.xlu0 %2385 }
 0x18f   : > { %2188 = vst.msk [vmem:[#allocation4 + $0x28] sm:$0xff] %vm2182_vm9, %v2001_v24  ;;  %v3790_v6 = vld [vmem:[#allocation4 + $0x10] sm:$0xff] }
 0x190   : > { %2573 = vst.msk [vmem:[#allocation4 + $0x28] sm:$0xff] %vm15119_vm10, %v2386_v4  ;;  %3172 = vrot.lane.b32.xlu1 %v3031_v2, %s11079_s14  ;;  %10654 = vmatprep.mubr.msk.f32.mxu0 %vm3856_vm14, %v3790_v6  ;;  %v2268_v6 = vld [vmem:[#allocation2 + $0x112] sm:$0xff] }
 0x191   : > { %2403 = vrot.lane.b32.xlu0 %v11695_v21, %s11077_s12 }
 0x192   : > { %v3538_v19 = vpop.permute.xlu1 %3537  ;;  %v1618_v46 = vpop.permute.xlu0 %1617 }
 0x193   : > { %3727 = vst.msk [vmem:[#allocation4 + $0x18] sm:$0xff] %vm15121_vm13, %v3538_v19 }
 0x194   : > { %1804 = vst.msk [vmem:[#allocation4 + $0x30] sm:$0xff] %vm1797_vm8, %v1618_v46  ;;  %2020 = vrot.lane.b32.xlu1 %v3031_v2, %s11076_s11 }
 0x195   : > { %2405 = vrot.lane.b32.xlu0 %v11710_v37, %s11077_s12 }
 0x196   : > { %v2770_v15 = vpop.permute.xlu1 %2769  ;;  %v3155_v29 = vpop.permute.xlu0 %3154 }
 0x197   : > { %2958 = vst.msk [vmem:[#allocation4 + $0x20] sm:$0xff] %vm2953_vm11, %v2770_v15  ;;  %v1499_v15 = vld [vmem:[#allocation2 + $0x120] sm:$0xff] }
 0x198   : > { %3343 = vst.msk [vmem:[#allocation4 + $0x20] sm:$0xff] %vm3338_vm12, %v3155_v29  ;;  %3557 = vrot.lane.b32.xlu1 %v11710_v37, %s11080_s23 }
 0x199   : > { %1637 = vrot.lane.b32.xlu0 %v1493_v34, %s11075_s10 }
 0x19a   : > { %v2772_v21 = vpop.permute.xlu1 %2771  ;;  %v3791_v1 = vld [vmem:[#allocation4 + $0x18] sm:$0xff]  ;;  %v2003_v58 = vpop.permute.xlu0 %2002 }
 0x19b   : > { %2959 = vst.msk [vmem:[#allocation4 + $0x28] sm:$0xff] %vm2953_vm11, %v2772_v21  ;;  %10655 = vmatmul.mubr.msk.f32.gmra.mrb[2].mxu0 %vm3856_vm14, %v3791_v1  ;;  %v3038_v1 = vld [vmem:[#allocation2 + $0x121] sm:$0xff] }
 0x19c   : > { %2189 = vst.msk [vmem:[#allocation4 + $0x30] sm:$0xff] %vm2182_vm9, %v2003_v58  ;;  %2789 = vrot.lane.b32.xlu1 %v1493_v34, %s11078_s13  ;;  %v2654_v58 = vld [vmem:[#allocation2 + $0x128] sm:$0xff] }
 0x19d   : > { %3174 = vrot.lane.b32.xlu0 %v3032_v25, %s11079_s14 }
 0x19e   : > { %v1620_v8 = vpop.permute.xlu1 %1619  ;;  %v3540_v37 = vpop.permute.xlu0 %3539 }
 0x19f   : > { %1805 = vst.msk [vmem:[#allocation4 + $0x38] sm:$0xff] %vm1797_vm8, %v1620_v8 }
 0x1a0   : > { %3728 = vst.msk [vmem:[#allocation4 + $0x20] sm:$0xff] %vm15121_vm13, %v3540_v37  ;;  %2791 = vrot.lane.b32.xlu1 %v2648_v52, %s11078_s13 }
 0x1a1   : > { %2022 = vrot.lane.b32.xlu0 %v3032_v25, %s11076_s11 }
 0x1a2   : > { %v3157_v7 = vpop.permute.xlu1 %3156  ;;  %v2388_v32 = vpop.permute.xlu0 %2387 }
 0x1a3   : > { %3344 = vst.msk [vmem:[#allocation4 + $0x28] sm:$0xff] %vm3338_vm12, %v3157_v7  ;;  %v3423_v7 = vld [vmem:[#allocation2 + $0x122] sm:$0xff] }
 0x1a4   : > { %2574 = vst.msk [vmem:[#allocation4 + $0x30] sm:$0xff] %vm15119_vm10, %v2388_v32  ;;  %1639 = vrot.lane.b32.xlu1 %v2648_v52, %s11075_s10  ;;  %v3039_v32 = vld [vmem:[#allocation2 + $0x129] sm:$0xff] }
 0x1a5   : > { %3559 = vrot.lane.b32.xlu0 %v3417_v16, %s11080_s23 }
 0x1a6   : > { %v2005_v12 = vpop.permute.xlu1 %2004  ;;  %v2390_v14 = vpop.permute.xlu0 %2389 }
 0x1a7   : > { %2190 = vst.msk [vmem:[#allocation4 + $0x38] sm:$0xff] %vm2182_vm9, %v2005_v12  ;;  %v3792_v18 = vld [vmem:[#allocation4 + $0x20] sm:$0xff] }
 0x1a8   : > { %2575 = vst.msk [vmem:[#allocation4 + $0x38] sm:$0xff] %vm15119_vm10, %v2390_v14  ;;  %3176 = vrot.lane.b32.xlu1 %v3033_v10, %s11079_s14  ;;  %10657 = vmatprep.mubr.msk.f32.mxu0 %vm3856_vm14, %v3792_v18 }
 0x1a9   : > { %2407 = vrot.lane.b32.xlu0 %v3417_v16, %s11077_s12 }
 0x1aa   : > { %v3542_v38 = vpop.permute.xlu1 %3541  ;;  %v1622_v5 = vpop.permute.xlu0 %1621 }
 0x1ab   : > { %3729 = vst.msk [vmem:[#allocation4 + $0x28] sm:$0xff] %vm15121_vm13, %v3542_v38  ;;  %v2270_v38 = vld [vmem:[#allocation2 + $0x12a] sm:$0xff] }
 0x1ac   : > { %1806 = vst.msk [vmem:[#allocation4 + $0x40] sm:$0xff] %vm1797_vm8, %v1622_v5  ;;  %2024 = vrot.lane.b32.xlu1 %v3033_v10, %s11076_s11 }
 0x1ad   : > { %2409 = vrot.lane.b32.xlu0 %v2264_v26, %s11077_s12 }
 0x1ae   : > { %v2774_v22 = vpop.permute.xlu1 %2773  ;;  %v3159_v23 = vpop.permute.xlu0 %3158 }
 0x1af   : > { %2960 = vst.msk [vmem:[#allocation4 + $0x30] sm:$0xff] %vm2953_vm11, %v2774_v22 }
 0x1b0   : > { %3345 = vst.msk [vmem:[#allocation4 + $0x30] sm:$0xff] %vm3338_vm12, %v3159_v23  ;;  %3561 = vrot.lane.b32.xlu1 %v2264_v26, %s11080_s23 }
 0x1b1   : > { %1641 = vrot.lane.b32.xlu0 %v1495_v28, %s11075_s10 }
 0x1b2   : > { %v2776_v11 = vpop.permute.xlu1 %2775  ;;  %v3793_v33 = vld [vmem:[#allocation4 + $0x28] sm:$0xff]  ;;  %v2007_v35 = vpop.permute.xlu0 %2006 }
 0x1b3   : > { %2961 = vst.msk [vmem:[#allocation4 + $0x38] sm:$0xff] %vm2953_vm11, %v2776_v11  ;;  %10658 = vmatmul.mubr.msk.f32.gmra.mrb[4].mxu0 %vm3856_vm14, %v3793_v33  ;;  %v2656_v33 = vld [vmem:[#allocation2 + $0x140] sm:$0xff] }
 0x1b4   : > { %2191 = vst.msk [vmem:[#allocation4 + $0x40] sm:$0xff] %vm2182_vm9, %v2007_v35  ;;  %2793 = vrot.lane.b32.xlu1 %v1495_v28, %s11078_s13  ;;  %v2655_v28 = vld [vmem:[#allocation2 + $0x138] sm:$0xff] }
 0x1b5   : > { %3178 = vrot.lane.b32.xlu0 %v3034_v36, %s11079_s14 }
 0x1b6   : > { %v1624_v44 = vpop.permute.xlu1 %1623  ;;  %v3544_v56 = vpop.permute.xlu0 %3543 }
 0x1b7   : > { %1807 = vst.msk [vmem:[#allocation4 + $0x48] sm:$0xff] %vm1797_vm8, %v1624_v44  ;;  %v3040_v44 = vld [vmem:[#allocation2 + $0x139] sm:$0xff] }
 0x1b8   : > { %3730 = vst.msk [vmem:[#allocation4 + $0x30] sm:$0xff] %vm15121_vm13, %v3544_v56  ;;  %2795 = vrot.lane.b32.xlu1 %v2650_v42, %s11078_s13 }
 0x1b9   : > { %2026 = vrot.lane.b32.xlu0 %v3034_v36, %s11076_s11 }
 0x1ba   : > { %v3161_v40 = vpop.permute.xlu1 %3160  ;;  %v2392_v31 = vpop.permute.xlu0 %2391 }
 0x1bb   : > { %3346 = vst.msk [vmem:[#allocation4 + $0x38] sm:$0xff] %vm3338_vm12, %v3161_v40  ;;  %v3041_v40 = vld [vmem:[#allocation2 + $0x141] sm:$0xff] }
 0x1bc   : > { %2576 = vst.msk [vmem:[#allocation4 + $0x40] sm:$0xff] %vm15119_vm10, %v2392_v31  ;;  %1643 = vrot.lane.b32.xlu1 %v2650_v42, %s11075_s10 }
 0x1bd   : > { %3563 = vrot.lane.b32.xlu0 %v3419_v45, %s11080_s23 }
 0x1be   : > { %v2009_v47 = vpop.permute.xlu1 %2008  ;;  %v2394_v48 = vpop.permute.xlu0 %2393 }
 0x1bf   : > { %2192 = vst.msk [vmem:[#allocation4 + $0x48] sm:$0xff] %vm2182_vm9, %v2009_v47  ;;  %v3794_v62 = vld [vmem:[#allocation4 + $0x30] sm:$0xff] }
 0x1c0   : > { %2577 = vst.msk [vmem:[#allocation4 + $0x48] sm:$0xff] %vm15119_vm10, %v2394_v48  ;;  %3180 = vrot.lane.b32.xlu1 %v3035_v9, %s11079_s14  ;;  %10660 = vmatprep.mubr.msk.f32.mxu0 %vm3856_vm14, %v3794_v62  ;;  %v12123_v48 = vld [vmem:[#allocation2 + $0x13a] sm:$0xff] }
 0x1c1   : > { %2411 = vrot.lane.b32.xlu0 %v3419_v45, %s11077_s12 }
 0x1c2   : > { %v3546_v17 = vpop.permute.xlu1 %3545  ;;  %v1626_v20 = vpop.permute.xlu0 %1625 }
 0x1c3   : > { %3731 = vst.msk [vmem:[#allocation4 + $0x38] sm:$0xff] %vm15121_vm13, %v3546_v17  ;;  %v3426_v17 = vld [vmem:[#allocation2 + $0x142] sm:$0xff] }
 0x1c4   : > { %1808 = vst.msk [vmem:[#allocation4 + $0x50] sm:$0xff] %vm1797_vm8, %v1626_v20  ;;  %2028 = vrot.lane.b32.xlu1 %v3035_v9, %s11076_s11 }
 0x1c5   : > { %2413 = vrot.lane.b32.xlu0 %v2266_v49, %s11077_s12 }
 0x1c6   : > { %v2778_v39 = vpop.permute.xlu1 %2777  ;;  %v3163_v51 = vpop.permute.xlu0 %3162 }
 0x1c7   : > { %2962 = vst.msk [vmem:[#allocation4 + $0x40] sm:$0xff] %vm2953_vm11, %v2778_v39 }
 0x1c8   : > { %3347 = vst.msk [vmem:[#allocation4 + $0x40] sm:$0xff] %vm3338_vm12, %v3163_v51  ;;  %3565 = vrot.lane.b32.xlu1 %v2266_v49, %s11080_s23 }
 0x1c9   : > { %1645 = vrot.lane.b32.xlu0 %v1497_v50, %s11075_s10 }
 0x1ca   : > { %v2780_v54 = vpop.permute.xlu1 %2779  ;;  %v3795_v30 = vld [vmem:[#allocation4 + $0x38] sm:$0xff]  ;;  %v2011_v13 = vpop.permute.xlu0 %2010 }
 0x1cb   : > { %2963 = vst.msk [vmem:[#allocation4 + $0x48] sm:$0xff] %vm2953_vm11, %v2780_v54  ;;  %10661 = vmatmul.mubr.msk.f32.gmra.mrb[6].mxu0 %vm3856_vm14, %v3795_v30  ;;  %v2658_v30 = vld [vmem:[#allocation2 + $0x158] sm:$0xff] }
 0x1cc   : > { %2193 = vst.msk [vmem:[#allocation4 + $0x50] sm:$0xff] %vm2182_vm9, %v2011_v13  ;;  %2797 = vrot.lane.b32.xlu1 %v1497_v50, %s11078_s13 }
 0x1cd   : > { %3182 = vrot.lane.b32.xlu0 %v3036_v55, %s11079_s14 }
 0x1ce   : > { %v1628_v57 = vpop.permute.xlu1 %1627  ;;  %v3548_v59 = vpop.permute.xlu0 %3547 }
 0x1cf   : > { %1809 = vst.msk [vmem:[#allocation4 + $0x58] sm:$0xff] %vm1797_vm8, %v1628_v57 }
 0x1d0   : > { %3732 = vst.msk [vmem:[#allocation4 + $0x40] sm:$0xff] %vm15121_vm13, %v3548_v59  ;;  %2799 = vrot.lane.b32.xlu1 %v2652_v60, %s11078_s13  ;;  %v3043_v59 = vld [vmem:[#allocation2 + $0x159] sm:$0xff] }
 0x1d1   : > { %2030 = vrot.lane.b32.xlu0 %v3036_v55, %s11076_s11 }
 0x1d2   : > { %v3165_v61 = vpop.permute.xlu1 %3164  ;;  %v2396_v27 = vpop.permute.xlu0 %2395 }
 0x1d3   : > { %3348 = vst.msk [vmem:[#allocation4 + $0x48] sm:$0xff] %vm3338_vm12, %v3165_v61 }
 0x1d4   : > { %2578 = vst.msk [vmem:[#allocation4 + $0x50] sm:$0xff] %vm15119_vm10, %v2396_v27  ;;  %1647 = vrot.lane.b32.xlu1 %v2652_v60, %s11075_s10  ;;  %v3042_v60 = vld [vmem:[#allocation2 + $0x151] sm:$0xff] }
 0x1d5   : > { %3567 = vrot.lane.b32.xlu0 %v3421_v3, %s11080_s23 }
 0x1d6   : > { %v2013_v63 = vpop.permute.xlu1 %2012  ;;  %v2398_v2 = vpop.permute.xlu0 %2397 }
 0x1d7   : > { %2194 = vst.msk [vmem:[#allocation4 + $0x58] sm:$0xff] %vm2182_vm9, %v2013_v63  ;;  %v3796_v24 = vld [vmem:[#allocation4 + $0x40] sm:$0xff]  ;;  %v3427_v63 = vld [vmem:[#allocation2 + $0x152] sm:$0xff] }
 0x1d8   : > { %2579 = vst.msk [vmem:[#allocation4 + $0x58] sm:$0xff] %vm15119_vm10, %v2398_v2  ;;  %3184 = vrot.lane.b32.xlu1 %v3037_v41, %s11079_s14  ;;  %10663 = vmatprep.mubr.msk.f32.mxu0 %vm3856_vm14, %v3796_v24  ;;  %v3428_v24 = vld [vmem:[#allocation2 + $0x15a] sm:$0xff] }
 0x1d9   : > { %2415 = vrot.lane.b32.xlu0 %v3421_v3, %s11077_s12 }
 0x1da   : > { %v3550_v4 = vpop.permute.xlu1 %3549  ;;  %v1630_v19 = vpop.permute.xlu0 %1629 }
 0x1db   : > { %3733 = vst.msk [vmem:[#allocation4 + $0x48] sm:$0xff] %vm15121_vm13, %v3550_v4 }
 0x1dc   : > { %1810 = vst.msk [vmem:[#allocation4 + $0x60] sm:$0xff] %vm1797_vm8, %v1630_v19  ;;  %2032 = vrot.lane.b32.xlu1 %v3037_v41, %s11076_s11 }
 0x1dd   : > { %2417 = vrot.lane.b32.xlu0 %v2268_v6, %s11077_s12 }
 0x1de   : > { %v2782_v46 = vpop.permute.xlu1 %2781  ;;  %v3167_v34 = vpop.permute.xlu0 %3166 }
 0x1df   : > { %2964 = vst.msk [vmem:[#allocation4 + $0x50] sm:$0xff] %vm2953_vm11, %v2782_v46 }
 0x1e0   : > { %3349 = vst.msk [vmem:[#allocation4 + $0x50] sm:$0xff] %vm3338_vm12, %v3167_v34  ;;  %3569 = vrot.lane.b32.xlu1 %v2268_v6, %s11080_s23 }
 0x1e1   : > { %1649 = vrot.lane.b32.xlu0 %v1499_v15, %s11075_s10 }
 0x1e2   : > { %v2784_v29 = vpop.permute.xlu1 %2783  ;;  %v3797_v21 = vld [vmem:[#allocation4 + $0x48] sm:$0xff]  ;;  %v2015_v25 = vpop.permute.xlu0 %2014 }
 0x1e3   : > { %2965 = vst.msk [vmem:[#allocation4 + $0x58] sm:$0xff] %vm2953_vm11, %v2784_v29  ;;  %10664 = vmatmul.mubr.msk.f32.gmra.mrb[8].mxu0 %vm3856_vm14, %v3797_v21  ;;  %v2659_v29 = vld [vmem:[#allocation2 + $0x168] sm:$0xff] }
 0x1e4   : > { %2195 = vst.msk [vmem:[#allocation4 + $0x60] sm:$0xff] %vm2182_vm9, %v2015_v25  ;;  %2801 = vrot.lane.b32.xlu1 %v1499_v15, %s11078_s13 }
 0x1e5   : > { %3186 = vrot.lane.b32.xlu0 %v3038_v1, %s11079_s14 }
 0x1e6   : > { %v1632_v52 = vpop.permute.xlu1 %1631  ;;  %v3552_v8 = vpop.permute.xlu0 %3551 }
 0x1e7   : > { %1811 = vst.msk [vmem:[#allocation4 + $0x68] sm:$0xff] %vm1797_vm8, %v1632_v52 }
 0x1e8   : > { %3734 = vst.msk [vmem:[#allocation4 + $0x50] sm:$0xff] %vm15121_vm13, %v3552_v8  ;;  %2803 = vrot.lane.b32.xlu1 %v2654_v58, %s11078_s13 }
 0x1e9   : > { %2034 = vrot.lane.b32.xlu0 %v3038_v1, %s11076_s11  ;;  %v2660_v1 = vld [vmem:[#allocation2 + $0x170] sm:$0xff] }
 0x1ea   : > { %v3169_v37 = vpop.permute.xlu1 %3168 }
 0x1eb   : > { %3350 = vst.msk [vmem:[#allocation4 + $0x58] sm:$0xff] %vm3338_vm12, %v3169_v37  ;;  %v2400_v16 = vpop.permute.xlu0 %2399  ;;  %v3044_v37 = vld [vmem:[#allocation2 + $0x169] sm:$0xff] }
 0x1ec   : > { %2580 = vst.msk [vmem:[#allocation4 + $0x60] sm:$0xff] %vm15119_vm10, %v2400_v16  ;;  %1651 = vrot.lane.b32.xlu1 %v2654_v58, %s11075_s10  ;;  %v3045_v16 = vld [vmem:[#allocation2 + $0x171] sm:$0xff] }
 0x1ed   : > { %3571 = vrot.lane.b32.xlu0 %v3423_v7, %s11080_s23 }
 0x1ee   : > { %v2017_v10 = vpop.permute.xlu1 %2016 }
 0x1ef   : > { %2196 = vst.msk [vmem:[#allocation4 + $0x68] sm:$0xff] %vm2182_vm9, %v2017_v10  ;;  %v2402_v12 = vpop.permute.xlu0 %2401  ;;  %v3798_v14 = vld [vmem:[#allocation4 + $0x50] sm:$0xff] }
 0x1f0   : > { %2581 = vst.msk [vmem:[#allocation4 + $0x68] sm:$0xff] %vm15119_vm10, %v2402_v12  ;;  %3188 = vrot.lane.b32.xlu1 %v3039_v32, %s11079_s14  ;;  %10666 = vmatprep.mubr.msk.f32.mxu0 %vm3856_vm14, %v3798_v14  ;;  %v3429_v14 = vld [vmem:[#allocation2 + $0x16a] sm:$0xff] }
 0x1f1   : > { %2419 = vrot.lane.b32.xlu0 %v3423_v7, %s11077_s12 }
 0x1f2   : > { %v3554_v18 = vpop.permute.xlu1 %3553 }
 0x1f3   : > { %3735 = vst.msk [vmem:[#allocation4 + $0x58] sm:$0xff] %vm15121_vm13, %v3554_v18  ;;  %v1634_v26 = vpop.permute.xlu0 %1633 }
 0x1f4   : > { %1812 = vst.msk [vmem:[#allocation4 + $0x70] sm:$0xff] %vm1797_vm8, %v1634_v26  ;;  %2036 = vrot.lane.b32.xlu1 %v3039_v32, %s11076_s11  ;;  %v3430_v26 = vld [vmem:[#allocation2 + $0x172] sm:$0xff] }
 0x1f5   : > { %2421 = vrot.lane.b32.xlu0 %v2270_v38, %s11077_s12 }
 0x1f6   : > { %v2786_v5 = vpop.permute.xlu1 %2785 }
 0x1f7   : > { %2966 = vst.msk [vmem:[#allocation4 + $0x60] sm:$0xff] %vm2953_vm11, %v2786_v5  ;;  %v3171_v22 = vpop.permute.xlu0 %3170 }
 0x1f8   : > { %3351 = vst.msk [vmem:[#allocation4 + $0x60] sm:$0xff] %vm3338_vm12, %v3171_v22  ;;  %3573 = vrot.lane.b32.xlu1 %v2270_v38, %s11080_s23 }
 0x1f9   : > { %1270 = vrot.lane.b32.xlu0 %v2270_v38, %s11074_s9 }
 0x1fa   : > { %v2788_v23 = vpop.permute.xlu1 %2787  ;;  %v3799_v11 = vld [vmem:[#allocation4 + $0x58] sm:$0xff] }
 0x1fb   : > { %2967 = vst.msk [vmem:[#allocation4 + $0x68] sm:$0xff] %vm2953_vm11, %v2788_v23  ;;  %v2019_v36 = vpop.permute.xlu0 %2018  ;;  %10667 = vmatmul.mubr.msk.f32.gmra.mrb[10].mxu0 %vm3856_vm14, %v3799_v11 }
 0x1fc   : > { %2197 = vst.msk [vmem:[#allocation4 + $0x70] sm:$0xff] %vm2182_vm9, %v2019_v36  ;;  %2805 = vrot.lane.b32.xlu1 %v2655_v28, %s11078_s13 }
 0x1fd   : > { %2807 = vrot.lane.b32.xlu0 %v2656_v33, %s11078_s13 }
 0x1fe   : > { %v1636_v35 = vpop.permute.xlu1 %1635 }
 0x1ff   : > { %1813 = vst.msk [vmem:[#allocation4 + $0x78] sm:$0xff] %vm1797_vm8, %v1636_v35  ;;  %v3556_v42 = vpop.permute.xlu0 %3555  ;;  %v2662_v35 = vld [vmem:[#allocation2 + $0x188] sm:$0xff] }
 0x200   : > { %3736 = vst.msk [vmem:[#allocation4 + $0x60] sm:$0xff] %vm15121_vm13, %v3556_v42  ;;  %1653 = vrot.lane.b32.xlu1 %v2655_v28, %s11075_s10 }
 0x201   : > { %1655 = vrot.lane.b32.xlu0 %v2656_v33, %s11075_s10  ;;  %v2661_v33 = vld [vmem:[#allocation2 + $0x180] sm:$0xff] }
 0x202   : > { %v3173_v56 = vpop.permute.xlu1 %3172 }
 0x203   : > { %3352 = vst.msk [vmem:[#allocation4 + $0x68] sm:$0xff] %vm3338_vm12, %v3173_v56  ;;  %v2404_v45 = vpop.permute.xlu0 %2403 }
 0x204   : > { %2582 = vst.msk [vmem:[#allocation4 + $0x70] sm:$0xff] %vm15119_vm10, %v2404_v45  ;;  %3190 = vrot.lane.b32.xlu1 %v3040_v44, %s11079_s14  ;;  %v3046_v45 = vld [vmem:[#allocation2 + $0x181] sm:$0xff] }
 0x205   : > { %3192 = vrot.lane.b32.xlu0 %v3041_v40, %s11079_s14 }
 0x206   : > { %v2021_v31 = vpop.permute.xlu1 %2020 }
 0x207   : > { %2198 = vst.msk [vmem:[#allocation4 + $0x78] sm:$0xff] %vm2182_vm9, %v2021_v31  ;;  %v2406_v9 = vpop.permute.xlu0 %2405  ;;  %v3800_v47 = vld [vmem:[#allocation4 + $0x60] sm:$0xff] }
 0x208   : > { %2583 = vst.msk [vmem:[#allocation4 + $0x78] sm:$0xff] %vm15119_vm10, %v2406_v9  ;;  %2038 = vrot.lane.b32.xlu1 %v3040_v44, %s11076_s11  ;;  %10669 = vmatprep.mubr.msk.f32.mxu0 %vm3856_vm14, %v3800_v47  ;;  %v3047_v47 = vld [vmem:[#allocation2 + $0x189] sm:$0xff] }
 0x209   : > { %2040 = vrot.lane.b32.xlu0 %v3041_v40, %s11076_s11 }
 0x20a   : > { %v3558_v62 = vpop.permute.xlu1 %3557 }
 0x20b   : > { %3737 = vst.msk [vmem:[#allocation4 + $0x68] sm:$0xff] %vm15121_vm13, %v3558_v62  ;;  %v1638_v49 = vpop.permute.xlu0 %1637 }
 0x20c   : > { %1814 = vst.msk [vmem:[#allocation4 + $0x80] sm:$0xff] %vm1797_vm8, %v1638_v49  ;;  %3575 = vrot.lane.b32.xlu1 %v12123_v48, %s11080_s23 }
 0x20d   : > { %3577 = vrot.lane.b32.xlu0 %v3426_v17, %s11080_s23 }
 0x20e   : > { %v2790_v20 = vpop.permute.xlu1 %2789 }
 0x20f   : > { %2968 = vst.msk [vmem:[#allocation4 + $0x70] sm:$0xff] %vm2953_vm11, %v2790_v20  ;;  %v3175_v39 = vpop.permute.xlu0 %3174 }
 0x210   : > { %3353 = vst.msk [vmem:[#allocation4 + $0x70] sm:$0xff] %vm3338_vm12, %v3175_v39  ;;  %2423 = vrot.lane.b32.xlu1 %v12123_v48, %s11077_s12  ;;  %v3431_v39 = vld [vmem:[#allocation2 + $0x182] sm:$0xff] }
 0x211   : > { %2425 = vrot.lane.b32.xlu0 %v3426_v17, %s11077_s12 }
 0x212   : > { %v2792_v50 = vpop.permute.xlu1 %2791  ;;  %v3801_v51 = vld [vmem:[#allocation4 + $0x68] sm:$0xff] }
 0x213   : > { %2969 = vst.msk [vmem:[#allocation4 + $0x78] sm:$0xff] %vm2953_vm11, %v2792_v50  ;;  %v2023_v53 = vpop.permute.xlu0 %2022  ;;  %10670 = vmatmul.mubr.msk.f32.gmra.mrb[12].mxu0 %vm3856_vm14, %v3801_v51  ;;  %v3432_v51 = vld [vmem:[#allocation2 + $0x18a] sm:$0xff] }
 0x214   : > { %2199 = vst.msk [vmem:[#allocation4 + $0x80] sm:$0xff] %vm2182_vm9, %v2023_v53  ;;  %1272 = vrot.lane.b32.xlu1 %v12123_v48, %s11074_s9 }
 0x215   : > { %1274 = vrot.lane.b32.xlu0 %v3426_v17, %s11074_s9 }
 0x216   : > { %v1640_v54 = vpop.permute.xlu1 %1639 }
 0x217   : > { %1815 = vst.msk [vmem:[#allocation4 + $0x88] sm:$0xff] %vm1797_vm8, %v1640_v54  ;;  %v3560_v55 = vpop.permute.xlu0 %3559 }
 0x218   : > { %3738 = vst.msk [vmem:[#allocation4 + $0x70] sm:$0xff] %vm15121_vm13, %v3560_v55  ;;  %2809 = vrot.lane.b32.xlu1 %v2657_v43, %s11078_s13 }
 0x219   : > { %2811 = vrot.lane.b32.xlu0 %v2658_v30, %s11078_s13 }
 0x21a   : > { %v3177_v0 = vpop.permute.xlu1 %3176 }
 0x21b   : > { %3354 = vst.msk [vmem:[#allocation4 + $0x78] sm:$0xff] %vm3338_vm12, %v3177_v0  ;;  %v2408_v13 = vpop.permute.xlu0 %2407  ;;  %v1125_v0 = vld [vmem:[#allocation2 + $0x1ba] sm:$0xff] }
 0x21c   : > { %2584 = vst.msk [vmem:[#allocation4 + $0x80] sm:$0xff] %vm15119_vm10, %v2408_v13  ;;  %1657 = vrot.lane.b32.xlu1 %v2657_v43, %s11075_s10 }
 0x21d   : > { %1659 = vrot.lane.b32.xlu0 %v2658_v30, %s11075_s10  ;;  %v1124_v30 = vld [vmem:[#allocation2 + $0x1b2] sm:$0xff] }
 0x21e   : > { %v2025_v57 = vpop.permute.xlu1 %2024 }
 0x21f   : > { %2200 = vst.msk [vmem:[#allocation4 + $0x88] sm:$0xff] %vm2182_vm9, %v2025_v57  ;;  %v2410_v61 = vpop.permute.xlu0 %2409  ;;  %v3802_v3 = vld [vmem:[#allocation4 + $0x70] sm:$0xff]  ;;  %v2663_v57 = vld [vmem:[#allocation2 + $0x198] sm:$0xff] }
 0x220   : > { %2585 = vst.msk [vmem:[#allocation4 + $0x88] sm:$0xff] %vm15119_vm10, %v2410_v61  ;;  %3194 = vrot.lane.b32.xlu1 %v3042_v60, %s11079_s14  ;;  %10672 = vmatprep.mubr.msk.f32.mxu0 %vm3856_vm14, %v3802_v3  ;;  %v2664_v61 = vld [vmem:[#allocation2 + $0x1a0] sm:$0xff] }
 0x221   : > { %3196 = vrot.lane.b32.xlu0 %v3043_v59, %s11079_s14 }
 0x222   : > { %v3562_v27 = vpop.permute.xlu1 %3561 }
 0x223   : > { %3739 = vst.msk [vmem:[#allocation4 + $0x78] sm:$0xff] %vm15121_vm13, %v3562_v27  ;;  %v1642_v41 = vpop.permute.xlu0 %1641 }
 0x224   : > { %1816 = vst.msk [vmem:[#allocation4 + $0x90] sm:$0xff] %vm1797_vm8, %v1642_v41  ;;  %2042 = vrot.lane.b32.xlu1 %v3042_v60, %s11076_s11  ;;  %v11082_v41 = vmov 1983009808  }
 0x225   : > { %2044 = vrot.lane.b32.xlu0 %v3043_v59, %s11076_s11 }
 0x226   : > { %v2794_v2 = vpop.permute.xlu1 %2793 }
 0x227   : > { %2970 = vst.msk [vmem:[#allocation4 + $0x80] sm:$0xff] %vm2953_vm11, %v2794_v2  ;;  %v3179_v4 = vpop.permute.xlu0 %3178  ;;  %v4702_v2 = vlaneseq }
 0x228   : > { %3355 = vst.msk [vmem:[#allocation4 + $0x80] sm:$0xff] %vm3338_vm12, %v3179_v4  ;;  %3579 = vrot.lane.b32.xlu1 %v3427_v63, %s11080_s23 }
 0x229   : > { %3581 = vrot.lane.b32.xlu0 %v3428_v24, %s11080_s23 }
 0x22a   : > { %v2796_v6 = vpop.permute.xlu1 %2795  ;;  %v3803_v19 = vld [vmem:[#allocation4 + $0x78] sm:$0xff] }
 0x22b   : > { %2971 = vst.msk [vmem:[#allocation4 + $0x88] sm:$0xff] %vm2953_vm11, %v2796_v6  ;;  %v2027_v46 = vpop.permute.xlu0 %2026  ;;  %10673 = vmatmul.mubr.msk.f32.gmra.mrb[14].mxu0 %vm3856_vm14, %v3803_v19  ;;  %v1509_v6 = vld [vmem:[#allocation2 + $0x1c8] sm:$0xff] }
 0x22c   : > { %2201 = vst.msk [vmem:[#allocation4 + $0x90] sm:$0xff] %vm2182_vm9, %v2027_v46  ;;  %2427 = vrot.lane.b32.xlu1 %v3427_v63, %s11077_s12 }
 0x22d   : > { %2429 = vrot.lane.b32.xlu0 %v3428_v24, %s11077_s12 }
 0x22e   : > { %v1644_v15 = vpop.permute.xlu1 %1643 }
 0x22f   : > { %1817 = vst.msk [vmem:[#allocation4 + $0x98] sm:$0xff] %vm1797_vm8, %v1644_v15  ;;  %v3564_v34 = vpop.permute.xlu0 %3563  ;;  %v1510_v15 = vld [vmem:[#allocation2 + $0x1d0] sm:$0xff] }
 0x230   : > { %3740 = vst.msk [vmem:[#allocation4 + $0x80] sm:$0xff] %vm15121_vm13, %v3564_v34  ;;  %1276 = vrot.lane.b32.xlu1 %v3427_v63, %s11074_s9  ;;  %v4700_v63 = vunpack.c.l.s4 %v11082_v41 }
 0x231   : > { %1278 = vrot.lane.b32.xlu0 %v3428_v24, %s11074_s9  ;;  %v12324_v24 = vld [vmem:[%s15113_s6] ss:$0 sm:$0xff] }
 0x232   : > { %v3181_v21 = vpop.permute.xlu1 %3180 }
 0x233   : > { %3356 = vst.msk [vmem:[#allocation4 + $0x88] sm:$0xff] %vm3338_vm12, %v3181_v21  ;;  %v2412_v25 = vpop.permute.xlu0 %2411  ;;  %v4701_v21 = vunpack.c.0.s8 %v4700_v63 }
 0x234   : > { %2586 = vst.msk [vmem:[#allocation4 + $0x90] sm:$0xff] %vm15119_vm10, %v2412_v25  ;;  %2813 = vrot.lane.b32.xlu1 %v2659_v29, %s11078_s13 }
 0x235   : > { %2815 = vrot.lane.b32.xlu0 %v2660_v1, %s11078_s13 }
 0x236   : > { %v2029_v58 = vpop.permute.xlu1 %2028 }
 0x237   : > { %2202 = vst.msk [vmem:[#allocation4 + $0x98] sm:$0xff] %vm2182_vm9, %v2029_v58  ;;  %v2414_v52 = vpop.permute.xlu0 %2413  ;;  %v3804_v8 = vld [vmem:[#allocation4 + $0x80] sm:$0xff] }
 0x238   : > { %2587 = vst.msk [vmem:[#allocation4 + $0x98] sm:$0xff] %vm15119_vm10, %v2414_v52  ;;  %1661 = vrot.lane.b32.xlu1 %v2659_v29, %s11075_s10  ;;  %10675 = vmatprep.mubr.msk.f32.mxu0 %vm3856_vm14, %v3804_v8 }
 0x239   : > { %1663 = vrot.lane.b32.xlu0 %v2660_v1, %s11075_s10  ;;  %v4703_v1 = vshrl.u32 %v4702_v2, 7 }
 0x23a   : > { %v3566_v7 = vpop.permute.xlu1 %3565 }
 0x23b   : > { %3741 = vst.msk [vmem:[#allocation4 + $0x88] sm:$0xff] %vm15121_vm13, %v3566_v7  ;;  %v1646_v32 = vpop.permute.xlu0 %1645  ;;  %v3048_v7 = vld [vmem:[#allocation2 + $0x199] sm:$0xff] }
 0x23c   : > { %1818 = vst.msk [vmem:[#allocation4 + $0xa0] sm:$0xff] %vm1797_vm8, %v1646_v32  ;;  %3198 = vrot.lane.b32.xlu1 %v3044_v37, %s11079_s14 }
 0x23d   : > { %3200 = vrot.lane.b32.xlu0 %v3045_v16, %s11079_s14 }
 0x23e   : > { %v2798_v10 = vpop.permute.xlu1 %2797 }
 0x23f   : > { %2972 = vst.msk [vmem:[#allocation4 + $0x90] sm:$0xff] %vm2953_vm11, %v2798_v10  ;;  %v3183_v12 = vpop.permute.xlu0 %3182 }
 0x240   : > { %3357 = vst.msk [vmem:[#allocation4 + $0x90] sm:$0xff] %vm3338_vm12, %v3183_v12  ;;  %2046 = vrot.lane.b32.xlu1 %v3044_v37, %s11076_s11  ;;  %v3049_v12 = vld [vmem:[#allocation2 + $0x1a1] sm:$0xff] }
 0x241   : > { %2048 = vrot.lane.b32.xlu0 %v3045_v16, %s11076_s11 }
 0x242   : > { %v2800_v18 = vpop.permute.xlu1 %2799  ;;  %v3805_v38 = vld [vmem:[#allocation4 + $0x88] sm:$0xff] }
 0x243   : > { %2973 = vst.msk [vmem:[#allocation4 + $0x98] sm:$0xff] %vm2953_vm11, %v2800_v18  ;;  %v2031_v5 = vpop.permute.xlu0 %2030  ;;  %10676 = vmatmul.mubr.msk.f32.gmra.mrb[16].mxu0 %vm3856_vm14, %v3805_v38  ;;  %v12337_v38 = vsub.s32 %v4701_v21, %v4703_v1 }
 0x244   : > { %2203 = vst.msk [vmem:[#allocation4 + $0xa0] sm:$0xff] %vm2182_vm9, %v2031_v5  ;;  %3583 = vrot.lane.b32.xlu1 %v3429_v14, %s11080_s23 }
 0x245   : > { %3585 = vrot.lane.b32.xlu0 %v3430_v26, %s11080_s23 }
 0x246   : > { %v1648_v22 = vpop.permute.xlu1 %1647 }
 0x247   : > { %1819 = vst.msk [vmem:[#allocation4 + $0xa8] sm:$0xff] %vm1797_vm8, %v1648_v22  ;;  %v3568_v28 = vpop.permute.xlu0 %3567 }
 0x248   : > { %3742 = vst.msk [vmem:[#allocation4 + $0x90] sm:$0xff] %vm15121_vm13, %v3568_v28  ;;  %2431 = vrot.lane.b32.xlu1 %v3429_v14, %s11077_s12 }
 0x249   : > { %2433 = vrot.lane.b32.xlu0 %v3430_v26, %s11077_s12 }
 0x24a   : > { %v3185_v23 = vpop.permute.xlu1 %3184 }
 0x24b   : > { %3358 = vst.msk [vmem:[#allocation4 + $0x98] sm:$0xff] %vm3338_vm12, %v3185_v23  ;;  %v2416_v11 = vpop.permute.xlu0 %2415  ;;  %v1894_v23 = vld [vmem:[#allocation2 + $0x1c9] sm:$0xff] }
 0x24c   : > { %2588 = vst.msk [vmem:[#allocation4 + $0xa0] sm:$0xff] %vm15119_vm10, %v2416_v11  ;;  %1280 = vrot.lane.b32.xlu1 %v3429_v14, %s11074_s9 }
 0x24d   : > { %1282 = vrot.lane.b32.xlu0 %v3430_v26, %s11074_s9 }
 0x24e   : > { %v2033_v36 = vpop.permute.xlu1 %2032 }
 0x24f   : > { %2204 = vst.msk [vmem:[#allocation4 + $0xa8] sm:$0xff] %vm2182_vm9, %v2033_v36  ;;  %v2418_v42 = vpop.permute.xlu0 %2417  ;;  %v3806_v44 = vld [vmem:[#allocation4 + $0x90] sm:$0xff] }
 0x250   : > { %2589 = vst.msk [vmem:[#allocation4 + $0xa8] sm:$0xff] %vm15119_vm10, %v2418_v42  ;;  %2817 = vrot.lane.b32.xlu1 %v2661_v33, %s11078_s13  ;;  %10678 = vmatprep.mubr.msk.f32.mxu0 %vm3856_vm14, %v3806_v44  ;;  %v1895_v36 = vld [vmem:[#allocation2 + $0x1d1] sm:$0xff] }
 0x251   : > { %2819 = vrot.lane.b32.xlu0 %v2662_v35, %s11078_s13 }
 0x252   : > { %v3570_v56 = vpop.permute.xlu1 %3569 }
 0x253   : > { %3743 = vst.msk [vmem:[#allocation4 + $0x98] sm:$0xff] %vm15121_vm13, %v3570_v56  ;;  %v1650_v40 = vpop.permute.xlu0 %1649 }
 0x254   : > { %1820 = vst.msk [vmem:[#allocation4 + $0xb0] sm:$0xff] %vm1797_vm8, %v1650_v40  ;;  %1665 = vrot.lane.b32.xlu1 %v2661_v33, %s11075_s10 }
 0x255   : > { %1667 = vrot.lane.b32.xlu0 %v2662_v35, %s11075_s10 }
 0x256   : > { %v10653_v31 = vpop.f32.mrb[0].mxu0  ;;  %v2802_v9 = vpop.permute.xlu1 %2801 }
 0x257   : > { %2974 = vst.msk [vmem:[#allocation4 + $0xa0] sm:$0xff] %vm2953_vm11, %v2802_v9  ;;  %v3187_v48 = vpop.permute.xlu0 %3186  ;;  %v4119_v62 = vpop.f32.mrb[1].mxu0  ;;  %v4439_v3 = vmul.f32 0.003921569, %v10653_v31 }
 0x258   : > { %3359 = vst.msk [vmem:[#allocation4 + $0xa0] sm:$0xff] %vm3338_vm12, %v3187_v48  ;;  %3202 = vrot.lane.b32.xlu1 %v3046_v45, %s11079_s14  ;;  %v4438_v4 = vmul.f32 0.003921569, %v4119_v62 }
 0x259   : > { %3204 = vrot.lane.b32.xlu0 %v3047_v47, %s11079_s14  ;;  %v4507_v34 = vadd.f32 %v12324_v24, %v4439_v3  ;;  %v2279_v3 = vld [vmem:[#allocation2 + $0x1ca] sm:$0xff] }
 0x25a   : > { %v2804_v17 = vpop.permute.xlu1 %2803  ;;  %v3807_v49 = vld [vmem:[#allocation4 + $0x98] sm:$0xff]  ;;  %v4506_v52 = vadd.f32 %v12324_v24, %v4438_v4 }
 0x25b   : > { %2975 = vst.msk [vmem:[#allocation4 + $0xa8] sm:$0xff] %vm2953_vm11, %v2804_v17  ;;  %v2035_v20 = vpop.permute.xlu0 %2034  ;;  %10679 = vmatmul.mubr.msk.f32.gmra.mrb[18].mxu0 %vm3856_vm14, %v3807_v49  ;;  %v4571_v14 = vmax.f32 %v4507_v34, 0.0  ;;  %v2280_v4 = vld [vmem:[#allocation2 + $0x1d2] sm:$0xff] }
 0x25c   : > { %2205 = vst.msk [vmem:[#allocation4 + $0xb0] sm:$0xff] %vm2182_vm9, %v2035_v20  ;;  %2050 = vrot.lane.b32.xlu1 %v3046_v45, %s11076_s11  ;;  %v4570_v5 = vmax.f32 %v4506_v52, 0.0 }
 0x25d   : > { %2052 = vrot.lane.b32.xlu0 %v3047_v47, %s11076_s11  ;;  %v3433_v47 = vld [vmem:[#allocation2 + $0x19a] sm:$0xff] }
 0x25e   : > { %v1652_v50 = vpop.permute.xlu1 %1651 }
 0x25f   : > { %1821 = vst.msk [vmem:[#allocation4 + $0xb8] sm:$0xff] %vm1797_vm8, %v1652_v50  ;;  %v3572_v53 = vpop.permute.xlu0 %3571 }
 0x260   : > { %3744 = vst.msk [vmem:[#allocation4 + $0xa0] sm:$0xff] %vm15121_vm13, %v3572_v53  ;;  %3587 = vrot.lane.b32.xlu1 %v3431_v39, %s11080_s23 }
 0x261   : > { %3589 = vrot.lane.b32.xlu0 %v3432_v51, %s11080_s23 }
 0x262   : > { %v3189_v43 = vpop.permute.xlu1 %3188 }
 0x263   : > { %3360 = vst.msk [vmem:[#allocation4 + $0xa8] sm:$0xff] %vm3338_vm12, %v3189_v43  ;;  %v2420_v54 = vpop.permute.xlu0 %2419 }
 0x264   : > { %2590 = vst.msk [vmem:[#allocation4 + $0xb0] sm:$0xff] %vm15119_vm10, %v2420_v54  ;;  %2435 = vrot.lane.b32.xlu1 %v3431_v39, %s11077_s12  ;;  %v3434_v39 = vld [vmem:[#allocation2 + $0x1a2] sm:$0xff] }
 0x265   : > { %2437 = vrot.lane.b32.xlu0 %v3432_v51, %s11077_s12 }
 0x266   : > { %v2037_v55 = vpop.permute.xlu1 %2036 }
 0x267   : > { %2206 = vst.msk [vmem:[#allocation4 + $0xb8] sm:$0xff] %vm2182_vm9, %v2037_v55  ;;  %v2422_v13 = vpop.permute.xlu0 %2421  ;;  %v3808_v60 = vld [vmem:[#allocation4 + $0xa0] sm:$0xff] }
 0x268   : > { %2591 = vst.msk [vmem:[#allocation4 + $0xb8] sm:$0xff] %vm15119_vm10, %v2422_v13  ;;  %1284 = vrot.lane.b32.xlu1 %v1124_v30, %s11074_s9  ;;  %10681 = vmatprep.mubr.msk.f32.mxu0 %vm3856_vm14, %v3808_v60 }
 0x269   : > { %1286 = vrot.lane.b32.xlu0 %v1125_v0, %s11074_s9 }
 0x26a   : > { %v3574_v59 = vpop.permute.xlu1 %3573 }
 0x26b   : > { %3745 = vst.msk [vmem:[#allocation4 + $0xa8] sm:$0xff] %vm15121_vm13, %v3574_v59  ;;  %v1271_v27 = vpop.permute.xlu0 %1270 }
 0x26c   : > { %1438 = vst.msk [vmem:[#allocation4 + $0xc8] sm:$0xff] %vm1412_vm7, %v1271_v27  ;;  %2821 = vrot.lane.b32.xlu1 %v2663_v57, %s11078_s13 }
 0x26d   : > { %2823 = vrot.lane.b32.xlu0 %v2664_v61, %s11078_s13 }
 0x26e   : > { %v2806_v19 = vpop.permute.xlu1 %2805  ;;  %v10656_v46 = vpop.f32.mrb[2].mxu0 }
 0x26f   : > { %2976 = vst.msk [vmem:[#allocation4 + $0xb0] sm:$0xff] %vm2953_vm11, %v2806_v19  ;;  %v4441_v29 = vmul.f32 0.003921569, %v10656_v46  ;;  %v2808_v25 = vpop.permute.xlu0 %2807  ;;  %v4129_v58 = vpop.f32.mrb[3].mxu0 }
 0x270   : > { %2977 = vst.msk [vmem:[#allocation4 + $0xb8] sm:$0xff] %vm2953_vm11, %v2808_v25  ;;  %v4440_v8 = vmul.f32 0.003921569, %v4129_v58  ;;  %1669 = vrot.lane.b32.xlu1 %v1509_v6, %s11075_s10 }
 0x271   : > { %v4509_v37 = vadd.f32 %v12324_v24, %v4441_v29  ;;  %1671 = vrot.lane.b32.xlu0 %v1510_v15, %s11075_s10 }
 0x272   : > { %v4508_v16 = vadd.f32 %v12324_v24, %v4440_v8  ;;  %v1654_v32 = vpop.permute.xlu1 %1653  ;;  %v3809_v10 = vld [vmem:[#allocation4 + $0xa8] sm:$0xff] }
 0x273   : > { %v4573_v18 = vmax.f32 %v4509_v37, 0.0  ;;  %1822 = vst.msk [vmem:[#allocation4 + $0xc0] sm:$0xff] %vm1797_vm8, %v1654_v32  ;;  %v1656_v26 = vpop.permute.xlu0 %1655  ;;  %10682 = vmatmul.mubr.msk.f32.gmra.mrb[20].mxu0 %vm3856_vm14, %v3809_v10 }
 0x274   : > { %v4572_v22 = vmax.f32 %v4508_v16, 0.0  ;;  %1823 = vst.msk [vmem:[#allocation4 + $0xc8] sm:$0xff] %vm1797_vm8, %v1656_v26  ;;  %3206 = vrot.lane.b32.xlu1 %v3048_v7, %s11079_s14 }
 0x275   : > { %v4635_v28 = vmax.f32 %v4571_v14, %v4573_v18  ;;  %3208 = vrot.lane.b32.xlu0 %v3049_v12, %s11079_s14 }
 0x276   : > { %v4634_v11 = vmax.f32 %v4570_v5, %v4572_v22  ;;  %v3191_v33 = vpop.permute.xlu1 %3190 }
 0x277   : > { %v4715_v35 = vcombine.high %v4635_v28, %v4635_v28  ;;  %v4722_v42 = vrot.slane %v4635_v28, %v12337_v38  ;;  %3361 = vst.msk [vmem:[#allocation4 + $0xb0] sm:$0xff] %vm3338_vm12, %v3191_v33  ;;  %v3193_v44 = vpop.permute.xlu0 %3192 }
 0x278   : > { %v4698_v56 = vcombine.high %v4634_v11, %v4634_v11  ;;  %v4705_v40 = vrot.slane %v4634_v11, %v12337_v38  ;;  %3362 = vst.msk [vmem:[#allocation4 + $0xb8] sm:$0xff] %vm3338_vm12, %v3193_v44  ;;  %2054 = vrot.lane.b32.xlu1 %v1894_v23, %s11076_s11  ;;  %v2665_v11 = vld [vmem:[#allocation2 + $0x1e0] sm:$0xff]  ;;  %v2666_v44 = vld [vmem:[#allocation2 + $0x1e8] sm:$0xff] }
 0x279   : > { %v4729_v45 = vrot.slane %v4715_v35, %v12337_v38  ;;  %v4730_v31 = vcombine.high %v4722_v42, %v4722_v42  ;;  %v5398_v9 = vsel %vm15117_vm15, %v4722_v42, -inf  ;;  %2056 = vrot.lane.b32.xlu0 %v1895_v36, %s11076_s11 }
 0x27a   : > { %v5399_v48 = vrot.slane %v5398_v9, 4  ;;  %v4712_v62 = vrot.slane %v4698_v56, %v12337_v38  ;;  %v4713_v17 = vcombine.high %v4705_v40, %v4705_v40  ;;  %v5370_v49 = vsel %vm15117_vm15, %v4705_v40, -inf  ;;  %v2039_v20 = vpop.permute.xlu1 %2038 }
 0x27b   : > { %v4731_v50 = vcombine.high %v4729_v45, %v4729_v45  ;;  %v5405_v51 = vsel %vm15117_vm15, %v4730_v31, -inf  ;;  %v5412_v53 = vsel %vm15117_vm15, %v4729_v45, -inf  ;;  %v5371_v43 = vrot.slane %v5370_v49, 4  ;;  %2207 = vst.msk [vmem:[#allocation4 + $0xc0] sm:$0xff] %vm2182_vm9, %v2039_v20  ;;  %v2041_v54 = vpop.permute.xlu0 %2040 }
 0x27c   : > { %v5400_v30 = vmax.f32 %v5398_v9, %v5399_v48  ;;  %v5406_v55 = vrot.slane %v5405_v51, 4  ;;  %v5413_v0 = vrot.slane %v5412_v53, 4  ;;  %v4714_v13 = vcombine.high %v4712_v62, %v4712_v62  ;;  %2208 = vst.msk [vmem:[#allocation4 + $0xc8] sm:$0xff] %vm2182_vm9, %v2041_v54  ;;  %3591 = vrot.lane.b32.xlu1 %v3433_v47, %s11080_s23 }
 0x27d   : > { %v5419_v60 = vsel %vm15117_vm15, %v4731_v50, -inf  ;;  %v5372_v57 = vmax.f32 %v5370_v49, %v5371_v43  ;;  %v5377_v59 = vsel %vm15117_vm15, %v4713_v17, -inf  ;;  %v5384_v61 = vsel %vm15117_vm15, %v4712_v62, -inf  ;;  %3593 = vrot.lane.b32.xlu0 %v3434_v39, %s11080_s23 }
 0x27e   : > { %v5407_v27 = vmax.f32 %v5405_v51, %v5406_v55  ;;  %v5414_v41 = vmax.f32 %v5412_v53, %v5413_v0  ;;  %v5420_v63 = vrot.slane %v5419_v60, 4  ;;  %v3576_v2 = vpop.permute.xlu1 %3575  ;;  %v5378_v19 = vrot.slane %v5377_v59, 4 }
 0x27f   : > { %v5373_v6 = vrot.slane %v5372_v57, 2  ;;  %v5385_v46 = vrot.slane %v5384_v61, 4  ;;  %v5391_v15 = vsel %vm15117_vm15, %v4714_v13, -inf  ;;  %3746 = vst.msk [vmem:[#allocation4 + $0xb0] sm:$0xff] %vm15121_vm13, %v3576_v2  ;;  %v3578_v34 = vpop.permute.xlu0 %3577  ;;  %v5401_v29 = vrot.slane %v5400_v30, 2 }
 0x280   : > { %v5408_v21 = vrot.slane %v5407_v27, 2  ;;  %v5421_v1 = vmax.f32 %v5419_v60, %v5420_v63  ;;  %3747 = vst.msk [vmem:[#allocation4 + $0xb8] sm:$0xff] %vm15121_vm13, %v3578_v34  ;;  %2439 = vrot.lane.b32.xlu1 %v2279_v3, %s11077_s12  ;;  %v5379_v58 = vmax.f32 %v5377_v59, %v5378_v19  ;;  %v5392_v8 = vrot.slane %v5391_v15, 4  ;;  %v3050_v59 = vld [vmem:[#allocation2 + $0x1e1] sm:$0xff] }
 0x281   : > { %v5374_v25 = vmax.f32 %v5372_v57, %v5373_v6  ;;  %v5386_v52 = vmax.f32 %v5384_v61, %v5385_v46  ;;  %2441 = vrot.lane.b32.xlu0 %v2280_v4, %s11077_s12  ;;  %v5415_v37 = vrot.slane %v5414_v41, 2  ;;  %v5402_v18 = vmax.f32 %v5400_v30, %v5401_v29  ;;  %v3435_v34 = vld [vmem:[#allocation2 + $0x1e2] sm:$0xff] }
 0x282   : > { %v2424_v7 = vpop.permute.xlu1 %2423  ;;  %v5422_v16 = vrot.slane %v5421_v1, 2  ;;  %v5380_v32 = vrot.slane %v5379_v58, 2  ;;  %v5393_v12 = vmax.f32 %v5391_v15, %v5392_v8  ;;  %v5409_v26 = vmax.f32 %v5407_v27, %v5408_v21  ;;  %v3436_v21 = vld [vmem:[#allocation2 + $0x1ea] sm:$0xff] }
 0x283   : > { %v5387_v10 = vrot.slane %v5386_v52, 2  ;;  %2592 = vst.msk [vmem:[#allocation4 + $0xc0] sm:$0xff] %vm15119_vm10, %v2424_v7  ;;  %v2426_v14 = vpop.permute.xlu0 %2425  ;;  %v5375_v5 = vrot.slane %v5374_v25, 1  ;;  %v5416_v33 = vmax.f32 %v5414_v41, %v5415_v37  ;;  %v5403_v62 = vrot.slane %v5402_v18, 1  ;;  %v3051_v41 = vld [vmem:[#allocation2 + $0x1e9] sm:$0xff] }
 0x284   : > { %2593 = vst.msk [vmem:[#allocation4 + $0xc8] sm:$0xff] %vm15119_vm10, %v2426_v14  ;;  %1288 = vrot.lane.b32.xlu1 %v2279_v3, %s11074_s9  ;;  %v5381_v22 = vmax.f32 %v5379_v58, %v5380_v32  ;;  %v5394_v23 = vrot.slane %v5393_v12, 2  ;;  %v5423_v56 = vmax.f32 %v5421_v1, %v5422_v16  ;;  %v5410_v17 = vrot.slane %v5409_v26, 1 }
 0x285   : > { %v5388_v28 = vmax.f32 %v5386_v52, %v5387_v10  ;;  %1290 = vrot.lane.b32.xlu0 %v2280_v4, %s11074_s9  ;;  %v5376_v49 = vmax.f32 %v5374_v25, %v5375_v5  ;;  %v5417_v51 = vrot.slane %v5416_v33, 1  ;;  %v5404_v0 = vmax.f32 %v5402_v18, %v5403_v62 }
 0x286   : > { %v1273_v36 = vpop.permute.xlu1 %1272  ;;  %v12372_v35 = vpop.f32.mrb[4].mxu0  ;;  %v3810_v42 = vld [vmem:[#allocation4 + $0xb0] sm:$0xff]  ;;  %v5382_v40 = vrot.slane %v5381_v22, 1  ;;  %v5395_v31 = vmax.f32 %v5393_v12, %v5394_v23  ;;  %v5424_v43 = vrot.slane %v5423_v56, 1  ;;  %v5411_v60 = vmax.f32 %v5409_v26, %v5410_v17 }
 0x287   : > { %v5389_v45 = vrot.slane %v5388_v28, 1  ;;  %1439 = vst.msk [vmem:[#allocation4 + $0xd0] sm:$0xff] %vm1412_vm7, %v1273_v36  ;;  %v1275_v9 = vpop.permute.xlu0 %1274  ;;  %v12375_v47 = vpop.f32.mrb[5].mxu0  ;;  %10684 = vmatprep.mubr.msk.f32.mxu0 %vm3856_vm14, %v3810_v42  ;;  %v3811_v48 = vld [vmem:[#allocation4 + $0xb8] sm:$0xff]  ;;  %v5418_v61 = vmax.f32 %v5416_v33, %v5417_v51  ;;  %v4443_v8 = vmul.f32 0.003921569, %v12372_v35 }
 0x288   : > { %1440 = vst.msk [vmem:[#allocation4 + $0xd8] sm:$0xff] %vm1412_vm7, %v1275_v9  ;;  %2825 = vrot.lane.b32.xlu1 %v2665_v11, %s11078_s13  ;;  %10685 = vmatmul.mubr.msk.f32.gmra.mrb[22].mxu0 %vm3856_vm14, %v3811_v48  ;;  %v5383_v20 = vmax.f32 %v5381_v22, %v5382_v40  ;;  %v5396_v50 = vrot.slane %v5395_v31, 1  ;;  %v5425_v63 = vmax.f32 %v5423_v56, %v5424_v43  ;;  %v4442_v7 = vmul.f32 0.003921569, %v12375_v47  ;;  %v2668_v36 = vld [vmem:[#allocation2 + $0x200] sm:$0xff] }
 0x289   : > { %v5390_v39 = vmax.f32 %v5388_v28, %v5389_v45  ;;  %2827 = vrot.lane.b32.xlu0 %v2666_v44, %s11078_s13  ;;  %v4511_v10 = vadd.f32 %v12324_v24, %v4443_v8  ;;  %v2667_v28 = vld [vmem:[#allocation2 + $0x1f8] sm:$0xff] }
 0x28a   : > { %v2810_v53 = vpop.permute.xlu1 %2809  ;;  %v5397_v54 = vmax.f32 %v5395_v31, %v5396_v50  ;;  %v6395_v30 = vsel %vm15116_vm3, %v5383_v20, %v5376_v49  ;;  %vm15120_vm3 = vcmask 1047559   ;;  %v4510_v26 = vadd.f32 %v12324_v24, %v4442_v7 }
 0x28b   : > { %2978 = vst.msk [vmem:[#allocation4 + $0xc0] sm:$0xff] %vm2953_vm11, %v2810_v53  ;;  %v2812_v55 = vpop.permute.xlu0 %2811  ;;  %v6397_v13 = vsel %vm6396_vm4, %v5390_v39, %v6395_v30  ;;  %v4575_v35 = vmax.f32 %v4511_v10, 0.0  ;;  %v3052_v53 = vld [vmem:[#allocation2 + $0x1f9] sm:$0xff] }
 0x28c   : > { %2979 = vst.msk [vmem:[#allocation4 + $0xc8] sm:$0xff] %vm2953_vm11, %v2812_v55  ;;  %1673 = vrot.lane.b32.xlu1 %v2665_v11, %s11075_s10  ;;  %v6399_v57 = vsel %vm6398_vm5, %v5397_v54, %v6397_v13  ;;  %v4574_v40 = vmax.f32 %v4510_v26, 0.0  ;;  %v3053_v13 = vld [vmem:[#allocation2 + $0x201] sm:$0xff] }
 0x28d   : > { %1675 = vrot.lane.b32.xlu0 %v2666_v44, %s11075_s10  ;;  %v6401_v3 = vsel %vm6400_vm6, %v5404_v0, %v6399_v57 }
 0x28e   : > { %v1658_v27 = vpop.permute.xlu1 %1657  ;;  %v6403_v2 = vsel %vm6402_vm2, %v5411_v60, %v6401_v3 }
 0x28f   : > { %1824 = vst.msk [vmem:[#allocation4 + $0xd0] sm:$0xff] %vm1797_vm8, %v1658_v27  ;;  %v1660_v4 = vpop.permute.xlu0 %1659  ;;  %v6405_v6 = vsel %vm6404_vm0, %v5418_v61, %v6403_v2 }
 0x290   : > { %1825 = vst.msk [vmem:[#allocation4 + $0xd8] sm:$0xff] %vm1797_vm8, %v1660_v4  ;;  %3210 = vrot.lane.b32.xlu1 %v3050_v59, %s11079_s14  ;;  %v6407_v19 = vsel %vm15120_vm3, %v5425_v63, %v6405_v6 }
 0x291   : > { %3212 = vrot.lane.b32.xlu0 %v3051_v41, %s11079_s14  ;;  %6530 = vst.msk [vmem:[#allocation3 + $0x11] sm:$0xff] %vm15118_vm1, %v6407_v19 }
 0x292   : > { %v3195_v46 = vpop.permute.xlu1 %3194 }
 0x293   : > { %3363 = vst.msk [vmem:[#allocation4 + $0xc0] sm:$0xff] %vm3338_vm12, %v3195_v46  ;;  %v3197_v15 = vpop.permute.xlu0 %3196 }
 0x294   : > { %3364 = vst.msk [vmem:[#allocation4 + $0xc8] sm:$0xff] %vm3338_vm12, %v3197_v15  ;;  %2058 = vrot.lane.b32.xlu1 %v3050_v59, %s11076_s11 }
 0x295   : > { %2060 = vrot.lane.b32.xlu0 %v3051_v41, %s11076_s11 }
 0x296   : > { %v2043_v29 = vpop.permute.xlu1 %2042 }
 0x297   : > { %2209 = vst.msk [vmem:[#allocation4 + $0xd0] sm:$0xff] %vm2182_vm9, %v2043_v29  ;;  %v2045_v1 = vpop.permute.xlu0 %2044 }
 0x298   : > { %2210 = vst.msk [vmem:[#allocation4 + $0xd8] sm:$0xff] %vm2182_vm9, %v2045_v1  ;;  %3595 = vrot.lane.b32.xlu1 %v3435_v34, %s11080_s23  ;;  %v12406_v25 = vld [vmem:[#allocation3 + $0x10] sm:$0xff] }
 0x299   : > { %3597 = vrot.lane.b32.xlu0 %v3436_v21, %s11080_s23  ;;  %v12408_v58 = vld [vmem:[#allocation3 + $0x11] sm:$0xff]  ;;  %6563 = vst.msk [vmem:[#allocation5 + $0x18] sm:$0xff] %vm15118_vm1, %v12406_v25 }
 0x29a   : > { %v3580_v52 = vpop.permute.xlu1 %3579  ;;  %6885 = vst.msk [vmem:[#allocation5 + $0x8] sm:$0xff] %vm15118_vm1, %v12408_v58 }
 0x29b   : > { %3748 = vst.msk [vmem:[#allocation4 + $0xc0] sm:$0xff] %vm15121_vm13, %v3580_v52  ;;  %v3582_v37 = vpop.permute.xlu0 %3581 }
 0x29c   : > { %3749 = vst.msk [vmem:[#allocation4 + $0xc8] sm:$0xff] %vm15121_vm13, %v3582_v37  ;;  %2443 = vrot.lane.b32.xlu1 %v3435_v34, %s11077_s12 }
 0x29d   : > { %2445 = vrot.lane.b32.xlu0 %v3436_v21, %s11077_s12 }
 0x29e   : > { %v2428_v16 = vpop.permute.xlu1 %2427  ;;  %v10662_v32 = vpop.f32.mrb[6].mxu0 }
 0x29f   : > { %2594 = vst.msk [vmem:[#allocation4 + $0xd0] sm:$0xff] %vm15119_vm10, %v2428_v16  ;;  %v4445_v12 = vmul.f32 0.003921569, %v10662_v32  ;;  %v2430_v14 = vpop.permute.xlu0 %2429  ;;  %v4149_v18 = vpop.f32.mrb[7].mxu0 }
 0x2a0   : > { %2595 = vst.msk [vmem:[#allocation4 + $0xd8] sm:$0xff] %vm15119_vm10, %v2430_v14  ;;  %v4444_v5 = vmul.f32 0.003921569, %v4149_v18  ;;  %1292 = vrot.lane.b32.xlu1 %v3435_v34, %s11074_s9 }
 0x2a1   : > { %v4513_v22 = vadd.f32 %v12324_v24, %v4445_v12  ;;  %1294 = vrot.lane.b32.xlu0 %v3436_v21, %s11074_s9 }
 0x2a2   : > { %v4512_v23 = vadd.f32 %v12324_v24, %v4444_v5  ;;  %v1277_v11 = vpop.permute.xlu1 %1276  ;;  %v3812_v33 = vld [vmem:[#allocation4 + $0xc0] sm:$0xff] }
 0x2a3   : > { %v4577_v42 = vmax.f32 %v4513_v22, 0.0  ;;  %1441 = vst.msk [vmem:[#allocation4 + $0xe0] sm:$0xff] %vm1412_vm7, %v1277_v11  ;;  %v1279_v44 = vpop.permute.xlu0 %1278  ;;  %10687 = vmatprep.mubr.msk.f32.mxu0 %vm3856_vm14, %v3812_v33  ;;  %v3813_v56 = vld [vmem:[#allocation4 + $0xc8] sm:$0xff]  ;;  %v3437_v5 = vld [vmem:[#allocation2 + $0x1fa] sm:$0xff] }
 0x2a4   : > { %v4576_v45 = vmax.f32 %v4512_v23, 0.0  ;;  %1442 = vst.msk [vmem:[#allocation4 + $0xe8] sm:$0xff] %vm1412_vm7, %v1279_v44  ;;  %2829 = vrot.lane.b32.xlu1 %v2667_v28, %s11078_s13  ;;  %10688 = vmatmul.mubr.msk.f32.gmra.mrb[24].mxu0 %vm3856_vm14, %v3813_v56  ;;  %v3438_v23 = vld [vmem:[#allocation2 + $0x202] sm:$0xff] }
 0x2a5   : > { %v4637_v31 = vmax.f32 %v4575_v35, %v4577_v42  ;;  %2831 = vrot.lane.b32.xlu0 %v2668_v36, %s11078_s13 }
 0x2a6   : > { %v4636_v9 = vmax.f32 %v4574_v40, %v4576_v45  ;;  %v2814_v47 = vpop.permute.xlu1 %2813 }
 0x2a7   : > { %v4749_v48 = vcombine.high %v4637_v31, %v4637_v31  ;;  %v4756_v62 = vrot.slane %v4637_v31, %v12337_v38  ;;  %2980 = vst.msk [vmem:[#allocation4 + $0xd0] sm:$0xff] %vm2953_vm11, %v2814_v47  ;;  %v2816_v17 = vpop.permute.xlu0 %2815 }
 0x2a8   : > { %v4732_v49 = vcombine.high %v4636_v9, %v4636_v9  ;;  %v4739_v20 = vrot.slane %v4636_v9, %v12337_v38  ;;  %2981 = vst.msk [vmem:[#allocation4 + $0xd8] sm:$0xff] %vm2953_vm11, %v2816_v17  ;;  %1677 = vrot.lane.b32.xlu1 %v2667_v28, %s11075_s10 }
 0x2a9   : > { %v4763_v39 = vrot.slane %v4749_v48, %v12337_v38  ;;  %v4764_v50 = vcombine.high %v4756_v62, %v4756_v62  ;;  %v5454_v51 = vsel %vm15117_vm15, %v4756_v62, -inf  ;;  %1679 = vrot.lane.b32.xlu0 %v2668_v36, %s11075_s10 }
 0x2aa   : > { %v5455_v43 = vrot.slane %v5454_v51, 4  ;;  %v4746_v54 = vrot.slane %v4732_v49, %v12337_v38  ;;  %v4747_v30 = vcombine.high %v4739_v20, %v4739_v20  ;;  %v5426_v55 = vsel %vm15117_vm15, %v4739_v20, -inf  ;;  %v1662_v0 = vpop.permute.xlu1 %1661 }
 0x2ab   : > { %v4765_v60 = vcombine.high %v4763_v39, %v4763_v39  ;;  %v5461_v57 = vsel %vm15117_vm15, %v4764_v50, -inf  ;;  %v5468_v59 = vsel %vm15117_vm15, %v4763_v39, -inf  ;;  %v5427_v61 = vrot.slane %v5426_v55, 4  ;;  %1826 = vst.msk [vmem:[#allocation4 + $0xe0] sm:$0xff] %vm1797_vm8, %v1662_v0  ;;  %v1664_v3 = vpop.permute.xlu0 %1663 }
 0x2ac   : > { %v5456_v27 = vmax.f32 %v5454_v51, %v5455_v43  ;;  %v5462_v41 = vrot.slane %v5461_v57, 4  ;;  %v5469_v63 = vrot.slane %v5468_v59, 4  ;;  %v4748_v2 = vcombine.high %v4746_v54, %v4746_v54  ;;  %1827 = vst.msk [vmem:[#allocation4 + $0xe8] sm:$0xff] %vm1797_vm8, %v1664_v3  ;;  %3214 = vrot.lane.b32.xlu1 %v3052_v53, %s11079_s14 }
 0x2ad   : > { %v5475_v4 = vsel %vm15117_vm15, %v4765_v60, -inf  ;;  %v5428_v6 = vmax.f32 %v5426_v55, %v5427_v61  ;;  %v5433_v19 = vsel %vm15117_vm15, %v4747_v30, -inf  ;;  %v5440_v46 = vsel %vm15117_vm15, %v4746_v54, -inf  ;;  %3216 = vrot.lane.b32.xlu0 %v3053_v13, %s11079_s14 }
 0x2ae   : > { %v5463_v15 = vmax.f32 %v5461_v57, %v5462_v41  ;;  %v5470_v34 = vmax.f32 %v5468_v59, %v5469_v63  ;;  %v5476_v29 = vrot.slane %v5475_v4, 4  ;;  %v3199_v21 = vpop.permute.xlu1 %3198  ;;  %v5434_v52 = vrot.slane %v5433_v19, 4 }
 0x2af   : > { %v5429_v1 = vrot.slane %v5428_v6, 2  ;;  %v5441_v8 = vrot.slane %v5440_v46, 4  ;;  %v5447_v37 = vsel %vm15117_vm15, %v4748_v2, -inf  ;;  %3365 = vst.msk [vmem:[#allocation4 + $0xd0] sm:$0xff] %vm3338_vm12, %v3199_v21  ;;  %v3201_v7 = vpop.permute.xlu0 %3200  ;;  %v5457_v16 = vrot.slane %v5456_v27, 2 }
 0x2b0   : > { %v5464_v32 = vrot.slane %v5463_v15, 2  ;;  %v5477_v10 = vmax.f32 %v5475_v4, %v5476_v29  ;;  %3366 = vst.msk [vmem:[#allocation4 + $0xd8] sm:$0xff] %vm3338_vm12, %v3201_v7  ;;  %2062 = vrot.lane.b32.xlu1 %v3052_v53, %s11076_s11  ;;  %v5435_v14 = vmax.f32 %v5433_v19, %v5434_v52  ;;  %v5448_v26 = vrot.slane %v5447_v37, 4  ;;  %v2669_v4 = vld [vmem:[#allocation2 + $0x210] sm:$0xff] }
 0x2b1   : > { %v5430_v12 = vmax.f32 %v5428_v6, %v5429_v1  ;;  %v5442_v18 = vmax.f32 %v5440_v46, %v5441_v8  ;;  %2064 = vrot.lane.b32.xlu0 %v3053_v13, %s11076_s11  ;;  %v5471_v22 = vrot.slane %v5470_v34, 2  ;;  %v5458_v44 = vmax.f32 %v5456_v27, %v5457_v16 }
 0x2b2   : > { %v2047_v28 = vpop.permute.xlu1 %2046  ;;  %v5478_v11 = vrot.slane %v5477_v10, 2  ;;  %v5436_v33 = vrot.slane %v5435_v14, 2  ;;  %v5449_v35 = vmax.f32 %v5447_v37, %v5448_v26  ;;  %v5465_v56 = vmax.f32 %v5463_v15, %v5464_v32  ;;  %v3054_v32 = vld [vmem:[#allocation2 + $0x211] sm:$0xff] }
 0x2b3   : > { %v5443_v36 = vrot.slane %v5442_v18, 2  ;;  %2211 = vst.msk [vmem:[#allocation4 + $0xe0] sm:$0xff] %vm2182_vm9, %v2047_v28  ;;  %v2049_v42 = vpop.permute.xlu0 %2048  ;;  %v5431_v40 = vrot.slane %v5430_v12, 1  ;;  %v5472_v47 = vmax.f32 %v5470_v34, %v5471_v22  ;;  %v5459_v53 = vrot.slane %v5458_v44, 1  ;;  %v2670_v34 = vld [vmem:[#allocation2 + $0x218] sm:$0xff] }
 0x2b4   : > { %2212 = vst.msk [vmem:[#allocation4 + $0xe8] sm:$0xff] %vm2182_vm9, %v2049_v42  ;;  %3599 = vrot.lane.b32.xlu1 %v3437_v5, %s11080_s23  ;;  %v5437_v45 = vmax.f32 %v5435_v14, %v5436_v33  ;;  %v5450_v9 = vrot.slane %v5449_v35, 2  ;;  %v5479_v17 = vmax.f32 %v5477_v10, %v5478_v11  ;;  %v5466_v43 = vrot.slane %v5465_v56, 1  ;;  %v3439_v33 = vld [vmem:[#allocation2 + $0x212] sm:$0xff]  ;;  %v3440_v42 = vld [vmem:[#allocation2 + $0x21a] sm:$0xff] }
 0x2b5   : > { %v5444_v31 = vmax.f32 %v5442_v18, %v5443_v36  ;;  %3601 = vrot.lane.b32.xlu0 %v3438_v23, %s11080_s23  ;;  %v5432_v54 = vmax.f32 %v5430_v12, %v5431_v40  ;;  %v5473_v13 = vrot.slane %v5472_v47, 1  ;;  %vm15122_vm15 = vcmask 1041409   ;;  %v3055_v12 = vld [vmem:[#allocation2 + $0x219] sm:$0xff] }
 0x2b6   : > { %v3584_v48 = vpop.permute.xlu1 %3583  ;;  %v12462_v62 = vpop.f32.mrb[8].mxu0  ;;  %v5438_v49 = vrot.slane %v5437_v45, 1  ;;  %v5451_v39 = vmax.f32 %v5449_v35, %v5450_v9  ;;  %v5480_v57 = vrot.slane %v5479_v17, 1  ;;  %v5460_v27 = vmax.f32 %v5458_v44, %v5459_v53 }
 0x2b7   : > { %v5445_v20 = vrot.slane %v5444_v31, 1  ;;  %3750 = vst.msk [vmem:[#allocation4 + $0xd0] sm:$0xff] %vm15121_vm13, %v3584_v48  ;;  %v3586_v50 = vpop.permute.xlu0 %3585  ;;  %v12465_v51 = vpop.f32.mrb[9].mxu0  ;;  %v5467_v63 = vmax.f32 %v5465_v56, %v5466_v43  ;;  %v5474_v6 = vmax.f32 %v5472_v47, %v5473_v13  ;;  %v4447_v28 = vmul.f32 0.003921569, %v12462_v62 }
 0x2b8   : > { %3751 = vst.msk [vmem:[#allocation4 + $0xd8] sm:$0xff] %vm15121_vm13, %v3586_v50  ;;  %2447 = vrot.lane.b32.xlu1 %v3437_v5, %s11077_s12  ;;  %v5439_v30 = vmax.f32 %v5437_v45, %v5438_v49  ;;  %v5452_v0 = vrot.slane %v5451_v39, 1  ;;  %v5481_v29 = vmax.f32 %v5479_v17, %v5480_v57  ;;  %v4446_v11 = vmul.f32 0.003921569, %v12465_v51 }
 0x2b9   : > { %v5446_v55 = vmax.f32 %v5444_v31, %v5445_v20  ;;  %2449 = vrot.lane.b32.xlu0 %v3438_v23, %s11077_s12  ;;  %v4515_v44 = vadd.f32 %v12324_v24, %v4447_v28 }
 0x2ba   : > { %v2432_v60 = vpop.permute.xlu1 %2431  ;;  %v5453_v59 = vmax.f32 %v5451_v39, %v5452_v0  ;;  %v6408_v61 = vsel %vm15122_vm15, %v5439_v30, %v5432_v54  ;;  %v4514_v31 = vadd.f32 %v12324_v24, %v4446_v11  ;;  %vm15123_vm15 = vcmask 254976  }
 0x2bb   : > { %2596 = vst.msk [vmem:[#allocation4 + $0xe0] sm:$0xff] %vm15119_vm10, %v2432_v60  ;;  %v2434_v3 = vpop.permute.xlu0 %2433  ;;  %v6409_v41 = vsel %vm6396_vm4, %v5446_v55, %v6408_v61  ;;  %v4579_v17 = vmax.f32 %v4515_v44, 0.0 }
 0x2bc   : > { %2597 = vst.msk [vmem:[#allocation4 + $0xe8] sm:$0xff] %vm15119_vm10, %v2434_v3  ;;  %1296 = vrot.lane.b32.xlu1 %v3437_v5, %s11074_s9  ;;  %v6410_v2 = vsel %vm6398_vm5, %v5453_v59, %v6409_v41  ;;  %v4578_v39 = vmax.f32 %v4514_v31, 0.0  ;;  %v2671_v59 = vld [vmem:[#allocation2 + $0x228] sm:$0xff] }
 0x2bd   : > { %1298 = vrot.lane.b32.xlu0 %v3438_v23, %s11074_s9  ;;  %v6411_v19 = vsel %vm6400_vm6, %v5460_v27, %v6410_v2 }
 0x2be   : > { %v1281_v46 = vpop.permute.xlu1 %1280  ;;  %v3814_v15 = vld [vmem:[#allocation4 + $0xd0] sm:$0xff]  ;;  %v6412_v21 = vsel %vm6402_vm2, %v5467_v63, %v6411_v19 }
 0x2bf   : > { %1443 = vst.msk [vmem:[#allocation4 + $0xf0] sm:$0xff] %vm1412_vm7, %v1281_v46  ;;  %v1283_v1 = vpop.permute.xlu0 %1282  ;;  %10690 = vmatprep.mubr.msk.f32.mxu0 %vm3856_vm14, %v3814_v15  ;;  %v3815_v52 = vld [vmem:[#allocation4 + $0xd8] sm:$0xff]  ;;  %v6413_v8 = vsel %vm6404_vm0, %v5474_v6, %v6412_v21 }
 0x2c0   : > { %1444 = vst.msk [vmem:[#allocation4 + $0xf8] sm:$0xff] %vm1412_vm7, %v1283_v1  ;;  %2833 = vrot.lane.b32.xlu1 %v2669_v4, %s11078_s13  ;;  %10691 = vmatmul.mubr.msk.f32.gmra.mrb[26].mxu0 %vm3856_vm14, %v3815_v52  ;;  %v6414_v37 = vsel %vm15120_vm3, %v5481_v29, %v6413_v8 }
 0x2c1   : > { %2835 = vrot.lane.b32.xlu0 %v2670_v34, %s11078_s13  ;;  %6531 = vst.msk [vmem:[#allocation3 + $0x21] sm:$0xff] %vm15118_vm1, %v6414_v37 }
 0x2c2   : > { %v2818_v7 = vpop.permute.xlu1 %2817 }
 0x2c3   : > { %2982 = vst.msk [vmem:[#allocation4 + $0xe0] sm:$0xff] %vm2953_vm11, %v2818_v7  ;;  %v2820_v16 = vpop.permute.xlu0 %2819 }
 0x2c4   : > { %2983 = vst.msk [vmem:[#allocation4 + $0xe8] sm:$0xff] %vm2953_vm11, %v2820_v16  ;;  %1681 = vrot.lane.b32.xlu1 %v2669_v4, %s11075_s10  ;;  %v2672_v4 = vld [vmem:[#allocation2 + $0x230] sm:$0xff] }
 0x2c5   : > { %1683 = vrot.lane.b32.xlu0 %v2670_v34, %s11075_s10 }
 0x2c6   : > { %v1666_v10 = vpop.permute.xlu1 %1665 }
 0x2c7   : > { %1828 = vst.msk [vmem:[#allocation4 + $0xf0] sm:$0xff] %vm1797_vm8, %v1666_v10  ;;  %v1668_v14 = vpop.permute.xlu0 %1667 }
 0x2c8   : > { %1829 = vst.msk [vmem:[#allocation4 + $0xf8] sm:$0xff] %vm1797_vm8, %v1668_v14  ;;  %3218 = vrot.lane.b32.xlu1 %v3054_v32, %s11079_s14  ;;  %v6870_v26 = vld [vmem:[#allocation3 + $0x21] sm:$0xff] }
 0x2c9   : > { %3220 = vrot.lane.b32.xlu0 %v3055_v12, %s11079_s14  ;;  %v6548_v5 = vld [vmem:[#allocation3 + $0x20] sm:$0xff]  ;;  %6886 = vst.msk [vmem:[#allocation5 + $0x20] sm:$0xff] %vm15118_vm1, %v6870_v26 }
 0x2ca   : > { %v3203_v18 = vpop.permute.xlu1 %3202  ;;  %v7190_v22 = vld [vmem:[#allocation3 + $0x22] sm:$0xff]  ;;  %6564 = vst.msk [vmem:[#allocation5 + $0x30] sm:$0xff] %vm15118_vm1, %v6548_v5 }
 0x2cb   : > { %3367 = vst.msk [vmem:[#allocation4 + $0xe0] sm:$0xff] %vm3338_vm12, %v3203_v18  ;;  %v3205_v23 = vpop.permute.xlu0 %3204 }
 0x2cc   : > { %7206 = vst.msk [vmem:[#allocation5 + $0x10] sm:$0xff] %vm15118_vm1, %v7190_v22  ;;  %2066 = vrot.lane.b32.xlu1 %v3054_v32, %s11076_s11  ;;  %vm15124_vm1 = vmmov %vm15123_vm15 }
 0x2cd   : > { %3368 = vst.msk [vmem:[#allocation4 + $0xe8] sm:$0xff] %vm3338_vm12, %v3205_v23  ;;  %2068 = vrot.lane.b32.xlu0 %v3055_v12, %s11076_s11  ;;  %vm15126_vm3 = vmmov %vm15124_vm1 }
 0x2ce   : > { %v2051_v36 = vpop.permute.xlu1 %2050  ;;  %v10668_v35 = vpop.f32.mrb[10].mxu0 }
 0x2cf   : > { %2213 = vst.msk [vmem:[#allocation4 + $0xf0] sm:$0xff] %vm2182_vm9, %v2051_v36  ;;  %v4449_v56 = vmul.f32 0.003921569, %v10668_v35  ;;  %v2053_v40 = vpop.permute.xlu0 %2052  ;;  %v4169_v45 = vpop.f32.mrb[11].mxu0 }
 0x2d0   : > { %2214 = vst.msk [vmem:[#allocation4 + $0xf8] sm:$0xff] %vm2182_vm9, %v2053_v40  ;;  %v4448_v9 = vmul.f32 0.003921569, %v4169_v45  ;;  %3603 = vrot.lane.b32.xlu1 %v3439_v33, %s11080_s23  ;;  %v3056_v40 = vld [vmem:[#allocation2 + $0x229] sm:$0xff] }
 0x2d1   : > { %v4517_v47 = vadd.f32 %v12324_v24, %v4449_v56  ;;  %3605 = vrot.lane.b32.xlu0 %v3440_v42, %s11080_s23 }
 0x2d2   : > { %v4516_v48 = vadd.f32 %v12324_v24, %v4448_v9  ;;  %v3588_v62 = vpop.permute.xlu1 %3587  ;;  %v3057_v9 = vld [vmem:[#allocation2 + $0x231] sm:$0xff] }
 0x2d3   : > { %v4581_v49 = vmax.f32 %v4517_v47, 0.0  ;;  %3752 = vst.msk [vmem:[#allocation4 + $0xe0] sm:$0xff] %vm15121_vm13, %v3588_v62  ;;  %v3590_v20 = vpop.permute.xlu0 %3589 }
 0x2d4   : > { %v4580_v50 = vmax.f32 %v4516_v48, 0.0  ;;  %3753 = vst.msk [vmem:[#allocation4 + $0xe8] sm:$0xff] %vm15121_vm13, %v3590_v20  ;;  %2451 = vrot.lane.b32.xlu1 %v3439_v33, %s11077_s12 }
 0x2d5   : > { %v4639_v51 = vmax.f32 %v4579_v17, %v4581_v49  ;;  %2453 = vrot.lane.b32.xlu0 %v3440_v42, %s11077_s12 }
 0x2d6   : > { %v4638_v53 = vmax.f32 %v4578_v39, %v4580_v50  ;;  %v2436_v43 = vpop.permute.xlu1 %2435 }
 0x2d7   : > { %v4783_v54 = vcombine.high %v4639_v51, %v4639_v51  ;;  %v4790_v24 = vrot.slane %v4639_v51, %v12337_v38  ;;  %2598 = vst.msk [vmem:[#allocation4 + $0xf0] sm:$0xff] %vm15119_vm10, %v2436_v43  ;;  %v2438_v30 = vpop.permute.xlu0 %2437 }
 0x2d8   : > { %v4766_v55 = vcombine.high %v4638_v53, %v4638_v53  ;;  %v4773_v0 = vrot.slane %v4638_v53, %v12337_v38  ;;  %2599 = vst.msk [vmem:[#allocation4 + $0xf8] sm:$0xff] %vm15119_vm10, %v2438_v30  ;;  %1300 = vrot.lane.b32.xlu1 %v3439_v33, %s11074_s9  ;;  %vm15125_vm10 = vmmov %vm15124_vm1 }
 0x2d9   : > { %v4797_v13 = vrot.slane %v4783_v54, %v12337_v38  ;;  %v4798_v60 = vcombine.high %v4790_v24, %v4790_v24  ;;  %v5510_v57 = vsel %vm15123_vm15, %v4790_v24, -inf  ;;  %1302 = vrot.lane.b32.xlu0 %v3440_v42, %s11074_s9  ;;  %vm15129_vm15 = vmmov %vm15124_vm1 }
 0x2da   : > { %v5511_v61 = vrot.slane %v5510_v57, 4  ;;  %v4780_v3 = vrot.slane %v4766_v55, %v12337_v38  ;;  %v4781_v27 = vcombine.high %v4773_v0, %v4773_v0  ;;  %v5482_v41 = vsel %vm15124_vm1, %v4773_v0, -inf  ;;  %v1285_v63 = vpop.permute.xlu1 %1284  ;;  %v3816_v2 = vld [vmem:[#allocation4 + $0xe0] sm:$0xff] }
 0x2db   : > { %v4799_v6 = vcombine.high %v4797_v13, %v4797_v13  ;;  %v5517_v19 = vsel %vm15125_vm10, %v4798_v60, -inf  ;;  %v5524_v46 = vsel %vm15126_vm3, %v4797_v13, -inf  ;;  %v5483_v15 = vrot.slane %v5482_v41, 4  ;;  %1445 = vst.msk [vmem:[#allocation4 + $0x100] sm:$0xff] %vm1412_vm7, %v1285_v63  ;;  %v1287_v34 = vpop.permute.xlu0 %1286  ;;  %10693 = vmatprep.mubr.msk.f32.mxu0 %vm3856_vm14, %v3816_v2  ;;  %v3817_v29 = vld [vmem:[#allocation4 + $0xe8] sm:$0xff]  ;;  %vm15127_vm10 = vmmov %vm15124_vm1 }
 0x2dc   : > { %v5512_v21 = vmax.f32 %v5510_v57, %v5511_v61  ;;  %v5518_v1 = vrot.slane %v5517_v19, 4  ;;  %v5525_v52 = vrot.slane %v5524_v46, 4  ;;  %v4782_v8 = vcombine.high %v4780_v3, %v4780_v3  ;;  %1446 = vst.msk [vmem:[#allocation4 + $0x108] sm:$0xff] %vm1412_vm7, %v1287_v34  ;;  %2837 = vrot.lane.b32.xlu1 %v2671_v59, %s11078_s13  ;;  %10694 = vmatmul.mubr.msk.f32.gmra.mrb[28].mxu0 %vm3856_vm14, %v3817_v29  ;;  %vm15128_vm3 = vmmov %vm15124_vm1 }
 0x2dd   : > { %v5531_v37 = vsel %vm15127_vm10, %v4799_v6, -inf  ;;  %v5484_v7 = vmax.f32 %v5482_v41, %v5483_v15  ;;  %v5489_v16 = vsel %vm15124_vm1, %v4781_v27, -inf  ;;  %v5496_v32 = vsel %vm15128_vm3, %v4780_v3, -inf  ;;  %2839 = vrot.lane.b32.xlu0 %v2672_v4, %s11078_s13 }
 0x2de   : > { %v5519_v10 = vmax.f32 %v5517_v19, %v5518_v1  ;;  %v5526_v12 = vmax.f32 %v5524_v46, %v5525_v52  ;;  %v5532_v14 = vrot.slane %v5531_v37, 4  ;;  %v2822_v18 = vpop.permute.xlu1 %2821  ;;  %v5490_v5 = vrot.slane %v5489_v16, 4  ;;  %v3442_v46 = vld [vmem:[#allocation2 + $0x232] sm:$0xff] }
 0x2df   : > { %v5485_v26 = vrot.slane %v5484_v7, 2  ;;  %v5497_v22 = vrot.slane %v5496_v32, 4  ;;  %v5503_v28 = vsel %vm15129_vm15, %v4782_v8, -inf  ;;  %2984 = vst.msk [vmem:[#allocation4 + $0xf0] sm:$0xff] %vm2953_vm11, %v2822_v18  ;;  %v2824_v23 = vpop.permute.xlu0 %2823  ;;  %v5513_v11 = vrot.slane %v5512_v21, 2 }
 0x2e0   : > { %v5520_v33 = vrot.slane %v5519_v10, 2  ;;  %v5533_v36 = vmax.f32 %v5531_v37, %v5532_v14  ;;  %2985 = vst.msk [vmem:[#allocation4 + $0xf8] sm:$0xff] %vm2953_vm11, %v2824_v23  ;;  %1685 = vrot.lane.b32.xlu1 %v2671_v59, %s11075_s10  ;;  %v5491_v42 = vmax.f32 %v5489_v16, %v5490_v5  ;;  %v5504_v56 = vrot.slane %v5503_v28, 4 }
 0x2e1   : > { %v5486_v35 = vmax.f32 %v5484_v7, %v5485_v26  ;;  %v5498_v44 = vmax.f32 %v5496_v32, %v5497_v22  ;;  %1687 = vrot.lane.b32.xlu0 %v2672_v4, %s11075_s10  ;;  %v5527_v45 = vrot.slane %v5526_v12, 2  ;;  %v5514_v20 = vmax.f32 %v5512_v21, %v5513_v11  ;;  %v3441_v4 = vld [vmem:[#allocation2 + $0x22a] sm:$0xff] }
 0x2e2   : > { %v1670_v31 = vpop.permute.xlu1 %1669  ;;  %v5534_v47 = vrot.slane %v5533_v36, 2  ;;  %v5492_v48 = vrot.slane %v5491_v42, 2  ;;  %v5505_v17 = vmax.f32 %v5503_v28, %v5504_v56  ;;  %v5521_v39 = vmax.f32 %v5519_v10, %v5520_v33  ;;  %v2673_v28 = vld [vmem:[#allocation2 + $0x240] sm:$0xff]  ;;  %v2674_v33 = vld [vmem:[#allocation2 + $0x248] sm:$0xff] }
 0x2e3   : > { %v5499_v62 = vrot.slane %v5498_v44, 2  ;;  %1830 = vst.msk [vmem:[#allocation4 + $0x100] sm:$0xff] %vm1797_vm8, %v1670_v31  ;;  %v1672_v49 = vpop.permute.xlu0 %1671  ;;  %v5487_v50 = vrot.slane %v5486_v35, 1  ;;  %v5528_v54 = vmax.f32 %v5526_v12, %v5527_v45  ;;  %v5515_v61 = vrot.slane %v5514_v20, 1 }
 0x2e4   : > { %1831 = vst.msk [vmem:[#allocation4 + $0x108] sm:$0xff] %vm1797_vm8, %v1672_v49  ;;  %3222 = vrot.lane.b32.xlu1 %v3056_v40, %s11079_s14  ;;  %v5493_v51 = vmax.f32 %v5491_v42, %v5492_v48  ;;  %v5506_v43 = vrot.slane %v5505_v17, 2  ;;  %v5535_v55 = vmax.f32 %v5533_v36, %v5534_v47  ;;  %v5522_v3 = vrot.slane %v5521_v39, 1  ;;  %v3058_v47 = vld [vmem:[#allocation2 + $0x241] sm:$0xff]  ;;  %v12596_v49 = vld [vmem:[%s15113_s6] ss:$0 sm:$0xff] }
 0x2e5   : > { %v5500_v53 = vmax.f32 %v5498_v44, %v5499_v62  ;;  %3224 = vrot.lane.b32.xlu0 %v3057_v9, %s11079_s14  ;;  %v5488_v27 = vmax.f32 %v5486_v35, %v5487_v50  ;;  %v5529_v6 = vrot.slane %v5528_v54, 1  ;;  %vm15130_vm10 = vcmask 1041409  }
 0x2e6   : > { %v3207_v24 = vpop.permute.xlu1 %3206  ;;  %v12547_v30 = vpop.f32.mrb[12].mxu0  ;;  %v5494_v0 = vrot.slane %v5493_v51, 1  ;;  %v5507_v60 = vmax.f32 %v5505_v17, %v5506_v43  ;;  %v5536_v15 = vrot.slane %v5535_v55, 1  ;;  %v5516_v1 = vmax.f32 %v5514_v20, %v5515_v61  ;;  %v3059_v17 = vld [vmem:[#allocation2 + $0x249] sm:$0xff] }
 0x2e7   : > { %v5501_v13 = vrot.slane %v5500_v53, 1  ;;  %3369 = vst.msk [vmem:[#allocation4 + $0xf0] sm:$0xff] %vm3338_vm12, %v3207_v24  ;;  %v3209_v57 = vpop.permute.xlu0 %3208  ;;  %v12550_v59 = vpop.f32.mrb[13].mxu0  ;;  %v5523_v8 = vmax.f32 %v5521_v39, %v5522_v3  ;;  %v5530_v7 = vmax.f32 %v5528_v54, %v5529_v6  ;;  %vm15131_vm1 = vcmask 1047559   ;;  %v3443_v61 = vld [vmem:[#allocation2 + $0x242] sm:$0xff] }
 0x2e8   : > { %3370 = vst.msk [vmem:[#allocation4 + $0xf8] sm:$0xff] %vm3338_vm12, %v3209_v57  ;;  %2070 = vrot.lane.b32.xlu1 %v3056_v40, %s11076_s11  ;;  %v5495_v41 = vmax.f32 %v5493_v51, %v5494_v0  ;;  %v5508_v2 = vrot.slane %v5507_v60, 1  ;;  %v5537_v10 = vmax.f32 %v5535_v55, %v5536_v15  ;;  %vm15132_vm3 = vcmask 261120  }
 0x2e9   : > { %v5502_v63 = vmax.f32 %v5500_v53, %v5501_v13  ;;  %2072 = vrot.lane.b32.xlu0 %v3057_v9, %s11076_s11  ;;  %vm15133_vm15 = vcmask 146552   ;;  %v4451_v40 = vmul.f32 0.003921569, %v12547_v30  ;;  %v4450_v9 = vmul.f32 0.003921569, %v12550_v59 }
 0x2ea   : > { %v2055_v19 = vpop.permute.xlu1 %2054  ;;  %v5509_v34 = vmax.f32 %v5507_v60, %v5508_v2  ;;  %v6415_v29 = vsel %vm15130_vm10, %v5495_v41, %v5488_v27  ;;  %vm15134_vm10 = vmmov %vm15133_vm15  ;;  %v3444_v41 = vld [vmem:[#allocation2 + $0x24a] sm:$0xff] }
 0x2eb   : > { %2215 = vst.msk [vmem:[#allocation4 + $0x100] sm:$0xff] %vm2182_vm9, %v2055_v19  ;;  %v2057_v21 = vpop.permute.xlu0 %2056  ;;  %v6416_v52 = vsel %vm6396_vm4, %v5502_v63, %v6415_v29  ;;  %v4519_v20 = vadd.f32 %v12596_v49, %v4451_v40  ;;  %v4518_v53 = vadd.f32 %v12596_v49, %v4450_v9 }
 0x2ec   : > { %2216 = vst.msk [vmem:[#allocation4 + $0x108] sm:$0xff] %vm2182_vm9, %v2057_v21  ;;  %3607 = vrot.lane.b32.xlu1 %v3441_v4, %s11080_s23  ;;  %v6417_v37 = vsel %vm6398_vm5, %v5509_v34, %v6416_v52 }
 0x2ed   : > { %3609 = vrot.lane.b32.xlu0 %v3442_v46, %s11080_s23  ;;  %v6418_v16 = vsel %vm6400_vm6, %v5516_v1, %v6417_v37  ;;  %v4583_v55 = vmax.f32 %v4519_v20, 0.0  ;;  %v4582_v60 = vmax.f32 %v4518_v53, 0.0 }
 0x2ee   : > { %v3592_v32 = vpop.permute.xlu1 %3591  ;;  %v6419_v12 = vsel %vm6402_vm2, %v5523_v8, %v6418_v16 }
 0x2ef   : > { %3754 = vst.msk [vmem:[#allocation4 + $0xf0] sm:$0xff] %vm15121_vm13, %v3592_v32  ;;  %v3594_v14 = vpop.permute.xlu0 %3593  ;;  %v6420_v18 = vsel %vm6404_vm0, %v5530_v7, %v6419_v12 }
 0x2f0   : > { %3755 = vst.msk [vmem:[#allocation4 + $0xf8] sm:$0xff] %vm15121_vm13, %v3594_v14  ;;  %2455 = vrot.lane.b32.xlu1 %v3441_v4, %s11077_s12  ;;  %v6421_v26 = vsel %vm15131_vm1, %v5537_v10, %v6420_v18  ;;  %vm15135_vm1 = vmmov %vm15132_vm3 }
 0x2f1   : > { %2457 = vrot.lane.b32.xlu0 %v3442_v46, %s11077_s12  ;;  %6532 = vst.msk [vmem:[#allocation3 + $0x31] sm:$0xff] %vm15132_vm3, %v6421_v26  ;;  %vm15136_vm3 = vmmov %vm15135_vm1 }
 0x2f2   : > { %v2440_v5 = vpop.permute.xlu1 %2439 }
 0x2f3   : > { %2600 = vst.msk [vmem:[#allocation4 + $0x100] sm:$0xff] %vm15133_vm15, %v2440_v5  ;;  %v2442_v22 = vpop.permute.xlu0 %2441  ;;  %vm15137_vm15 = vmmov %vm15135_vm1 }
 0x2f4   : > { %2601 = vst.msk [vmem:[#allocation4 + $0x108] sm:$0xff] %vm15134_vm10, %v2442_v22  ;;  %1304 = vrot.lane.b32.xlu1 %v3441_v4, %s11074_s9  ;;  %vm15138_vm10 = vcmask 254976  }
 0x2f5   : > { %1306 = vrot.lane.b32.xlu0 %v3442_v46, %s11074_s9 }
 0x2f6   : > { %v1289_v23 = vpop.permute.xlu1 %1288  ;;  %v3818_v11 = vld [vmem:[#allocation4 + $0xf0] sm:$0xff] }
 0x2f7   : > { %1447 = vst.msk [vmem:[#allocation4 + $0x110] sm:$0xff] %vm1412_vm7, %v1289_v23  ;;  %v1291_v36 = vpop.permute.xlu0 %1290  ;;  %10696 = vmatprep.mubr.msk.f32.mxu0 %vm3856_vm14, %v3818_v11  ;;  %v3819_v35 = vld [vmem:[#allocation4 + $0xf8] sm:$0xff] }
 0x2f8   : > { %1448 = vst.msk [vmem:[#allocation4 + $0x118] sm:$0xff] %vm1412_vm7, %v1291_v36  ;;  %2841 = vrot.lane.b32.xlu1 %v2673_v28, %s11078_s13  ;;  %10697 = vmatmul.mubr.msk.f32.gmra.mrb[30].mxu0 %vm3856_vm14, %v3819_v35  ;;  %v12581_v42 = vld [vmem:[#allocation3 + $0x31] sm:$0xff] }
 0x2f9   : > { %2843 = vrot.lane.b32.xlu0 %v2674_v33, %s11078_s13  ;;  %6887 = vst.msk [vmem:[#allocation5 + $0x38] sm:$0xff] %vm15135_vm1, %v12581_v42  ;;  %v6549_v56 = vld [vmem:[#allocation3 + $0x30] sm:$0xff]  ;;  %vm15139_vm1 = vmmov %vm15138_vm10 }
 0x2fa   : > { %v2826_v44 = vpop.permute.xlu1 %2825  ;;  %6565 = vst.msk [vmem:[#allocation5 + $0x48] sm:$0xff] %vm15136_vm3, %v6549_v56  ;;  %v7191_v31 = vld [vmem:[#allocation3 + $0x32] sm:$0xff]  ;;  %vm15140_vm3 = vmmov %vm15139_vm1 }
 0x2fb   : > { %2986 = vst.msk [vmem:[#allocation4 + $0x100] sm:$0xff] %vm2953_vm11, %v2826_v44  ;;  %v2828_v45 = vpop.permute.xlu0 %2827 }
 0x2fc   : > { %2987 = vst.msk [vmem:[#allocation4 + $0x108] sm:$0xff] %vm2953_vm11, %v2828_v45  ;;  %1689 = vrot.lane.b32.xlu1 %v2673_v28, %s11075_s10 }
 0x2fd   : > { %7207 = vst.msk [vmem:[#allocation5 + $0x28] sm:$0xff] %vm15137_vm15, %v7191_v31  ;;  %1691 = vrot.lane.b32.xlu0 %v2674_v33, %s11075_s10  ;;  %vm15141_vm15 = vmmov %vm15139_vm1 }
 0x2fe   : > { %v1674_v48 = vpop.permute.xlu1 %1673  ;;  %v10674_v62 = vpop.f32.mrb[14].mxu0 }
 0x2ff   : > { %1832 = vst.msk [vmem:[#allocation4 + $0x110] sm:$0xff] %vm1797_vm8, %v1674_v48  ;;  %v4453_v39 = vmul.f32 0.003921569, %v10674_v62  ;;  %v1676_v50 = vpop.permute.xlu0 %1675  ;;  %v4189_v51 = vpop.f32.mrb[15].mxu0 }
 0x300   : > { %1833 = vst.msk [vmem:[#allocation4 + $0x118] sm:$0xff] %vm1797_vm8, %v1676_v50  ;;  %v4452_v43 = vmul.f32 0.003921569, %v4189_v51  ;;  %3226 = vrot.lane.b32.xlu1 %v3058_v47, %s11079_s14  ;;  %v2675_v50 = vld [vmem:[#allocation2 + $0x258] sm:$0xff] }
 0x301   : > { %v4521_v54 = vadd.f32 %v12596_v49, %v4453_v39  ;;  %3228 = vrot.lane.b32.xlu0 %v3059_v17, %s11079_s14 }
 0x302   : > { %v4520_v24 = vadd.f32 %v12596_v49, %v4452_v43  ;;  %v3211_v30 = vpop.permute.xlu1 %3210 }
 0x303   : > { %v4585_v0 = vmax.f32 %v4521_v54, 0.0  ;;  %3371 = vst.msk [vmem:[#allocation4 + $0x100] sm:$0xff] %vm3338_vm12, %v3211_v30  ;;  %v3213_v13 = vpop.permute.xlu0 %3212  ;;  %v2676_v54 = vld [vmem:[#allocation2 + $0x260] sm:$0xff] }
 0x304   : > { %v4584_v57 = vmax.f32 %v4520_v24, 0.0  ;;  %3372 = vst.msk [vmem:[#allocation4 + $0x108] sm:$0xff] %vm3338_vm12, %v3213_v13  ;;  %2074 = vrot.lane.b32.xlu1 %v3058_v47, %s11076_s11 }
 0x305   : > { %v4641_v59 = vmax.f32 %v4583_v55, %v4585_v0  ;;  %2076 = vrot.lane.b32.xlu0 %v3059_v17, %s11076_s11 }
 0x306   : > { %v4640_v3 = vmax.f32 %v4582_v60, %v4584_v57  ;;  %v2059_v27 = vpop.permute.xlu1 %2058 }
 0x307   : > { %v4817_v63 = vcombine.high %v4641_v59, %v4641_v59  ;;  %v4824_v2 = vrot.slane %v4641_v59, %v12337_v38  ;;  %2217 = vst.msk [vmem:[#allocation4 + $0x110] sm:$0xff] %vm2182_vm9, %v2059_v27  ;;  %v2061_v4 = vpop.permute.xlu0 %2060 }
 0x308   : > { %v4800_v6 = vcombine.high %v4640_v3, %v4640_v3  ;;  %v4807_v19 = vrot.slane %v4640_v3, %v12337_v38  ;;  %2218 = vst.msk [vmem:[#allocation4 + $0x118] sm:$0xff] %vm2182_vm9, %v2061_v4  ;;  %3611 = vrot.lane.b32.xlu1 %v3443_v61, %s11080_s23 }
 0x309   : > { %v4831_v46 = vrot.slane %v4817_v63, %v12337_v38  ;;  %v4832_v15 = vcombine.high %v4824_v2, %v4824_v2  ;;  %v5566_v34 = vsel %vm15138_vm10, %v4824_v2, -inf  ;;  %3613 = vrot.lane.b32.xlu0 %v3444_v41, %s11080_s23  ;;  %vm15142_vm10 = vmmov %vm15139_vm1 }
 0x30a   : > { %v5567_v29 = vrot.slane %v5566_v34, 4  ;;  %v4814_v21 = vrot.slane %v4800_v6, %v12337_v38  ;;  %v4815_v1 = vcombine.high %v4807_v19, %v4807_v19  ;;  %v5538_v52 = vsel %vm15139_vm1, %v4807_v19, -inf  ;;  %v3596_v8 = vpop.permute.xlu1 %3595 }
 0x30b   : > { %v4833_v37 = vcombine.high %v4831_v46, %v4831_v46  ;;  %v5573_v7 = vsel %vm15140_vm3, %v4832_v15, -inf  ;;  %v5580_v16 = vsel %vm15141_vm15, %v4831_v46, -inf  ;;  %v5539_v32 = vrot.slane %v5538_v52, 4  ;;  %3756 = vst.msk [vmem:[#allocation4 + $0x100] sm:$0xff] %vm15121_vm13, %v3596_v8  ;;  %v3598_v10 = vpop.permute.xlu0 %3597  ;;  %vm15143_vm3 = vmmov %vm15139_vm1 }
 0x30c   : > { %v5568_v12 = vmax.f32 %v5566_v34, %v5567_v29  ;;  %v5574_v14 = vrot.slane %v5573_v7, 4  ;;  %v5581_v18 = vrot.slane %v5580_v16, 4  ;;  %v4816_v26 = vcombine.high %v4814_v21, %v4814_v21  ;;  %3757 = vst.msk [vmem:[#allocation4 + $0x108] sm:$0xff] %vm15121_vm13, %v3598_v10  ;;  %2459 = vrot.lane.b32.xlu1 %v3443_v61, %s11077_s12  ;;  %vm15144_vm15 = vmmov %vm15139_vm1 }
 0x30d   : > { %v5587_v5 = vsel %vm15142_vm10, %v4833_v37, -inf  ;;  %v5540_v22 = vmax.f32 %v5538_v52, %v5539_v32  ;;  %v5545_v28 = vsel %vm15139_vm1, %v4815_v1, -inf  ;;  %v5552_v23 = vsel %vm15143_vm3, %v4814_v21, -inf  ;;  %2461 = vrot.lane.b32.xlu0 %v3444_v41, %s11077_s12 }
 0x30e   : > { %v5575_v11 = vmax.f32 %v5573_v7, %v5574_v14  ;;  %v5582_v33 = vmax.f32 %v5580_v16, %v5581_v18  ;;  %v5588_v36 = vrot.slane %v5587_v5, 4  ;;  %v2444_v35 = vpop.permute.xlu1 %2443  ;;  %v5546_v56 = vrot.slane %v5545_v28, 4  ;;  %v3060_v16 = vld [vmem:[#allocation2 + $0x259] sm:$0xff] }
 0x30f   : > { %v5541_v44 = vrot.slane %v5540_v22, 2  ;;  %v5553_v40 = vrot.slane %v5552_v23, 4  ;;  %v5559_v45 = vsel %vm15144_vm15, %v4816_v26, -inf  ;;  %vm15145_vm13 = vcmask 146552   ;;  %v2446_v31 = vpop.permute.xlu0 %2445 }
 0x310   : > { %2602 = vst.msk [vmem:[#allocation4 + $0x110] sm:$0xff] %vm15145_vm13, %v2444_v35  ;;  %v5569_v9 = vrot.slane %v5568_v12, 2  ;;  %v5576_v47 = vrot.slane %v5575_v11, 2  ;;  %v5589_v48 = vmax.f32 %v5587_v5, %v5588_v36  ;;  %vm15146_vm10 = vmmov %vm15145_vm13  ;;  %1308 = vrot.lane.b32.xlu1 %v3443_v61, %s11074_s9  ;;  %v5547_v17 = vmax.f32 %v5545_v28, %v5546_v56 }
 0x311   : > { %2603 = vst.msk [vmem:[#allocation4 + $0x118] sm:$0xff] %vm15146_vm10, %v2446_v31  ;;  %v5542_v62 = vmax.f32 %v5540_v22, %v5541_v44  ;;  %v5554_v20 = vmax.f32 %v5552_v23, %v5553_v40  ;;  %v5560_v39 = vrot.slane %v5559_v45, 4  ;;  %1310 = vrot.lane.b32.xlu0 %v3444_v41, %s11074_s9  ;;  %v5583_v51 = vrot.slane %v5582_v33, 2 }
 0x312   : > { %v1293_v53 = vpop.permute.xlu1 %1292  ;;  %v3820_v43 = vld [vmem:[#allocation4 + $0x100] sm:$0xff]  ;;  %v5590_v24 = vrot.slane %v5589_v48, 2  ;;  %v5548_v30 = vrot.slane %v5547_v17, 2  ;;  %v5570_v57 = vmax.f32 %v5568_v12, %v5569_v9  ;;  %v5577_v59 = vmax.f32 %v5575_v11, %v5576_v47 }
 0x313   : > { %v5555_v55 = vrot.slane %v5554_v20, 2  ;;  %v5561_v0 = vmax.f32 %v5559_v45, %v5560_v39  ;;  %1449 = vst.msk [vmem:[#allocation4 + $0x120] sm:$0xff] %vm1412_vm7, %v1293_v53  ;;  %v1295_v13 = vpop.permute.xlu0 %1294  ;;  %10699 = vmatprep.mubr.msk.f32.mxu0 %vm3856_vm14, %v3820_v43  ;;  %v3821_v60 = vld [vmem:[#allocation4 + $0x108] sm:$0xff]  ;;  %v5543_v61 = vrot.slane %v5542_v62, 1  ;;  %v5584_v63 = vmax.f32 %v5582_v33, %v5583_v51  ;;  %v3445_v9 = vld [vmem:[#allocation2 + $0x25a] sm:$0xff] }
 0x314   : > { %1450 = vst.msk [vmem:[#allocation4 + $0x128] sm:$0xff] %vm1412_vm7, %v1295_v13  ;;  %2845 = vrot.lane.b32.xlu1 %v2675_v50, %s11078_s13  ;;  %10700 = vmatmul.mubr.msk.f32.gmra.mrb[32].mxu0 %vm3856_vm14, %v3821_v60  ;;  %v5549_v3 = vmax.f32 %v5547_v17, %v5548_v30  ;;  %v5591_v6 = vmax.f32 %v5589_v48, %v5590_v24  ;;  %v5571_v21 = vrot.slane %v5570_v57, 1  ;;  %v5578_v1 = vrot.slane %v5577_v59, 1  ;;  %v3061_v12 = vld [vmem:[#allocation2 + $0x261] sm:$0xff]  ;;  %v2677_v30 = vld [vmem:[#allocation2 + $0x270] sm:$0xff]  ;;  %v2678_v60 = vld [vmem:[#allocation2 + $0x278] sm:$0xff] }
 0x315   : > { %v5556_v27 = vmax.f32 %v5554_v20, %v5555_v55  ;;  %v5562_v41 = vrot.slane %v5561_v0, 2  ;;  %2847 = vrot.lane.b32.xlu0 %v2676_v54, %s11078_s13  ;;  %v5544_v52 = vmax.f32 %v5542_v62, %v5543_v61  ;;  %v5585_v32 = vrot.slane %v5584_v63, 1  ;;  %v3446_v48 = vld [vmem:[#allocation2 + $0x262] sm:$0xff] }
 0x316   : > { %v2830_v2 = vpop.permute.xlu1 %2829  ;;  %v12640_v4 = vpop.f32.mrb[16].mxu0  ;;  %v5550_v19 = vrot.slane %v5549_v3, 1  ;;  %v5592_v14 = vrot.slane %v5591_v6, 1  ;;  %vm15147_vm13 = vcmask 1041409   ;;  %v5572_v22 = vmax.f32 %v5570_v57, %v5571_v21 }
 0x317   : > { %v5557_v46 = vrot.slane %v5556_v27, 1  ;;  %v5563_v15 = vmax.f32 %v5561_v0, %v5562_v41  ;;  %2988 = vst.msk [vmem:[#allocation4 + $0x110] sm:$0xff] %vm2953_vm11, %v2830_v2  ;;  %v2832_v34 = vpop.permute.xlu0 %2831  ;;  %v4199_v29 = vpop.f32.mrb[17].mxu0  ;;  %v5579_v23 = vmax.f32 %v5577_v59, %v5578_v1  ;;  %v5586_v33 = vmax.f32 %v5584_v63, %v5585_v32  ;;  %v3062_v1 = vld [vmem:[#allocation2 + $0x271] sm:$0xff] }
 0x318   : > { %2989 = vst.msk [vmem:[#allocation4 + $0x118] sm:$0xff] %vm2953_vm11, %v2832_v34  ;;  %1693 = vrot.lane.b32.xlu1 %v2675_v50, %s11075_s10  ;;  %v5551_v8 = vmax.f32 %v5549_v3, %v5550_v19  ;;  %v5593_v44 = vmax.f32 %v5591_v6, %v5592_v14  ;;  %vm15148_vm1 = vcmask 1047559   ;;  %vm15149_vm3 = vcmask 261120  }
 0x319   : > { %v5558_v37 = vmax.f32 %v5556_v27, %v5557_v46  ;;  %v5564_v7 = vrot.slane %v5563_v15, 1  ;;  %1695 = vrot.lane.b32.xlu0 %v2676_v54, %s11075_s10  ;;  %vm15150_vm15 = vcmask 220352   ;;  %v4455_v53 = vmul.f32 0.003921569, %v12640_v4 }
 0x31a   : > { %v1678_v10 = vpop.permute.xlu1 %1677  ;;  %v6422_v26 = vsel %vm15147_vm13, %v5551_v8, %v5544_v52  ;;  %vm15151_vm10 = vmmov %vm15150_vm15  ;;  %v4454_v24 = vmul.f32 0.003921569, %v4199_v29 }
 0x31b   : > { %v5565_v18 = vmax.f32 %v5563_v15, %v5564_v7  ;;  %1834 = vst.msk [vmem:[#allocation4 + $0x120] sm:$0xff] %vm1797_vm8, %v1678_v10  ;;  %v1680_v5 = vpop.permute.xlu0 %1679  ;;  %v6423_v28 = vsel %vm6396_vm4, %v5558_v37, %v6422_v26  ;;  %vm15152_vm13 = vmmov %vm15149_vm3  ;;  %v4523_v57 = vadd.f32 %v12596_v49, %v4455_v53  ;;  %v3063_v37 = vld [vmem:[#allocation2 + $0x279] sm:$0xff] }
 0x31c   : > { %1835 = vst.msk [vmem:[#allocation4 + $0x128] sm:$0xff] %vm1797_vm8, %v1680_v5  ;;  %3230 = vrot.lane.b32.xlu1 %v3060_v16, %s11079_s14  ;;  %v4522_v41 = vadd.f32 %v12596_v49, %v4454_v24 }
 0x31d   : > { %v6424_v11 = vsel %vm6398_vm5, %v5565_v18, %v6423_v28  ;;  %3232 = vrot.lane.b32.xlu0 %v3061_v12, %s11079_s14  ;;  %v4587_v19 = vmax.f32 %v4523_v57, 0.0 }
 0x31e   : > { %v6425_v36 = vsel %vm6400_vm6, %v5572_v22, %v6424_v11  ;;  %v3215_v35 = vpop.permute.xlu1 %3214  ;;  %v4586_v34 = vmax.f32 %v4522_v41, 0.0 }
 0x31f   : > { %v6426_v56 = vsel %vm6402_vm2, %v5579_v23, %v6425_v36  ;;  %3373 = vst.msk [vmem:[#allocation4 + $0x110] sm:$0xff] %vm3338_vm12, %v3215_v35  ;;  %v3217_v40 = vpop.permute.xlu0 %3216 }
 0x320   : > { %v6427_v45 = vsel %vm6404_vm0, %v5586_v33, %v6426_v56  ;;  %3374 = vst.msk [vmem:[#allocation4 + $0x118] sm:$0xff] %vm3338_vm12, %v3217_v40  ;;  %2078 = vrot.lane.b32.xlu1 %v3060_v16, %s11076_s11 }
 0x321   : > { %v6428_v31 = vsel %vm15148_vm1, %v5593_v44, %v6427_v45  ;;  %2080 = vrot.lane.b32.xlu0 %v3061_v12, %s11076_s11  ;;  %vm15153_vm1 = vcmask 146552  }
 0x322   : > { %6533 = vst.msk [vmem:[#allocation3 + $0x41] sm:$0xff] %vm15149_vm3, %v6428_v31  ;;  %v2063_v47 = vpop.permute.xlu1 %2062 }
 0x323   : > { %2219 = vst.msk [vmem:[#allocation4 + $0x120] sm:$0xff] %vm2182_vm9, %v2063_v47  ;;  %v2065_v62 = vpop.permute.xlu0 %2064 }
 0x324   : > { %2220 = vst.msk [vmem:[#allocation4 + $0x128] sm:$0xff] %vm2182_vm9, %v2065_v62  ;;  %3615 = vrot.lane.b32.xlu1 %v3445_v9, %s11080_s23 }
 0x325   : > { %3617 = vrot.lane.b32.xlu0 %v3446_v48, %s11080_s23 }
 0x326   : > { %v3600_v17 = vpop.permute.xlu1 %3599 }
 0x327   : > { %3758 = vst.msk [vmem:[#allocation4 + $0x110] sm:$0xff] %vm15150_vm15, %v3600_v17  ;;  %v3602_v20 = vpop.permute.xlu0 %3601  ;;  %vm15154_vm15 = vmmov %vm15153_vm1 }
 0x328   : > { %3759 = vst.msk [vmem:[#allocation4 + $0x118] sm:$0xff] %vm15151_vm10, %v3602_v20  ;;  %2463 = vrot.lane.b32.xlu1 %v3445_v9, %s11077_s12  ;;  %vm15155_vm10 = vmmov %vm15149_vm3  ;;  %v3447_v20 = vld [vmem:[#allocation2 + $0x272] sm:$0xff] }
 0x329   : > { %2465 = vrot.lane.b32.xlu0 %v3446_v48, %s11077_s12  ;;  %v12670_v39 = vld [vmem:[#allocation3 + $0x41] sm:$0xff] }
 0x32a   : > { %v2448_v50 = vpop.permute.xlu1 %2447  ;;  %6888 = vst.msk [vmem:[#allocation5 + $0x50] sm:$0xff] %vm15152_vm13, %v12670_v39  ;;  %v6550_v51 = vld [vmem:[#allocation3 + $0x40] sm:$0xff]  ;;  %vm15156_vm13 = vcmask 254976  }
 0x32b   : > { %2604 = vst.msk [vmem:[#allocation4 + $0x120] sm:$0xff] %vm15153_vm1, %v2448_v50  ;;  %v2450_v43 = vpop.permute.xlu0 %2449  ;;  %v7192_v54 = vld [vmem:[#allocation3 + $0x42] sm:$0xff]  ;;  %vm15157_vm1 = vmmov %vm15156_vm13 }
 0x32c   : > { %6566 = vst.msk [vmem:[#allocation5 + $0x60] sm:$0xff] %vm15149_vm3, %v6550_v51  ;;  %1312 = vrot.lane.b32.xlu1 %v3445_v9, %s11074_s9  ;;  %vm15158_vm3 = vmmov %vm15157_vm1 }
 0x32d   : > { %2605 = vst.msk [vmem:[#allocation4 + $0x128] sm:$0xff] %vm15154_vm15, %v2450_v43  ;;  %1314 = vrot.lane.b32.xlu0 %v3446_v48, %s11074_s9  ;;  %vm15159_vm15 = vmmov %vm15157_vm1 }
 0x32e   : > { %7208 = vst.msk [vmem:[#allocation5 + $0x40] sm:$0xff] %vm15155_vm10, %v7192_v54  ;;  %v1297_v55 = vpop.permute.xlu1 %1296  ;;  %v10680_v0 = vpop.f32.mrb[18].mxu0  ;;  %v3822_v13 = vld [vmem:[#allocation4 + $0x110] sm:$0xff]  ;;  %vm15160_vm10 = vmmov %vm15157_vm1  ;;  %v3448_v54 = vld [vmem:[#allocation2 + $0x27a] sm:$0xff] }
 0x32f   : > { %1451 = vst.msk [vmem:[#allocation4 + $0x130] sm:$0xff] %vm1412_vm7, %v1297_v55  ;;  %v4457_v59 = vmul.f32 0.003921569, %v10680_v0  ;;  %v1299_v61 = vpop.permute.xlu0 %1298  ;;  %v4209_v3 = vpop.f32.mrb[19].mxu0  ;;  %10702 = vmatprep.mubr.msk.f32.mxu0 %vm3856_vm14, %v3822_v13  ;;  %v3823_v27 = vld [vmem:[#allocation4 + $0x118] sm:$0xff] }
 0x330   : > { %1452 = vst.msk [vmem:[#allocation4 + $0x138] sm:$0xff] %vm1412_vm7, %v1299_v61  ;;  %v4456_v63 = vmul.f32 0.003921569, %v4209_v3  ;;  %2849 = vrot.lane.b32.xlu1 %v2677_v30, %s11078_s13  ;;  %10703 = vmatmul.mubr.msk.f32.gmra.mrb[34].mxu0 %vm3856_vm14, %v3823_v27 }
 0x331   : > { %v4525_v2 = vadd.f32 %v12596_v49, %v4457_v59  ;;  %2851 = vrot.lane.b32.xlu0 %v2678_v60, %s11078_s13 }
 0x332   : > { %v4524_v4 = vadd.f32 %v12596_v49, %v4456_v63  ;;  %v2834_v6 = vpop.permute.xlu1 %2833 }
 0x333   : > { %v4589_v46 = vmax.f32 %v4525_v2, 0.0  ;;  %2990 = vst.msk [vmem:[#allocation4 + $0x120] sm:$0xff] %vm2953_vm11, %v2834_v6  ;;  %v2836_v15 = vpop.permute.xlu0 %2835 }
 0x334   : > { %v4588_v29 = vmax.f32 %v4524_v4, 0.0  ;;  %2991 = vst.msk [vmem:[#allocation4 + $0x128] sm:$0xff] %vm2953_vm11, %v2836_v15  ;;  %1697 = vrot.lane.b32.xlu1 %v2677_v30, %s11075_s10 }
 0x335   : > { %v4643_v21 = vmax.f32 %v4587_v19, %v4589_v46  ;;  %1699 = vrot.lane.b32.xlu0 %v2678_v60, %s11075_s10 }
 0x336   : > { %v4642_v52 = vmax.f32 %v4586_v34, %v4588_v29  ;;  %v1682_v8 = vpop.permute.xlu1 %1681 }
 0x337   : > { %v4851_v7 = vcombine.high %v4643_v21, %v4643_v21  ;;  %v4858_v16 = vrot.slane %v4643_v21, %v12337_v38  ;;  %1836 = vst.msk [vmem:[#allocation4 + $0x130] sm:$0xff] %vm1797_vm8, %v1682_v8  ;;  %v1684_v32 = vpop.permute.xlu0 %1683 }
 0x338   : > { %v4834_v10 = vcombine.high %v4642_v52, %v4642_v52  ;;  %v4841_v12 = vrot.slane %v4642_v52, %v12337_v38  ;;  %1837 = vst.msk [vmem:[#allocation4 + $0x138] sm:$0xff] %vm1797_vm8, %v1684_v32  ;;  %3234 = vrot.lane.b32.xlu1 %v3062_v1, %s11079_s14 }
 0x339   : > { %v4865_v14 = vrot.slane %v4851_v7, %v12337_v38  ;;  %v4866_v18 = vcombine.high %v4858_v16, %v4858_v16  ;;  %v5622_v26 = vsel %vm15156_vm13, %v4858_v16, -inf  ;;  %3236 = vrot.lane.b32.xlu0 %v3063_v37, %s11079_s14  ;;  %vm15161_vm13 = vmmov %vm15157_vm1 }
 0x33a   : > { %v5623_v5 = vrot.slane %v5622_v26, 4  ;;  %v4848_v22 = vrot.slane %v4834_v10, %v12337_v38  ;;  %v4849_v28 = vcombine.high %v4841_v12, %v4841_v12  ;;  %v5594_v23 = vsel %vm15157_vm1, %v4841_v12, -inf  ;;  %v3219_v11 = vpop.permute.xlu1 %3218 }
 0x33b   : > { %v4867_v33 = vcombine.high %v4865_v14, %v4865_v14  ;;  %v5629_v36 = vsel %vm15158_vm3, %v4866_v18, -inf  ;;  %v5636_v35 = vsel %vm15159_vm15, %v4865_v14, -inf  ;;  %v5595_v44 = vrot.slane %v5594_v23, 4  ;;  %3375 = vst.msk [vmem:[#allocation4 + $0x120] sm:$0xff] %vm3338_vm12, %v3219_v11  ;;  %v3221_v56 = vpop.permute.xlu0 %3220  ;;  %vm15162_vm3 = vmmov %vm15157_vm1 }
 0x33c   : > { %v5624_v40 = vmax.f32 %v5622_v26, %v5623_v5  ;;  %v5630_v45 = vrot.slane %v5629_v36, 4  ;;  %v5637_v31 = vrot.slane %v5636_v35, 4  ;;  %v4850_v9 = vcombine.high %v4848_v22, %v4848_v22  ;;  %3376 = vst.msk [vmem:[#allocation4 + $0x128] sm:$0xff] %vm3338_vm12, %v3221_v56  ;;  %2082 = vrot.lane.b32.xlu1 %v3062_v1, %s11076_s11 }
 0x33d   : > { %v5643_v47 = vsel %vm15160_vm10, %v4867_v33, -inf  ;;  %v5596_v48 = vmax.f32 %v5594_v23, %v5595_v44  ;;  %v5601_v62 = vsel %vm15161_vm13, %v4849_v28, -inf  ;;  %v5608_v17 = vsel %vm15157_vm1, %v4848_v22, -inf  ;;  %2084 = vrot.lane.b32.xlu0 %v3063_v37, %s11076_s11 }
 0x33e   : > { %v5631_v50 = vmax.f32 %v5629_v36, %v5630_v45  ;;  %v5638_v51 = vmax.f32 %v5636_v35, %v5637_v31  ;;  %v5644_v53 = vrot.slane %v5643_v47, 4  ;;  %v2067_v43 = vpop.permute.xlu1 %2066  ;;  %v5602_v30 = vrot.slane %v5601_v62, 4  ;;  %v2679_v36 = vld [vmem:[#allocation2 + $0x288] sm:$0xff] }
 0x33f   : > { %v5597_v24 = vrot.slane %v5596_v48, 2  ;;  %v5609_v55 = vrot.slane %v5608_v17, 4  ;;  %v5615_v0 = vsel %vm15162_vm3, %v4850_v9, -inf  ;;  %2221 = vst.msk [vmem:[#allocation4 + $0x130] sm:$0xff] %vm2182_vm9, %v2067_v43  ;;  %v2069_v13 = vpop.permute.xlu0 %2068  ;;  %v5625_v60 = vrot.slane %v5624_v40, 2 }
 0x340   : > { %v5632_v57 = vrot.slane %v5631_v50, 2  ;;  %v5645_v59 = vmax.f32 %v5643_v47, %v5644_v53  ;;  %2222 = vst.msk [vmem:[#allocation4 + $0x138] sm:$0xff] %vm2182_vm9, %v2069_v13  ;;  %3619 = vrot.lane.b32.xlu1 %v3447_v20, %s11080_s23  ;;  %v5603_v3 = vmax.f32 %v5601_v62, %v5602_v30  ;;  %v5616_v41 = vrot.slane %v5615_v0, 4  ;;  %v3064_v13 = vld [vmem:[#allocation2 + $0x289] sm:$0xff] }
 0x341   : > { %v5598_v61 = vmax.f32 %v5596_v48, %v5597_v24  ;;  %v5610_v27 = vmax.f32 %v5608_v17, %v5609_v55  ;;  %3621 = vrot.lane.b32.xlu0 %v3448_v54, %s11080_s23  ;;  %v5639_v63 = vrot.slane %v5638_v51, 2  ;;  %vm15163_vm15 = vcmask 220352  }
 0x342   : > { %v3604_v2 = vpop.permute.xlu1 %3603  ;;  %v5646_v4 = vrot.slane %v5645_v59, 2  ;;  %v5604_v6 = vrot.slane %v5603_v3, 2  ;;  %v5617_v46 = vmax.f32 %v5615_v0, %v5616_v41  ;;  %v5626_v34 = vmax.f32 %v5624_v40, %v5625_v60  ;;  %vm15164_vm10 = vmmov %vm15163_vm15  ;;  %v2680_v40 = vld [vmem:[#allocation2 + $0x290] sm:$0xff] }
 0x343   : > { %v5611_v19 = vrot.slane %v5610_v27, 2  ;;  %3760 = vst.msk [vmem:[#allocation4 + $0x120] sm:$0xff] %vm15163_vm15, %v3604_v2  ;;  %v3606_v15 = vpop.permute.xlu0 %3605  ;;  %v5633_v29 = vmax.f32 %v5631_v50, %v5632_v57  ;;  %v5599_v21 = vrot.slane %v5598_v61, 1  ;;  %v5640_v37 = vmax.f32 %v5638_v51, %v5639_v63  ;;  %v3065_v57 = vld [vmem:[#allocation2 + $0x291] sm:$0xff] }
 0x344   : > { %3761 = vst.msk [vmem:[#allocation4 + $0x128] sm:$0xff] %vm15164_vm10, %v3606_v15  ;;  %2467 = vrot.lane.b32.xlu1 %v3447_v20, %s11077_s12  ;;  %v5605_v1 = vmax.f32 %v5603_v3, %v5604_v6  ;;  %v5618_v8 = vrot.slane %v5617_v46, 2  ;;  %v5647_v32 = vmax.f32 %v5645_v59, %v5646_v4  ;;  %vm15165_vm13 = vcmask 146552   ;;  %v3449_v63 = vld [vmem:[#allocation2 + $0x28a] sm:$0xff]  ;;  %v3450_v6 = vld [vmem:[#allocation2 + $0x292] sm:$0xff] }
 0x345   : > { %v5612_v52 = vmax.f32 %v5610_v27, %v5611_v19  ;;  %2469 = vrot.lane.b32.xlu0 %v3448_v54, %s11077_s12  ;;  %v5627_v5 = vrot.slane %v5626_v34, 1  ;;  %v5634_v22 = vrot.slane %v5633_v29, 1  ;;  %vm15166_vm1 = vmmov %vm15165_vm13  ;;  %v5600_v28 = vmax.f32 %v5598_v61, %v5599_v21 }
 0x346   : > { %v2452_v7 = vpop.permute.xlu1 %2451  ;;  %v10683_v16 = vpop.f32.mrb[20].mxu0  ;;  %v5606_v10 = vrot.slane %v5605_v1, 1  ;;  %v5619_v14 = vmax.f32 %v5617_v46, %v5618_v8  ;;  %v5641_v35 = vrot.slane %v5640_v37, 1  ;;  %v5648_v45 = vrot.slane %v5647_v32, 1 }
 0x347   : > { %v5613_v12 = vrot.slane %v5612_v52, 1  ;;  %2606 = vst.msk [vmem:[#allocation4 + $0x130] sm:$0xff] %vm15165_vm13, %v2452_v7  ;;  %v2454_v18 = vpop.permute.xlu0 %2453  ;;  %v4219_v26 = vpop.f32.mrb[21].mxu0  ;;  %vm15167_vm3 = vcmask 1041409   ;;  %v5628_v62 = vmax.f32 %v5626_v34, %v5627_v5  ;;  %vm15168_vm15 = vcmask 1047559  }
 0x348   : > { %2607 = vst.msk [vmem:[#allocation4 + $0x138] sm:$0xff] %vm15166_vm1, %v2454_v18  ;;  %1316 = vrot.lane.b32.xlu1 %v3447_v20, %s11074_s9  ;;  %v5607_v23 = vmax.f32 %v5605_v1, %v5606_v10  ;;  %v5620_v33 = vrot.slane %v5619_v14, 1  ;;  %v5635_v20 = vmax.f32 %v5633_v29, %v5634_v22  ;;  %v5642_v51 = vmax.f32 %v5640_v37, %v5641_v35 }
 0x349   : > { %v5614_v11 = vmax.f32 %v5612_v52, %v5613_v12  ;;  %1318 = vrot.lane.b32.xlu0 %v3448_v54, %s11074_s9  ;;  %v5649_v54 = vmax.f32 %v5647_v32, %v5648_v45  ;;  %vm15169_vm10 = vcmask 261120   ;;  %v4459_v27 = vmul.f32 0.003921569, %v10683_v16 }
 0x34a   : > { %v1301_v44 = vpop.permute.xlu1 %1300  ;;  %v3824_v56 = vld [vmem:[#allocation4 + $0x120] sm:$0xff]  ;;  %v5621_v31 = vmax.f32 %v5619_v14, %v5620_v33  ;;  %v6429_v9 = vsel %vm15167_vm3, %v5607_v23, %v5600_v28  ;;  %v4458_v41 = vmul.f32 0.003921569, %v4219_v26  ;;  %vm15170_vm13 = vmmov %vm15169_vm10 }
 0x34b   : > { %1453 = vst.msk [vmem:[#allocation4 + $0x140] sm:$0xff] %vm1412_vm7, %v1301_v44  ;;  %v1303_v47 = vpop.permute.xlu0 %1302  ;;  %10705 = vmatprep.mubr.msk.f32.mxu0 %vm3856_vm14, %v3824_v56  ;;  %v3825_v48 = vld [vmem:[#allocation4 + $0x128] sm:$0xff]  ;;  %v6430_v17 = vsel %vm6396_vm4, %v5614_v11, %v6429_v9  ;;  %vm15171_vm1 = vmmov %vm15169_vm10  ;;  %v4527_v29 = vadd.f32 %v12596_v49, %v4459_v27 }
 0x34c   : > { %1454 = vst.msk [vmem:[#allocation4 + $0x148] sm:$0xff] %vm1412_vm7, %v1303_v47  ;;  %2853 = vrot.lane.b32.xlu1 %v2679_v36, %s11078_s13  ;;  %10706 = vmatmul.mubr.msk.f32.gmra.mrb[36].mxu0 %vm3856_vm14, %v3825_v48  ;;  %v6431_v50 = vsel %vm6398_vm5, %v5621_v31, %v6430_v17  ;;  %vm15172_vm3 = vmmov %vm15171_vm1  ;;  %v4526_v52 = vadd.f32 %v12596_v49, %v4458_v41  ;;  %v2682_v31 = vld [vmem:[#allocation2 + $0x2a8] sm:$0xff] }
 0x34d   : > { %2855 = vrot.lane.b32.xlu0 %v2680_v40, %s11078_s13  ;;  %v6432_v53 = vsel %vm6400_vm6, %v5628_v62, %v6431_v50  ;;  %v4591_v10 = vmax.f32 %v4527_v29, 0.0  ;;  %v3066_v29 = vld [vmem:[#allocation2 + $0x2a1] sm:$0xff] }
 0x34e   : > { %v2838_v43 = vpop.permute.xlu1 %2837  ;;  %v6433_v24 = vsel %vm6402_vm2, %v5635_v20, %v6432_v53  ;;  %v4590_v14 = vmax.f32 %v4526_v52, 0.0 }
 0x34f   : > { %2992 = vst.msk [vmem:[#allocation4 + $0x130] sm:$0xff] %vm2953_vm11, %v2838_v43  ;;  %v2840_v30 = vpop.permute.xlu0 %2839  ;;  %v6434_v55 = vsel %vm6404_vm0, %v5642_v51, %v6433_v24 }
 0x350   : > { %2993 = vst.msk [vmem:[#allocation4 + $0x138] sm:$0xff] %vm2953_vm11, %v2840_v30  ;;  %1701 = vrot.lane.b32.xlu1 %v2679_v36, %s11075_s10  ;;  %v6435_v0 = vsel %vm15168_vm15, %v5649_v54, %v6434_v55  ;;  %vm15173_vm15 = vcmask 220352   ;;  %v2681_v36 = vld [vmem:[#allocation2 + $0x2a0] sm:$0xff] }
 0x351   : > { %1703 = vrot.lane.b32.xlu0 %v2680_v40, %s11075_s10  ;;  %6534 = vst.msk [vmem:[#allocation3 + $0x51] sm:$0xff] %vm15169_vm10, %v6435_v0  ;;  %vm15174_vm10 = vmmov %vm15173_vm15 }
 0x352   : > { %v1686_v60 = vpop.permute.xlu1 %1685 }
 0x353   : > { %1838 = vst.msk [vmem:[#allocation4 + $0x140] sm:$0xff] %vm1797_vm8, %v1686_v60  ;;  %v1688_v59 = vpop.permute.xlu0 %1687 }
 0x354   : > { %1839 = vst.msk [vmem:[#allocation4 + $0x148] sm:$0xff] %vm1797_vm8, %v1688_v59  ;;  %3238 = vrot.lane.b32.xlu1 %v3064_v13, %s11079_s14 }
 0x355   : > { %3240 = vrot.lane.b32.xlu0 %v3065_v57, %s11079_s14 }
 0x356   : > { %v3223_v61 = vpop.permute.xlu1 %3222 }
 0x357   : > { %3377 = vst.msk [vmem:[#allocation4 + $0x130] sm:$0xff] %vm3338_vm12, %v3223_v61  ;;  %v3225_v3 = vpop.permute.xlu0 %3224 }
 0x358   : > { %3378 = vst.msk [vmem:[#allocation4 + $0x138] sm:$0xff] %vm3338_vm12, %v3225_v3  ;;  %2086 = vrot.lane.b32.xlu1 %v3064_v13, %s11076_s11  ;;  %v12753_v2 = vld [vmem:[#allocation3 + $0x51] sm:$0xff] }
 0x359   : > { %2088 = vrot.lane.b32.xlu0 %v3065_v57, %s11076_s11  ;;  %6889 = vst.msk [vmem:[#allocation5 + $0x68] sm:$0xff] %vm15170_vm13, %v12753_v2  ;;  %v6551_v19 = vld [vmem:[#allocation3 + $0x50] sm:$0xff]  ;;  %vm15175_vm13 = vcmask 146552  }
 0x35a   : > { %v2071_v4 = vpop.permute.xlu1 %2070  ;;  %6567 = vst.msk [vmem:[#allocation5 + $0x78] sm:$0xff] %vm15171_vm1, %v6551_v19  ;;  %v7193_v34 = vld [vmem:[#allocation3 + $0x52] sm:$0xff]  ;;  %vm15176_vm1 = vmmov %vm15175_vm13 }
 0x35b   : > { %2223 = vst.msk [vmem:[#allocation4 + $0x140] sm:$0xff] %vm2182_vm9, %v2071_v4  ;;  %v2073_v46 = vpop.permute.xlu0 %2072  ;;  %v10686_v15 = vpop.f32.mrb[22].mxu0 }
 0x35c   : > { %2224 = vst.msk [vmem:[#allocation4 + $0x148] sm:$0xff] %vm2182_vm9, %v2073_v46  ;;  %v4461_v21 = vmul.f32 0.003921569, %v10686_v15  ;;  %3623 = vrot.lane.b32.xlu1 %v3449_v63, %s11080_s23  ;;  %v4229_v1 = vpop.f32.mrb[23].mxu0 }
 0x35d   : > { %7209 = vst.msk [vmem:[#allocation5 + $0x58] sm:$0xff] %vm15172_vm3, %v7193_v34  ;;  %v4460_v8 = vmul.f32 0.003921569, %v4229_v1  ;;  %3625 = vrot.lane.b32.xlu0 %v3450_v6, %s11080_s23  ;;  %vm15177_vm3 = vcmask 254976  }
 0x35e   : > { %v4529_v37 = vadd.f32 %v12596_v49, %v4461_v21  ;;  %v3608_v7 = vpop.permute.xlu1 %3607 }
 0x35f   : > { %v4528_v16 = vadd.f32 %v12596_v49, %v4460_v8  ;;  %3762 = vst.msk [vmem:[#allocation4 + $0x130] sm:$0xff] %vm15173_vm15, %v3608_v7  ;;  %v3610_v32 = vpop.permute.xlu0 %3609  ;;  %vm15178_vm15 = vmmov %vm15177_vm3  ;;  %v3067_v7 = vld [vmem:[#allocation2 + $0x2a9] sm:$0xff] }
 0x360   : > { %v4593_v12 = vmax.f32 %v4529_v37, 0.0  ;;  %3763 = vst.msk [vmem:[#allocation4 + $0x138] sm:$0xff] %vm15174_vm10, %v3610_v32  ;;  %2471 = vrot.lane.b32.xlu1 %v3449_v63, %s11077_s12  ;;  %vm15179_vm10 = vmmov %vm15177_vm3 }
 0x361   : > { %v4592_v18 = vmax.f32 %v4528_v16, 0.0  ;;  %2473 = vrot.lane.b32.xlu0 %v3450_v6, %s11077_s12 }
 0x362   : > { %v4645_v26 = vmax.f32 %v4591_v10, %v4593_v12  ;;  %v2456_v5 = vpop.permute.xlu1 %2455 }
 0x363   : > { %v4644_v22 = vmax.f32 %v4590_v14, %v4592_v18  ;;  %2608 = vst.msk [vmem:[#allocation4 + $0x140] sm:$0xff] %vm15175_vm13, %v2456_v5  ;;  %v2458_v28 = vpop.permute.xlu0 %2457  ;;  %vm15180_vm13 = vmmov %vm15177_vm3 }
 0x364   : > { %v4885_v49 = vcombine.high %v4645_v26, %v4645_v26  ;;  %v4892_v23 = vrot.slane %v4645_v26, %v12337_v38  ;;  %2609 = vst.msk [vmem:[#allocation4 + $0x148] sm:$0xff] %vm15176_vm1, %v2458_v28  ;;  %1320 = vrot.lane.b32.xlu1 %v3449_v63, %s11074_s9  ;;  %vm15181_vm1 = vmmov %vm15177_vm3 }
 0x365   : > { %v4868_v11 = vcombine.high %v4644_v22, %v4644_v22  ;;  %v4875_v33 = vrot.slane %v4644_v22, %v12337_v38  ;;  %1322 = vrot.lane.b32.xlu0 %v3450_v6, %s11074_s9 }
 0x366   : > { %v4899_v35 = vrot.slane %v4885_v49, %v12337_v38  ;;  %v4900_v44 = vcombine.high %v4892_v23, %v4892_v23  ;;  %v5678_v56 = vsel %vm15177_vm3, %v4892_v23, -inf  ;;  %v1305_v40 = vpop.permute.xlu1 %1304  ;;  %v3826_v45 = vld [vmem:[#allocation4 + $0x130] sm:$0xff]  ;;  %vm15182_vm3 = vmmov %vm15181_vm1 }
 0x367   : > { %v5679_v9 = vrot.slane %v5678_v56, 4  ;;  %v4882_v47 = vrot.slane %v4868_v11, %v12337_v38  ;;  %v4883_v48 = vcombine.high %v4875_v33, %v4875_v33  ;;  %v5650_v62 = vsel %vm15178_vm15, %v4875_v33, -inf  ;;  %1455 = vst.msk [vmem:[#allocation4 + $0x150] sm:$0xff] %vm1412_vm7, %v1305_v40  ;;  %v1307_v17 = vpop.permute.xlu0 %1306  ;;  %10708 = vmatprep.mubr.msk.f32.mxu0 %vm3856_vm14, %v3826_v45  ;;  %v3827_v20 = vld [vmem:[#allocation4 + $0x138] sm:$0xff]  ;;  %vm15183_vm15 = vmmov %vm15181_vm1 }
 0x368   : > { %v4901_v50 = vcombine.high %v4899_v35, %v4899_v35  ;;  %v5685_v51 = vsel %vm15179_vm10, %v4900_v44, -inf  ;;  %v5692_v53 = vsel %vm15180_vm13, %v4899_v35, -inf  ;;  %v5651_v43 = vrot.slane %v5650_v62, 4  ;;  %1456 = vst.msk [vmem:[#allocation4 + $0x158] sm:$0xff] %vm1412_vm7, %v1307_v17  ;;  %2857 = vrot.lane.b32.xlu1 %v2681_v36, %s11078_s13  ;;  %10709 = vmatmul.mubr.msk.f32.gmra.mrb[38].mxu0 %vm3856_vm14, %v3827_v20  ;;  %vm15184_vm10 = vmmov %vm15181_vm1 }
 0x369   : > { %v5680_v54 = vmax.f32 %v5678_v56, %v5679_v9  ;;  %v5686_v24 = vrot.slane %v5685_v51, 4  ;;  %v5693_v30 = vrot.slane %v5692_v53, 4  ;;  %v4884_v55 = vcombine.high %v4882_v47, %v4882_v47  ;;  %2859 = vrot.lane.b32.xlu0 %v2682_v31, %s11078_s13  ;;  %v3451_v9 = vld [vmem:[#allocation2 + $0x2a2] sm:$0xff] }
 0x36a   : > { %v5699_v0 = vsel %vm15181_vm1, %v4901_v50, -inf  ;;  %v5652_v13 = vmax.f32 %v5650_v62, %v5651_v43  ;;  %v5657_v60 = vsel %vm15182_vm3, %v4883_v48, -inf  ;;  %v5664_v57 = vsel %vm15183_vm15, %v4882_v47, -inf  ;;  %v2842_v59 = vpop.permute.xlu1 %2841  ;;  %v3452_v50 = vld [vmem:[#allocation2 + $0x2aa] sm:$0xff] }
 0x36b   : > { %v5687_v61 = vmax.f32 %v5685_v51, %v5686_v24  ;;  %v5694_v3 = vmax.f32 %v5692_v53, %v5693_v30  ;;  %v5700_v27 = vrot.slane %v5699_v0, 4  ;;  %2994 = vst.msk [vmem:[#allocation4 + $0x140] sm:$0xff] %vm2953_vm11, %v2842_v59  ;;  %v2844_v41 = vpop.permute.xlu0 %2843  ;;  %v5658_v4 = vrot.slane %v5657_v60, 4 }
 0x36c   : > { %v5653_v63 = vrot.slane %v5652_v13, 2  ;;  %v5665_v6 = vrot.slane %v5664_v57, 4  ;;  %v5671_v19 = vsel %vm15184_vm10, %v4884_v55, -inf  ;;  %2995 = vst.msk [vmem:[#allocation4 + $0x148] sm:$0xff] %vm2953_vm11, %v2844_v41  ;;  %1705 = vrot.lane.b32.xlu1 %v2681_v36, %s11075_s10  ;;  %v5681_v46 = vrot.slane %v5680_v54, 2 }
 0x36d   : > { %v5688_v15 = vrot.slane %v5687_v61, 2  ;;  %v5701_v34 = vmax.f32 %v5699_v0, %v5700_v27  ;;  %1707 = vrot.lane.b32.xlu0 %v2682_v31, %s11075_s10  ;;  %v5659_v1 = vmax.f32 %v5657_v60, %v5658_v4  ;;  %v5672_v8 = vrot.slane %v5671_v19, 4 }
 0x36e   : > { %v5654_v21 = vmax.f32 %v5652_v13, %v5653_v63  ;;  %v5666_v52 = vmax.f32 %v5664_v57, %v5665_v6  ;;  %v1690_v37 = vpop.permute.xlu1 %1689  ;;  %v5695_v16 = vrot.slane %v5694_v3, 2  ;;  %v5682_v26 = vmax.f32 %v5680_v54, %v5681_v46 }
 0x36f   : > { %1840 = vst.msk [vmem:[#allocation4 + $0x150] sm:$0xff] %vm1797_vm8, %v1690_v37  ;;  %v1692_v32 = vpop.permute.xlu0 %1691  ;;  %v5702_v10 = vrot.slane %v5701_v34, 2  ;;  %v5660_v12 = vrot.slane %v5659_v1, 2  ;;  %v5673_v18 = vmax.f32 %v5671_v19, %v5672_v8  ;;  %v5689_v5 = vmax.f32 %v5687_v61, %v5688_v15  ;;  %v2683_v15 = vld [vmem:[#allocation2 + $0x2b8] sm:$0xff] }
 0x370   : > { %v5667_v14 = vrot.slane %v5666_v52, 2  ;;  %1841 = vst.msk [vmem:[#allocation4 + $0x158] sm:$0xff] %vm1797_vm8, %v1692_v32  ;;  %3242 = vrot.lane.b32.xlu1 %v3066_v29, %s11079_s14  ;;  %v5655_v22 = vrot.slane %v5654_v21, 1  ;;  %v5696_v33 = vmax.f32 %v5694_v3, %v5695_v16  ;;  %v5683_v45 = vrot.slane %v5682_v26, 1 }
 0x371   : > { %3244 = vrot.lane.b32.xlu0 %v3067_v7, %s11079_s14  ;;  %v5661_v28 = vmax.f32 %v5659_v1, %v5660_v12  ;;  %v5674_v23 = vrot.slane %v5673_v18, 2  ;;  %v5703_v35 = vmax.f32 %v5701_v34, %v5702_v10  ;;  %v5690_v31 = vrot.slane %v5689_v5, 1  ;;  %v3068_v10 = vld [vmem:[#allocation2 + $0x2b9] sm:$0xff]  ;;  %v512_v12 = vld [vmem:[%s11313_s30 + $0x1f0] sm:$0xff] }
 0x372   : > { %v5668_v49 = vmax.f32 %v5666_v52, %v5667_v14  ;;  %v3227_v11 = vpop.permute.xlu1 %3226  ;;  %v5656_v47 = vmax.f32 %v5654_v21, %v5655_v22  ;;  %v5697_v51 = vrot.slane %v5696_v33, 1  ;;  %vm15185_vm13 = vcmask 1041409   ;;  %v2684_v21 = vld [vmem:[#allocation2 + $0x2c0] sm:$0xff] }
 0x373   : > { %3379 = vst.msk [vmem:[#allocation4 + $0x140] sm:$0xff] %vm3338_vm12, %v3227_v11  ;;  %v3229_v36 = vpop.permute.xlu0 %3228  ;;  %v5662_v44 = vrot.slane %v5661_v28, 1  ;;  %v5675_v40 = vmax.f32 %v5673_v18, %v5674_v23  ;;  %v5704_v54 = vrot.slane %v5703_v35, 1  ;;  %v5684_v0 = vmax.f32 %v5682_v26, %v5683_v45  ;;  %v3069_v18 = vld [vmem:[#allocation2 + $0x2c1] sm:$0xff]  ;;  %v513_v26 = vld [vmem:[%s11313_s30 + $0x1f8] sm:$0xff] }
 0x374   : > { %v5669_v56 = vrot.slane %v5668_v49, 1  ;;  %3380 = vst.msk [vmem:[#allocation4 + $0x148] sm:$0xff] %vm3338_vm12, %v3229_v36  ;;  %2090 = vrot.lane.b32.xlu1 %v3066_v29, %s11076_s11  ;;  %v5691_v60 = vmax.f32 %v5689_v5, %v5690_v31  ;;  %v5698_v61 = vmax.f32 %v5696_v33, %v5697_v51  ;;  %vm15186_vm1 = vcmask 220352   ;;  %v3453_v11 = vld [vmem:[#allocation2 + $0x2ba] sm:$0xff]  ;;  %v3454_v36 = vld [vmem:[#allocation2 + $0x2c2] sm:$0xff] }
 0x375   : > { %2092 = vrot.lane.b32.xlu0 %v3067_v7, %s11076_s11  ;;  %v5663_v48 = vmax.f32 %v5661_v28, %v5662_v44  ;;  %v5676_v17 = vrot.slane %v5675_v40, 1  ;;  %v5705_v41 = vmax.f32 %v5703_v35, %v5704_v54  ;;  %vm15187_vm3 = vmmov %vm15186_vm1  ;;  %vm15188_vm15 = vcmask 1047559  }
 0x376   : > { %v5670_v62 = vmax.f32 %v5668_v49, %v5669_v56  ;;  %v2075_v20 = vpop.permute.xlu1 %2074  ;;  %vm15189_vm10 = vcmask 261120   ;;  %v12863_v56 = vld [vmem:[%s15113_s6] ss:$0 sm:$0xff] }
 0x377   : > { %2225 = vst.msk [vmem:[#allocation4 + $0x150] sm:$0xff] %vm2182_vm9, %v2075_v20  ;;  %v2077_v53 = vpop.permute.xlu0 %2076  ;;  %v12806_v43 = vpop.f32.mrb[24].mxu0  ;;  %v5677_v24 = vmax.f32 %v5675_v40, %v5676_v17  ;;  %v6436_v30 = vsel %vm15185_vm13, %v5663_v48, %v5656_v47  ;;  %vm15190_vm13 = vcmask 146552  }
 0x378   : > { %2226 = vst.msk [vmem:[#allocation4 + $0x158] sm:$0xff] %vm2182_vm9, %v2077_v53  ;;  %3627 = vrot.lane.b32.xlu1 %v3451_v9, %s11080_s23  ;;  %v12811_v55 = vpop.f32.mrb[25].mxu0  ;;  %v6437_v13 = vsel %vm6396_vm4, %v5670_v62, %v6436_v30  ;;  %v4463_v49 = vmul.f32 0.003921569, %v12806_v43 }
 0x379   : > { %3629 = vrot.lane.b32.xlu0 %v3452_v50, %s11080_s23  ;;  %v6438_v57 = vsel %vm6398_vm5, %v5677_v24, %v6437_v13  ;;  %v4462_v23 = vmul.f32 0.003921569, %v12811_v55 }
 0x37a   : > { %v3612_v59 = vpop.permute.xlu1 %3611  ;;  %v6439_v3 = vsel %vm6400_vm6, %v5684_v0, %v6438_v57  ;;  %v4531_v40 = vadd.f32 %v12863_v56, %v4463_v49 }
 0x37b   : > { %3764 = vst.msk [vmem:[#allocation4 + $0x140] sm:$0xff] %vm15186_vm1, %v3612_v59  ;;  %v3614_v27 = vpop.permute.xlu0 %3613  ;;  %v6440_v63 = vsel %vm6402_vm2, %v5691_v60, %v6439_v3  ;;  %vm15191_vm1 = vmmov %vm15190_vm13  ;;  %v2685_v59 = vld [vmem:[#allocation2 + $0x2d0] sm:$0xff] }
 0x37c   : > { %3765 = vst.msk [vmem:[#allocation4 + $0x148] sm:$0xff] %vm15187_vm3, %v3614_v27  ;;  %2475 = vrot.lane.b32.xlu1 %v3451_v9, %s11077_s12  ;;  %v6441_v4 = vsel %vm6404_vm0, %v5698_v61, %v6440_v63  ;;  %vm15192_vm3 = vmmov %vm15189_vm10 }
 0x37d   : > { %2477 = vrot.lane.b32.xlu0 %v3452_v50, %s11077_s12  ;;  %v6442_v6 = vsel %vm15188_vm15, %v5705_v41, %v6441_v4  ;;  %vm15193_vm15 = vmmov %vm15192_vm3  ;;  %v2686_v4 = vld [vmem:[#allocation2 + $0x2d8] sm:$0xff] }
 0x37e   : > { %v2460_v19 = vpop.permute.xlu1 %2459  ;;  %6535 = vst.msk [vmem:[#allocation3 + $0x61] sm:$0xff] %vm15189_vm10, %v6442_v6  ;;  %vm15194_vm10 = vmmov %vm15192_vm3 }
 0x37f   : > { %2610 = vst.msk [vmem:[#allocation4 + $0x150] sm:$0xff] %vm15190_vm13, %v2460_v19  ;;  %v2462_v46 = vpop.permute.xlu0 %2461  ;;  %vm15195_vm13 = vcmask 23552  }
 0x380   : > { %2611 = vst.msk [vmem:[#allocation4 + $0x158] sm:$0xff] %vm15191_vm1, %v2462_v46  ;;  %1324 = vrot.lane.b32.xlu1 %v3451_v9, %s11074_s9  ;;  %vm15196_vm1 = vmmov %vm15195_vm13  ;;  %v4530_v9 = vadd.f32 %v12863_v56, %v4462_v23 }
 0x381   : > { %1326 = vrot.lane.b32.xlu0 %v3452_v50, %s11074_s9  ;;  %577 = vst.msk [vmem:[#allocation2 + $0x331] sm:$0xff] %vm15195_vm13, %v512_v12  ;;  %v4595_v50 = vmax.f32 %v4531_v40, 0.0 }
 0x382   : > { %v1309_v34 = vpop.permute.xlu1 %1308  ;;  %v3828_v29 = vld [vmem:[#allocation4 + $0x140] sm:$0xff]  ;;  %578 = vst.msk [vmem:[#allocation2 + $0x339] sm:$0xff] %vm15196_vm1, %v513_v26  ;;  %v4594_v53 = vmax.f32 %v4530_v9, 0.0  ;;  %vm15201_vm1 = vcmask 254976  }
 0x383   : > { %1457 = vst.msk [vmem:[#allocation4 + $0x160] sm:$0xff] %vm1412_vm7, %v1309_v34  ;;  %v1311_v1 = vpop.permute.xlu0 %1310  ;;  %10711 = vmatprep.mubr.msk.f32.mxu0 %vm3856_vm14, %v3828_v29  ;;  %v3829_v52 = vld [vmem:[#allocation4 + $0x148] sm:$0xff] }
 0x384   : > { %1458 = vst.msk [vmem:[#allocation4 + $0x168] sm:$0xff] %vm1412_vm7, %v1311_v1  ;;  %2861 = vrot.lane.b32.xlu1 %v2683_v15, %s11078_s13  ;;  %10712 = vmatmul.mubr.msk.f32.gmra.mrb[40].mxu0 %vm3856_vm14, %v3829_v52 }
 0x385   : > { %2863 = vrot.lane.b32.xlu0 %v2684_v21, %s11078_s13  ;;  %v12835_v37 = vld [vmem:[#allocation3 + $0x61] sm:$0xff] }
 0x386   : > { %v2846_v8 = vpop.permute.xlu1 %2845  ;;  %6890 = vst.msk [vmem:[#allocation5 + $0x80] sm:$0xff] %vm15192_vm3, %v12835_v37  ;;  %v6552_v16 = vld [vmem:[#allocation3 + $0x60] sm:$0xff]  ;;  %vm15197_vm3 = vcmask 220352  }
 0x387   : > { %2996 = vst.msk [vmem:[#allocation4 + $0x150] sm:$0xff] %vm2953_vm11, %v2846_v8  ;;  %v2848_v7 = vpop.permute.xlu0 %2847  ;;  %v7194_v32 = vld [vmem:[#allocation3 + $0x62] sm:$0xff] }
 0x388   : > { %2997 = vst.msk [vmem:[#allocation4 + $0x158] sm:$0xff] %vm2953_vm11, %v2848_v7  ;;  %1709 = vrot.lane.b32.xlu1 %v2683_v15, %s11075_s10 }
 0x389   : > { %6568 = vst.msk [vmem:[#allocation5 + $0x90] sm:$0xff] %vm15193_vm15, %v6552_v16  ;;  %1711 = vrot.lane.b32.xlu0 %v2684_v21, %s11075_s10  ;;  %vm15198_vm15 = vmmov %vm15197_vm3 }
 0x38a   : > { %7210 = vst.msk [vmem:[#allocation5 + $0x70] sm:$0xff] %vm15194_vm10, %v7194_v32  ;;  %v1694_v14 = vpop.permute.xlu1 %1693  ;;  %vm15199_vm10 = vcmask 146552  }
 0x38b   : > { %1842 = vst.msk [vmem:[#allocation4 + $0x160] sm:$0xff] %vm1797_vm8, %v1694_v14  ;;  %v1696_v5 = vpop.permute.xlu0 %1695  ;;  %vm15200_vm13 = vmmov %vm15199_vm10 }
 0x38c   : > { %1843 = vst.msk [vmem:[#allocation4 + $0x168] sm:$0xff] %vm1797_vm8, %v1696_v5  ;;  %3246 = vrot.lane.b32.xlu1 %v3068_v10, %s11079_s14 }
 0x38d   : > { %3248 = vrot.lane.b32.xlu0 %v3069_v18, %s11079_s14 }
 0x38e   : > { %v3231_v22 = vpop.permute.xlu1 %3230 }
 0x38f   : > { %3381 = vst.msk [vmem:[#allocation4 + $0x150] sm:$0xff] %vm3338_vm12, %v3231_v22  ;;  %v3233_v28 = vpop.permute.xlu0 %3232 }
 0x390   : > { %3382 = vst.msk [vmem:[#allocation4 + $0x158] sm:$0xff] %vm3338_vm12, %v3233_v28  ;;  %2094 = vrot.lane.b32.xlu1 %v3068_v10, %s11076_s11 }
 0x391   : > { %2096 = vrot.lane.b32.xlu0 %v3069_v18, %s11076_s11 }
 0x392   : > { %v2079_v33 = vpop.permute.xlu1 %2078 }
 0x393   : > { %2227 = vst.msk [vmem:[#allocation4 + $0x160] sm:$0xff] %vm2182_vm9, %v2079_v33  ;;  %v2081_v35 = vpop.permute.xlu0 %2080  ;;  %v10692_v44 = vpop.f32.mrb[26].mxu0 }
 0x394   : > { %2228 = vst.msk [vmem:[#allocation4 + $0x168] sm:$0xff] %vm2182_vm9, %v2081_v35  ;;  %v4465_v45 = vmul.f32 0.003921569, %v10692_v44  ;;  %3631 = vrot.lane.b32.xlu1 %v3453_v11, %s11080_s23  ;;  %v4249_v31 = vpop.f32.mrb[27].mxu0 }
 0x395   : > { %v4464_v47 = vmul.f32 0.003921569, %v4249_v31  ;;  %3633 = vrot.lane.b32.xlu0 %v3454_v36, %s11080_s23  ;;  %v3070_v31 = vld [vmem:[#allocation2 + $0x2d1] sm:$0xff] }
 0x396   : > { %v4533_v48 = vadd.f32 %v12863_v56, %v4465_v45  ;;  %v3616_v62 = vpop.permute.xlu1 %3615 }
 0x397   : > { %v4532_v17 = vadd.f32 %v12863_v56, %v4464_v47  ;;  %3766 = vst.msk [vmem:[#allocation4 + $0x150] sm:$0xff] %vm15197_vm3, %v3616_v62  ;;  %v3618_v20 = vpop.permute.xlu0 %3617  ;;  %vm15202_vm3 = vmmov %vm15201_vm1 }
 0x398   : > { %v4597_v51 = vmax.f32 %v4533_v48, 0.0  ;;  %3767 = vst.msk [vmem:[#allocation4 + $0x158] sm:$0xff] %vm15198_vm15, %v3618_v20  ;;  %2479 = vrot.lane.b32.xlu1 %v3453_v11, %s11077_s12  ;;  %vm15203_vm15 = vmmov %vm15201_vm1  ;;  %v3071_v20 = vld [vmem:[#allocation2 + $0x2d9] sm:$0xff] }
 0x399   : > { %v4596_v43 = vmax.f32 %v4532_v17, 0.0  ;;  %2481 = vrot.lane.b32.xlu0 %v3454_v36, %s11077_s12 }
 0x39a   : > { %v4647_v54 = vmax.f32 %v4595_v50, %v4597_v51  ;;  %v2464_v24 = vpop.permute.xlu1 %2463 }
 0x39b   : > { %v4646_v30 = vmax.f32 %v4594_v53, %v4596_v43  ;;  %2612 = vst.msk [vmem:[#allocation4 + $0x160] sm:$0xff] %vm15199_vm10, %v2464_v24  ;;  %v2466_v55 = vpop.permute.xlu0 %2465  ;;  %vm15204_vm10 = vmmov %vm15201_vm1 }
 0x39c   : > { %v4919_v0 = vcombine.high %v4647_v54, %v4647_v54  ;;  %v4926_v13 = vrot.slane %v4647_v54, %v12337_v38  ;;  %2613 = vst.msk [vmem:[#allocation4 + $0x168] sm:$0xff] %vm15200_vm13, %v2466_v55  ;;  %1328 = vrot.lane.b32.xlu1 %v3453_v11, %s11074_s9  ;;  %vm15205_vm13 = vmmov %vm15201_vm1 }
 0x39d   : > { %v4902_v60 = vcombine.high %v4646_v30, %v4646_v30  ;;  %v4909_v57 = vrot.slane %v4646_v30, %v12337_v38  ;;  %1330 = vrot.lane.b32.xlu0 %v3454_v36, %s11074_s9 }
 0x39e   : > { %v4933_v61 = vrot.slane %v4919_v0, %v12337_v38  ;;  %v4934_v3 = vcombine.high %v4926_v13, %v4926_v13  ;;  %v5734_v27 = vsel %vm15201_vm1, %v4926_v13, -inf  ;;  %v1313_v41 = vpop.permute.xlu1 %1312  ;;  %v3830_v63 = vld [vmem:[#allocation4 + $0x150] sm:$0xff] }
 0x39f   : > { %v5735_v6 = vrot.slane %v5734_v27, 4  ;;  %v4916_v19 = vrot.slane %v4902_v60, %v12337_v38  ;;  %v4917_v46 = vcombine.high %v4909_v57, %v4909_v57  ;;  %v5706_v15 = vsel %vm15202_vm3, %v4909_v57, -inf  ;;  %1459 = vst.msk [vmem:[#allocation4 + $0x170] sm:$0xff] %vm1412_vm7, %v1313_v41  ;;  %v1315_v34 = vpop.permute.xlu0 %1314  ;;  %10714 = vmatprep.mubr.msk.f32.mxu0 %vm3856_vm14, %v3830_v63  ;;  %v3831_v29 = vld [vmem:[#allocation4 + $0x158] sm:$0xff]  ;;  %vm15206_vm3 = vmmov %vm15201_vm1 }
 0x3a0   : > { %v4935_v21 = vcombine.high %v4933_v61, %v4933_v61  ;;  %v5741_v1 = vsel %vm15203_vm15, %v4934_v3, -inf  ;;  %v5748_v52 = vsel %vm15204_vm10, %v4933_v61, -inf  ;;  %v5707_v8 = vrot.slane %v5706_v15, 4  ;;  %1460 = vst.msk [vmem:[#allocation4 + $0x178] sm:$0xff] %vm1412_vm7, %v1315_v34  ;;  %2865 = vrot.lane.b32.xlu1 %v2685_v59, %s11078_s13  ;;  %10715 = vmatmul.mubr.msk.f32.gmra.mrb[42].mxu0 %vm3856_vm14, %v3831_v29  ;;  %vm15207_vm15 = vmmov %vm15201_vm1 }
 0x3a1   : > { %v5736_v7 = vmax.f32 %v5734_v27, %v5735_v6  ;;  %v5742_v16 = vrot.slane %v5741_v1, 4  ;;  %v5749_v32 = vrot.slane %v5748_v52, 4  ;;  %v4918_v10 = vcombine.high %v4916_v19, %v4916_v19  ;;  %2867 = vrot.lane.b32.xlu0 %v2686_v4, %s11078_s13 }
 0x3a2   : > { %v5755_v12 = vsel %vm15205_vm13, %v4935_v21, -inf  ;;  %v5708_v14 = vmax.f32 %v5706_v15, %v5707_v8  ;;  %v5713_v18 = vsel %vm15201_vm1, %v4917_v46, -inf  ;;  %v5720_v26 = vsel %vm15206_vm3, %v4916_v19, -inf  ;;  %v2850_v5 = vpop.permute.xlu1 %2849  ;;  %v3455_v46 = vld [vmem:[#allocation2 + $0x2d2] sm:$0xff] }
 0x3a3   : > { %v5743_v22 = vmax.f32 %v5741_v1, %v5742_v16  ;;  %v5750_v28 = vmax.f32 %v5748_v52, %v5749_v32  ;;  %v5756_v49 = vrot.slane %v5755_v12, 4  ;;  %2998 = vst.msk [vmem:[#allocation4 + $0x160] sm:$0xff] %vm2953_vm11, %v2850_v5  ;;  %v2852_v23 = vpop.permute.xlu0 %2851  ;;  %v5714_v33 = vrot.slane %v5713_v18, 4  ;;  %v3456_v52 = vld [vmem:[#allocation2 + $0x2da] sm:$0xff] }
 0x3a4   : > { %v5709_v11 = vrot.slane %v5708_v14, 2  ;;  %v5721_v36 = vrot.slane %v5720_v26, 4  ;;  %v5727_v35 = vsel %vm15207_vm15, %v4918_v10, -inf  ;;  %2999 = vst.msk [vmem:[#allocation4 + $0x168] sm:$0xff] %vm2953_vm11, %v2852_v23  ;;  %1713 = vrot.lane.b32.xlu1 %v2685_v59, %s11075_s10  ;;  %v5737_v44 = vrot.slane %v5736_v7, 2 }
 0x3a5   : > { %v5744_v40 = vrot.slane %v5743_v22, 2  ;;  %v5757_v45 = vmax.f32 %v5755_v12, %v5756_v49  ;;  %1715 = vrot.lane.b32.xlu0 %v2686_v4, %s11075_s10  ;;  %v5715_v47 = vmax.f32 %v5713_v18, %v5714_v33  ;;  %v5728_v62 = vrot.slane %v5727_v35, 4 }
 0x3a6   : > { %v5710_v9 = vmax.f32 %v5708_v14, %v5709_v11  ;;  %v5722_v48 = vmax.f32 %v5720_v26, %v5721_v36  ;;  %v1698_v17 = vpop.permute.xlu1 %1697  ;;  %v5751_v50 = vrot.slane %v5750_v28, 2  ;;  %v5738_v30 = vmax.f32 %v5736_v7, %v5737_v44 }
 0x3a7   : > { %1844 = vst.msk [vmem:[#allocation4 + $0x170] sm:$0xff] %vm1797_vm8, %v1698_v17  ;;  %v1700_v51 = vpop.permute.xlu0 %1699  ;;  %v5758_v53 = vrot.slane %v5757_v45, 2  ;;  %v5716_v43 = vrot.slane %v5715_v47, 2  ;;  %v5729_v24 = vmax.f32 %v5727_v35, %v5728_v62  ;;  %v5745_v55 = vmax.f32 %v5743_v22, %v5744_v40 }
 0x3a8   : > { %v5723_v54 = vrot.slane %v5722_v48, 2  ;;  %1845 = vst.msk [vmem:[#allocation4 + $0x178] sm:$0xff] %vm1797_vm8, %v1700_v51  ;;  %3250 = vrot.lane.b32.xlu1 %v3070_v31, %s11079_s14  ;;  %v5711_v0 = vrot.slane %v5710_v9, 1  ;;  %v5752_v61 = vmax.f32 %v5750_v28, %v5751_v50  ;;  %v5739_v6 = vrot.slane %v5738_v30, 1 }
 0x3a9   : > { %3252 = vrot.lane.b32.xlu0 %v3071_v20, %s11079_s14  ;;  %v5717_v13 = vmax.f32 %v5715_v47, %v5716_v43  ;;  %v5730_v57 = vrot.slane %v5729_v24, 2  ;;  %v5759_v27 = vmax.f32 %v5757_v45, %v5758_v53  ;;  %v5746_v19 = vrot.slane %v5745_v55, 1 }
 0x3aa   : > { %v5724_v60 = vmax.f32 %v5722_v48, %v5723_v54  ;;  %v3235_v59 = vpop.permute.xlu1 %3234  ;;  %v5712_v15 = vmax.f32 %v5710_v9, %v5711_v0  ;;  %v5753_v8 = vrot.slane %v5752_v61, 1  ;;  %vm15208_vm10 = vcmask 1041409   ;;  %v2688_v48 = vld [vmem:[#allocation2 + $0x2f0] sm:$0xff] }
 0x3ab   : > { %3383 = vst.msk [vmem:[#allocation4 + $0x160] sm:$0xff] %vm3338_vm12, %v3235_v59  ;;  %v3237_v3 = vpop.permute.xlu0 %3236  ;;  %v5718_v41 = vrot.slane %v5717_v13, 1  ;;  %v5731_v4 = vmax.f32 %v5729_v24, %v5730_v57  ;;  %v5760_v32 = vrot.slane %v5759_v27, 1  ;;  %v5740_v18 = vmax.f32 %v5738_v30, %v5739_v6  ;;  %v3072_v54 = vld [vmem:[#allocation2 + $0x2e9] sm:$0xff]  ;;  %v3073_v30 = vld [vmem:[#allocation2 + $0x2f1] sm:$0xff] }
 0x3ac   : > { %v5725_v63 = vrot.slane %v5724_v60, 1  ;;  %3384 = vst.msk [vmem:[#allocation4 + $0x168] sm:$0xff] %vm3338_vm12, %v3237_v3  ;;  %2098 = vrot.lane.b32.xlu1 %v3070_v31, %s11076_s11  ;;  %v5747_v5 = vmax.f32 %v5745_v55, %v5746_v19  ;;  %v5754_v49 = vmax.f32 %v5752_v61, %v5753_v8  ;;  %vm15209_vm13 = vcmask 220352   ;;  %v2687_v31 = vld [vmem:[#allocation2 + $0x2e8] sm:$0xff]  ;;  %v3458_v3 = vld [vmem:[#allocation2 + $0x2f2] sm:$0xff] }
 0x3ad   : > { %2100 = vrot.lane.b32.xlu0 %v3071_v20, %s11076_s11  ;;  %v5719_v34 = vmax.f32 %v5717_v13, %v5718_v41  ;;  %v5732_v21 = vrot.slane %v5731_v4, 1  ;;  %v5761_v33 = vmax.f32 %v5759_v27, %v5760_v32  ;;  %vm15210_vm1 = vmmov %vm15209_vm13  ;;  %vm15211_vm3 = vcmask 1047559   ;;  %v3457_v59 = vld [vmem:[#allocation2 + $0x2ea] sm:$0xff] }
 0x3ae   : > { %v5726_v29 = vmax.f32 %v5724_v60, %v5725_v63  ;;  %v2083_v1 = vpop.permute.xlu1 %2082  ;;  %vm15212_vm15 = vcmask 261120  }
 0x3af   : > { %2229 = vst.msk [vmem:[#allocation4 + $0x170] sm:$0xff] %vm2182_vm9, %v2083_v1  ;;  %v2085_v7 = vpop.permute.xlu0 %2084  ;;  %v12911_v16 = vpop.f32.mrb[28].mxu0  ;;  %v5733_v10 = vmax.f32 %v5731_v4, %v5732_v21  ;;  %v6443_v12 = vsel %vm15208_vm10, %v5719_v34, %v5712_v15  ;;  %vm15213_vm10 = vcmask 146552  }
 0x3b0   : > { %2230 = vst.msk [vmem:[#allocation4 + $0x178] sm:$0xff] %vm2182_vm9, %v2085_v7  ;;  %3635 = vrot.lane.b32.xlu1 %v3455_v46, %s11080_s23  ;;  %v4259_v14 = vpop.f32.mrb[29].mxu0  ;;  %v6444_v26 = vsel %vm6396_vm4, %v5726_v29, %v6443_v12  ;;  %v4467_v60 = vmul.f32 0.003921569, %v12911_v16 }
 0x3b1   : > { %3637 = vrot.lane.b32.xlu0 %v3456_v52, %s11080_s23  ;;  %v6445_v22 = vsel %vm6398_vm5, %v5733_v10, %v6444_v26  ;;  %v4466_v57 = vmul.f32 0.003921569, %v4259_v14 }
 0x3b2   : > { %v3620_v28 = vpop.permute.xlu1 %3619  ;;  %v6446_v23 = vsel %vm6400_vm6, %v5740_v18, %v6445_v22  ;;  %v4535_v63 = vadd.f32 %v12863_v56, %v4467_v60  ;;  %v2689_v22 = vld [vmem:[#allocation2 + $0x300] sm:$0xff] }
 0x3b3   : > { %3768 = vst.msk [vmem:[#allocation4 + $0x160] sm:$0xff] %vm15209_vm13, %v3620_v28  ;;  %v3622_v11 = vpop.permute.xlu0 %3621  ;;  %v6447_v36 = vsel %vm6402_vm2, %v5747_v5, %v6446_v23  ;;  %vm15214_vm13 = vmmov %vm15213_vm10  ;;  %v4534_v19 = vadd.f32 %v12863_v56, %v4466_v57 }
 0x3b4   : > { %3769 = vst.msk [vmem:[#allocation4 + $0x168] sm:$0xff] %vm15210_vm1, %v3622_v11  ;;  %2483 = vrot.lane.b32.xlu1 %v3455_v46, %s11077_s12  ;;  %v6448_v35 = vsel %vm6404_vm0, %v5754_v49, %v6447_v36  ;;  %vm15215_vm1 = vmmov %vm15212_vm15  ;;  %v4599_v1 = vmax.f32 %v4535_v63, 0.0  ;;  %v2690_v36 = vld [vmem:[#allocation2 + $0x308] sm:$0xff] }
 0x3b5   : > { %2485 = vrot.lane.b32.xlu0 %v3456_v52, %s11077_s12  ;;  %v6449_v44 = vsel %vm15211_vm3, %v5761_v33, %v6448_v35  ;;  %vm15216_vm3 = vmmov %vm15215_vm1  ;;  %v4598_v8 = vmax.f32 %v4534_v19, 0.0  ;;  %v3074_v19 = vld [vmem:[#allocation2 + $0x301] sm:$0xff] }
 0x3b6   : > { %v2468_v40 = vpop.permute.xlu1 %2467  ;;  %6536 = vst.msk [vmem:[#allocation3 + $0x71] sm:$0xff] %vm15212_vm15, %v6449_v44  ;;  %vm15217_vm15 = vmmov %vm15215_vm1 }
 0x3b7   : > { %2614 = vst.msk [vmem:[#allocation4 + $0x170] sm:$0xff] %vm15213_vm10, %v2468_v40  ;;  %v2470_v45 = vpop.permute.xlu0 %2469  ;;  %vm15218_vm10 = vcmask 220352  }
 0x3b8   : > { %2615 = vst.msk [vmem:[#allocation4 + $0x178] sm:$0xff] %vm15214_vm13, %v2470_v45  ;;  %1332 = vrot.lane.b32.xlu1 %v3455_v46, %s11074_s9  ;;  %vm15219_vm13 = vmmov %vm15218_vm10 }
 0x3b9   : > { %1334 = vrot.lane.b32.xlu0 %v3456_v52, %s11074_s9 }
 0x3ba   : > { %v1317_v9 = vpop.permute.xlu1 %1316  ;;  %v3832_v47 = vld [vmem:[#allocation4 + $0x160] sm:$0xff] }
 0x3bb   : > { %1461 = vst.msk [vmem:[#allocation4 + $0x180] sm:$0xff] %vm1412_vm7, %v1317_v9  ;;  %v1319_v62 = vpop.permute.xlu0 %1318  ;;  %10717 = vmatprep.mubr.msk.f32.mxu0 %vm3856_vm14, %v3832_v47  ;;  %v3833_v17 = vld [vmem:[#allocation4 + $0x168] sm:$0xff] }
 0x3bc   : > { %1462 = vst.msk [vmem:[#allocation4 + $0x188] sm:$0xff] %vm1412_vm7, %v1319_v62  ;;  %2869 = vrot.lane.b32.xlu1 %v2687_v31, %s11078_s13  ;;  %10718 = vmatmul.mubr.msk.f32.gmra.mrb[44].mxu0 %vm3856_vm14, %v3833_v17 }
 0x3bd   : > { %2871 = vrot.lane.b32.xlu0 %v2688_v48, %s11078_s13  ;;  %v12938_v50 = vld [vmem:[#allocation3 + $0x71] sm:$0xff] }
 0x3be   : > { %v2854_v20 = vpop.permute.xlu1 %2853  ;;  %6891 = vst.msk [vmem:[#allocation5 + $0x98] sm:$0xff] %vm15215_vm1, %v12938_v50  ;;  %v6553_v53 = vld [vmem:[#allocation3 + $0x70] sm:$0xff]  ;;  %vm15220_vm1 = vcmask 146552  }
 0x3bf   : > { %3000 = vst.msk [vmem:[#allocation4 + $0x170] sm:$0xff] %vm2953_vm11, %v2854_v20  ;;  %v2856_v51 = vpop.permute.xlu0 %2855  ;;  %v7195_v43 = vld [vmem:[#allocation3 + $0x72] sm:$0xff] }
 0x3c0   : > { %3001 = vst.msk [vmem:[#allocation4 + $0x178] sm:$0xff] %vm2953_vm11, %v2856_v51  ;;  %1717 = vrot.lane.b32.xlu1 %v2687_v31, %s11075_s10 }
 0x3c1   : > { %6569 = vst.msk [vmem:[#allocation5 + $0xa8] sm:$0xff] %vm15216_vm3, %v6553_v53  ;;  %1719 = vrot.lane.b32.xlu0 %v2688_v48, %s11075_s10  ;;  %vm15221_vm3 = vmmov %vm15220_vm1 }
 0x3c2   : > { %7211 = vst.msk [vmem:[#allocation5 + $0x88] sm:$0xff] %vm15217_vm15, %v7195_v43  ;;  %v1702_v24 = vpop.permute.xlu1 %1701  ;;  %vm15222_vm15 = vcmask 254976  }
 0x3c3   : > { %1846 = vst.msk [vmem:[#allocation4 + $0x180] sm:$0xff] %vm1797_vm8, %v1702_v24  ;;  %v1704_v55 = vpop.permute.xlu0 %1703 }
 0x3c4   : > { %1847 = vst.msk [vmem:[#allocation4 + $0x188] sm:$0xff] %vm1797_vm8, %v1704_v55  ;;  %3254 = vrot.lane.b32.xlu1 %v3072_v54, %s11079_s14 }
 0x3c5   : > { %3256 = vrot.lane.b32.xlu0 %v3073_v30, %s11079_s14 }
 0x3c6   : > { %v3239_v0 = vpop.permute.xlu1 %3238 }
 0x3c7   : > { %3385 = vst.msk [vmem:[#allocation4 + $0x170] sm:$0xff] %vm3338_vm12, %v3239_v0  ;;  %v3241_v13 = vpop.permute.xlu0 %3240 }
 0x3c8   : > { %3386 = vst.msk [vmem:[#allocation4 + $0x178] sm:$0xff] %vm3338_vm12, %v3241_v13  ;;  %2102 = vrot.lane.b32.xlu1 %v3072_v54, %s11076_s11 }
 0x3c9   : > { %2104 = vrot.lane.b32.xlu0 %v3073_v30, %s11076_s11 }
 0x3ca   : > { %v2087_v61 = vpop.permute.xlu1 %2086 }
 0x3cb   : > { %2231 = vst.msk [vmem:[#allocation4 + $0x180] sm:$0xff] %vm2182_vm9, %v2087_v61  ;;  %v2089_v27 = vpop.permute.xlu0 %2088  ;;  %v10698_v41 = vpop.f32.mrb[30].mxu0 }
 0x3cc   : > { %2232 = vst.msk [vmem:[#allocation4 + $0x188] sm:$0xff] %vm2182_vm9, %v2089_v27  ;;  %v4469_v4 = vmul.f32 0.003921569, %v10698_v41  ;;  %3639 = vrot.lane.b32.xlu1 %v3457_v59, %s11080_s23  ;;  %v4269_v6 = vpop.f32.mrb[31].mxu0 }
 0x3cd   : > { %v4468_v46 = vmul.f32 0.003921569, %v4269_v6  ;;  %3641 = vrot.lane.b32.xlu0 %v3458_v3, %s11080_s23 }
 0x3ce   : > { %v4537_v15 = vadd.f32 %v12863_v56, %v4469_v4  ;;  %v3624_v34 = vpop.permute.xlu1 %3623 }
 0x3cf   : > { %v4536_v29 = vadd.f32 %v12863_v56, %v4468_v46  ;;  %3770 = vst.msk [vmem:[#allocation4 + $0x170] sm:$0xff] %vm15218_vm10, %v3624_v34  ;;  %v3626_v21 = vpop.permute.xlu0 %3625  ;;  %vm15223_vm10 = vmmov %vm15222_vm15 }
 0x3d0   : > { %v4601_v52 = vmax.f32 %v4537_v15, 0.0  ;;  %3771 = vst.msk [vmem:[#allocation4 + $0x178] sm:$0xff] %vm15219_vm13, %v3626_v21  ;;  %2487 = vrot.lane.b32.xlu1 %v3457_v59, %s11077_s12  ;;  %vm15224_vm13 = vmmov %vm15223_vm10 }
 0x3d1   : > { %v4600_v7 = vmax.f32 %v4536_v29, 0.0  ;;  %2489 = vrot.lane.b32.xlu0 %v3458_v3, %s11077_s12 }
 0x3d2   : > { %v4649_v16 = vmax.f32 %v4599_v1, %v4601_v52  ;;  %v2472_v32 = vpop.permute.xlu1 %2471  ;;  %v3075_v1 = vld [vmem:[#allocation2 + $0x309] sm:$0xff] }
 0x3d3   : > { %v4648_v10 = vmax.f32 %v4598_v8, %v4600_v7  ;;  %2616 = vst.msk [vmem:[#allocation4 + $0x180] sm:$0xff] %vm15220_vm1, %v2472_v32  ;;  %v2474_v12 = vpop.permute.xlu0 %2473  ;;  %vm15225_vm1 = vmmov %vm15223_vm10 }
 0x3d4   : > { %v4953_v14 = vcombine.high %v4649_v16, %v4649_v16  ;;  %v4960_v18 = vrot.slane %v4649_v16, %v12337_v38  ;;  %2617 = vst.msk [vmem:[#allocation4 + $0x188] sm:$0xff] %vm15221_vm3, %v2474_v12  ;;  %1336 = vrot.lane.b32.xlu1 %v3457_v59, %s11074_s9  ;;  %vm15226_vm3 = vmmov %vm15225_vm1 }
 0x3d5   : > { %v4936_v26 = vcombine.high %v4648_v10, %v4648_v10  ;;  %v4943_v5 = vrot.slane %v4648_v10, %v12337_v38  ;;  %1338 = vrot.lane.b32.xlu0 %v3458_v3, %s11074_s9 }
 0x3d6   : > { %v4967_v28 = vrot.slane %v4953_v14, %v12337_v38  ;;  %v4968_v49 = vcombine.high %v4960_v18, %v4960_v18  ;;  %v5790_v23 = vsel %vm15222_vm15, %v4960_v18, -inf  ;;  %v1321_v11 = vpop.permute.xlu1 %1320  ;;  %v3834_v33 = vld [vmem:[#allocation4 + $0x170] sm:$0xff]  ;;  %vm15227_vm15 = vmmov %vm15225_vm1 }
 0x3d7   : > { %v5791_v35 = vrot.slane %v5790_v23, 4  ;;  %v4950_v44 = vrot.slane %v4936_v26, %v12337_v38  ;;  %v4951_v40 = vcombine.high %v4943_v5, %v4943_v5  ;;  %v5762_v45 = vsel %vm15223_vm10, %v4943_v5, -inf  ;;  %1463 = vst.msk [vmem:[#allocation4 + $0x190] sm:$0xff] %vm1412_vm7, %v1321_v11  ;;  %v1323_v31 = vpop.permute.xlu0 %1322  ;;  %10720 = vmatprep.mubr.msk.f32.mxu0 %vm3856_vm14, %v3834_v33  ;;  %v3835_v9 = vld [vmem:[#allocation4 + $0x178] sm:$0xff]  ;;  %vm15228_vm10 = vmmov %vm15225_vm1 }
 0x3d8   : > { %v4969_v47 = vcombine.high %v4967_v28, %v4967_v28  ;;  %v5797_v48 = vsel %vm15224_vm13, %v4968_v49, -inf  ;;  %v5804_v62 = vsel %vm15225_vm1, %v4967_v28, -inf  ;;  %v5763_v17 = vrot.slane %v5762_v45, 4  ;;  %1464 = vst.msk [vmem:[#allocation4 + $0x198] sm:$0xff] %vm1412_vm7, %v1323_v31  ;;  %2873 = vrot.lane.b32.xlu1 %v2689_v22, %s11078_s13  ;;  %10721 = vmatmul.mubr.msk.f32.gmra.mrb[46].mxu0 %vm3856_vm14, %v3835_v9  ;;  %vm15229_vm13 = vmmov %vm15225_vm1 }
 0x3d9   : > { %v5792_v20 = vmax.f32 %v5790_v23, %v5791_v35  ;;  %v5798_v51 = vrot.slane %v5797_v48, 4  ;;  %v5805_v53 = vrot.slane %v5804_v62, 4  ;;  %v4952_v43 = vcombine.high %v4950_v44, %v4950_v44  ;;  %2875 = vrot.lane.b32.xlu0 %v2690_v36, %s11078_s13 }
 0x3da   : > { %v5811_v54 = vsel %vm15226_vm3, %v4969_v47, -inf  ;;  %v5764_v24 = vmax.f32 %v5762_v45, %v5763_v17  ;;  %v5769_v30 = vsel %vm15227_vm15, %v4951_v40, -inf  ;;  %v5776_v55 = vsel %vm15228_vm10, %v4950_v44, -inf  ;;  %v2858_v0 = vpop.permute.xlu1 %2857  ;;  %v3459_v45 = vld [vmem:[#allocation2 + $0x302] sm:$0xff]  ;;  %v3460_v17 = vld [vmem:[#allocation2 + $0x30a] sm:$0xff] }
 0x3db   : > { %v5799_v13 = vmax.f32 %v5797_v48, %v5798_v51  ;;  %v5806_v60 = vmax.f32 %v5804_v62, %v5805_v53  ;;  %v5812_v57 = vrot.slane %v5811_v54, 4  ;;  %3002 = vst.msk [vmem:[#allocation4 + $0x180] sm:$0xff] %vm2953_vm11, %v2858_v0  ;;  %v2860_v59 = vpop.permute.xlu0 %2859  ;;  %v5770_v3 = vrot.slane %v5769_v30, 4 }
 0x3dc   : > { %v5765_v61 = vrot.slane %v5764_v24, 2  ;;  %v5777_v27 = vrot.slane %v5776_v55, 4  ;;  %v5783_v41 = vsel %vm15229_vm13, %v4952_v43, -inf  ;;  %3003 = vst.msk [vmem:[#allocation4 + $0x188] sm:$0xff] %vm2953_vm11, %v2860_v59  ;;  %1721 = vrot.lane.b32.xlu1 %v2689_v22, %s11075_s10  ;;  %v5793_v63 = vrot.slane %v5792_v20, 2 }
 0x3dd   : > { %v5800_v4 = vrot.slane %v5799_v13, 2  ;;  %v5813_v6 = vmax.f32 %v5811_v54, %v5812_v57  ;;  %1723 = vrot.lane.b32.xlu0 %v2690_v36, %s11075_s10  ;;  %v5771_v15 = vmax.f32 %v5769_v30, %v5770_v3  ;;  %v5784_v29 = vrot.slane %v5783_v41, 4 }
 0x3de   : > { %v5766_v46 = vmax.f32 %v5764_v24, %v5765_v61  ;;  %v5778_v34 = vmax.f32 %v5776_v55, %v5777_v27  ;;  %v1706_v21 = vpop.permute.xlu1 %1705  ;;  %v5807_v52 = vrot.slane %v5806_v60, 2  ;;  %v5794_v12 = vmax.f32 %v5792_v20, %v5793_v63 }
 0x3df   : > { %1848 = vst.msk [vmem:[#allocation4 + $0x190] sm:$0xff] %vm1797_vm8, %v1706_v21  ;;  %v1708_v8 = vpop.permute.xlu0 %1707  ;;  %v5814_v7 = vrot.slane %v5813_v6, 2  ;;  %v5772_v16 = vrot.slane %v5771_v15, 2  ;;  %v5785_v10 = vmax.f32 %v5783_v41, %v5784_v29  ;;  %v5801_v14 = vmax.f32 %v5799_v13, %v5800_v4  ;;  %v2692_v29 = vld [vmem:[#allocation2 + $0x320] sm:$0xff] }
 0x3e0   : > { %v5779_v32 = vrot.slane %v5778_v34, 2  ;;  %1849 = vst.msk [vmem:[#allocation4 + $0x198] sm:$0xff] %vm1797_vm8, %v1708_v8  ;;  %3258 = vrot.lane.b32.xlu1 %v3074_v19, %s11079_s14  ;;  %v5767_v18 = vrot.slane %v5766_v46, 1  ;;  %v5808_v49 = vmax.f32 %v5806_v60, %v5807_v52  ;;  %v5795_v44 = vrot.slane %v5794_v12, 1 }
 0x3e1   : > { %3260 = vrot.lane.b32.xlu0 %v3075_v1, %s11079_s14  ;;  %v5773_v26 = vmax.f32 %v5771_v15, %v5772_v16  ;;  %v5786_v22 = vrot.slane %v5785_v10, 2  ;;  %v5815_v11 = vmax.f32 %v5813_v6, %v5814_v7  ;;  %v5802_v40 = vrot.slane %v5801_v14, 1 }
 0x3e2   : > { %v5780_v5 = vmax.f32 %v5778_v34, %v5779_v32  ;;  %v3243_v28 = vpop.permute.xlu1 %3242  ;;  %v5768_v31 = vmax.f32 %v5766_v46, %v5767_v18  ;;  %v5809_v20 = vrot.slane %v5808_v49, 1  ;;  %vm15230_vm1 = vcmask 1041409   ;;  %v2691_v46 = vld [vmem:[#allocation2 + $0x318] sm:$0xff] }
 0x3e3   : > { %3387 = vst.msk [vmem:[#allocation4 + $0x180] sm:$0xff] %vm3338_vm12, %v3243_v28  ;;  %v3245_v23 = vpop.permute.xlu0 %3244  ;;  %v5774_v33 = vrot.slane %v5773_v26, 1  ;;  %v5787_v35 = vmax.f32 %v5785_v10, %v5786_v22  ;;  %v5816_v43 = vrot.slane %v5815_v11, 1  ;;  %v5796_v55 = vmax.f32 %v5794_v12, %v5795_v44  ;;  %v3076_v32 = vld [vmem:[#allocation2 + $0x319] sm:$0xff]  ;;  %v3077_v12 = vld [vmem:[#allocation2 + $0x321] sm:$0xff] }
 0x3e4   : > { %v5781_v36 = vrot.slane %v5780_v5, 1  ;;  %3388 = vst.msk [vmem:[#allocation4 + $0x188] sm:$0xff] %vm3338_vm12, %v3245_v23  ;;  %2106 = vrot.lane.b32.xlu1 %v3074_v19, %s11076_s11  ;;  %v5803_v13 = vmax.f32 %v5801_v14, %v5802_v40  ;;  %v5810_v59 = vmax.f32 %v5808_v49, %v5809_v20  ;;  %vm15231_vm3 = vcmask 220352   ;;  %v3461_v28 = vld [vmem:[#allocation2 + $0x31a] sm:$0xff]  ;;  %v3462_v23 = vld [vmem:[#allocation2 + $0x322] sm:$0xff] }
 0x3e5   : > { %2108 = vrot.lane.b32.xlu0 %v3075_v1, %s11076_s11  ;;  %v5775_v9 = vmax.f32 %v5773_v26, %v5774_v33  ;;  %v5788_v48 = vrot.slane %v5787_v35, 1  ;;  %v5817_v27 = vmax.f32 %v5815_v11, %v5816_v43  ;;  %vm15232_vm15 = vmmov %vm15231_vm3  ;;  %vm15233_vm10 = vcmask 1047559  }
 0x3e6   : > { %v5782_v47 = vmax.f32 %v5780_v5, %v5781_v36  ;;  %v2091_v62 = vpop.permute.xlu1 %2090  ;;  %vm15234_vm13 = vcmask 261120  }
 0x3e7   : > { %2233 = vst.msk [vmem:[#allocation4 + $0x190] sm:$0xff] %vm2182_vm9, %v2091_v62  ;;  %v2093_v51 = vpop.permute.xlu0 %2092  ;;  %v13004_v53 = vpop.f32.mrb[32].mxu0  ;;  %v5789_v54 = vmax.f32 %v5787_v35, %v5788_v48  ;;  %v6450_v24 = vsel %vm15230_vm1, %v5775_v9, %v5768_v31  ;;  %vm15235_vm1 = vcmask 146552  }
 0x3e8   : > { %2234 = vst.msk [vmem:[#allocation4 + $0x198] sm:$0xff] %vm2182_vm9, %v2093_v51  ;;  %3643 = vrot.lane.b32.xlu1 %v3459_v45, %s11080_s23  ;;  %v4279_v30 = vpop.f32.mrb[33].mxu0  ;;  %v6451_v0 = vsel %vm6396_vm4, %v5782_v47, %v6450_v24  ;;  %v4471_v5 = vmul.f32 0.003921569, %v13004_v53 }
 0x3e9   : > { %3645 = vrot.lane.b32.xlu0 %v3460_v17, %s11080_s23  ;;  %v6452_v60 = vsel %vm6398_vm5, %v5789_v54, %v6451_v0  ;;  %v4470_v22 = vmul.f32 0.003921569, %v4279_v30 }
 0x3ea   : > { %v3628_v57 = vpop.permute.xlu1 %3627  ;;  %v6453_v61 = vsel %vm6400_vm6, %v5796_v55, %v6452_v60  ;;  %v4539_v36 = vadd.f32 %v12863_v56, %v4471_v5 }
 0x3eb   : > { %3772 = vst.msk [vmem:[#allocation4 + $0x180] sm:$0xff] %vm15231_vm3, %v3628_v57  ;;  %v3630_v3 = vpop.permute.xlu0 %3629  ;;  %v6454_v41 = vsel %vm6402_vm2, %v5803_v13, %v6453_v61  ;;  %vm15236_vm3 = vmmov %vm15235_vm1  ;;  %v4538_v40 = vadd.f32 %v12863_v56, %v4470_v22  ;;  %v2693_v13 = vld [vmem:[#allocation2 + $0x330] sm:$0xff] }
 0x3ec   : > { %3773 = vst.msk [vmem:[#allocation4 + $0x188] sm:$0xff] %vm15232_vm15, %v3630_v3  ;;  %2491 = vrot.lane.b32.xlu1 %v3459_v45, %s11077_s12  ;;  %v6455_v63 = vsel %vm6404_vm0, %v5810_v59, %v6454_v41  ;;  %vm15237_vm15 = vmmov %vm15234_vm13  ;;  %v4603_v62 = vmax.f32 %v4539_v36, 0.0 }
 0x3ed   : > { %2493 = vrot.lane.b32.xlu0 %v3460_v17, %s11077_s12  ;;  %v6456_v4 = vsel %vm15233_vm10, %v5817_v27, %v6455_v63  ;;  %vm15238_vm10 = vmmov %vm15234_vm13  ;;  %v4602_v20 = vmax.f32 %v4538_v40, 0.0  ;;  %v2694_v27 = vld [vmem:[#allocation2 + $0x338] sm:$0xff] }
 0x3ee   : > { %v2476_v6 = vpop.permute.xlu1 %2475  ;;  %6537 = vst.msk [vmem:[#allocation3 + $0x81] sm:$0xff] %vm15234_vm13, %v6456_v4  ;;  %vm15239_vm13 = vcmask 220352   ;;  %v3078_v40 = vld [vmem:[#allocation2 + $0x331] sm:$0xff] }
 0x3ef   : > { %2618 = vst.msk [vmem:[#allocation4 + $0x190] sm:$0xff] %vm15235_vm1, %v2476_v6  ;;  %v2478_v19 = vpop.permute.xlu0 %2477  ;;  %vm15240_vm1 = vmmov %vm15239_vm13 }
 0x3f0   : > { %2619 = vst.msk [vmem:[#allocation4 + $0x198] sm:$0xff] %vm15236_vm3, %v2478_v19  ;;  %1340 = vrot.lane.b32.xlu1 %v3459_v45, %s11074_s9 }
 0x3f1   : > { %1342 = vrot.lane.b32.xlu0 %v3460_v17, %s11074_s9 }
 0x3f2   : > { %v1325_v15 = vpop.permute.xlu1 %1324  ;;  %v3836_v34 = vld [vmem:[#allocation4 + $0x180] sm:$0xff] }
 0x3f3   : > { %1465 = vst.msk [vmem:[#allocation4 + $0x1a0] sm:$0xff] %vm1412_vm7, %v1325_v15  ;;  %v1327_v21 = vpop.permute.xlu0 %1326  ;;  %10723 = vmatprep.mubr.msk.f32.mxu0 %vm3856_vm14, %v3836_v34  ;;  %v3837_v1 = vld [vmem:[#allocation4 + $0x188] sm:$0xff] }
 0x3f4   : > { %1466 = vst.msk [vmem:[#allocation4 + $0x1a8] sm:$0xff] %vm1412_vm7, %v1327_v21  ;;  %2877 = vrot.lane.b32.xlu1 %v2691_v46, %s11078_s13  ;;  %10724 = vmatmul.mubr.msk.f32.gmra.mrb[48].mxu0 %vm3856_vm14, %v3837_v1 }
 0x3f5   : > { %2879 = vrot.lane.b32.xlu0 %v2692_v29, %s11078_s13  ;;  %v13031_v8 = vld [vmem:[#allocation3 + $0x81] sm:$0xff] }
 0x3f6   : > { %v2862_v52 = vpop.permute.xlu1 %2861  ;;  %6892 = vst.msk [vmem:[#allocation5 + $0xb0] sm:$0xff] %vm15237_vm15, %v13031_v8  ;;  %v7196_v16 = vld [vmem:[#allocation3 + $0x82] sm:$0xff]  ;;  %vm15241_vm15 = vmmov %vm15236_vm3 }
 0x3f7   : > { %3004 = vst.msk [vmem:[#allocation4 + $0x190] sm:$0xff] %vm2953_vm11, %v2862_v52  ;;  %v2864_v7 = vpop.permute.xlu0 %2863 }
 0x3f8   : > { %3005 = vst.msk [vmem:[#allocation4 + $0x198] sm:$0xff] %vm2953_vm11, %v2864_v7  ;;  %1725 = vrot.lane.b32.xlu1 %v2691_v46, %s11075_s10 }
 0x3f9   : > { %7212 = vst.msk [vmem:[#allocation5 + $0xa0] sm:$0xff] %vm15238_vm10, %v7196_v16  ;;  %1727 = vrot.lane.b32.xlu0 %v2692_v29, %s11075_s10  ;;  %vm15242_vm10 = vcmask 254976  }
 0x3fa   : > { %v1710_v10 = vpop.permute.xlu1 %1709 }
 0x3fb   : > { %1850 = vst.msk [vmem:[#allocation4 + $0x1a0] sm:$0xff] %vm1797_vm8, %v1710_v10  ;;  %v1712_v14 = vpop.permute.xlu0 %1711 }
 0x3fc   : > { %1851 = vst.msk [vmem:[#allocation4 + $0x1a8] sm:$0xff] %vm1797_vm8, %v1712_v14  ;;  %3262 = vrot.lane.b32.xlu1 %v3076_v32, %s11079_s14 }
 0x3fd   : > { %3264 = vrot.lane.b32.xlu0 %v3077_v12, %s11079_s14 }
 0x3fe   : > { %v3247_v18 = vpop.permute.xlu1 %3246 }
 0x3ff   : > { %3389 = vst.msk [vmem:[#allocation4 + $0x190] sm:$0xff] %vm3338_vm12, %v3247_v18  ;;  %v3249_v26 = vpop.permute.xlu0 %3248 }
 0x400   : > { %3390 = vst.msk [vmem:[#allocation4 + $0x198] sm:$0xff] %vm3338_vm12, %v3249_v26  ;;  %2110 = vrot.lane.b32.xlu1 %v3076_v32, %s11076_s11 }
 0x401   : > { %2112 = vrot.lane.b32.xlu0 %v3077_v12, %s11076_s11 }
 0x402   : > { %v2095_v49 = vpop.permute.xlu1 %2094 }
 0x403   : > { %2235 = vst.msk [vmem:[#allocation4 + $0x1a0] sm:$0xff] %vm2182_vm9, %v2095_v49  ;;  %v2097_v11 = vpop.permute.xlu0 %2096  ;;  %v10704_v33 = vpop.f32.mrb[34].mxu0 }
 0x404   : > { %2236 = vst.msk [vmem:[#allocation4 + $0x1a8] sm:$0xff] %vm2182_vm9, %v2097_v11  ;;  %v4473_v35 = vmul.f32 0.003921569, %v10704_v33  ;;  %3647 = vrot.lane.b32.xlu1 %v3461_v28, %s11080_s23  ;;  %v4289_v44 = vpop.f32.mrb[35].mxu0 }
 0x405   : > { %v4472_v45 = vmul.f32 0.003921569, %v4289_v44  ;;  %3649 = vrot.lane.b32.xlu0 %v3462_v23, %s11080_s23 }
 0x406   : > { %v4541_v31 = vadd.f32 %v12863_v56, %v4473_v35  ;;  %v3632_v9 = vpop.permute.xlu1 %3631 }
 0x407   : > { %v4540_v47 = vadd.f32 %v12863_v56, %v4472_v45  ;;  %3774 = vst.msk [vmem:[#allocation4 + $0x190] sm:$0xff] %vm15239_vm13, %v3632_v9  ;;  %v3634_v48 = vpop.permute.xlu0 %3633  ;;  %vm15243_vm13 = vmmov %vm15242_vm10 }
 0x408   : > { %v4605_v17 = vmax.f32 %v4541_v31, 0.0  ;;  %3775 = vst.msk [vmem:[#allocation4 + $0x198] sm:$0xff] %vm15240_vm1, %v3634_v48  ;;  %2495 = vrot.lane.b32.xlu1 %v3461_v28, %s11077_s12  ;;  %vm15244_vm1 = vmmov %vm15242_vm10 }
 0x409   : > { %v4604_v51 = vmax.f32 %v4540_v47, 0.0  ;;  %2497 = vrot.lane.b32.xlu0 %v3462_v23, %s11077_s12 }
 0x40a   : > { %v4651_v53 = vmax.f32 %v4603_v62, %v4605_v17  ;;  %v2480_v43 = vpop.permute.xlu1 %2479  ;;  %v3079_v62 = vld [vmem:[#allocation2 + $0x339] sm:$0xff] }
 0x40b   : > { %v4650_v54 = vmax.f32 %v4602_v20, %v4604_v51  ;;  %2620 = vst.msk [vmem:[#allocation4 + $0x1a0] sm:$0xff] %vm15236_vm3, %v2480_v43  ;;  %v2482_v24 = vpop.permute.xlu0 %2481  ;;  %vm15245_vm3 = vmmov %vm15244_vm1 }
 0x40c   : > { %v4987_v56 = vcombine.high %v4651_v53, %v4651_v53  ;;  %v4994_v30 = vrot.slane %v4651_v53, %v12337_v38  ;;  %2621 = vst.msk [vmem:[#allocation4 + $0x1a8] sm:$0xff] %vm15241_vm15, %v2482_v24  ;;  %1344 = vrot.lane.b32.xlu1 %v3461_v28, %s11074_s9  ;;  %vm15246_vm15 = vmmov %vm15244_vm1 }
 0x40d   : > { %v4970_v55 = vcombine.high %v4650_v54, %v4650_v54  ;;  %v4977_v0 = vrot.slane %v4650_v54, %v12337_v38  ;;  %1346 = vrot.lane.b32.xlu0 %v3462_v23, %s11074_s9 }
 0x40e   : > { %v5001_v60 = vrot.slane %v4987_v56, %v12337_v38  ;;  %v5002_v57 = vcombine.high %v4994_v30, %v4994_v30  ;;  %v5846_v59 = vsel %vm15242_vm10, %v4994_v30, -inf  ;;  %v1329_v61 = vpop.permute.xlu1 %1328  ;;  %v3838_v3 = vld [vmem:[#allocation4 + $0x190] sm:$0xff]  ;;  %vm15247_vm10 = vmmov %vm15244_vm1 }
 0x40f   : > { %v5847_v41 = vrot.slane %v5846_v59, 4  ;;  %v4984_v63 = vrot.slane %v4970_v55, %v12337_v38  ;;  %v4985_v4 = vcombine.high %v4977_v0, %v4977_v0  ;;  %v5818_v6 = vsel %vm15243_vm13, %v4977_v0, -inf  ;;  %1467 = vst.msk [vmem:[#allocation4 + $0x1b0] sm:$0xff] %vm1412_vm7, %v1329_v61  ;;  %v1331_v19 = vpop.permute.xlu0 %1330  ;;  %10726 = vmatprep.mubr.msk.f32.mxu0 %vm3856_vm14, %v3838_v3  ;;  %v3839_v46 = vld [vmem:[#allocation4 + $0x198] sm:$0xff]  ;;  %vm15248_vm13 = vmmov %vm15244_vm1  ;;  %v7286_v3 = vld [vmem:[%s15110_s3 + $0x80] sm:$0xff] }
 0x410   : > { %v5003_v15 = vcombine.high %v5001_v60, %v5001_v60  ;;  %v5853_v34 = vsel %vm15244_vm1, %v5002_v57, -inf  ;;  %v5860_v29 = vsel %vm15245_vm3, %v5001_v60, -inf  ;;  %v5819_v21 = vrot.slane %v5818_v6, 4  ;;  %1468 = vst.msk [vmem:[#allocation4 + $0x1b8] sm:$0xff] %vm1412_vm7, %v1331_v19  ;;  %2881 = vrot.lane.b32.xlu1 %v2693_v13, %s11078_s13  ;;  %10727 = vmatmul.mubr.msk.f32.gmra.mrb[50].mxu0 %vm3856_vm14, %v3839_v46  ;;  %v7270_v19 = vld [vmem:[%s15110_s3] sm:$0xff]  ;;  %v7271_v46 = vld [vmem:[%s15110_s3 + $0x8] sm:$0xff] }
 0x411   : > { %v5848_v1 = vmax.f32 %v5846_v59, %v5847_v41  ;;  %v5854_v52 = vrot.slane %v5853_v34, 4  ;;  %v5861_v7 = vrot.slane %v5860_v29, 4  ;;  %v4986_v16 = vcombine.high %v4984_v63, %v4984_v63  ;;  %2883 = vrot.lane.b32.xlu0 %v2694_v27, %s11078_s13 }
 0x412   : > { %v5867_v32 = vsel %vm15246_vm15, %v5003_v15, -inf  ;;  %v5820_v10 = vmax.f32 %v5818_v6, %v5819_v21  ;;  %v5825_v12 = vsel %vm15247_vm10, %v4985_v4, -inf  ;;  %v5832_v14 = vsel %vm15248_vm13, %v4984_v63, -inf  ;;  %v2866_v18 = vpop.permute.xlu1 %2865 }
 0x413   : > { %v5855_v26 = vmax.f32 %v5853_v34, %v5854_v52  ;;  %v5862_v5 = vmax.f32 %v5860_v29, %v5861_v7  ;;  %v5868_v22 = vrot.slane %v5867_v32, 4  ;;  %3006 = vst.msk [vmem:[#allocation4 + $0x1a0] sm:$0xff] %vm2953_vm11, %v2866_v18  ;;  %v2868_v28 = vpop.permute.xlu0 %2867  ;;  %v5826_v23 = vrot.slane %v5825_v12, 4  ;;  %v3463_v29 = vld [vmem:[#allocation2 + $0x332] sm:$0xff] }
 0x414   : > { %v5821_v49 = vrot.slane %v5820_v10, 2  ;;  %v5833_v11 = vrot.slane %v5832_v14, 4  ;;  %v5839_v33 = vsel %vm15244_vm1, %v4986_v16, -inf  ;;  %3007 = vst.msk [vmem:[#allocation4 + $0x1a8] sm:$0xff] %vm2953_vm11, %v2868_v28  ;;  %1729 = vrot.lane.b32.xlu1 %v2693_v13, %s11075_s10  ;;  %v5849_v36 = vrot.slane %v5848_v1, 2 }
 0x415   : > { %v5856_v35 = vrot.slane %v5855_v26, 2  ;;  %v5869_v44 = vmax.f32 %v5867_v32, %v5868_v22  ;;  %1731 = vrot.lane.b32.xlu0 %v2694_v27, %s11075_s10  ;;  %v5827_v31 = vmax.f32 %v5825_v12, %v5826_v23  ;;  %v5840_v47 = vrot.slane %v5839_v33, 4  ;;  %v7287_v27 = vld [vmem:[%s15110_s3 + $0x88] sm:$0xff] }
 0x416   : > { %v5822_v45 = vmax.f32 %v5820_v10, %v5821_v49  ;;  %v5834_v9 = vmax.f32 %v5832_v14, %v5833_v11  ;;  %v1714_v48 = vpop.permute.xlu1 %1713  ;;  %v5863_v17 = vrot.slane %v5862_v5, 2  ;;  %v5850_v24 = vmax.f32 %v5848_v1, %v5849_v36  ;;  %v3464_v10 = vld [vmem:[#allocation2 + $0x33a] sm:$0xff] }
 0x417   : > { %v5870_v20 = vrot.slane %v5869_v44, 2  ;;  %1852 = vst.msk [vmem:[#allocation4 + $0x1b0] sm:$0xff] %vm1797_vm8, %v1714_v48  ;;  %v1716_v51 = vpop.permute.xlu0 %1715  ;;  %v5828_v53 = vrot.slane %v5827_v31, 2  ;;  %v5841_v54 = vmax.f32 %v5839_v33, %v5840_v47  ;;  %v5857_v56 = vmax.f32 %v5855_v26, %v5856_v35  ;;  %v7288_v26 = vld [vmem:[%s15110_s3 + $0x90] sm:$0xff]  ;;  %v7273_v36 = vld [vmem:[%s15110_s3 + $0x18] sm:$0xff]  ;;  %v2695_v47 = vld [vmem:[#allocation2 + $0x348] sm:$0xff] }
 0x418   : > { %v5835_v43 = vrot.slane %v5834_v9, 2  ;;  %1853 = vst.msk [vmem:[#allocation4 + $0x1b8] sm:$0xff] %vm1797_vm8, %v1716_v51  ;;  %3266 = vrot.lane.b32.xlu1 %v3078_v40, %s11079_s14  ;;  %v5823_v30 = vrot.slane %v5822_v45, 1  ;;  %v5864_v57 = vmax.f32 %v5862_v5, %v5863_v17  ;;  %v10853_v6 = vpack.c.bf16 %v7287_v27, %v7286_v3  ;;  %v7289_v5 = vld [vmem:[%s15110_s3 + $0x98] sm:$0xff]  ;;  %v7272_v33 = vld [vmem:[%s15110_s3 + $0x10] sm:$0xff]  ;;  %v7291_v51 = vld [vmem:[%s15110_s3 + $0xa8] sm:$0xff] }
 0x419   : > { %3268 = vrot.lane.b32.xlu0 %v3079_v62, %s11079_s14  ;;  %v5829_v55 = vmax.f32 %v5827_v31, %v5828_v53  ;;  %v5842_v13 = vrot.slane %v5841_v54, 2  ;;  %v5871_v59 = vmax.f32 %v5869_v44, %v5870_v20  ;;  %v5851_v15 = vrot.slane %v5850_v24, 1  ;;  %v7290_v20 = vld [vmem:[%s15110_s3 + $0xa0] sm:$0xff]  ;;  %v7276_v27 = vld [vmem:[%s15110_s3 + $0x30] sm:$0xff] }
 0x41a   : > { %v5836_v0 = vmax.f32 %v5834_v9, %v5835_v43  ;;  %v3251_v60 = vpop.permute.xlu1 %3250  ;;  %v5858_v34 = vrot.slane %v5857_v56, 1  ;;  %v10855_v21 = vpack.c.bf16 %v7271_v46, %v7270_v19  ;;  %v5824_v1 = vmax.f32 %v5822_v45, %v5823_v30  ;;  %10854 = vmatprep.subr.bf16.mxu1 %v10853_v6  ;;  %v6546_v6 = vld [vmem:[#allocation3] sm:$0xff] }
 0x41b   : > { %3391 = vst.msk [vmem:[#allocation4 + $0x1a0] sm:$0xff] %vm3338_vm12, %v3251_v60  ;;  %v3253_v61 = vpop.permute.xlu0 %3252  ;;  %v5830_v41 = vrot.slane %v5829_v55, 1  ;;  %v5843_v4 = vmax.f32 %v5841_v54, %v5842_v13  ;;  %v5865_v12 = vrot.slane %v5864_v57, 1  ;;  %v5872_v22 = vrot.slane %v5871_v59, 1  ;;  %v3080_v60 = vld [vmem:[#allocation2 + $0x349] sm:$0xff] }
 0x41c   : > { %v5837_v63 = vrot.slane %v5836_v0, 1  ;;  %3392 = vst.msk [vmem:[#allocation4 + $0x1a8] sm:$0xff] %vm3338_vm12, %v3253_v61  ;;  %2114 = vrot.lane.b32.xlu1 %v3078_v40, %s11076_s11  ;;  %10856 = vmatpush3.bf16.msra.mxu1 %v10855_v21  ;;  %vm15249_vm3 = vcmask 1041409   ;;  %v10857_v11 = vpack.c.bf16 %v7289_v5, %v7288_v26  ;;  %v5852_v35 = vmax.f32 %v5850_v24, %v5851_v15  ;;  %v7274_v24 = vld [vmem:[%s15110_s3 + $0x20] sm:$0xff]  ;;  %v7293_v61 = vld [vmem:[%s15110_s3 + $0xb8] sm:$0xff]  ;;  %v3465_v15 = vld [vmem:[#allocation2 + $0x34a] sm:$0xff] }
 0x41d   : > { %2116 = vrot.lane.b32.xlu0 %v3079_v62, %s11076_s11  ;;  %v5831_v52 = vmax.f32 %v5829_v55, %v5830_v41  ;;  %v5844_v16 = vrot.slane %v5843_v4, 1  ;;  %v10859_v40 = vpack.c.bf16 %v7273_v36, %v7272_v33  ;;  %v5859_v45 = vmax.f32 %v5857_v56, %v5858_v34  ;;  %v7275_v56 = vld [vmem:[%s15110_s3 + $0x28] sm:$0xff]  ;;  %v7277_v41 = vld [vmem:[%s15110_s3 + $0x38] sm:$0xff]  ;;  %v7294_v21 = vld [vmem:[%s15110_s3 + $0xc0] sm:$0xff] }
 0x41e   : > { %v5838_v7 = vmax.f32 %v5836_v0, %v5837_v63  ;;  %v2099_v32 = vpop.permute.xlu1 %2098  ;;  %10858 = vmatprep.subr.bf16.mxu1 %v10857_v11  ;;  %v5866_v48 = vmax.f32 %v5864_v57, %v5865_v12  ;;  %vm15250_vm15 = vcmask 220352   ;;  %v5873_v53 = vmax.f32 %v5871_v59, %v5872_v22  ;;  %v7292_v59 = vld [vmem:[%s15110_s3 + $0xb0] sm:$0xff]  ;;  %v7281_v36 = vld [vmem:[%s15110_s3 + $0x58] sm:$0xff] }
 0x41f   : > { %2237 = vst.msk [vmem:[#allocation4 + $0x1b0] sm:$0xff] %vm2182_vm9, %v2099_v32  ;;  %v2101_v14 = vpop.permute.xlu0 %2100  ;;  %v13108_v18 = vpop.f32.mrb[36].mxu0  ;;  %v5845_v28 = vmax.f32 %v5843_v4, %v5844_v16  ;;  %v6457_v49 = vsel %vm15249_vm3, %v5831_v52, %v5824_v1  ;;  %vm15251_vm10 = vmmov %vm15250_vm15  ;;  %v10861_v54 = vpack.c.bf16 %v7291_v51, %v7290_v20  ;;  %v10863_v55 = vpack.c.bf16 %v7275_v56, %v7274_v24  ;;  %v2696_v63 = vld [vmem:[#allocation2 + $0x350] sm:$0xff]  ;;  %v7295_v1 = vld [vmem:[%s15110_s3 + $0xc8] sm:$0xff] }
 0x420   : > { %2238 = vst.msk [vmem:[#allocation4 + $0x1b8] sm:$0xff] %vm2182_vm9, %v2101_v14  ;;  %3651 = vrot.lane.b32.xlu1 %v3463_v29, %s11080_s23  ;;  %v13119_v23 = vpop.f32.mrb[37].mxu0  ;;  %v6458_v44 = vsel %vm6396_vm4, %v5838_v7, %v6457_v49  ;;  %10860 = vmatpush3.bf16.msra.mxu1 %v10859_v40  ;;  %vm15252_vm13 = vcmask 1047559   ;;  %vm15253_vm1 = vcmask 261120   ;;  %vm15254_vm3 = vcmask 146552   ;;  %v7278_v7 = vld [vmem:[%s15110_s3 + $0x40] sm:$0xff] }
 0x421   : > { %3653 = vrot.lane.b32.xlu0 %v3464_v10, %s11080_s23  ;;  %v6459_v31 = vsel %vm6398_vm5, %v5845_v28, %v6458_v44  ;;  %10862 = vmatprep.subr.bf16.mxu1 %v10861_v54  ;;  %v10865_v3 = vpack.c.bf16 %v7293_v61, %v7292_v59  ;;  %v10867_v4 = vpack.c.bf16 %v7277_v41, %v7276_v27  ;;  %v7279_v16 = vld [vmem:[%s15110_s3 + $0x48] sm:$0xff]  ;;  %v3081_v32 = vld [vmem:[#allocation2 + $0x351] sm:$0xff]  ;;  %v4475_v56 = vmul.f32 0.003921569, %v13108_v18  ;;  %v13257_v27 = vld [vmem:[%s15113_s6] ss:$0 sm:$0xff] }
 0x422   : > { %v3636_v9 = vpop.permute.xlu1 %3635  ;;  %v6460_v62 = vsel %vm6400_vm6, %v5852_v35, %v6459_v31  ;;  %v10869_v52 = vpack.c.bf16 %v7295_v1, %v7294_v21  ;;  %v7296_v22 = vld [vmem:[%s15110_s3 + $0xd0] sm:$0xff]  ;;  %v7297_v28 = vld [vmem:[%s15110_s3 + $0xd8] sm:$0xff]  ;;  %v7298_v31 = vld [vmem:[%s15110_s3 + $0xe0] sm:$0xff] }
 0x423   : > { %3776 = vst.msk [vmem:[#allocation4 + $0x1a0] sm:$0xff] %vm15250_vm15, %v3636_v9  ;;  %v3638_v17 = vpop.permute.xlu0 %3637  ;;  %v6461_v43 = vsel %vm6402_vm2, %v5859_v45, %v6460_v62  ;;  %vm15255_vm15 = vmmov %vm15254_vm3  ;;  %v13203_v49 = vld [vmem:[#allocation3 + $0x12] sm:$0xff]  ;;  %v10873_v11 = vpack.c.bf16 %v7297_v28, %v7296_v22  ;;  %v7299_v9 = vld [vmem:[%s15110_s3 + $0xe8] sm:$0xff] }
 0x424   : > { %3777 = vst.msk [vmem:[#allocation4 + $0x1a8] sm:$0xff] %vm15251_vm10, %v3638_v17  ;;  %2499 = vrot.lane.b32.xlu1 %v3463_v29, %s11077_s12  ;;  %v6462_v30 = vsel %vm6404_vm0, %v5866_v48, %v6461_v43  ;;  %10864 = vmatpush3.bf16.msra.mxu1 %v10863_v55  ;;  %vm15256_vm10 = vmmov %vm15253_vm1  ;;  %v7280_v33 = vld [vmem:[%s15110_s3 + $0x50] sm:$0xff]  ;;  %v10877_v48 = vpack.c.bf16 %v7299_v9, %v7298_v31  ;;  %v7282_v62 = vld [vmem:[%s15110_s3 + $0x60] sm:$0xff] }
 0x425   : > { %2885 = vrot.lane.b32.xlu0 %v2695_v47, %s11078_s13  ;;  %v6463_v0 = vsel %vm15252_vm13, %v5873_v53, %v6462_v30  ;;  %10866 = vmatprep.subr.bf16.mxu1 %v10865_v3  ;;  %6562 = vst.msk [vmem:[#allocation5] sm:$0xff] %vm15256_vm10, %v6546_v6  ;;  %vm15257_vm13 = vmmov %vm15253_vm1  ;;  %v3466_v35 = vld [vmem:[#allocation2 + $0x352] sm:$0xff]  ;;  %v10875_v44 = vpack.c.bf16 %v7281_v36, %v7280_v33  ;;  %v13222_v47 = vld [vmem:[#allocation3 + $0x20] sm:$0xff]  ;;  %vm15260_vm10 = vcmask 146552  }
 0x426   : > { %v2484_v13 = vpop.permute.xlu1 %2483  ;;  %6538 = vst.msk [vmem:[#allocation3 + $0xb1] sm:$0xff] %vm15253_vm1, %v6463_v0  ;;  %v7283_v17 = vld [vmem:[%s15110_s3 + $0x68] sm:$0xff]  ;;  %v7300_v54 = vld [vmem:[%s15110_s3 + $0xf0] sm:$0xff]  ;;  %v7301_v24 = vld [vmem:[%s15110_s3 + $0xf8] sm:$0xff] }
 0x427   : > { %2622 = vst.msk [vmem:[#allocation4 + $0x1b0] sm:$0xff] %vm15254_vm3, %v2484_v13  ;;  %v2486_v57 = vpop.permute.xlu0 %2485  ;;  %v6578_v20 = vld [vmem:[#allocation3 + $0x1] sm:$0xff]  ;;  %v10879_v51 = vpack.c.bf16 %v7283_v17, %v7282_v62  ;;  %v10881_v55 = vpack.c.bf16 %v7301_v24, %v7300_v54  ;;  %v7284_v0 = vld [vmem:[%s15110_s3 + $0x70] sm:$0xff]  ;;  %v7285_v13 = vld [vmem:[%s15110_s3 + $0x78] sm:$0xff]  ;;  %vm15258_vm3 = vcmask 220352  }
 0x428   : > { %2623 = vst.msk [vmem:[#allocation4 + $0x1b8] sm:$0xff] %vm15255_vm15, %v2486_v57  ;;  %2501 = vrot.lane.b32.xlu1 %v3464_v10, %s11077_s12  ;;  %10868 = vmatpush3.bf16.msra.mxu1 %v10867_v4  ;;  %v10871_v10 = vpack.c.bf16 %v7279_v16, %v7278_v7  ;;  %v13242_v30 = vld [vmem:[#allocation3 + $0x21] sm:$0xff]  ;;  %v10883_v57 = vpack.c.bf16 %v7285_v13, %v7284_v0  ;;  %vm15259_vm15 = vmmov %vm15258_vm3 }
 0x429   : > { %3270 = vrot.lane.b32.xlu0 %v3080_v60, %s11079_s14  ;;  %10870 = vmatprep.subr.bf16.mxu1 %v10869_v52  ;;  %v4474_v60 = vmul.f32 0.003921569, %v13119_v23  ;;  %v6675_v18 = vld [vmem:[#allocation3 + $0x2] sm:$0xff]  ;;  %v4543_v23 = vadd.f32 %v13257_v27, %v4475_v56  ;;  %v13273_v52 = vld [vmem:[#allocation3 + $0x30] sm:$0xff] }
 0x42a   : > { %v1333_v19 = vpop.permute.xlu1 %1332  ;;  %v3840_v46 = vld [vmem:[#allocation4 + $0x1a0] sm:$0xff] }
 0x42b   : > { %1469 = vst.msk [vmem:[#allocation4 + $0x1c0] sm:$0xff] %vm1412_vm7, %v1333_v19  ;;  %v1335_v34 = vpop.permute.xlu0 %1334  ;;  %10729 = vmatprep.mubr.msk.f32.mxu0 %vm3856_vm14, %v3840_v46  ;;  %v3841_v29 = vld [vmem:[#allocation4 + $0x1a8] sm:$0xff]  ;;  %v4542_v6 = vadd.f32 %v13257_v27, %v4474_v60  ;;  %v4607_v21 = vmax.f32 %v4543_v23, 0.0 }
 0x42c   : > { %1470 = vst.msk [vmem:[#allocation4 + $0x1c8] sm:$0xff] %vm1412_vm7, %v1335_v34  ;;  %2887 = vrot.lane.b32.xlu1 %v2696_v63, %s11078_s13  ;;  %10730 = vmatmul.mubr.msk.f32.gmra.mrb[52].mxu0 %vm3856_vm14, %v3841_v29  ;;  %v13262_v4 = vld [vmem:[#allocation3 + $0x22] sm:$0xff] }
 0x42d   : > { %3655 = vrot.lane.b32.xlu0 %v3465_v15, %s11080_s23  ;;  %v13186_v14 = vld [vmem:[#allocation3 + $0xb0] sm:$0xff]  ;;  %10872 = vmatpush3.bf16.msra.mxu1 %v10871_v10  ;;  %v4606_v7 = vmax.f32 %v4542_v6, 0.0 }
 0x42e   : > { %v2870_v12 = vpop.permute.xlu1 %2869  ;;  %v13188_v26 = vld [vmem:[#allocation3 + $0xb1] sm:$0xff]  ;;  %6571 = vst.msk [vmem:[#allocation5 + $0xd8] sm:$0xff] %vm15253_vm1, %v13186_v14  ;;  %10874 = vmatprep.subr.bf16.mxu1 %v10873_v11  ;;  %vm15262_vm1 = vcmask 254976  }
 0x42f   : > { %3008 = vst.msk [vmem:[#allocation4 + $0x1b0] sm:$0xff] %vm2953_vm11, %v2870_v12  ;;  %v2872_v5 = vpop.permute.xlu0 %2871 }
 0x430   : > { %6893 = vst.msk [vmem:[#allocation5 + $0xc8] sm:$0xff] %vm15257_vm13, %v13188_v26  ;;  %3272 = vrot.lane.b32.xlu1 %v3081_v32, %s11079_s14  ;;  %vm15261_vm13 = vmmov %vm15260_vm10 }
 0x431   : > { %3009 = vst.msk [vmem:[#allocation4 + $0x1b8] sm:$0xff] %vm2953_vm11, %v2872_v5  ;;  %6933 = vrot.lane.b32.xlu0 %v13203_v49, %s11083_s27  ;;  %10876 = vmatpush3.bf16.msra.mxu1 %v10875_v44 }
 0x432   : > { %v1718_v40 = vpop.permute.xlu1 %1717  ;;  %10878 = vmatprep.subr.bf16.mxu1 %v10877_v48 }
 0x433   : > { %1854 = vst.msk [vmem:[#allocation4 + $0x1c0] sm:$0xff] %vm1797_vm8, %v1718_v40  ;;  %v1720_v45 = vpop.permute.xlu0 %1719 }
 0x434   : > { %1855 = vst.msk [vmem:[#allocation4 + $0x1c8] sm:$0xff] %vm1797_vm8, %v1720_v45  ;;  %3657 = vrot.lane.b32.xlu1 %v3466_v35, %s11080_s23 }
 0x435   : > { %7030 = vrot.lane.b32.xlu0 %v13222_v47, %s11084_s15  ;;  %10880 = vmatpush3.bf16.msra.mxu1 %v10879_v51 }
 0x436   : > { %v3255_v53 = vpop.permute.xlu1 %3254  ;;  %10882 = vmatprep.subr.bf16.mxu1 %v10881_v55 }
 0x437   : > { %3393 = vst.msk [vmem:[#allocation4 + $0x1b0] sm:$0xff] %vm3338_vm12, %v3255_v53  ;;  %v3257_v43 = vpop.permute.xlu0 %3256 }
 0x438   : > { %3394 = vst.msk [vmem:[#allocation4 + $0x1b8] sm:$0xff] %vm3338_vm12, %v3257_v43  ;;  %6610 = vrot.lane.b32.xlu1 %v6578_v20, %s11083_s27  ;;  %v13297_v43 = vld [vmem:[#allocation3 + $0x32] sm:$0xff] }
 0x439   : > { %7126 = vrot.lane.b32.xlu0 %v13242_v30, %s11085_s22  ;;  %10884 = vmatpush3.bf16.msra.mxu1 %v10883_v57 }
 0x43a   : > { %v2103_v59 = vpop.permute.xlu1 %2102 }
 0x43b   : > { %2239 = vst.msk [vmem:[#allocation4 + $0x1c0] sm:$0xff] %vm2182_vm9, %v2103_v59  ;;  %v2105_v61 = vpop.permute.xlu0 %2104  ;;  %v10710_v3 = vpop.f32.mrb[38].mxu0 }
 0x43c   : > { %2240 = vst.msk [vmem:[#allocation4 + $0x1c8] sm:$0xff] %vm2182_vm9, %v2105_v61  ;;  %v4477_v41 = vmul.f32 0.003921569, %v10710_v3  ;;  %6707 = vrot.lane.b32.xlu1 %v6675_v18, %s11084_s15  ;;  %v4309_v63 = vpop.f32.mrb[39].mxu0 }
 0x43d   : > { %v4476_v19 = vmul.f32 0.003921569, %v4309_v63  ;;  %6935 = vrot.lane.b32.xlu0 %v13262_v4, %s11083_s27 }
 0x43e   : > { %v4545_v46 = vadd.f32 %v13257_v27, %v4477_v41  ;;  %v3640_v15 = vpop.permute.xlu1 %3639 }
 0x43f   : > { %v4544_v34 = vadd.f32 %v13257_v27, %v4476_v19  ;;  %3778 = vst.msk [vmem:[#allocation4 + $0x1b0] sm:$0xff] %vm15258_vm3, %v3640_v15  ;;  %v3642_v29 = vpop.permute.xlu0 %3641  ;;  %vm15263_vm3 = vmmov %vm15262_vm1  ;;  %v13309_v19 = vld [vmem:[#allocation3 + $0x40] sm:$0xff] }
 0x440   : > { %v4609_v1 = vmax.f32 %v4545_v46, 0.0  ;;  %3779 = vst.msk [vmem:[#allocation4 + $0x1b8] sm:$0xff] %vm15259_vm15, %v3642_v29  ;;  %6804 = vrot.lane.b32.xlu1 %v12406_v25, %s11085_s22  ;;  %vm15264_vm15 = vmmov %vm15262_vm1 }
 0x441   : > { %v4608_v16 = vmax.f32 %v4544_v34, 0.0  ;;  %7032 = vrot.lane.b32.xlu0 %v13273_v52, %s11084_s15 }
 0x442   : > { %v4653_v32 = vmax.f32 %v4607_v21, %v4609_v1  ;;  %v2488_v10 = vpop.permute.xlu1 %2487 }
 0x443   : > { %v4652_v12 = vmax.f32 %v4606_v7, %v4608_v16  ;;  %2624 = vst.msk [vmem:[#allocation4 + $0x1c0] sm:$0xff] %vm15260_vm10, %v2488_v10  ;;  %v2490_v5 = vpop.permute.xlu0 %2489  ;;  %vm15265_vm10 = vmmov %vm15262_vm1 }
 0x444   : > { %v5021_v22 = vcombine.high %v4653_v32, %v4653_v32  ;;  %v5028_v28 = vrot.slane %v4653_v32, %v12337_v38  ;;  %2625 = vst.msk [vmem:[#allocation4 + $0x1c8] sm:$0xff] %vm15261_vm13, %v2490_v5  ;;  %6612 = vrot.lane.b32.xlu1 %v12408_v58, %s11083_s27  ;;  %vm15266_vm13 = vmmov %vm15262_vm1 }
 0x445   : > { %v5004_v25 = vcombine.high %v4652_v12, %v4652_v12  ;;  %v5011_v11 = vrot.slane %v4652_v12, %v12337_v38  ;;  %7128 = vrot.lane.b32.xlu0 %v12581_v42, %s11085_s22 }
 0x446   : > { %v5035_v33 = vrot.slane %v5021_v22, %v12337_v38  ;;  %v5036_v36 = vcombine.high %v5028_v28, %v5028_v28  ;;  %v5902_v35 = vsel %vm15262_vm1, %v5028_v28, -inf  ;;  %v1337_v44 = vpop.permute.xlu1 %1336  ;;  %v3842_v40 = vld [vmem:[#allocation4 + $0x1b0] sm:$0xff] }
 0x447   : > { %v5903_v45 = vrot.slane %v5902_v35, 4  ;;  %v5018_v31 = vrot.slane %v5004_v25, %v12337_v38  ;;  %v5019_v9 = vcombine.high %v5011_v11, %v5011_v11  ;;  %v5874_v48 = vsel %vm15263_vm3, %v5011_v11, -inf  ;;  %1471 = vst.msk [vmem:[#allocation4 + $0x1d0] sm:$0xff] %vm1412_vm7, %v1337_v44  ;;  %v1339_v58 = vpop.permute.xlu0 %1338  ;;  %10732 = vmatprep.mubr.msk.f32.mxu0 %vm3856_vm14, %v3842_v40  ;;  %v3843_v62 = vld [vmem:[#allocation4 + $0x1b8] sm:$0xff]  ;;  %vm15267_vm3 = vmmov %vm15262_vm1 }
 0x448   : > { %v5037_v17 = vcombine.high %v5035_v33, %v5035_v33  ;;  %v5909_v20 = vsel %vm15264_vm15, %v5036_v36, -inf  ;;  %v5916_v51 = vsel %vm15265_vm10, %v5035_v33, -inf  ;;  %v5875_v53 = vrot.slane %v5874_v48, 4  ;;  %1472 = vst.msk [vmem:[#allocation4 + $0x1d8] sm:$0xff] %vm1412_vm7, %v1339_v58  ;;  %10733 = vmatmul.mubr.msk.f32.gmra.mrb[54].mxu0 %vm3856_vm14, %v3843_v62  ;;  %6709 = vrot.lane.b32.xlu1 %v13203_v49, %s11084_s15  ;;  %vm15268_vm15 = vmmov %vm15262_vm1 }
 0x449   : > { %v5904_v54 = vmax.f32 %v5902_v35, %v5903_v45  ;;  %v5910_v24 = vrot.slane %v5909_v20, 4  ;;  %v5917_v56 = vrot.slane %v5916_v51, 4  ;;  %v5020_v55 = vcombine.high %v5018_v31, %v5018_v31  ;;  %6937 = vrot.lane.b32.xlu0 %v13297_v43, %s11083_s27 }
 0x44a   : > { %v5923_v0 = vsel %vm15266_vm13, %v5037_v17, -inf  ;;  %v5876_v13 = vmax.f32 %v5874_v48, %v5875_v53  ;;  %v5881_v60 = vsel %vm15262_vm1, %v5019_v9, -inf  ;;  %v5888_v18 = vsel %vm15267_vm3, %v5018_v31, -inf  ;;  %v2874_v57 = vpop.permute.xlu1 %2873 }
 0x44b   : > { %v5911_v59 = vmax.f32 %v5909_v20, %v5910_v24  ;;  %v5918_v61 = vmax.f32 %v5916_v51, %v5917_v56  ;;  %v5924_v49 = vrot.slane %v5923_v0, 4  ;;  %3010 = vst.msk [vmem:[#allocation4 + $0x1c0] sm:$0xff] %vm2953_vm11, %v2874_v57  ;;  %v2876_v3 = vpop.permute.xlu0 %2875  ;;  %v5882_v41 = vrot.slane %v5881_v60, 4 }
 0x44c   : > { %v5877_v23 = vrot.slane %v5876_v13, 2  ;;  %v5889_v63 = vrot.slane %v5888_v18, 4  ;;  %v5895_v6 = vsel %vm15268_vm15, %v5020_v55, -inf  ;;  %3011 = vst.msk [vmem:[#allocation4 + $0x1c8] sm:$0xff] %vm2953_vm11, %v2876_v3  ;;  %6806 = vrot.lane.b32.xlu1 %v13222_v47, %s11085_s22  ;;  %v5905_v46 = vrot.slane %v5904_v54, 2 }
 0x44d   : > { %v5912_v15 = vrot.slane %v5911_v59, 2  ;;  %v5925_v34 = vmax.f32 %v5923_v0, %v5924_v49  ;;  %7034 = vrot.lane.b32.xlu0 %v13309_v19, %s11084_s15  ;;  %v5883_v21 = vmax.f32 %v5881_v60, %v5882_v41  ;;  %v5896_v7 = vrot.slane %v5895_v6, 4 }
 0x44e   : > { %v5878_v29 = vmax.f32 %v5876_v13, %v5877_v23  ;;  %v5890_v1 = vmax.f32 %v5888_v18, %v5889_v63  ;;  %v1722_v16 = vpop.permute.xlu1 %1721  ;;  %v5919_v32 = vrot.slane %v5918_v61, 2  ;;  %v5906_v28 = vmax.f32 %v5904_v54, %v5905_v46  ;;  %v7001_v18 = vld [vmem:[#allocation3 + $0x50] sm:$0xff] }
 0x44f   : > { %1856 = vst.msk [vmem:[#allocation4 + $0x1d0] sm:$0xff] %vm1797_vm8, %v1722_v16  ;;  %v1724_v10 = vpop.permute.xlu0 %1723  ;;  %v5926_v12 = vrot.slane %v5925_v34, 2  ;;  %v5884_v5 = vrot.slane %v5883_v21, 2  ;;  %v5897_v22 = vmax.f32 %v5895_v6, %v5896_v7  ;;  %v5913_v25 = vmax.f32 %v5911_v59, %v5912_v15 }
 0x450   : > { %v5891_v47 = vrot.slane %v5890_v1, 2  ;;  %1857 = vst.msk [vmem:[#allocation4 + $0x1d8] sm:$0xff] %vm1797_vm8, %v1724_v10  ;;  %6614 = vrot.lane.b32.xlu1 %v13242_v30, %s11083_s27  ;;  %v5879_v11 = vrot.slane %v5878_v29, 1  ;;  %v5920_v40 = vmax.f32 %v5918_v61, %v5919_v32  ;;  %v13323_v30 = vld [vmem:[#allocation3 + $0x42] sm:$0xff]  ;;  %v5907_v62 = vrot.slane %v5906_v28, 1 }
 0x451   : > { %7130 = vrot.lane.b32.xlu0 %v12670_v39, %s11085_s22  ;;  %v5885_v33 = vmax.f32 %v5883_v21, %v5884_v5  ;;  %v5898_v35 = vrot.slane %v5897_v22, 2  ;;  %v5927_v31 = vmax.f32 %v5925_v34, %v5926_v12  ;;  %v5914_v17 = vrot.slane %v5913_v25, 1  ;;  %v13358_v10 = vld [vmem:[#allocation3 + $0x60] sm:$0xff] }
 0x452   : > { %v5892_v36 = vmax.f32 %v5890_v1, %v5891_v47  ;;  %v3259_v44 = vpop.permute.xlu1 %3258  ;;  %v5880_v20 = vmax.f32 %v5878_v29, %v5879_v11  ;;  %v5921_v56 = vrot.slane %v5920_v40, 1  ;;  %vm15269_vm10 = vcmask 1041409   ;;  %v6905_v1 = vld [vmem:[#allocation3 + $0x52] sm:$0xff] }
 0x453   : > { %3395 = vst.msk [vmem:[#allocation4 + $0x1c0] sm:$0xff] %vm3338_vm12, %v3259_v44  ;;  %v3261_v45 = vpop.permute.xlu0 %3260  ;;  %v5886_v9 = vrot.slane %v5885_v33, 1  ;;  %v5899_v58 = vmax.f32 %v5897_v22, %v5898_v35  ;;  %v5928_v13 = vrot.slane %v5927_v31, 1  ;;  %v5908_v59 = vmax.f32 %v5906_v28, %v5907_v62 }
 0x454   : > { %v5893_v48 = vrot.slane %v5892_v36, 1  ;;  %3396 = vst.msk [vmem:[#allocation4 + $0x1c8] sm:$0xff] %vm3338_vm12, %v3261_v45  ;;  %6711 = vrot.lane.b32.xlu1 %v13262_v4, %s11084_s15  ;;  %v5915_v49 = vmax.f32 %v5913_v25, %v5914_v17  ;;  %v5922_v41 = vmax.f32 %v5920_v40, %v5921_v56  ;;  %vm15270_vm13 = vcmask 220352   ;;  %v13379_v25 = vld [vmem:[#allocation3 + $0x62] sm:$0xff] }
 0x455   : > { %6939 = vrot.lane.b32.xlu0 %v13323_v30, %s11083_s27  ;;  %v5887_v51 = vmax.f32 %v5885_v33, %v5886_v9  ;;  %v5900_v54 = vrot.slane %v5899_v58, 1  ;;  %v5929_v46 = vmax.f32 %v5927_v31, %v5928_v13  ;;  %vm15271_vm1 = vmmov %vm15270_vm13  ;;  %vm15272_vm3 = vcmask 1047559  }
 0x456   : > { %v5894_v53 = vmax.f32 %v5892_v36, %v5893_v48  ;;  %v2107_v24 = vpop.permute.xlu1 %2106  ;;  %vm15273_vm15 = vcmask 261120   ;;  %v13387_v36 = vld [vmem:[#allocation3 + $0x70] sm:$0xff] }
 0x457   : > { %2241 = vst.msk [vmem:[#allocation4 + $0x1d0] sm:$0xff] %vm2182_vm9, %v2107_v24  ;;  %v2109_v55 = vpop.permute.xlu0 %2108  ;;  %v13328_v0 = vpop.f32.mrb[40].mxu0  ;;  %v5901_v4 = vmax.f32 %v5899_v58, %v5900_v54  ;;  %v6464_v60 = vsel %vm15269_vm10, %v5887_v51, %v5880_v20  ;;  %vm15274_vm10 = vcmask 146552  }
 0x458   : > { %2242 = vst.msk [vmem:[#allocation4 + $0x1d8] sm:$0xff] %vm2182_vm9, %v2109_v55  ;;  %6808 = vrot.lane.b32.xlu1 %v13273_v52, %s11085_s22  ;;  %v4319_v57 = vpop.f32.mrb[41].mxu0  ;;  %v6465_v61 = vsel %vm6396_vm4, %v5894_v53, %v6464_v60  ;;  %v4479_v33 = vmul.f32 0.003921569, %v13328_v0 }
 0x459   : > { %7036 = vrot.lane.b32.xlu0 %v7001_v18, %s11084_s15  ;;  %v6466_v3 = vsel %vm6398_vm5, %v5901_v4, %v6465_v61  ;;  %v4478_v35 = vmul.f32 0.003921569, %v4319_v57  ;;  %v13413_v57 = vld [vmem:[#allocation3 + $0x80] sm:$0xff] }
 0x45a   : > { %v3644_v23 = vpop.permute.xlu1 %3643  ;;  %v6467_v63 = vsel %vm6400_vm6, %v5908_v59, %v6466_v3  ;;  %v4547_v31 = vadd.f32 %v13257_v27, %v4479_v33 }
 0x45b   : > { %3780 = vst.msk [vmem:[#allocation4 + $0x1c0] sm:$0xff] %vm15270_vm13, %v3644_v23  ;;  %v3646_v6 = vpop.permute.xlu0 %3645  ;;  %v6468_v52 = vsel %vm6402_vm2, %v5915_v49, %v6467_v63  ;;  %vm15275_vm13 = vmmov %vm15274_vm10  ;;  %v4546_v58 = vadd.f32 %v13257_v27, %v4478_v35 }
 0x45c   : > { %3781 = vst.msk [vmem:[#allocation4 + $0x1c8] sm:$0xff] %vm15271_vm1, %v3646_v6  ;;  %6616 = vrot.lane.b32.xlu1 %v12581_v42, %s11083_s27  ;;  %v6469_v15 = vsel %vm6404_vm0, %v5922_v41, %v6468_v52  ;;  %vm15276_vm1 = vmmov %vm15273_vm15  ;;  %v4611_v53 = vmax.f32 %v4547_v31, 0.0 }
 0x45d   : > { %7132 = vrot.lane.b32.xlu0 %v12753_v2, %s11085_s22  ;;  %v6470_v34 = vsel %vm15272_vm3, %v5929_v46, %v6469_v15  ;;  %vm15277_vm3 = vmmov %vm15276_vm1  ;;  %v4610_v24 = vmax.f32 %v4546_v58, 0.0 }
 0x45e   : > { %v2492_v29 = vpop.permute.xlu1 %2491  ;;  %6539 = vst.msk [vmem:[#allocation3 + $0xc1] sm:$0xff] %vm15273_vm15, %v6470_v34  ;;  %vm15278_vm15 = vmmov %vm15276_vm1 }
 0x45f   : > { %2626 = vst.msk [vmem:[#allocation4 + $0x1d0] sm:$0xff] %vm15274_vm10, %v2492_v29  ;;  %v2494_v21 = vpop.permute.xlu0 %2493  ;;  %vm15279_vm10 = vcmask 220352  }
 0x460   : > { %2627 = vst.msk [vmem:[#allocation4 + $0x1d8] sm:$0xff] %vm15275_vm13, %v2494_v21  ;;  %6713 = vrot.lane.b32.xlu1 %v13297_v43, %s11084_s15  ;;  %vm15280_vm13 = vmmov %vm15279_vm10 }
 0x461   : > { %6941 = vrot.lane.b32.xlu0 %v6905_v1, %s11083_s27 }
 0x462   : > { %v1341_v42 = vpop.permute.xlu1 %1340  ;;  %v3844_v7 = vld [vmem:[#allocation4 + $0x1c0] sm:$0xff] }
 0x463   : > { %1473 = vst.msk [vmem:[#allocation4 + $0x1e0] sm:$0xff] %vm1412_vm7, %v1341_v42  ;;  %v1343_v16 = vpop.permute.xlu0 %1342  ;;  %10735 = vmatprep.mubr.msk.f32.mxu0 %vm3856_vm14, %v3844_v7  ;;  %v3845_v32 = vld [vmem:[#allocation4 + $0x1c8] sm:$0xff] }
 0x464   : > { %1474 = vst.msk [vmem:[#allocation4 + $0x1e8] sm:$0xff] %vm1412_vm7, %v1343_v16  ;;  %6810 = vrot.lane.b32.xlu1 %v13309_v19, %s11085_s22  ;;  %10736 = vmatmul.mubr.msk.f32.gmra.mrb[56].mxu0 %vm3856_vm14, %v3845_v32 }
 0x465   : > { %7038 = vrot.lane.b32.xlu0 %v13358_v10, %s11084_s15  ;;  %v13363_v12 = vld [vmem:[#allocation3 + $0xc1] sm:$0xff] }
 0x466   : > { %v2878_v43 = vpop.permute.xlu1 %2877  ;;  %6894 = vst.msk [vmem:[#allocation5 + $0xe0] sm:$0xff] %vm15276_vm1, %v13363_v12  ;;  %v6556_v47 = vld [vmem:[#allocation3 + $0xc0] sm:$0xff]  ;;  %vm15281_vm1 = vcmask 146552  }
 0x467   : > { %3012 = vst.msk [vmem:[#allocation4 + $0x1d0] sm:$0xff] %vm2953_vm11, %v2878_v43  ;;  %v2880_v5 = vpop.permute.xlu0 %2879  ;;  %v7198_v22 = vld [vmem:[#allocation3 + $0xc2] sm:$0xff] }
 0x468   : > { %3013 = vst.msk [vmem:[#allocation4 + $0x1d8] sm:$0xff] %vm2953_vm11, %v2880_v5  ;;  %6618 = vrot.lane.b32.xlu1 %v12670_v39, %s11083_s27 }
 0x469   : > { %6572 = vst.msk [vmem:[#allocation5 + $0xf0] sm:$0xff] %vm15277_vm3, %v6556_v47  ;;  %7134 = vrot.lane.b32.xlu0 %v12835_v37, %s11085_s22  ;;  %vm15282_vm3 = vmmov %vm15281_vm1 }
 0x46a   : > { %7214 = vst.msk [vmem:[#allocation5 + $0xd0] sm:$0xff] %vm15278_vm15, %v7198_v22  ;;  %v1726_v19 = vpop.permute.xlu1 %1725  ;;  %vm15283_vm15 = vcmask 254976  }
 0x46b   : > { %1858 = vst.msk [vmem:[#allocation4 + $0x1e0] sm:$0xff] %vm1797_vm8, %v1726_v19  ;;  %v1728_v28 = vpop.permute.xlu0 %1727 }
 0x46c   : > { %1859 = vst.msk [vmem:[#allocation4 + $0x1e8] sm:$0xff] %vm1797_vm8, %v1728_v28  ;;  %6715 = vrot.lane.b32.xlu1 %v13323_v30, %s11084_s15 }
 0x46d   : > { %6943 = vrot.lane.b32.xlu0 %v13379_v25, %s11083_s27 }
 0x46e   : > { %v3263_v39 = vpop.permute.xlu1 %3262 }
 0x46f   : > { %3397 = vst.msk [vmem:[#allocation4 + $0x1d0] sm:$0xff] %vm3338_vm12, %v3263_v39  ;;  %v3265_v11 = vpop.permute.xlu0 %3264 }
 0x470   : > { %3398 = vst.msk [vmem:[#allocation4 + $0x1d8] sm:$0xff] %vm3338_vm12, %v3265_v11  ;;  %6812 = vrot.lane.b32.xlu1 %v7001_v18, %s11085_s22 }
 0x471   : > { %7040 = vrot.lane.b32.xlu0 %v13387_v36, %s11084_s15 }
 0x472   : > { %v2111_v44 = vpop.permute.xlu1 %2110 }
 0x473   : > { %2243 = vst.msk [vmem:[#allocation4 + $0x1e0] sm:$0xff] %vm2182_vm9, %v2111_v44  ;;  %v2113_v40 = vpop.permute.xlu0 %2112  ;;  %v10716_v45 = vpop.f32.mrb[42].mxu0 }
 0x474   : > { %2244 = vst.msk [vmem:[#allocation4 + $0x1e8] sm:$0xff] %vm2182_vm9, %v2113_v40  ;;  %v4481_v9 = vmul.f32 0.003921569, %v10716_v45  ;;  %6620 = vrot.lane.b32.xlu1 %v12753_v2, %s11083_s27  ;;  %v4329_v48 = vpop.f32.mrb[43].mxu0  ;;  %v13404_v2 = vld [vmem:[#allocation3 + $0x72] sm:$0xff] }
 0x475   : > { %v4480_v30 = vmul.f32 0.003921569, %v4329_v48  ;;  %7136 = vrot.lane.b32.xlu0 %v12938_v50, %s11085_s22 }
 0x476   : > { %v4549_v62 = vadd.f32 %v13257_v27, %v4481_v9  ;;  %v3648_v17 = vpop.permute.xlu1 %3647 }
 0x477   : > { %v4548_v20 = vadd.f32 %v13257_v27, %v4480_v30  ;;  %3782 = vst.msk [vmem:[#allocation4 + $0x1d0] sm:$0xff] %vm15279_vm10, %v3648_v17  ;;  %v3650_v51 = vpop.permute.xlu0 %3649  ;;  %vm15284_vm10 = vmmov %vm15283_vm15 }
 0x478   : > { %v4613_v54 = vmax.f32 %v4549_v62, 0.0  ;;  %3783 = vst.msk [vmem:[#allocation4 + $0x1d8] sm:$0xff] %vm15280_vm13, %v3650_v51  ;;  %6717 = vrot.lane.b32.xlu1 %v6905_v1, %s11084_s15  ;;  %vm15285_vm13 = vmmov %vm15284_vm10  ;;  %v7005_v51 = vld [vmem:[#allocation3 + $0x90] sm:$0xff] }
 0x479   : > { %v4612_v56 = vmax.f32 %v4548_v20, 0.0  ;;  %6945 = vrot.lane.b32.xlu0 %v13404_v2, %s11083_s27 }
 0x47a   : > { %v4655_v55 = vmax.f32 %v4611_v53, %v4613_v54  ;;  %v2496_v0 = vpop.permute.xlu1 %2495 }
 0x47b   : > { %v4654_v13 = vmax.f32 %v4610_v24, %v4612_v56  ;;  %2628 = vst.msk [vmem:[#allocation4 + $0x1e0] sm:$0xff] %vm15281_vm1, %v2496_v0  ;;  %v2498_v4 = vpop.permute.xlu0 %2497  ;;  %vm15286_vm1 = vmmov %vm15284_vm10  ;;  %v6554_v0 = vld [vmem:[#allocation3 + $0xa0] sm:$0xff] }
 0x47c   : > { %v5055_v60 = vcombine.high %v4655_v55, %v4655_v55  ;;  %v5062_v18 = vrot.slane %v4655_v55, %v12337_v38  ;;  %2629 = vst.msk [vmem:[#allocation4 + $0x1e8] sm:$0xff] %vm15282_vm3, %v2498_v4  ;;  %6814 = vrot.lane.b32.xlu1 %v13358_v10, %s11085_s22  ;;  %vm15287_vm3 = vmmov %vm15286_vm1 }
 0x47d   : > { %v5038_v59 = vcombine.high %v4654_v13, %v4654_v13  ;;  %v5045_v61 = vrot.slane %v4654_v13, %v12337_v38  ;;  %7042 = vrot.lane.b32.xlu0 %v13413_v57, %s11084_s15 }
 0x47e   : > { %v5069_v49 = vrot.slane %v5055_v60, %v12337_v38  ;;  %v5070_v3 = vcombine.high %v5062_v18, %v5062_v18  ;;  %v5958_v23 = vsel %vm15283_vm15, %v5062_v18, -inf  ;;  %v1345_v41 = vpop.permute.xlu1 %1344  ;;  %v3846_v63 = vld [vmem:[#allocation4 + $0x1d0] sm:$0xff]  ;;  %vm15288_vm15 = vmmov %vm15286_vm1 }
 0x47f   : > { %v5959_v6 = vrot.slane %v5958_v23, 4  ;;  %v5052_v46 = vrot.slane %v5038_v59, %v12337_v38  ;;  %v5053_v52 = vcombine.high %v5045_v61, %v5045_v61  ;;  %v5930_v15 = vsel %vm15284_vm10, %v5045_v61, -inf  ;;  %1475 = vst.msk [vmem:[#allocation4 + $0x1f0] sm:$0xff] %vm1412_vm7, %v1345_v41  ;;  %v1347_v34 = vpop.permute.xlu0 %1346  ;;  %10738 = vmatprep.mubr.msk.f32.mxu0 %vm3856_vm14, %v3846_v63  ;;  %v3847_v29 = vld [vmem:[#allocation4 + $0x1d8] sm:$0xff]  ;;  %vm15289_vm10 = vmmov %vm15286_vm1 }
 0x480   : > { %v5071_v21 = vcombine.high %v5069_v49, %v5069_v49  ;;  %v5965_v1 = vsel %vm15285_vm13, %v5070_v3, -inf  ;;  %v5972_v42 = vsel %vm15286_vm1, %v5069_v49, -inf  ;;  %v5931_v7 = vrot.slane %v5930_v15, 4  ;;  %1476 = vst.msk [vmem:[#allocation4 + $0x1f8] sm:$0xff] %vm1412_vm7, %v1347_v34  ;;  %10739 = vmatmul.mubr.msk.f32.gmra.mrb[58].mxu0 %vm3856_vm14, %v3847_v29  ;;  %6622 = vrot.lane.b32.xlu1 %v12835_v37, %s11083_s27  ;;  %vm15290_vm7 = vmmov %vm15286_vm1  ;;  %v7101_v3 = vld [vmem:[#allocation3 + $0x91] sm:$0xff] }
 0x481   : > { %v5960_v16 = vmax.f32 %v5958_v23, %v5959_v6  ;;  %v5966_v32 = vrot.slane %v5965_v1, 4  ;;  %v5973_v10 = vrot.slane %v5972_v42, 4  ;;  %v5054_v43 = vcombine.high %v5052_v46, %v5052_v46  ;;  %7138 = vrot.lane.b32.xlu0 %v13031_v8, %s11085_s22  ;;  %v6908_v8 = vld [vmem:[#allocation3 + $0x82] sm:$0xff] }
 0x482   : > { %v5979_v5 = vsel %vm15287_vm3, %v5071_v21, -inf  ;;  %v5932_v47 = vmax.f32 %v5930_v15, %v5931_v7  ;;  %v5937_v22 = vsel %vm15288_vm15, %v5053_v52, -inf  ;;  %v5944_v19 = vsel %vm15289_vm10, %v5052_v46, -inf  ;;  %v2882_v28 = vpop.permute.xlu1 %2881 }
 0x483   : > { %v5967_v39 = vmax.f32 %v5965_v1, %v5966_v32  ;;  %v5974_v11 = vmax.f32 %v5972_v42, %v5973_v10  ;;  %v5980_v33 = vrot.slane %v5979_v5, 4  ;;  %3014 = vst.msk [vmem:[#allocation4 + $0x1e0] sm:$0xff] %vm2953_vm11, %v2882_v28  ;;  %v2884_v37 = vpop.permute.xlu0 %2883  ;;  %v5938_v44 = vrot.slane %v5937_v22, 4 }
 0x484   : > { %v5933_v35 = vrot.slane %v5932_v47, 2  ;;  %v5945_v40 = vrot.slane %v5944_v19, 4  ;;  %v5951_v45 = vsel %vm15290_vm7, %v5054_v43, -inf  ;;  %3015 = vst.msk [vmem:[#allocation4 + $0x1e8] sm:$0xff] %vm2953_vm11, %v2884_v37  ;;  %6719 = vrot.lane.b32.xlu1 %v13379_v25, %s11084_s15  ;;  %v5961_v31 = vrot.slane %v5960_v16, 2 }
 0x485   : > { %v5968_v9 = vrot.slane %v5967_v39, 2  ;;  %v5981_v48 = vmax.f32 %v5979_v5, %v5980_v33  ;;  %6947 = vrot.lane.b32.xlu0 %v6908_v8, %s11083_s27  ;;  %v5939_v30 = vmax.f32 %v5937_v22, %v5938_v44  ;;  %v5952_v17 = vrot.slane %v5951_v45, 4  ;;  %v6586_v8 = vld [vmem:[#allocation3 + $0xa1] sm:$0xff] }
 0x486   : > { %v5934_v58 = vmax.f32 %v5932_v47, %v5933_v35  ;;  %v5946_v62 = vmax.f32 %v5944_v19, %v5945_v40  ;;  %v1730_v20 = vpop.permute.xlu1 %1729  ;;  %v5975_v53 = vrot.slane %v5974_v11, 2  ;;  %v5962_v13 = vmax.f32 %v5960_v16, %v5961_v31  ;;  %v13473_v40 = vld [vmem:[#allocation3 + $0xc0] sm:$0xff] }
 0x487   : > { %1860 = vst.msk [vmem:[#allocation4 + $0x1f0] sm:$0xff] %vm1797_vm8, %v1730_v20  ;;  %v1732_v54 = vpop.permute.xlu0 %1731  ;;  %v5982_v24 = vrot.slane %v5981_v48, 2  ;;  %v5940_v56 = vrot.slane %v5939_v30, 2  ;;  %v5953_v25 = vmax.f32 %v5951_v45, %v5952_v17  ;;  %v5969_v4 = vmax.f32 %v5967_v39, %v5968_v9  ;;  %v13489_v20 = vld [vmem:[#allocation3 + $0xc2] sm:$0xff] }
 0x488   : > { %v5947_v55 = vrot.slane %v5946_v62, 2  ;;  %1861 = vst.msk [vmem:[#allocation4 + $0x1f8] sm:$0xff] %vm1797_vm8, %v1732_v54  ;;  %6816 = vrot.lane.b32.xlu1 %v13387_v36, %s11085_s22  ;;  %vm15291_vm13 = vcmask 261120   ;;  %v5935_v60 = vrot.slane %v5934_v58, 1  ;;  %v5976_v23 = vmax.f32 %v5974_v11, %v5975_v53 }
 0x489   : > { %7044 = vrot.lane.b32.xlu0 %v7005_v51, %s11084_s15  ;;  %6570 = vst.msk [vmem:[#allocation5 + $0xc0] sm:$0xff] %vm15291_vm13, %v6554_v0  ;;  %v5941_v18 = vmax.f32 %v5939_v30, %v5940_v56  ;;  %v5954_v61 = vrot.slane %v5953_v25, 2  ;;  %v5983_v63 = vmax.f32 %v5981_v48, %v5982_v24  ;;  %v5963_v52 = vrot.slane %v5962_v13, 1  ;;  %vm15296_vm15 = vmmov %vm15291_vm13 }
 0x48a   : > { %v5948_v59 = vmax.f32 %v5946_v62, %v5947_v55  ;;  %v3267_v49 = vpop.permute.xlu1 %3266  ;;  %v5970_v15 = vrot.slane %v5969_v4, 1  ;;  %v5936_v34 = vmax.f32 %v5934_v58, %v5935_v60  ;;  %v5977_v7 = vrot.slane %v5976_v23, 1 }
 0x48b   : > { %3399 = vst.msk [vmem:[#allocation4 + $0x1e0] sm:$0xff] %vm3338_vm12, %v3267_v49  ;;  %v3269_v41 = vpop.permute.xlu0 %3268  ;;  %v5942_v6 = vrot.slane %v5941_v18, 1  ;;  %v5955_v46 = vmax.f32 %v5953_v25, %v5954_v61  ;;  %v5984_v10 = vrot.slane %v5983_v63, 1  ;;  %vm15292_vm8 = vcmask 1041409  }
 0x48c   : > { %v5949_v36 = vrot.slane %v5948_v59, 1  ;;  %3400 = vst.msk [vmem:[#allocation4 + $0x1e8] sm:$0xff] %vm3338_vm12, %v3269_v41  ;;  %6624 = vrot.lane.b32.xlu1 %v12938_v50, %s11083_s27  ;;  %v13459_v50 = vld [vmem:[#allocation3 + $0xb2] sm:$0xff]  ;;  %v5964_v22 = vmax.f32 %v5962_v13, %v5963_v52  ;;  %v5971_v28 = vmax.f32 %v5969_v4, %v5970_v15  ;;  %v5978_v33 = vmax.f32 %v5976_v23, %v5977_v7 }
 0x48d   : > { %7140 = vrot.lane.b32.xlu0 %v7101_v3, %s11085_s22  ;;  %v5943_v29 = vmax.f32 %v5941_v18, %v5942_v6  ;;  %v5956_v1 = vrot.slane %v5955_v46, 1  ;;  %v5985_v35 = vmax.f32 %v5983_v63, %v5984_v10  ;;  %vm15295_vm3 = vcmask 1047559  }
 0x48e   : > { %v5950_v21 = vmax.f32 %v5948_v59, %v5949_v36  ;;  %v2115_v42 = vpop.permute.xlu1 %2114  ;;  %vm15297_vm10 = vcmask 146552  }
 0x48f   : > { %2245 = vst.msk [vmem:[#allocation4 + $0x1f0] sm:$0xff] %vm2182_vm9, %v2115_v42  ;;  %v2117_v16 = vpop.permute.xlu0 %2116  ;;  %v13453_v32 = vpop.f32.mrb[44].mxu0  ;;  %v5957_v43 = vmax.f32 %v5955_v46, %v5956_v1  ;;  %v6471_v5 = vsel %vm15292_vm8, %v5943_v29, %v5936_v34  ;;  %vm15298_vm7 = vmmov %vm15297_vm10 }
 0x490   : > { %2246 = vst.msk [vmem:[#allocation4 + $0x1f8] sm:$0xff] %vm2182_vm9, %v2117_v16  ;;  %6721 = vrot.lane.b32.xlu1 %v13404_v2, %s11084_s15  ;;  %v13461_v47 = vpop.f32.mrb[45].mxu0  ;;  %v6472_v19 = vsel %vm6396_vm4, %v5950_v21, %v6471_v5  ;;  %vm15293_vm9 = vcmask 220352   ;;  %v4483_v60 = vmul.f32 0.003921569, %v13453_v32 }
 0x491   : > { %6949 = vrot.lane.b32.xlu0 %v13459_v50, %s11083_s27  ;;  %v6473_v39 = vsel %vm6398_vm5, %v5957_v43, %v6472_v19  ;;  %vm15294_vm1 = vmmov %vm15293_vm9 }
 0x492   : > { %v3652_v11 = vpop.permute.xlu1 %3651  ;;  %v6474_v37 = vsel %vm6400_vm6, %v5964_v22, %v6473_v39  ;;  %vm15299_vm8 = vmmov %vm15294_vm1  ;;  %v4551_v3 = vadd.f32 %v13257_v27, %v4483_v60 }
 0x493   : > { %3784 = vst.msk [vmem:[#allocation4 + $0x1e0] sm:$0xff] %vm15293_vm9, %v3652_v11  ;;  %v3654_v2 = vpop.permute.xlu0 %3653  ;;  %v6475_v44 = vsel %vm6402_vm2, %v5971_v28, %v6474_v37  ;;  %vm15300_vm9 = vmmov %vm15291_vm13 }
 0x494   : > { %3785 = vst.msk [vmem:[#allocation4 + $0x1e8] sm:$0xff] %vm15294_vm1, %v3654_v2  ;;  %6818 = vrot.lane.b32.xlu1 %v13413_v57, %s11085_s22  ;;  %v6476_v45 = vsel %vm6404_vm0, %v5978_v33, %v6475_v44  ;;  %v6683_v57 = vld [vmem:[#allocation3 + $0xa2] sm:$0xff]  ;;  %vm15301_vm1 = vmmov %vm15300_vm9  ;;  %v4615_v29 = vmax.f32 %v4551_v3, 0.0 }
 0x495   : > { %7046 = vrot.lane.b32.xlu0 %v13473_v40, %s11084_s15  ;;  %v6477_v31 = vsel %vm15295_vm3, %v5985_v35, %v6476_v45  ;;  %vm6755_vm3 = vcmask 785920  }
 0x496   : > { %v2500_v9 = vpop.permute.xlu1 %2499  ;;  %6540 = vst.msk [vmem:[#allocation3 + $0xd1] sm:$0xff] %vm15296_vm15, %v6477_v31  ;;  %vm15302_vm15 = vmmov %vm15299_vm8 }
 0x497   : > { %2630 = vst.msk [vmem:[#allocation4 + $0x1f0] sm:$0xff] %vm15297_vm10, %v2500_v9  ;;  %v2886_v48 = vpop.permute.xlu0 %2885 }
 0x498   : > { %3016 = vst.msk [vmem:[#allocation4 + $0x1f0] sm:$0xff] %vm2953_vm11, %v2886_v48  ;;  %6626 = vrot.lane.b32.xlu1 %v6586_v8, %s11083_s27 }
 0x499   : > { %7142 = vrot.lane.b32.xlu0 %v13363_v12, %s11085_s22 }
 0x49a   : > { %v2502_v58 = vpop.permute.xlu1 %2501  ;;  %v3848_v30 = vld [vmem:[#allocation4 + $0x1e0] sm:$0xff] }
 0x49b   : > { %2631 = vst.msk [vmem:[#allocation4 + $0x1f8] sm:$0xff] %vm15298_vm7, %v2502_v58  ;;  %v3271_v62 = vpop.permute.xlu0 %3270  ;;  %10741 = vmatprep.mubr.msk.f32.mxu0 %vm3856_vm14, %v3848_v30  ;;  %v3849_v17 = vld [vmem:[#allocation4 + $0x1e8] sm:$0xff] }
 0x49c   : > { %3401 = vst.msk [vmem:[#allocation4 + $0x1f0] sm:$0xff] %vm3338_vm12, %v3271_v62  ;;  %6723 = vrot.lane.b32.xlu1 %v6683_v57, %s11084_s15  ;;  %10742 = vmatmul.mubr.msk.f32.gmra.mrb[60].mxu0 %vm3856_vm14, %v3849_v17 }
 0x49d   : > { %6951 = vrot.lane.b32.xlu0 %v13489_v20, %s11083_s27  ;;  %v13494_v53 = vld [vmem:[#allocation3 + $0xd1] sm:$0xff] }
 0x49e   : > { %v2888_v51 = vpop.permute.xlu1 %2887  ;;  %6895 = vst.msk [vmem:[#allocation5 + $0xf8] sm:$0xff] %vm15291_vm13, %v13494_v53  ;;  %v6557_v24 = vld [vmem:[#allocation3 + $0xd0] sm:$0xff] }
 0x49f   : > { %3017 = vst.msk [vmem:[#allocation4 + $0x1f8] sm:$0xff] %vm2953_vm11, %v2888_v51  ;;  %v3656_v54 = vpop.permute.xlu0 %3655  ;;  %v7199_v56 = vld [vmem:[#allocation3 + $0xd2] sm:$0xff]  ;;  %vm6658_vm11 = vcmask 523520  }
 0x4a0   : > { %3786 = vst.msk [vmem:[#allocation4 + $0x1f0] sm:$0xff] %vm15299_vm8, %v3656_v54  ;;  %6820 = vrot.lane.b32.xlu1 %v13186_v14, %s11085_s22  ;;  %v13502_v55 = vld [vmem:[#allocation3 + $0xd0] sm:$0xff] }
 0x4a1   : > { %6573 = vst.msk [vmem:[#allocation5 + $0x108] sm:$0xff] %vm15300_vm9, %v6557_v24  ;;  %7048 = vrot.lane.b32.xlu0 %v13502_v55, %s11084_s15  ;;  %v13519_v18 = vld [vmem:[#allocation3 + $0xd2] sm:$0xff] }
 0x4a2   : > { %7215 = vst.msk [vmem:[#allocation5 + $0xe8] sm:$0xff] %vm15301_vm1, %v7199_v56  ;;  %v3273_v25 = vpop.permute.xlu1 %3272 }
 0x4a3   : > { %3402 = vst.msk [vmem:[#allocation4 + $0x1f8] sm:$0xff] %vm3338_vm12, %v3273_v25  ;;  %v6934_v0 = vpop.permute.xlu0 %6933  ;;  %vm6852_vm12 = vcmask 1048320  }
 0x4a4   : > { %6981 = vst.msk [vmem:[#allocation5 + $0x8] sm:$0xff] %vm6658_vm11, %v6934_v0  ;;  %6628 = vrot.lane.b32.xlu1 %v13188_v26, %s11083_s27  ;;  %v4482_v26 = vmul.f32 0.003921569, %v13461_v47 }
 0x4a5   : > { %7144 = vrot.lane.b32.xlu0 %v13494_v53, %s11085_s22 }
 0x4a6   : > { %v3658_v14 = vpop.permute.xlu1 %3657  ;;  %v4550_v63 = vadd.f32 %v13257_v27, %v4482_v26 }
 0x4a7   : > { %3787 = vst.msk [vmem:[#allocation4 + $0x1f8] sm:$0xff] %vm15302_vm15, %v3658_v14  ;;  %v7031_v13 = vpop.permute.xlu0 %7030  ;;  %v3850_v4 = vld [vmem:[#allocation4 + $0x1f0] sm:$0xff] }
 0x4a8   : > { %7078 = vst.msk [vmem:[#allocation5 + $0x8] sm:$0xff] %vm6755_vm3, %v7031_v13  ;;  %6725 = vrot.lane.b32.xlu1 %v13459_v50, %s11084_s15  ;;  %10744 = vmatprep.mubr.msk.f32.mxu0 %vm3856_vm14, %v3850_v4  ;;  %v4614_v1 = vmax.f32 %v4550_v63, 0.0 }
 0x4a9   : > { %6953 = vrot.lane.b32.xlu0 %v13519_v18, %s11083_s27 }
 0x4aa   : > { %v6611_v59 = vpop.permute.xlu1 %6610 }
 0x4ab   : > { %6659 = vst.msk [vmem:[#allocation5] sm:$0xff] %vm6658_vm11, %v6611_v59  ;;  %v7127_v61 = vpop.permute.xlu0 %7126  ;;  %v10722_v49 = vpop.f32.mrb[46].mxu0 }
 0x4ac   : > { %7174 = vst.msk [vmem:[#allocation5 + $0x8] sm:$0xff] %vm6852_vm12, %v7127_v61  ;;  %v4485_v23 = vmul.f32 0.003921569, %v10722_v49  ;;  %6822 = vrot.lane.b32.xlu1 %v13473_v40, %s11085_s22  ;;  %v4349_v41 = vpop.f32.mrb[47].mxu0 }
 0x4ad   : > { %v4484_v6 = vmul.f32 0.003921569, %v4349_v41 }
 0x4ae   : > { %v4553_v36 = vadd.f32 %v13257_v27, %v4485_v23  ;;  %v6708_v46 = vpop.permute.xlu1 %6707  ;;  %v3851_v52 = vld [vmem:[#allocation4 + $0x1f8] sm:$0xff] }
 0x4af   : > { %v4552_v15 = vadd.f32 %v13257_v27, %v4484_v6  ;;  %6756 = vst.msk [vmem:[#allocation5] sm:$0xff] %vm6755_vm3, %v6708_v46  ;;  %10745 = vmatmul.mubr.msk.f32.gmra.mrb[62].mxu0 %vm3856_vm14, %v3851_v52  ;;  %v6936_v34 = vpop.permute.xlu0 %6935  ;;  %vm15303_vm14 = vcmask 254976  }
 0x4b0   : > { %v4617_v21 = vmax.f32 %v4553_v36, 0.0  ;;  %6982 = vst.msk [vmem:[#allocation5 + $0x20] sm:$0xff] %vm6658_vm11, %v6936_v34  ;;  %6630 = vrot.lane.b32.xlu1 %v13363_v12, %s11083_s27  ;;  %vm15304_vm10 = vmmov %vm15303_vm14 }
 0x4b1   : > { %v4616_v42 = vmax.f32 %v4552_v15, 0.0  ;;  %vm15305_vm7 = vmmov %vm15304_vm10 }
 0x4b2   : > { %v4657_v7 = vmax.f32 %v4615_v29, %v4617_v21  ;;  %v6805_v16 = vpop.permute.xlu1 %6804  ;;  %vm15306_vm13 = vmmov %vm15305_vm7 }
 0x4b3   : > { %v4656_v32 = vmax.f32 %v4614_v1, %v4616_v42  ;;  %6853 = vst.msk [vmem:[#allocation5] sm:$0xff] %vm6852_vm12, %v6805_v16  ;;  %v7033_v27 = vpop.permute.xlu0 %7032  ;;  %v7223_v10 = vld [vmem:[#allocation5 + $0x8] sm:$0xff]  ;;  %vm15307_vm8 = vmmov %vm15305_vm7 }
 0x4b4   : > { %v5089_v43 = vcombine.high %v4657_v7, %v4657_v7  ;;  %v5096_v5 = vrot.slane %v4657_v7, %v12337_v38  ;;  %7079 = vst.msk [vmem:[#allocation5 + $0x20] sm:$0xff] %vm6755_vm3, %v7033_v27  ;;  %7422 = vmatprep.mubr.f32.mxu1 %v7223_v10  ;;  %6727 = vrot.lane.b32.xlu1 %v13489_v20, %s11084_s15  ;;  %vm15308_vm9 = vmmov %vm15305_vm7 }
 0x4b5   : > { %v5072_v50 = vcombine.high %v4656_v32, %v4656_v32  ;;  %v5079_v12 = vrot.slane %v4656_v32, %v12337_v38  ;;  %vm15309_vm1 = vmmov %vm15305_vm7 }
 0x4b6   : > { %v5103_v47 = vrot.slane %v5089_v43, %v12337_v38  ;;  %v5104_v22 = vcombine.high %v5096_v5, %v5096_v5  ;;  %v6014_v19 = vsel %vm15303_vm14, %v5096_v5, -inf  ;;  %v6613_v28 = vpop.permute.xlu1 %6612  ;;  %vm15310_vm15 = vmmov %vm15309_vm1  ;;  %vm15311_vm14 = vcmask 1041409  }
 0x4b7   : > { %v6015_v39 = vrot.slane %v6014_v19, 4  ;;  %v5086_v11 = vrot.slane %v5072_v50, %v12337_v38  ;;  %v5087_v33 = vcombine.high %v5079_v12, %v5079_v12  ;;  %v5986_v37 = vsel %vm15304_vm10, %v5079_v12, -inf  ;;  %6660 = vst.msk [vmem:[#allocation5 + $0x18] sm:$0xff] %vm6658_vm11, %v6613_v28  ;;  %v7129_v2 = vpop.permute.xlu0 %7128 }
 0x4b8   : > { %v5105_v35 = vcombine.high %v5103_v47, %v5103_v47  ;;  %v6021_v44 = vsel %vm15305_vm7, %v5104_v22, -inf  ;;  %v6028_v40 = vsel %vm15306_vm13, %v5103_v47, -inf  ;;  %v5987_v45 = vrot.slane %v5986_v37, 4  ;;  %7175 = vst.msk [vmem:[#allocation5 + $0x20] sm:$0xff] %vm6852_vm12, %v7129_v2  ;;  %6824 = vrot.lane.b32.xlu1 %v13502_v55, %s11085_s22 }
 0x4b9   : > { %v6016_v8 = vmax.f32 %v6014_v19, %v6015_v39  ;;  %v6022_v31 = vrot.slane %v6021_v44, 4  ;;  %v6029_v9 = vrot.slane %v6028_v40, 4  ;;  %v5088_v48 = vcombine.high %v5086_v11, %v5086_v11 }
 0x4ba   : > { %v6035_v57 = vsel %vm15307_vm8, %v5105_v35, -inf  ;;  %v5988_v58 = vmax.f32 %v5986_v37, %v5987_v45  ;;  %v5993_v30 = vsel %vm15308_vm9, %v5087_v33, -inf  ;;  %v6000_v62 = vsel %vm15309_vm1, %v5086_v11, -inf  ;;  %v6710_v17 = vpop.permute.xlu1 %6709  ;;  %v7222_v20 = vld [vmem:[#allocation5] sm:$0xff] }
 0x4bb   : > { %v6023_v51 = vmax.f32 %v6021_v44, %v6022_v31  ;;  %v6030_v54 = vmax.f32 %v6028_v40, %v6029_v9  ;;  %v6036_v24 = vrot.slane %v6035_v57, 4  ;;  %6757 = vst.msk [vmem:[#allocation5 + $0x18] sm:$0xff] %vm6755_vm3, %v6710_v17  ;;  %7423 = vmatmul.mubr.f32.vlgmr.msra.gmra.mrb[0].mxu1 %v7222_v20  ;;  %v6938_v56 = vpop.permute.xlu0 %6937  ;;  %v5994_v25 = vrot.slane %v5993_v30, 4 }
 0x4bc   : > { %v5989_v55 = vrot.slane %v5988_v58, 2  ;;  %v6001_v0 = vrot.slane %v6000_v62, 4  ;;  %v6007_v14 = vsel %vm15310_vm15, %v5088_v48, -inf  ;;  %6983 = vst.msk [vmem:[#allocation5 + $0x38] sm:$0xff] %vm6658_vm11, %v6938_v56  ;;  %6632 = vrot.lane.b32.xlu1 %v13494_v53, %s11083_s27  ;;  %v6017_v13 = vrot.slane %v6016_v8, 2  ;;  %vm15317_vm15 = vmmov %vm15309_vm1 }
 0x4bd   : > { %v6024_v4 = vrot.slane %v6023_v51, 2  ;;  %v6037_v60 = vmax.f32 %v6035_v57, %v6036_v24  ;;  %v5995_v59 = vmax.f32 %v5993_v30, %v5994_v25  ;;  %v6008_v49 = vrot.slane %v6007_v14, 4 }
 0x4be   : > { %v5990_v26 = vmax.f32 %v5988_v58, %v5989_v55  ;;  %v6002_v61 = vmax.f32 %v6000_v62, %v6001_v0  ;;  %v6807_v3 = vpop.permute.xlu1 %6806  ;;  %v6031_v23 = vrot.slane %v6030_v54, 2  ;;  %v6018_v53 = vmax.f32 %v6016_v8, %v6017_v13 }
 0x4bf   : > { %6854 = vst.msk [vmem:[#allocation5 + $0x18] sm:$0xff] %vm6852_vm12, %v6807_v3  ;;  %v7035_v41 = vpop.permute.xlu0 %7034  ;;  %v7226_v63 = vld [vmem:[#allocation5 + $0x20] sm:$0xff]  ;;  %v6038_v6 = vrot.slane %v6037_v60, 2  ;;  %v5996_v36 = vrot.slane %v5995_v59, 2  ;;  %v6009_v52 = vmax.f32 %v6007_v14, %v6008_v49  ;;  %v6025_v15 = vmax.f32 %v6023_v51, %v6024_v4 }
 0x4c0   : > { %v6003_v46 = vrot.slane %v6002_v61, 2  ;;  %7080 = vst.msk [vmem:[#allocation5 + $0x38] sm:$0xff] %vm6755_vm3, %v7035_v41  ;;  %7427 = vmatprep.mubr.f32.mxu1 %v7226_v63  ;;  %6729 = vrot.lane.b32.xlu1 %v13519_v18, %s11084_s15  ;;  %v5991_v34 = vrot.slane %v5990_v26, 1  ;;  %v6032_v7 = vmax.f32 %v6030_v54, %v6031_v23  ;;  %v6019_v5 = vrot.slane %v6018_v53, 1 }
 0x4c1   : > { %v5997_v29 = vmax.f32 %v5995_v59, %v5996_v36  ;;  %v6010_v1 = vrot.slane %v6009_v52, 2  ;;  %v6039_v32 = vmax.f32 %v6037_v60, %v6038_v6  ;;  %v6026_v50 = vrot.slane %v6025_v15, 1 }
 0x4c2   : > { %v6004_v21 = vmax.f32 %v6002_v61, %v6003_v46  ;;  %v6615_v42 = vpop.permute.xlu1 %6614  ;;  %v5992_v18 = vmax.f32 %v5990_v26, %v5991_v34  ;;  %v6033_v39 = vrot.slane %v6032_v7, 1  ;;  %v6020_v40 = vmax.f32 %v6018_v53, %v6019_v5 }
 0x4c3   : > { %6661 = vst.msk [vmem:[#allocation5 + $0x30] sm:$0xff] %vm6658_vm11, %v6615_v42  ;;  %v7131_v16 = vpop.permute.xlu0 %7130  ;;  %v5998_v27 = vrot.slane %v5997_v29, 1  ;;  %v6011_v43 = vmax.f32 %v6009_v52, %v6010_v1  ;;  %v6040_v37 = vrot.slane %v6039_v32, 1  ;;  %v6027_v8 = vmax.f32 %v6025_v15, %v6026_v50  ;;  %v13603_v15 = vld [vmem:[%s15113_s6] ss:$0 sm:$0xff] }
 0x4c4   : > { %v6005_v10 = vrot.slane %v6004_v21, 1  ;;  %7176 = vst.msk [vmem:[#allocation5 + $0x38] sm:$0xff] %vm6852_vm12, %v7131_v16  ;;  %v6034_v48 = vmax.f32 %v6032_v7, %v6033_v39  ;;  %vm15312_vm10 = vcmask 1047559   ;;  %vm15313_vm7 = vcmask 261120  }
 0x4c5   : > { %v5999_v12 = vmax.f32 %v5997_v29, %v5998_v27  ;;  %v6012_v22 = vrot.slane %v6011_v43, 1  ;;  %v6041_v62 = vmax.f32 %v6039_v32, %v6040_v37  ;;  %vm15314_vm13 = vmmov %vm15313_vm7 }
 0x4c6   : > { %v6006_v47 = vmax.f32 %v6004_v21, %v6005_v10  ;;  %v6712_v19 = vpop.permute.xlu1 %6711  ;;  %v7225_v28 = vld [vmem:[#allocation5 + $0x18] sm:$0xff]  ;;  %vm15315_vm8 = vmmov %vm15313_vm7 }
 0x4c7   : > { %6758 = vst.msk [vmem:[#allocation5 + $0x30] sm:$0xff] %vm6755_vm3, %v6712_v19  ;;  %7428 = vmatmul.mubr.f32.gmra.mrb[2].mxu1 %v7225_v28  ;;  %v6940_v11 = vpop.permute.xlu0 %6939  ;;  %v10725_v33 = vpop.f32.mrb[48].mxu0  ;;  %v6013_v2 = vmax.f32 %v6011_v43, %v6012_v22  ;;  %v6478_v35 = vsel %vm15311_vm14, %v5999_v12, %v5992_v18  ;;  %vm15316_vm9 = vmmov %vm15313_vm7 }
 0x4c8   : > { %6984 = vst.msk [vmem:[#allocation5 + $0x50] sm:$0xff] %vm6658_vm11, %v6940_v11  ;;  %v4359_v44 = vpop.f32.mrb[49].mxu0  ;;  %v6479_v45 = vsel %vm6396_vm4, %v6006_v47, %v6478_v35  ;;  %v4487_v63 = vmul.f32 0.003921569, %v10725_v33  ;;  %vm15318_vm14 = vmmov %vm15309_vm1 }
 0x4c9   : > { %v6480_v31 = vsel %vm6398_vm5, %v6013_v2, %v6479_v45  ;;  %v4486_v6 = vmul.f32 0.003921569, %v4359_v44 }
 0x4ca   : > { %v6809_v9 = vpop.permute.xlu1 %6808  ;;  %v6481_v57 = vsel %vm6400_vm6, %v6020_v40, %v6480_v31  ;;  %v4555_v34 = vadd.f32 %v13603_v15, %v4487_v63 }
 0x4cb   : > { %6855 = vst.msk [vmem:[#allocation5 + $0x30] sm:$0xff] %vm6852_vm12, %v6809_v9  ;;  %v7037_v58 = vpop.permute.xlu0 %7036  ;;  %v7229_v30 = vld [vmem:[#allocation5 + $0x38] sm:$0xff]  ;;  %v6482_v17 = vsel %vm6402_vm2, %v6027_v8, %v6481_v57  ;;  %v4554_v1 = vadd.f32 %v13603_v15, %v4486_v6 }
 0x4cc   : > { %7081 = vst.msk [vmem:[#allocation5 + $0x50] sm:$0xff] %vm6755_vm3, %v7037_v58  ;;  %7432 = vmatprep.mubr.f32.mxu1 %v7229_v30  ;;  %v6483_v20 = vsel %vm6404_vm0, %v6034_v48, %v6482_v17  ;;  %v4619_v10 = vmax.f32 %v4555_v34, 0.0 }
 0x4cd   : > { %v6484_v51 = vsel %vm15312_vm10, %v6041_v62, %v6483_v20  ;;  %v4618_v5 = vmax.f32 %v4554_v1, 0.0  ;;  %vm15319_vm10 = vmmov %vm15309_vm1 }
 0x4ce   : > { %v6617_v54 = vpop.permute.xlu1 %6616  ;;  %6541 = vst.msk [vmem:[#allocation3 + $0xe1] sm:$0xff] %vm15313_vm7, %v6484_v51  ;;  %vm15320_vm7 = vmmov %vm15309_vm1 }
 0x4cf   : > { %6662 = vst.msk [vmem:[#allocation5 + $0x48] sm:$0xff] %vm6658_vm11, %v6617_v54  ;;  %v7133_v24 = vpop.permute.xlu0 %7132 }
 0x4d0   : > { %7177 = vst.msk [vmem:[#allocation5 + $0x50] sm:$0xff] %vm6852_vm12, %v7133_v24 }
 0x4d2   : > { %v6714_v56 = vpop.permute.xlu1 %6713  ;;  %v7228_v55 = vld [vmem:[#allocation5 + $0x30] sm:$0xff] }
 0x4d3   : > { %6759 = vst.msk [vmem:[#allocation5 + $0x48] sm:$0xff] %vm6755_vm3, %v6714_v56  ;;  %7433 = vmatmul.mubr.f32.gmra.mrb[4].mxu1 %v7228_v55  ;;  %v6942_v25 = vpop.permute.xlu0 %6941 }
 0x4d4   : > { %6985 = vst.msk [vmem:[#allocation5 + $0x68] sm:$0xff] %vm6658_vm11, %v6942_v25 }
 0x4d5   : > { %v7008_v0 = vld [vmem:[#allocation3 + $0xe0] sm:$0xff] }
 0x4d6   : > { %v6811_v14 = vpop.permute.xlu1 %6810  ;;  %v7104_v13 = vld [vmem:[#allocation3 + $0xe1] sm:$0xff]  ;;  %7050 = vrot.lane.b32.xlu0 %v7008_v0, %s11084_s15  ;;  %6826 = vrot.lane.b32.xlu1 %v7008_v0, %s11085_s22  ;;  %6574 = vst.msk [vmem:[#allocation5 + $0x120] sm:$0xff] %vm15314_vm13, %v7008_v0  ;;  %vm15321_vm13 = vmmov %vm15309_vm1 }
 0x4d7   : > { %6856 = vst.msk [vmem:[#allocation5 + $0x48] sm:$0xff] %vm6852_vm12, %v6811_v14  ;;  %v7039_v4 = vpop.permute.xlu0 %7038  ;;  %v7232_v60 = vld [vmem:[#allocation5 + $0x50] sm:$0xff]  ;;  %v7200_v26 = vld [vmem:[#allocation3 + $0xe2] sm:$0xff] }
 0x4d8   : > { %6896 = vst.msk [vmem:[#allocation5 + $0x110] sm:$0xff] %vm15315_vm8, %v7104_v13  ;;  %7437 = vmatprep.mubr.f32.mxu1 %v7232_v60  ;;  %v6912_v49 = vld [vmem:[#allocation3 + $0xe2] sm:$0xff]  ;;  %vm15322_vm8 = vmmov %vm15309_vm1 }
 0x4d9   : > { %7082 = vst.msk [vmem:[#allocation5 + $0x68] sm:$0xff] %vm6755_vm3, %v7039_v4 }
 0x4da   : > { %7216 = vst.msk [vmem:[#allocation5 + $0x100] sm:$0xff] %vm15316_vm9, %v7200_v26  ;;  %v6619_v59 = vpop.permute.xlu1 %6618  ;;  %7146 = vrot.lane.b32.xlu0 %v7104_v13, %s11085_s22  ;;  %6634 = vrot.lane.b32.xlu1 %v7104_v13, %s11083_s27  ;;  %vm15323_vm9 = vmmov %vm15309_vm1 }
 0x4db   : > { %6663 = vst.msk [vmem:[#allocation5 + $0x60] sm:$0xff] %vm6658_vm11, %v6619_v59  ;;  %v7135_v61 = vpop.permute.xlu0 %7134 }
 0x4dc   : > { %7178 = vst.msk [vmem:[#allocation5 + $0x68] sm:$0xff] %vm6852_vm12, %v7135_v61 }
 0x4de   : > { %v6716_v3 = vpop.permute.xlu1 %6715  ;;  %v7231_v23 = vld [vmem:[#allocation5 + $0x48] sm:$0xff]  ;;  %6955 = vrot.lane.b32.xlu0 %v6912_v49, %s11083_s27  ;;  %6731 = vrot.lane.b32.xlu1 %v6912_v49, %s11084_s15 }
 0x4df   : > { %6760 = vst.msk [vmem:[#allocation5 + $0x60] sm:$0xff] %vm6755_vm3, %v6716_v3  ;;  %v6944_v41 = vpop.permute.xlu0 %6943  ;;  %7438 = vmatmul.mubr.f32.gmra.mrb[6].mxu1 %v7231_v23 }
 0x4e0   : > { %6986 = vst.msk [vmem:[#allocation5 + $0x80] sm:$0xff] %vm6658_vm11, %v6944_v41 }
 0x4e2   : > { %v6813_v36 = vpop.permute.xlu1 %6812 }
 0x4e3   : > { %6857 = vst.msk [vmem:[#allocation5 + $0x60] sm:$0xff] %vm6852_vm12, %v6813_v36  ;;  %v7041_v46 = vpop.permute.xlu0 %7040  ;;  %v10728_v52 = vpop.f32.mrb[50].mxu0  ;;  %v7235_v53 = vld [vmem:[#allocation5 + $0x68] sm:$0xff] }
 0x4e4   : > { %7083 = vst.msk [vmem:[#allocation5 + $0x80] sm:$0xff] %vm6755_vm3, %v7041_v46  ;;  %v4489_v29 = vmul.f32 0.003921569, %v10728_v52  ;;  %v4369_v21 = vpop.f32.mrb[51].mxu0  ;;  %7442 = vmatprep.mubr.f32.mxu1 %v7235_v53 }
 0x4e5   : > { %v4488_v42 = vmul.f32 0.003921569, %v4369_v21 }
 0x4e6   : > { %v4557_v7 = vadd.f32 %v13603_v15, %v4489_v29  ;;  %v6621_v16 = vpop.permute.xlu1 %6620 }
 0x4e7   : > { %v4556_v32 = vadd.f32 %v13603_v15, %v4488_v42  ;;  %6664 = vst.msk [vmem:[#allocation5 + $0x78] sm:$0xff] %vm6658_vm11, %v6621_v16  ;;  %v7137_v27 = vpop.permute.xlu0 %7136 }
 0x4e8   : > { %v4621_v43 = vmax.f32 %v4557_v7, 0.0  ;;  %7179 = vst.msk [vmem:[#allocation5 + $0x80] sm:$0xff] %vm6852_vm12, %v7137_v27 }
 0x4e9   : > { %v4620_v50 = vmax.f32 %v4556_v32, 0.0 }
 0x4ea   : > { %v4659_v18 = vmax.f32 %v4619_v10, %v4621_v43  ;;  %v6718_v12 = vpop.permute.xlu1 %6717  ;;  %v7234_v47 = vld [vmem:[#allocation5 + $0x60] sm:$0xff] }
 0x4eb   : > { %v4658_v22 = vmax.f32 %v4618_v5, %v4620_v50  ;;  %6761 = vst.msk [vmem:[#allocation5 + $0x78] sm:$0xff] %vm6755_vm3, %v6718_v12  ;;  %7443 = vmatmul.mubr.f32.gmra.mrb[8].mxu1 %v7234_v47  ;;  %v6946_v19 = vpop.permute.xlu0 %6945 }
 0x4ec   : > { %v5123_v28 = vcombine.high %v4659_v18, %v4659_v18  ;;  %v5130_v39 = vrot.slane %v4659_v18, %v12337_v38  ;;  %6987 = vst.msk [vmem:[#allocation5 + $0x98] sm:$0xff] %vm6658_vm11, %v6946_v19 }
 0x4ed   : > { %v5106_v11 = vcombine.high %v4658_v22, %v4658_v22  ;;  %v5113_v33 = vrot.slane %v4658_v22, %v12337_v38 }
 0x4ee   : > { %v5137_v37 = vrot.slane %v5123_v28, %v12337_v38  ;;  %v5138_v2 = vcombine.high %v5130_v39, %v5130_v39  ;;  %v6070_v35 = vsel %vm15309_vm1, %v5130_v39, -inf  ;;  %v6815_v44 = vpop.permute.xlu1 %6814  ;;  %vm15324_vm1 = vcmask 1041409  }
 0x4ef   : > { %v6071_v40 = vrot.slane %v6070_v35, 4  ;;  %v5120_v45 = vrot.slane %v5106_v11, %v12337_v38  ;;  %v5121_v8 = vcombine.high %v5113_v33, %v5113_v33  ;;  %v6042_v31 = vsel %vm15317_vm15, %v5113_v33, -inf  ;;  %6858 = vst.msk [vmem:[#allocation5 + $0x78] sm:$0xff] %vm6852_vm12, %v6815_v44  ;;  %v7043_v9 = vpop.permute.xlu0 %7042  ;;  %v7238_v48 = vld [vmem:[#allocation5 + $0x80] sm:$0xff] }
 0x4f0   : > { %v5139_v57 = vcombine.high %v5137_v37, %v5137_v37  ;;  %v6077_v58 = vsel %vm15318_vm14, %v5138_v2, -inf  ;;  %v6084_v30 = vsel %vm15319_vm10, %v5137_v37, -inf  ;;  %v6043_v62 = vrot.slane %v6042_v31, 4  ;;  %7084 = vst.msk [vmem:[#allocation5 + $0x98] sm:$0xff] %vm6755_vm3, %v7043_v9  ;;  %7447 = vmatprep.mubr.f32.mxu1 %v7238_v48 }
 0x4f1   : > { %v6072_v17 = vmax.f32 %v6070_v35, %v6071_v40  ;;  %v6078_v20 = vrot.slane %v6077_v58, 4  ;;  %v6085_v51 = vrot.slane %v6084_v30, 4  ;;  %v5122_v54 = vcombine.high %v5120_v45, %v5120_v45 }
 0x4f2   : > { %v6091_v24 = vsel %vm15320_vm7, %v5139_v57, -inf  ;;  %v6044_v56 = vmax.f32 %v6042_v31, %v6043_v62  ;;  %v6049_v55 = vsel %vm15321_vm13, %v5121_v8, -inf  ;;  %v6056_v25 = vsel %vm15322_vm8, %v5120_v45, -inf  ;;  %v6623_v0 = vpop.permute.xlu1 %6622 }
 0x4f3   : > { %v6079_v14 = vmax.f32 %v6077_v58, %v6078_v20  ;;  %v6086_v13 = vmax.f32 %v6084_v30, %v6085_v51  ;;  %v6092_v4 = vrot.slane %v6091_v24, 4  ;;  %6665 = vst.msk [vmem:[#allocation5 + $0x90] sm:$0xff] %vm6658_vm11, %v6623_v0  ;;  %v7139_v60 = vpop.permute.xlu0 %7138  ;;  %v6050_v59 = vrot.slane %v6049_v55, 4 }
 0x4f4   : > { %v6045_v26 = vrot.slane %v6044_v56, 2  ;;  %v6057_v61 = vrot.slane %v6056_v25, 4  ;;  %v6063_v49 = vsel %vm15323_vm9, %v5122_v54, -inf  ;;  %7180 = vst.msk [vmem:[#allocation5 + $0x98] sm:$0xff] %vm6852_vm12, %v7139_v60  ;;  %v6073_v3 = vrot.slane %v6072_v17, 2  ;;  %vm15330_vm9 = vmmov %vm15322_vm8 }
 0x4f5   : > { %v6080_v23 = vrot.slane %v6079_v14, 2  ;;  %v6093_v41 = vmax.f32 %v6091_v24, %v6092_v4  ;;  %v6051_v6 = vmax.f32 %v6049_v55, %v6050_v59  ;;  %v6064_v46 = vrot.slane %v6063_v49, 4 }
 0x4f6   : > { %v6046_v63 = vmax.f32 %v6044_v56, %v6045_v26  ;;  %v6058_v36 = vmax.f32 %v6056_v25, %v6057_v61  ;;  %v6720_v52 = vpop.permute.xlu1 %6719  ;;  %v7237_v53 = vld [vmem:[#allocation5 + $0x78] sm:$0xff]  ;;  %v6087_v34 = vrot.slane %v6086_v13, 2  ;;  %v6074_v16 = vmax.f32 %v6072_v17, %v6073_v3 }
 0x4f7   : > { %6762 = vst.msk [vmem:[#allocation5 + $0x90] sm:$0xff] %vm6755_vm3, %v6720_v52  ;;  %7448 = vmatmul.mubr.f32.gmra.mrb[10].mxu1 %v7237_v53  ;;  %v6948_v29 = vpop.permute.xlu0 %6947  ;;  %v6094_v21 = vrot.slane %v6093_v41, 2  ;;  %v6052_v1 = vrot.slane %v6051_v6, 2  ;;  %v6065_v7 = vmax.f32 %v6063_v49, %v6064_v46  ;;  %v6081_v32 = vmax.f32 %v6079_v14, %v6080_v23 }
 0x4f8   : > { %v6059_v42 = vrot.slane %v6058_v36, 2  ;;  %6988 = vst.msk [vmem:[#allocation5 + $0xb0] sm:$0xff] %vm6658_vm11, %v6948_v29  ;;  %v6047_v27 = vrot.slane %v6046_v63, 1  ;;  %v6088_v18 = vmax.f32 %v6086_v13, %v6087_v34  ;;  %v6075_v11 = vrot.slane %v6074_v16, 1 }
 0x4f9   : > { %v6053_v10 = vmax.f32 %v6051_v6, %v6052_v1  ;;  %v6066_v5 = vrot.slane %v6065_v7, 2  ;;  %v6095_v22 = vmax.f32 %v6093_v41, %v6094_v21  ;;  %v6082_v33 = vrot.slane %v6081_v32, 1 }
 0x4fa   : > { %v6060_v43 = vmax.f32 %v6058_v36, %v6059_v42  ;;  %v6817_v50 = vpop.permute.xlu1 %6816  ;;  %v6048_v37 = vmax.f32 %v6046_v63, %v6047_v27  ;;  %v6089_v45 = vrot.slane %v6088_v18, 1  ;;  %v6076_v30 = vmax.f32 %v6074_v16, %v6075_v11 }
 0x4fb   : > { %6859 = vst.msk [vmem:[#allocation5 + $0x90] sm:$0xff] %vm6852_vm12, %v6817_v50  ;;  %v7045_v12 = vpop.permute.xlu0 %7044  ;;  %v7241_v47 = vld [vmem:[#allocation5 + $0x98] sm:$0xff]  ;;  %v6054_v19 = vrot.slane %v6053_v10, 1  ;;  %v6067_v39 = vmax.f32 %v6065_v7, %v6066_v5  ;;  %v6096_v9 = vrot.slane %v6095_v22, 1  ;;  %v6083_v17 = vmax.f32 %v6081_v32, %v6082_v33 }
 0x4fc   : > { %v6061_v28 = vrot.slane %v6060_v43, 1  ;;  %7085 = vst.msk [vmem:[#allocation5 + $0xb0] sm:$0xff] %vm6755_vm3, %v7045_v12  ;;  %7452 = vmatprep.mubr.f32.mxu1 %v7241_v47  ;;  %v6090_v24 = vmax.f32 %v6088_v18, %v6089_v45  ;;  %vm15325_vm15 = vcmask 1047559   ;;  %vm15326_vm14 = vcmask 261120  }
 0x4fd   : > { %v6055_v2 = vmax.f32 %v6053_v10, %v6054_v19  ;;  %v6068_v44 = vrot.slane %v6067_v39, 1  ;;  %v6097_v25 = vmax.f32 %v6095_v22, %v6096_v9  ;;  %vm15327_vm10 = vmmov %vm15326_vm14 }
 0x4fe   : > { %v6062_v35 = vmax.f32 %v6060_v43, %v6061_v28  ;;  %v6625_v40 = vpop.permute.xlu1 %6624  ;;  %vm15328_vm7 = vmmov %vm15327_vm10 }
 0x4ff   : > { %6666 = vst.msk [vmem:[#allocation5 + $0xa8] sm:$0xff] %vm6658_vm11, %v6625_v40  ;;  %v7141_v8 = vpop.permute.xlu0 %7140  ;;  %v10731_v31 = vpop.f32.mrb[52].mxu0  ;;  %v6069_v48 = vmax.f32 %v6067_v39, %v6068_v44  ;;  %v6485_v57 = vsel %vm15324_vm1, %v6055_v2, %v6048_v37  ;;  %vm15329_vm13 = vmmov %vm15328_vm7 }
 0x500   : > { %7181 = vst.msk [vmem:[#allocation5 + $0xb0] sm:$0xff] %vm6852_vm12, %v7141_v8  ;;  %v4379_v58 = vpop.f32.mrb[53].mxu0  ;;  %v6486_v62 = vsel %vm6396_vm4, %v6062_v35, %v6485_v57  ;;  %v4491_v21 = vmul.f32 0.003921569, %v10731_v31  ;;  %vm15331_vm1 = vmmov %vm15322_vm8 }
 0x501   : > { %v6487_v20 = vsel %vm6398_vm5, %v6069_v48, %v6486_v62  ;;  %v4490_v1 = vmul.f32 0.003921569, %v4379_v58 }
 0x502   : > { %v6722_v51 = vpop.permute.xlu1 %6721  ;;  %v7240_v54 = vld [vmem:[#allocation5 + $0x90] sm:$0xff]  ;;  %v6488_v56 = vsel %vm6400_vm6, %v6076_v30, %v6487_v20  ;;  %v4559_v27 = vadd.f32 %v13603_v15, %v4491_v21 }
 0x503   : > { %6763 = vst.msk [vmem:[#allocation5 + $0xa8] sm:$0xff] %vm6755_vm3, %v6722_v51  ;;  %7453 = vmatmul.mubr.f32.gmra.mrb[12].mxu1 %v7240_v54  ;;  %v6950_v55 = vpop.permute.xlu0 %6949  ;;  %v6489_v0 = vsel %vm6402_vm2, %v6083_v17, %v6488_v56  ;;  %v4558_v5 = vadd.f32 %v13603_v15, %v4490_v1 }
 0x504   : > { %6989 = vst.msk [vmem:[#allocation5 + $0xc8] sm:$0xff] %vm6658_vm11, %v6950_v55  ;;  %v6490_v14 = vsel %vm6404_vm0, %v6090_v24, %v6489_v0  ;;  %v4623_v19 = vmax.f32 %v4559_v27, 0.0 }
 0x505   : > { %v6491_v13 = vsel %vm15325_vm15, %v6097_v25, %v6490_v14  ;;  %v4622_v39 = vmax.f32 %v4558_v5, 0.0  ;;  %vm15332_vm15 = vmmov %vm15331_vm1 }
 0x506   : > { %v6819_v4 = vpop.permute.xlu1 %6818  ;;  %6542 = vst.msk [vmem:[#allocation3 + $0xf1] sm:$0xff] %vm15326_vm14, %v6491_v13  ;;  %vm15333_vm14 = vmmov %vm15331_vm1 }
 0x507   : > { %6860 = vst.msk [vmem:[#allocation5 + $0xa8] sm:$0xff] %vm6852_vm12, %v6819_v4  ;;  %v7047_v60 = vpop.permute.xlu0 %7046  ;;  %v7244_v26 = vld [vmem:[#allocation5 + $0xb0] sm:$0xff] }
 0x508   : > { %7086 = vst.msk [vmem:[#allocation5 + $0xc8] sm:$0xff] %vm6755_vm3, %v7047_v60  ;;  %7457 = vmatprep.mubr.f32.mxu1 %v7244_v26 }
 0x50a   : > { %v6627_v59 = vpop.permute.xlu1 %6626 }
 0x50b   : > { %6667 = vst.msk [vmem:[#allocation5 + $0xc0] sm:$0xff] %vm6658_vm11, %v6627_v59  ;;  %v7143_v61 = vpop.permute.xlu0 %7142 }
 0x50c   : > { %7182 = vst.msk [vmem:[#allocation5 + $0xc8] sm:$0xff] %vm6852_vm12, %v7143_v61 }
 0x50d   : > { %v7009_v49 = vld [vmem:[#allocation3 + $0xf0] sm:$0xff] }
 0x50e   : > { %v6724_v3 = vpop.permute.xlu1 %6723  ;;  %v7243_v23 = vld [vmem:[#allocation5 + $0xa8] sm:$0xff]  ;;  %v7105_v41 = vld [vmem:[#allocation3 + $0xf1] sm:$0xff]  ;;  %7052 = vrot.lane.b32.xlu0 %v7009_v49, %s11084_s15  ;;  %6828 = vrot.lane.b32.xlu1 %v7009_v49, %s11085_s22  ;;  %6575 = vst.msk [vmem:[#allocation5 + $0x138] sm:$0xff] %vm15327_vm10, %v7009_v49  ;;  %vm15334_vm10 = vmmov %vm15331_vm1 }
 0x50f   : > { %6764 = vst.msk [vmem:[#allocation5 + $0xc0] sm:$0xff] %vm6755_vm3, %v6724_v3  ;;  %v6952_v63 = vpop.permute.xlu0 %6951  ;;  %v7201_v6 = vld [vmem:[#allocation3 + $0xf2] sm:$0xff]  ;;  %7458 = vmatmul.mubr.f32.gmra.mrb[14].mxu1 %v7243_v23 }
 0x510   : > { %6897 = vst.msk [vmem:[#allocation5 + $0x128] sm:$0xff] %vm15328_vm7, %v7105_v41  ;;  %v6913_v53 = vld [vmem:[#allocation3 + $0xf2] sm:$0xff]  ;;  %vm15335_vm7 = vmmov %vm15331_vm1 }
 0x511   : > { %6990 = vst.msk [vmem:[#allocation5 + $0xe0] sm:$0xff] %vm6658_vm11, %v6952_v63 }
 0x512   : > { %7217 = vst.msk [vmem:[#allocation5 + $0x118] sm:$0xff] %vm15329_vm13, %v7201_v6  ;;  %v6821_v36 = vpop.permute.xlu1 %6820  ;;  %7148 = vrot.lane.b32.xlu0 %v7105_v41, %s11085_s22  ;;  %6636 = vrot.lane.b32.xlu1 %v7105_v41, %s11083_s27  ;;  %vm15336_vm13 = vmmov %vm15331_vm1 }
 0x513   : > { %6861 = vst.msk [vmem:[#allocation5 + $0xc0] sm:$0xff] %vm6852_vm12, %v6821_v36  ;;  %v7049_v46 = vpop.permute.xlu0 %7048  ;;  %v7247_v52 = vld [vmem:[#allocation5 + $0xc8] sm:$0xff] }
 0x514   : > { %7087 = vst.msk [vmem:[#allocation5 + $0xe0] sm:$0xff] %vm6755_vm3, %v7049_v46  ;;  %7462 = vmatprep.mubr.f32.mxu1 %v7247_v52 }
 0x516   : > { %v6629_v34 = vpop.permute.xlu1 %6628  ;;  %6957 = vrot.lane.b32.xlu0 %v6913_v53, %s11083_s27  ;;  %6733 = vrot.lane.b32.xlu1 %v6913_v53, %s11084_s15 }
 0x517   : > { %6668 = vst.msk [vmem:[#allocation5 + $0xd8] sm:$0xff] %vm6658_vm11, %v6629_v34  ;;  %v7145_v29 = vpop.permute.xlu0 %7144 }
 0x518   : > { %7183 = vst.msk [vmem:[#allocation5 + $0xe0] sm:$0xff] %vm6852_vm12, %v7145_v29 }
 0x51a   : > { %v6726_v42 = vpop.permute.xlu1 %6725  ;;  %v7246_v7 = vld [vmem:[#allocation5 + $0xc0] sm:$0xff] }
 0x51b   : > { %6765 = vst.msk [vmem:[#allocation5 + $0xd8] sm:$0xff] %vm6755_vm3, %v6726_v42  ;;  %7463 = vmatmul.mubr.f32.gmra.mrb[16].mxu1 %v7246_v7  ;;  %v6954_v16 = vpop.permute.xlu0 %6953  ;;  %v10734_v32 = vpop.f32.mrb[54].mxu0 }
 0x51c   : > { %6991 = vst.msk [vmem:[#allocation5 + $0xf8] sm:$0xff] %vm6658_vm11, %v6954_v16  ;;  %v4493_v10 = vmul.f32 0.003921569, %v10734_v32  ;;  %v4389_v43 = vpop.f32.mrb[55].mxu0 }
 0x51d   : > { %v4492_v50 = vmul.f32 0.003921569, %v4389_v43 }
 0x51e   : > { %v4561_v18 = vadd.f32 %v13603_v15, %v4493_v10  ;;  %v6823_v12 = vpop.permute.xlu1 %6822 }
 0x51f   : > { %v4560_v47 = vadd.f32 %v13603_v15, %v4492_v50  ;;  %6862 = vst.msk [vmem:[#allocation5 + $0xd8] sm:$0xff] %vm6852_vm12, %v6823_v12  ;;  %v7250_v22 = vld [vmem:[#allocation5 + $0xe0] sm:$0xff] }
 0x520   : > { %v4625_v28 = vmax.f32 %v4561_v18, 0.0  ;;  %7467 = vmatprep.mubr.f32.mxu1 %v7250_v22 }
 0x521   : > { %v4624_v11 = vmax.f32 %v4560_v47, 0.0 }
 0x522   : > { %v4661_v33 = vmax.f32 %v4623_v19, %v4625_v28  ;;  %v6631_v37 = vpop.permute.xlu1 %6630 }
 0x523   : > { %v4660_v2 = vmax.f32 %v4622_v39, %v4624_v11  ;;  %6669 = vst.msk [vmem:[#allocation5 + $0xf0] sm:$0xff] %vm6658_vm11, %v6631_v37 }
 0x524   : > { %v5157_v35 = vcombine.high %v4661_v33, %v4661_v33  ;;  %v5164_v44 = vrot.slane %v4661_v33, %v12337_v38 }
 0x525   : > { %v5140_v40 = vcombine.high %v4660_v2, %v4660_v2  ;;  %v5147_v45 = vrot.slane %v4660_v2, %v12337_v38 }
 0x526   : > { %v5171_v8 = vrot.slane %v5157_v35, %v12337_v38  ;;  %v5172_v31 = vcombine.high %v5164_v44, %v5164_v44  ;;  %v6126_v9 = vsel %vm15322_vm8, %v5164_v44, -inf  ;;  %v6728_v48 = vpop.permute.xlu1 %6727  ;;  %v7249_v57 = vld [vmem:[#allocation5 + $0xd8] sm:$0xff]  ;;  %vm15337_vm8 = vcmask 1041409  }
 0x527   : > { %v6127_v58 = vrot.slane %v6126_v9, 4  ;;  %v5154_v30 = vrot.slane %v5140_v40, %v12337_v38  ;;  %v5155_v62 = vcombine.high %v5147_v45, %v5147_v45  ;;  %v6098_v17 = vsel %vm15330_vm9, %v5147_v45, -inf  ;;  %6766 = vst.msk [vmem:[#allocation5 + $0xf0] sm:$0xff] %vm6755_vm3, %v6728_v48  ;;  %7468 = vmatmul.mubr.f32.gmra.mrb[18].mxu1 %v7249_v57 }
 0x528   : > { %v5173_v20 = vcombine.high %v5171_v8, %v5171_v8  ;;  %v6133_v51 = vsel %vm15331_vm1, %v5172_v31, -inf  ;;  %v6140_v54 = vsel %vm15332_vm15, %v5171_v8, -inf  ;;  %v6099_v24 = vrot.slane %v6098_v17, 4 }
 0x529   : > { %v6128_v56 = vmax.f32 %v6126_v9, %v6127_v58  ;;  %v6134_v55 = vrot.slane %v6133_v51, 4  ;;  %v6141_v25 = vrot.slane %v6140_v54, 4  ;;  %v5156_v0 = vcombine.high %v5154_v30, %v5154_v30 }
 0x52a   : > { %v6147_v14 = vsel %vm15333_vm14, %v5173_v20, -inf  ;;  %v6100_v13 = vmax.f32 %v6098_v17, %v6099_v24  ;;  %v6105_v4 = vsel %vm15334_vm10, %v5155_v62, -inf  ;;  %v6112_v60 = vsel %vm15335_vm7, %v5154_v30, -inf  ;;  %v6825_v26 = vpop.permute.xlu1 %6824 }
 0x52b   : > { %v6135_v59 = vmax.f32 %v6133_v51, %v6134_v55  ;;  %v6142_v61 = vmax.f32 %v6140_v54, %v6141_v25  ;;  %v6148_v49 = vrot.slane %v6147_v14, 4  ;;  %6863 = vst.msk [vmem:[#allocation5 + $0xf0] sm:$0xff] %vm6852_vm12, %v6825_v26  ;;  %v6106_v23 = vrot.slane %v6105_v4, 4 }
 0x52c   : > { %v6101_v3 = vrot.slane %v6100_v13, 2  ;;  %v6113_v41 = vrot.slane %v6112_v60, 4  ;;  %v6119_v63 = vsel %vm15336_vm13, %v5156_v0, -inf  ;;  %v6129_v6 = vrot.slane %v6128_v56, 2  ;;  %vm15343_vm13 = vmmov %vm15335_vm7 }
 0x52d   : > { %v6136_v36 = vrot.slane %v6135_v59, 2  ;;  %v6149_v46 = vmax.f32 %v6147_v14, %v6148_v49  ;;  %v6107_v53 = vmax.f32 %v6105_v4, %v6106_v23  ;;  %v6120_v29 = vrot.slane %v6119_v63, 4 }
 0x52e   : > { %v6102_v52 = vmax.f32 %v6100_v13, %v6101_v3  ;;  %v6114_v34 = vmax.f32 %v6112_v60, %v6113_v41  ;;  %v6633_v21 = vpop.permute.xlu1 %6632  ;;  %v6143_v1 = vrot.slane %v6142_v61, 2  ;;  %v6130_v27 = vmax.f32 %v6128_v56, %v6129_v6 }
 0x52f   : > { %6670 = vst.msk [vmem:[#allocation5 + $0x108] sm:$0xff] %vm6658_vm11, %v6633_v21  ;;  %v6150_v42 = vrot.slane %v6149_v46, 2  ;;  %v6108_v7 = vrot.slane %v6107_v53, 2  ;;  %v6121_v32 = vmax.f32 %v6119_v63, %v6120_v29  ;;  %v6137_v10 = vmax.f32 %v6135_v59, %v6136_v36 }
 0x530   : > { %v6115_v16 = vrot.slane %v6114_v34, 2  ;;  %v6103_v43 = vrot.slane %v6102_v52, 1  ;;  %v6144_v47 = vmax.f32 %v6142_v61, %v6143_v1  ;;  %v6131_v11 = vrot.slane %v6130_v27, 1 }
 0x531   : > { %v6109_v5 = vmax.f32 %v6107_v53, %v6108_v7  ;;  %v6122_v18 = vrot.slane %v6121_v32, 2  ;;  %v6151_v22 = vmax.f32 %v6149_v46, %v6150_v42  ;;  %v6138_v33 = vrot.slane %v6137_v10, 1 }
 0x532   : > { %v6116_v50 = vmax.f32 %v6114_v34, %v6115_v16  ;;  %v6730_v12 = vpop.permute.xlu1 %6729  ;;  %v6104_v37 = vmax.f32 %v6102_v52, %v6103_v43  ;;  %v6145_v40 = vrot.slane %v6144_v47, 1  ;;  %v6132_v57 = vmax.f32 %v6130_v27, %v6131_v11  ;;  %v7252_v53 = vld [vmem:[#allocation5 + $0xf0] sm:$0xff] }
 0x533   : > { %6767 = vst.msk [vmem:[#allocation5 + $0x108] sm:$0xff] %vm6755_vm3, %v6730_v12  ;;  %v6110_v19 = vrot.slane %v6109_v5, 1  ;;  %v6123_v39 = vmax.f32 %v6121_v32, %v6122_v18  ;;  %v6152_v8 = vrot.slane %v6151_v22, 1  ;;  %v6139_v30 = vmax.f32 %v6137_v10, %v6138_v33 }
 0x534   : > { %v6117_v28 = vrot.slane %v6116_v50, 1  ;;  %v6146_v17 = vmax.f32 %v6144_v47, %v6145_v40  ;;  %vm15338_vm9 = vcmask 1047559   ;;  %vm15339_vm1 = vcmask 261120  }
 0x535   : > { %v6111_v2 = vmax.f32 %v6109_v5, %v6110_v19  ;;  %v6124_v44 = vrot.slane %v6123_v39, 1  ;;  %v6153_v51 = vmax.f32 %v6151_v22, %v6152_v8  ;;  %vm15340_vm15 = vmmov %vm15339_vm1 }
 0x536   : > { %v6118_v35 = vmax.f32 %v6116_v50, %v6117_v28  ;;  %vm15341_vm14 = vmmov %vm15339_vm1 }
 0x537   : > { %v10737_v45 = vpop.f32.mrb[56].mxu0  ;;  %v6125_v31 = vmax.f32 %v6123_v39, %v6124_v44  ;;  %v6492_v9 = vsel %vm15337_vm8, %v6111_v2, %v6104_v37  ;;  %vm15342_vm10 = vmmov %vm15339_vm1 }
 0x538   : > { %v4399_v48 = vpop.f32.mrb[57].mxu0  ;;  %v6493_v58 = vsel %vm6396_vm4, %v6118_v35, %v6492_v9  ;;  %v4495_v26 = vmul.f32 0.003921569, %v10737_v45  ;;  %vm15344_vm8 = vmmov %vm15335_vm7 }
 0x539   : > { %v6494_v62 = vsel %vm6398_vm5, %v6125_v31, %v6493_v58  ;;  %v4494_v59 = vmul.f32 0.003921569, %v4399_v48 }
 0x53a   : > { %v6495_v20 = vsel %vm6400_vm6, %v6132_v57, %v6494_v62  ;;  %v4563_v23 = vadd.f32 %v13603_v15, %v4495_v26 }
 0x53b   : > { %v6496_v54 = vsel %vm6402_vm2, %v6139_v30, %v6495_v20  ;;  %v4562_v6 = vadd.f32 %v13603_v15, %v4494_v59 }
 0x53c   : > { %v6497_v24 = vsel %vm6404_vm0, %v6146_v17, %v6496_v54  ;;  %v4627_v29 = vmax.f32 %v4563_v23, 0.0 }
 0x53d   : > { %v6498_v56 = vsel %vm15338_vm9, %v6153_v51, %v6497_v24  ;;  %v4626_v1 = vmax.f32 %v4562_v6, 0.0  ;;  %vm15345_vm9 = vmmov %vm15335_vm7 }
 0x53e   : > { %6543 = vst.msk [vmem:[#allocation3 + $0x101] sm:$0xff] %vm15339_vm1, %v6498_v56  ;;  %vm15346_vm1 = vmmov %vm15335_vm7 }
 0x545   : > { %v7010_v55 = vld [vmem:[#allocation3 + $0x100] sm:$0xff] }
 0x546   : > { %v7106_v25 = vld [vmem:[#allocation3 + $0x101] sm:$0xff]  ;;  %7054 = vrot.lane.b32.xlu0 %v7010_v55, %s11084_s15  ;;  %6830 = vrot.lane.b32.xlu1 %v7010_v55, %s11085_s22  ;;  %6576 = vst.msk [vmem:[#allocation5 + $0x150] sm:$0xff] %vm15340_vm15, %v7010_v55  ;;  %vm15347_vm15 = vmmov %vm15346_vm1 }
 0x547   : > { %v6914_v0 = vld [vmem:[#allocation3 + $0x102] sm:$0xff]  ;;  %6898 = vst.msk [vmem:[#allocation5 + $0x140] sm:$0xff] %vm15341_vm14, %v7106_v25  ;;  %vm15348_vm14 = vmmov %vm15346_vm1 }
 0x548   : > { %7218 = vst.msk [vmem:[#allocation5 + $0x130] sm:$0xff] %vm15342_vm10, %v6914_v0  ;;  %v7051_v14 = vpop.permute.xlu0 %7050  ;;  %v6827_v13 = vpop.permute.xlu1 %6826  ;;  %vm15349_vm10 = vmmov %vm15346_vm1 }
 0x549   : > { %7088 = vst.msk [vmem:[#allocation5 + $0xf8] sm:$0xff] %vm6755_vm3, %v7051_v14 }
 0x54a   : > { %6864 = vst.msk [vmem:[#allocation5 + $0x108] sm:$0xff] %vm6852_vm12, %v6827_v13  ;;  %7150 = vrot.lane.b32.xlu0 %v7106_v25, %s11085_s22  ;;  %6638 = vrot.lane.b32.xlu1 %v7106_v25, %s11083_s27 }
 0x54c   : > { %v7147_v4 = vpop.permute.xlu0 %7146  ;;  %v6635_v60 = vpop.permute.xlu1 %6634 }
 0x54d   : > { %7184 = vst.msk [vmem:[#allocation5 + $0xf8] sm:$0xff] %vm6852_vm12, %v7147_v4 }
 0x54e   : > { %6671 = vst.msk [vmem:[#allocation5 + $0x120] sm:$0xff] %vm6658_vm11, %v6635_v60  ;;  %6959 = vrot.lane.b32.xlu0 %v6914_v0, %s11083_s27  ;;  %6735 = vrot.lane.b32.xlu1 %v6914_v0, %s11084_s15 }
 0x550   : > { %v6956_v61 = vpop.permute.xlu0 %6955  ;;  %v6732_v49 = vpop.permute.xlu1 %6731 }
 0x551   : > { %6992 = vst.msk [vmem:[#allocation5 + $0x110] sm:$0xff] %vm6658_vm11, %v6956_v61 }
 0x552   : > { %6768 = vst.msk [vmem:[#allocation5 + $0x120] sm:$0xff] %vm6755_vm3, %v6732_v49 }
 0x553   : > { %v10740_v3 = vpop.f32.mrb[58].mxu0 }
 0x554   : > { %v4497_v41 = vmul.f32 0.003921569, %v10740_v3  ;;  %v4409_v63 = vpop.f32.mrb[59].mxu0  ;;  %v7253_v46 = vld [vmem:[#allocation5 + $0xf8] sm:$0xff] }
 0x555   : > { %v4496_v36 = vmul.f32 0.003921569, %v4409_v63  ;;  %7472 = vmatprep.mubr.f32.mxu1 %v7253_v46 }
 0x556   : > { %v4565_v52 = vadd.f32 %v13603_v15, %v4497_v41  ;;  %7473 = vmatmul.mubr.f32.gmra.mrb[20].mxu1 %v7252_v53 }
 0x557   : > { %v4564_v34 = vadd.f32 %v13603_v15, %v4496_v36 }
 0x558   : > { %v4629_v21 = vmax.f32 %v4565_v52, 0.0 }
 0x559   : > { %v4628_v42 = vmax.f32 %v4564_v34, 0.0 }
 0x55a   : > { %v4663_v7 = vmax.f32 %v4627_v29, %v4629_v21 }
 0x55b   : > { %v4662_v16 = vmax.f32 %v4626_v1, %v4628_v42 }
 0x55c   : > { %v5191_v32 = vcombine.high %v4663_v7, %v4663_v7  ;;  %v5198_v27 = vrot.slane %v4663_v7, %v12337_v38 }
 0x55d   : > { %v5174_v10 = vcombine.high %v4662_v16, %v4662_v16  ;;  %v5181_v43 = vrot.slane %v4662_v16, %v12337_v38 }
 0x55e   : > { %v5205_v5 = vrot.slane %v5191_v32, %v12337_v38  ;;  %v5206_v50 = vcombine.high %v5198_v27, %v5198_v27  ;;  %v6182_v18 = vsel %vm15335_vm7, %v5198_v27, -inf  ;;  %vm15350_vm7 = vcmask 1041409  }
 0x55f   : > { %v6183_v12 = vrot.slane %v6182_v18, 4  ;;  %v5188_v47 = vrot.slane %v5174_v10, %v12337_v38  ;;  %v5189_v22 = vcombine.high %v5181_v43, %v5181_v43  ;;  %v6154_v19 = vsel %vm15343_vm13, %v5181_v43, -inf }
 0x560   : > { %v5207_v28 = vcombine.high %v5205_v5, %v5205_v5  ;;  %v6189_v39 = vsel %vm15344_vm8, %v5206_v50, -inf  ;;  %v6196_v11 = vsel %vm15345_vm9, %v5205_v5, -inf  ;;  %v6155_v33 = vrot.slane %v6154_v19, 4 }
 0x561   : > { %v6184_v37 = vmax.f32 %v6182_v18, %v6183_v12  ;;  %v6190_v2 = vrot.slane %v6189_v39, 4  ;;  %v6197_v35 = vrot.slane %v6196_v11, 4  ;;  %v5190_v44 = vcombine.high %v5188_v47, %v5188_v47 }
 0x562   : > { %v6203_v40 = vsel %vm15346_vm1, %v5207_v28, -inf  ;;  %v6156_v45 = vmax.f32 %v6154_v19, %v6155_v33  ;;  %v6161_v8 = vsel %vm15347_vm15, %v5189_v22, -inf  ;;  %v6168_v31 = vsel %vm15348_vm14, %v5188_v47, -inf  ;;  %v7303_v33 = vld [vmem:[%s15110_s3 + $0x108] sm:$0xff]  ;;  %vm15356_vm14 = vmmov %vm15349_vm10 }
 0x563   : > { %v6191_v9 = vmax.f32 %v6189_v39, %v6190_v2  ;;  %v6198_v48 = vmax.f32 %v6196_v11, %v6197_v35  ;;  %v6204_v57 = vrot.slane %v6203_v40, 4  ;;  %v6162_v30 = vrot.slane %v6161_v8, 4  ;;  %v7302_v11 = vld [vmem:[%s15110_s3 + $0x100] sm:$0xff] }
 0x564   : > { %v6157_v58 = vrot.slane %v6156_v45, 2  ;;  %v6169_v62 = vrot.slane %v6168_v31, 4  ;;  %v6175_v17 = vsel %vm15349_vm10, %v5190_v44, -inf  ;;  %v6185_v20 = vrot.slane %v6184_v37, 2 }
 0x565   : > { %v6192_v51 = vrot.slane %v6191_v9, 2  ;;  %v6205_v54 = vmax.f32 %v6203_v40, %v6204_v57  ;;  %v6163_v56 = vmax.f32 %v6161_v8, %v6162_v30  ;;  %v6176_v25 = vrot.slane %v6175_v17, 4  ;;  %v7305_v8 = vld [vmem:[%s15110_s3 + $0x118] sm:$0xff] }
 0x566   : > { %v6158_v24 = vmax.f32 %v6156_v45, %v6157_v58  ;;  %v6170_v55 = vmax.f32 %v6168_v31, %v6169_v62  ;;  %v6199_v0 = vrot.slane %v6198_v48, 2  ;;  %v6186_v26 = vmax.f32 %v6184_v37, %v6185_v20  ;;  %v7304_v45 = vld [vmem:[%s15110_s3 + $0x110] sm:$0xff] }
 0x567   : > { %v6206_v14 = vrot.slane %v6205_v54, 2  ;;  %v6164_v13 = vrot.slane %v6163_v56, 2  ;;  %v6177_v60 = vmax.f32 %v6175_v17, %v6176_v25  ;;  %v6193_v59 = vmax.f32 %v6191_v9, %v6192_v51 }
 0x568   : > { %v6171_v4 = vrot.slane %v6170_v55, 2  ;;  %v6159_v61 = vrot.slane %v6158_v24, 1  ;;  %v6200_v41 = vmax.f32 %v6198_v48, %v6199_v0  ;;  %v6187_v52 = vrot.slane %v6186_v26, 1 }
 0x569   : > { %v6165_v49 = vmax.f32 %v6163_v56, %v6164_v13  ;;  %v6178_v23 = vrot.slane %v6177_v60, 2  ;;  %v6207_v63 = vmax.f32 %v6205_v54, %v6206_v14  ;;  %v6194_v53 = vrot.slane %v6193_v59, 1 }
 0x56a   : > { %v6172_v3 = vmax.f32 %v6170_v55, %v6171_v4  ;;  %v6160_v34 = vmax.f32 %v6158_v24, %v6159_v61  ;;  %v6201_v42 = vrot.slane %v6200_v41, 1  ;;  %v6188_v43 = vmax.f32 %v6186_v26, %v6187_v52 }
 0x56b   : > { %v6166_v6 = vrot.slane %v6165_v49, 1  ;;  %v6179_v46 = vmax.f32 %v6177_v60, %v6178_v23  ;;  %v6208_v16 = vrot.slane %v6207_v63, 1  ;;  %v6195_v50 = vmax.f32 %v6193_v59, %v6194_v53 }
 0x56c   : > { %v6173_v36 = vrot.slane %v6172_v3, 1  ;;  %v6202_v12 = vmax.f32 %v6200_v41, %v6201_v42  ;;  %vm15351_vm13 = vcmask 1047559   ;;  %vm15352_vm8 = vcmask 261120  }
 0x56d   : > { %v6167_v29 = vmax.f32 %v6165_v49, %v6166_v6  ;;  %v6180_v1 = vrot.slane %v6179_v46, 1  ;;  %v6209_v22 = vmax.f32 %v6207_v63, %v6208_v16  ;;  %v10885_v37 = vpack.c.bf16 %v7303_v33, %v7302_v11  ;;  %vm15353_vm9 = vmmov %vm15352_vm8 }
 0x56e   : > { %v6174_v21 = vmax.f32 %v6172_v3, %v6173_v36  ;;  %vm15354_vm1 = vmmov %vm15352_vm8  ;;  %v10889_v9 = vpack.c.bf16 %v7305_v8, %v7304_v45 }
 0x56f   : > { %v10743_v7 = vpop.f32.mrb[60].mxu0  ;;  %v6181_v32 = vmax.f32 %v6179_v46, %v6180_v1  ;;  %v6499_v27 = vsel %vm15350_vm7, %v6167_v29, %v6160_v34  ;;  %vm15355_vm15 = vmmov %vm15354_vm1  ;;  %10886 = vmatprep.subr.bf16.mxu1 %v10885_v37  ;;  %v7255_v34 = vld [vmem:[#allocation5 + $0x108] sm:$0xff] }
 0x570   : > { %v4419_v10 = vpop.f32.mrb[61].mxu0  ;;  %v6500_v5 = vsel %vm6396_vm4, %v6174_v21, %v6499_v27  ;;  %v4499_v40 = vmul.f32 0.003921569, %v10743_v7  ;;  %10888 = vmatpush3.bf16.msra.mxu1 %v10885_v37  ;;  %vm15357_vm7 = vmmov %vm15349_vm10 }
 0x571   : > { %v6501_v18 = vsel %vm6398_vm5, %v6181_v32, %v6500_v5  ;;  %v4498_v31 = vmul.f32 0.003921569, %v4419_v10  ;;  %10890 = vmatprep.subr.bf16.mxu1 %v10889_v9 }
 0x572   : > { %v6502_v47 = vsel %vm6400_vm6, %v6188_v43, %v6501_v18  ;;  %v4567_v30 = vadd.f32 %v13603_v15, %v4499_v40 }
 0x573   : > { %v6503_v19 = vsel %vm6402_vm2, %v6195_v50, %v6502_v47  ;;  %v4566_v20 = vadd.f32 %v13603_v15, %v4498_v31 }
 0x574   : > { %v6504_v28 = vsel %vm6404_vm0, %v6202_v12, %v6503_v19  ;;  %10892 = vmatpush3.bf16.msra.mxu1 %v10889_v9  ;;  %v4631_v25 = vmax.f32 %v4567_v30, 0.0 }
 0x575   : > { %v6505_v39 = vsel %vm15351_vm13, %v6209_v22, %v6504_v28  ;;  %v4630_v14 = vmax.f32 %v4566_v20, 0.0  ;;  %vm15358_vm13 = vmmov %vm15357_vm7 }
 0x576   : > { %6544 = vst.msk [vmem:[#allocation3 + $0x111] sm:$0xff] %vm15352_vm8, %v6505_v39  ;;  %vm15359_vm8 = vmmov %vm15357_vm7 }
 0x57d   : > { %v7011_v2 = vld [vmem:[#allocation3 + $0x110] sm:$0xff] }
 0x57e   : > { %v7107_v35 = vld [vmem:[#allocation3 + $0x111] sm:$0xff]  ;;  %7056 = vrot.lane.b32.xlu0 %v7011_v2, %s11084_s15  ;;  %6832 = vrot.lane.b32.xlu1 %v7011_v2, %s11085_s22  ;;  %6577 = vst.msk [vmem:[#allocation5 + $0x168] sm:$0xff] %vm15353_vm9, %v7011_v2  ;;  %vm15360_vm9 = vmmov %vm15357_vm7 }
 0x57f   : > { %v6915_v44 = vld [vmem:[#allocation3 + $0x112] sm:$0xff]  ;;  %6899 = vst.msk [vmem:[#allocation5 + $0x158] sm:$0xff] %vm15354_vm1, %v7107_v35  ;;  %vm15361_vm1 = vmmov %vm15357_vm7 }
 0x580   : > { %7219 = vst.msk [vmem:[#allocation5 + $0x148] sm:$0xff] %vm15355_vm15, %v6915_v44  ;;  %v7053_v48 = vpop.permute.xlu0 %7052  ;;  %v6829_v57 = vpop.permute.xlu1 %6828  ;;  %vm15362_vm15 = vmmov %vm15361_vm1 }
 0x581   : > { %7089 = vst.msk [vmem:[#allocation5 + $0x110] sm:$0xff] %vm6755_vm3, %v7053_v48 }
 0x582   : > { %6865 = vst.msk [vmem:[#allocation5 + $0x120] sm:$0xff] %vm6852_vm12, %v6829_v57  ;;  %v10746_v58 = vpop.f32.mrb[62].mxu0  ;;  %7152 = vrot.lane.b32.xlu0 %v7107_v35, %s11085_s22  ;;  %6640 = vrot.lane.b32.xlu1 %v7107_v35, %s11083_s27 }
 0x583   : > { %v4501_v62 = vmul.f32 0.003921569, %v10746_v58  ;;  %v4429_v17 = vpop.f32.mrb[63].mxu0 }
 0x584   : > { %v4500_v51 = vmul.f32 0.003921569, %v4429_v17  ;;  %v7149_v24 = vpop.permute.xlu0 %7148  ;;  %v6637_v56 = vpop.permute.xlu1 %6636 }
 0x585   : > { %v4569_v54 = vadd.f32 %v13603_v15, %v4501_v62  ;;  %7185 = vst.msk [vmem:[#allocation5 + $0x110] sm:$0xff] %vm6852_vm12, %v7149_v24 }
 0x586   : > { %6672 = vst.msk [vmem:[#allocation5 + $0x138] sm:$0xff] %vm6658_vm11, %v6637_v56  ;;  %v4568_v55 = vadd.f32 %v13603_v15, %v4500_v51  ;;  %6961 = vrot.lane.b32.xlu0 %v6915_v44, %s11083_s27  ;;  %6737 = vrot.lane.b32.xlu1 %v6915_v44, %s11084_s15 }
 0x587   : > { %v4633_v0 = vmax.f32 %v4569_v54, 0.0 }
 0x588   : > { %v4632_v13 = vmax.f32 %v4568_v55, 0.0  ;;  %v6958_v60 = vpop.permute.xlu0 %6957  ;;  %v6734_v26 = vpop.permute.xlu1 %6733 }
 0x589   : > { %v4665_v4 = vmax.f32 %v4631_v25, %v4633_v0  ;;  %6993 = vst.msk [vmem:[#allocation5 + $0x128] sm:$0xff] %vm6658_vm11, %v6958_v60 }
 0x58a   : > { %v4664_v59 = vmax.f32 %v4630_v14, %v4632_v13  ;;  %6769 = vst.msk [vmem:[#allocation5 + $0x138] sm:$0xff] %vm6755_vm3, %v6734_v26 }
 0x58b   : > { %v5225_v61 = vcombine.high %v4665_v4, %v4665_v4  ;;  %v5232_v49 = vrot.slane %v4665_v4, %v12337_v38 }
 0x58c   : > { %v5208_v15 = vcombine.high %v4664_v59, %v4664_v59  ;;  %v5215_v3 = vrot.slane %v4664_v59, %v12337_v38  ;;  %v7256_v6 = vld [vmem:[#allocation5 + $0x110] sm:$0xff] }
 0x58d   : > { %v5239_v23 = vrot.slane %v5225_v61, %v12337_v38  ;;  %v5240_v41 = vcombine.high %v5232_v49, %v5232_v49  ;;  %v6238_v63 = vsel %vm15356_vm14, %v5232_v49, -inf  ;;  %7477 = vmatprep.mubr.f32.mxu1 %v7256_v6  ;;  %vm15363_vm14 = vcmask 1041409  }
 0x58e   : > { %v6239_v36 = vrot.slane %v6238_v63, 4  ;;  %v5222_v46 = vrot.slane %v5208_v15, %v12337_v38  ;;  %v5223_v52 = vcombine.high %v5215_v3, %v5215_v3  ;;  %v6210_v53 = vsel %vm15349_vm10, %v5215_v3, -inf  ;;  %v10375_v29 = vpop.f32.mrb[0].mxu1  ;;  %7478 = vmatmul.mubr.f32.gmra.mrb[22].mxu1 %v7255_v34 }
 0x58f   : > { %v5241_v21 = vcombine.high %v5239_v23, %v5239_v23  ;;  %v6245_v1 = vsel %vm15357_vm7, %v5240_v41, -inf  ;;  %v6252_v42 = vsel %vm15358_vm13, %v5239_v23, -inf  ;;  %v6211_v7 = vrot.slane %v6210_v53, 4  ;;  %v10376_v16 = vpop.f32.mrb[1].mxu1 }
 0x590   : > { %v6240_v32 = vmax.f32 %v6238_v63, %v6239_v36  ;;  %v6246_v27 = vrot.slane %v6245_v1, 4  ;;  %v6253_v10 = vrot.slane %v6252_v42, 4  ;;  %v5224_v43 = vcombine.high %v5222_v46, %v5222_v46 }
 0x591   : > { %v6259_v38 = vsel %vm15359_vm8, %v5241_v21, -inf  ;;  %v6212_v5 = vmax.f32 %v6210_v53, %v6211_v7  ;;  %v6217_v50 = vsel %vm15360_vm9, %v5223_v52, -inf  ;;  %v6224_v18 = vsel %vm15361_vm1, %v5222_v46, -inf }
 0x592   : > { %v6247_v12 = vmax.f32 %v6245_v1, %v6246_v27  ;;  %v6254_v47 = vmax.f32 %v6252_v42, %v6253_v10  ;;  %v6260_v22 = vrot.slane %v6259_v38, 4  ;;  %v6218_v28 = vrot.slane %v6217_v50, 4 }
 0x593   : > { %v6213_v19 = vrot.slane %v6212_v5, 2  ;;  %v6225_v39 = vrot.slane %v6224_v18, 4  ;;  %v6231_v11 = vsel %vm15362_vm15, %v5224_v43, -inf  ;;  %v6241_v33 = vrot.slane %v6240_v32, 2 }
 0x594   : > { %v6248_v37 = vrot.slane %v6247_v12, 2  ;;  %v6261_v2 = vmax.f32 %v6259_v38, %v6260_v22  ;;  %v6219_v44 = vmax.f32 %v6217_v50, %v6218_v28  ;;  %v6232_v45 = vrot.slane %v6231_v11, 4  ;;  %v7109_v22 = vld [vmem:[#allocation3 + $0x131] sm:$0xff] }
 0x595   : > { %v6214_v35 = vmax.f32 %v6212_v5, %v6213_v19  ;;  %v6226_v40 = vmax.f32 %v6224_v18, %v6225_v39  ;;  %v6255_v8 = vrot.slane %v6254_v47, 2  ;;  %v6242_v58 = vmax.f32 %v6240_v32, %v6241_v33  ;;  %v7013_v18 = vld [vmem:[#allocation3 + $0x130] sm:$0xff] }
 0x596   : > { %v6262_v31 = vrot.slane %v6261_v2, 2  ;;  %v6220_v9 = vrot.slane %v6219_v44, 2  ;;  %v6233_v57 = vmax.f32 %v6231_v11, %v6232_v45  ;;  %v6249_v30 = vmax.f32 %v6247_v12, %v6248_v37 }
 0x597   : > { %v6227_v48 = vrot.slane %v6226_v40, 2  ;;  %v6215_v62 = vrot.slane %v6214_v35, 1  ;;  %v6256_v54 = vmax.f32 %v6254_v47, %v6255_v8  ;;  %v13779_v24 = vadd.f32 %v10376_v16, %v10375_v29 }
 0x598   : > { %v6221_v17 = vmax.f32 %v6219_v44, %v6220_v9  ;;  %v6234_v51 = vrot.slane %v6233_v57, 2  ;;  %v6263_v55 = vmax.f32 %v6261_v2, %v6262_v31  ;;  %v6243_v4 = vrot.slane %v6242_v58, 1  ;;  %v7258_v44 = vld [vmem:[#allocation5 + $0x120] sm:$0xff] }
 0x599   : > { %v6228_v20 = vmax.f32 %v6226_v40, %v6227_v48  ;;  %v6250_v60 = vrot.slane %v6249_v30, 1  ;;  %v6216_v59 = vmax.f32 %v6214_v35, %v6215_v62  ;;  %v6257_v3 = vrot.slane %v6256_v54, 1  ;;  %v13811_v40 = vld [vmem:[#allocation3 + $0x92] sm:$0xff] }
 0x59a   : > { %v10378_v56 = vpop.f32.mrb[2].mxu1  ;;  %v6222_v25 = vrot.slane %v6221_v17, 1  ;;  %v6235_v14 = vmax.f32 %v6233_v57, %v6234_v51  ;;  %v6264_v23 = vrot.slane %v6263_v55, 1  ;;  %v6244_v6 = vmax.f32 %v6242_v58, %v6243_v4  ;;  %v7205_v58 = vld [vmem:[#allocation3 + $0x132] sm:$0xff] }
 0x59b   : > { %v6229_v0 = vrot.slane %v6228_v20, 1  ;;  %v10379_v13 = vpop.f32.mrb[3].mxu1  ;;  %v6251_v46 = vmax.f32 %v6249_v30, %v6250_v60  ;;  %v6258_v53 = vmax.f32 %v6256_v54, %v6257_v3  ;;  %vm15364_vm10 = vcmask 1047559  }
 0x59c   : > { %v13781_v26 = vadd.f32 %v10379_v13, %v10378_v56  ;;  %v6223_v61 = vmax.f32 %v6221_v17, %v6222_v25  ;;  %v6236_v15 = vrot.slane %v6235_v14, 1  ;;  %v6265_v29 = vmax.f32 %v6263_v55, %v6264_v23  ;;  %v10219_v23 = vld [vmem:[%s13843_s18] ss:$0 sm:$0xff] }
 0x59d   : > { %v6230_v49 = vmax.f32 %v6228_v20, %v6229_v0  ;;  %vm15365_vm7 = vcmask 261120  }
 0x59e   : > { %v6237_v41 = vmax.f32 %v6235_v14, %v6236_v15  ;;  %v6506_v63 = vsel %vm15363_vm14, %v6223_v61, %v6216_v59 }
 0x59f   : > { %v6507_v36 = vsel %vm6396_vm4, %v6230_v49, %v6506_v63  ;;  %vm15366_vm4 = vmmov %vm15365_vm7 }
 0x5a0   : > { %v6508_v52 = vsel %vm6398_vm5, %v6237_v41, %v6507_v36  ;;  %vm15367_vm5 = vmmov %vm15366_vm4 }
 0x5a1   : > { %v6509_v34 = vsel %vm6400_vm6, %v6244_v6, %v6508_v52 }
 0x5a2   : > { %v6510_v21 = vsel %vm6402_vm2, %v6251_v46, %v6509_v34 }
 0x5a3   : > { %v6511_v1 = vsel %vm6404_vm0, %v6258_v53, %v6510_v21  ;;  %vm15368_vm0 = vmmov %vm15366_vm4 }
 0x5a4   : > { %v6512_v42 = vsel %vm15364_vm10, %v6265_v29, %v6511_v1  ;;  %7213 = vst.msk [vmem:[#allocation5 + $0xb8] sm:$0xff] %vm15368_vm0, %v13811_v40  ;;  %vm15369_vm6 = vmmov %vm15368_vm0 }
 0x5a5   : > { %6545 = vst.msk [vmem:[#allocation3 + $0x121] sm:$0xff] %vm15365_vm7, %v6512_v42  ;;  %vm15370_vm2 = vmmov %vm15368_vm0 }
 0x5a6   : > { %v10381_v7 = vpop.f32.mrb[4].mxu1  ;;  %7221 = vst.msk [vmem:[#allocation5 + $0x178] sm:$0xff] %vm15370_vm2, %v7205_v58  ;;  %vm15371_vm13 = vmmov %vm15368_vm0 }
 0x5a7   : > { %v10382_v16 = vpop.f32.mrb[5].mxu1  ;;  %vm15372_vm8 = vmmov %vm15368_vm0 }
 0x5a8   : > { %v13791_v32 = vadd.f32 %v10382_v16, %v10381_v7  ;;  %v7224_v16 = vld [vmem:[#allocation5 + $0x10] sm:$0xff]  ;;  %vm15373_vm9 = vmmov %vm15368_vm0 }
 0x5a9   : > { %vm15374_vm1 = vmmov %vm15368_vm0 }
 0x5aa   : > { %vm15375_vm15 = vmmov %vm15368_vm0 }
 0x5ab   : > { %v13817_v9 = vld [vmem:[#allocation5 + $0xb8] sm:$0xff]  ;;  %vm15376_vm14 = vmmov %vm15368_vm0 }
 0x5ac   : > { %v7012_v27 = vld [vmem:[#allocation3 + $0x120] sm:$0xff]  ;;  %8363 = vst.msk [vmem:[#allocation5 + $0xb8] sm:$0xff] %vm15369_vm6, %v13811_v40  ;;  %vm15377_vm10 = vmmov %vm15368_vm0 }
 0x5ad   : > { %v7108_v10 = vld [vmem:[#allocation3 + $0x121] sm:$0xff]  ;;  %7058 = vrot.lane.b32.xlu0 %v7012_v27, %s11084_s15  ;;  %6834 = vrot.lane.b32.xlu1 %v7012_v27, %s11085_s22  ;;  %v13824_v62 = vld [vmem:[#allocation5 + $0x178] sm:$0xff]  ;;  %vm15378_vm7 = vmmov %vm15368_vm0 }
 0x5ae   : > { %v6916_v43 = vld [vmem:[#allocation3 + $0x122] sm:$0xff]  ;;  %6900 = vst.msk [vmem:[#allocation5 + $0x170] sm:$0xff] %vm15366_vm4, %v7108_v10  ;;  %vm15379_vm4 = vmmov %vm15368_vm0 }
 0x5af   : > { %7220 = vst.msk [vmem:[#allocation5 + $0x160] sm:$0xff] %vm15367_vm5, %v6916_v43  ;;  %v7227_v27 = vld [vmem:[#allocation5 + $0x28] sm:$0xff]  ;;  %vm15380_vm5 = vmmov %vm15368_vm0 }
 0x5b0   : > { %8371 = vst.msk [vmem:[#allocation5 + $0x178] sm:$0xff] %vm15371_vm13, %v7205_v58  ;;  %vm15381_vm6 = vmmov %vm15368_vm0  ;;  %v8452_v58 = vld [vmem:[%s15111_s4 + $0x100] sm:$0xff] }
 0x5b1   : > { %7154 = vrot.lane.b32.xlu0 %v7108_v10, %s11085_s22  ;;  %v7230_v10 = vld [vmem:[#allocation5 + $0x40] sm:$0xff]  ;;  %vm15382_vm2 = vmmov %vm15368_vm0 }
 0x5b2   : > { %v10384_v38 = vpop.f32.mrb[6].mxu1  ;;  %vm15383_vm13 = vmmov %vm15368_vm0 }
 0x5b3   : > { %v10385_v5 = vpop.f32.mrb[7].mxu1 }
 0x5b4   : > { %v13798_v50 = vadd.f32 %v10385_v5, %v10384_v38  ;;  %v7236_v38 = vld [vmem:[#allocation5 + $0x70] sm:$0xff]  ;;  %v7239_v5 = vld [vmem:[#allocation5 + $0x88] sm:$0xff] }
 0x5b5   : > { %6963 = vrot.lane.b32.xlu0 %v6916_v43, %s11083_s27  ;;  %v7233_v43 = vld [vmem:[#allocation5 + $0x58] sm:$0xff] }
 0x5b8   : > { %v7055_v12 = vpop.permute.xlu0 %7054  ;;  %v6831_v47 = vpop.permute.xlu1 %6830 }
 0x5b9   : > { %7090 = vst.msk [vmem:[#allocation5 + $0x128] sm:$0xff] %vm6755_vm3, %v7055_v12  ;;  %7060 = vrot.lane.b32.xlu0 %v7013_v18, %s11084_s15  ;;  %v7242_v18 = vld [vmem:[#allocation5 + $0xa0] sm:$0xff]  ;;  %v7248_v12 = vld [vmem:[#allocation5 + $0xd0] sm:$0xff] }
 0x5ba   : > { %6866 = vst.msk [vmem:[#allocation5 + $0x138] sm:$0xff] %vm6852_vm12, %v6831_v47  ;;  %v7251_v47 = vld [vmem:[#allocation5 + $0xe8] sm:$0xff] }
 0x5bc   : > { %v7151_v19 = vpop.permute.xlu0 %7150  ;;  %v6639_v28 = vpop.permute.xlu1 %6638 }
 0x5bd   : > { %7186 = vst.msk [vmem:[#allocation5 + $0x128] sm:$0xff] %vm6852_vm12, %v7151_v19  ;;  %7156 = vrot.lane.b32.xlu0 %v7109_v22, %s11085_s22  ;;  %v7254_v22 = vld [vmem:[#allocation5 + $0x100] sm:$0xff]  ;;  %v7257_v19 = vld [vmem:[#allocation5 + $0x118] sm:$0xff] }
 0x5be   : > { %6673 = vst.msk [vmem:[#allocation5 + $0x150] sm:$0xff] %vm6658_vm11, %v6639_v28  ;;  %v10387_v39 = vpop.f32.mrb[8].mxu1  ;;  %v7260_v28 = vld [vmem:[#allocation5 + $0x130] sm:$0xff] }
 0x5bf   : > { %v10388_v11 = vpop.f32.mrb[9].mxu1 }
 0x5c0   : > { %v13807_v33 = vadd.f32 %v10388_v11, %v10387_v39  ;;  %v6960_v37 = vpop.permute.xlu0 %6959  ;;  %v6736_v2 = vpop.permute.xlu1 %6735  ;;  %v10220_v39 = vld [vmem:[%s13843_s18 + $0x1] ss:$0 sm:$0xff]  ;;  %v7263_v11 = vld [vmem:[#allocation5 + $0x148] sm:$0xff] }
 0x5c1   : > { %6994 = vst.msk [vmem:[#allocation5 + $0x140] sm:$0xff] %vm6658_vm11, %v6960_v37  ;;  %v7261_v3 = vld [vmem:[#allocation5 + $0x138] sm:$0xff]  ;;  %7677 = vrot.lane.b32.xlu0 %v10219_v23, %s11086_s19  ;;  %7679 = vrot.lane.b32.xlu1 %v10220_v39, %s11086_s19  ;;  %v7266_v37 = vld [vmem:[#allocation5 + $0x160] sm:$0xff] }
 0x5c2   : > { %6770 = vst.msk [vmem:[#allocation5 + $0x150] sm:$0xff] %vm6755_vm3, %v6736_v2  ;;  %v8420_v23 = vld [vmem:[%s15111_s4] sm:$0xff]  ;;  %v8427_v39 = vld [vmem:[%s15111_s4 + $0x38] sm:$0xff] }
 0x5c4   : > { %v7259_v35 = vld [vmem:[#allocation5 + $0x128] sm:$0xff] }
 0x5c5   : > { %7482 = vmatprep.mubr.f32.mxu1 %v7259_v35 }
 0x5c6   : > { %7483 = vmatmul.mubr.f32.gmra.mrb[24].mxu1 %v7258_v44 }
 0x5ca   : > { %v10390_v45 = vpop.f32.mrb[10].mxu1 }
 0x5cb   : > { %v10391_v8 = vpop.f32.mrb[11].mxu1 }
 0x5cc   : > { %v13815_v31 = vadd.f32 %v10391_v8, %v10390_v45  ;;  %v7732_v45 = vld [vmem:[#allocation3 + $0x1] sm:$0xff] }
 0x5cd   : > { %7764 = vrot.lane.b32.xlu1 %v7732_v45, %s11083_s27 }
 0x5d6   : > { %v10393_v48 = vpop.f32.mrb[12].mxu1 }
 0x5d7   : > { %v10394_v57 = vpop.f32.mrb[13].mxu1 }
 0x5d8   : > { %v13821_v30 = vadd.f32 %v10394_v57, %v10393_v48  ;;  %v7828_v57 = vld [vmem:[#allocation3 + $0x2] sm:$0xff] }
 0x5d9   : > { %7860 = vrot.lane.b32.xlu1 %v7828_v57, %s11084_s15 }
 0x5e2   : > { %v10396_v17 = vpop.f32.mrb[14].mxu1 }
 0x5e3   : > { %v10397_v20 = vpop.f32.mrb[15].mxu1 }
 0x5e4   : > { %v13827_v51 = vadd.f32 %v10397_v20, %v10396_v17  ;;  %v8454_v20 = vld [vmem:[%s15111_s4 + $0x110] sm:$0xff] }
 0x5ee   : > { %v10399_v54 = vpop.f32.mrb[16].mxu1 }
 0x5ef   : > { %v10400_v56 = vpop.f32.mrb[17].mxu1 }
 0x5f0   : > { %v13829_v55 = vadd.f32 %v10400_v56, %v10399_v54  ;;  %v7057_v25 = vpop.permute.xlu0 %7056  ;;  %v6833_v0 = vpop.permute.xlu1 %6832  ;;  %v8455_v54 = vld [vmem:[%s15111_s4 + $0x118] sm:$0xff] }
 0x5f1   : > { %7091 = vst.msk [vmem:[#allocation5 + $0x140] sm:$0xff] %vm6755_vm3, %v7057_v25  ;;  %v10929_v56 = vpack.c.bf16 %v8455_v54, %v8454_v20  ;;  %v8429_v20 = vld [vmem:[%s15111_s4 + $0x48] sm:$0xff] }
 0x5f2   : > { %6867 = vst.msk [vmem:[#allocation5 + $0x150] sm:$0xff] %vm6852_vm12, %v6833_v0 }
 0x5f4   : > { %v7153_v14 = vpop.permute.xlu0 %7152  ;;  %v6641_v13 = vpop.permute.xlu1 %6640 }
 0x5f5   : > { %7187 = vst.msk [vmem:[#allocation5 + $0x140] sm:$0xff] %vm6852_vm12, %v7153_v14 }
 0x5f6   : > { %6674 = vst.msk [vmem:[#allocation5 + $0x168] sm:$0xff] %vm6658_vm11, %v6641_v13  ;;  %v13895_v13 = vld [vmem:[#allocation5 + $0xb8] sm:$0xff] }
 0x5f8   : > { %v6962_v4 = vpop.permute.xlu0 %6961  ;;  %v6738_v60 = vpop.permute.xlu1 %6737 }
 0x5f9   : > { %6995 = vst.msk [vmem:[#allocation5 + $0x158] sm:$0xff] %vm6658_vm11, %v6962_v4  ;;  %v7264_v21 = vld [vmem:[#allocation5 + $0x150] sm:$0xff]  ;;  %v8436_v4 = vld [vmem:[%s15111_s4 + $0x80] sm:$0xff] }
 0x5fa   : > { %6771 = vst.msk [vmem:[#allocation5 + $0x168] sm:$0xff] %vm6755_vm3, %v6738_v60  ;;  %v10402_v59 = vpop.f32.mrb[18].mxu1  ;;  %v8437_v60 = vld [vmem:[%s15111_s4 + $0x88] sm:$0xff] }
 0x5fb   : > { %v10403_v61 = vpop.f32.mrb[19].mxu1 }
 0x5fc   : > { %v13837_v49 = vadd.f32 %v10403_v61, %v10402_v59  ;;  %v7262_v15 = vld [vmem:[#allocation5 + $0x140] sm:$0xff]  ;;  %v10893_v59 = vpack.c.bf16 %v8437_v60, %v8436_v4  ;;  %v8446_v4 = vld [vmem:[%s15111_s4 + $0xd0] sm:$0xff]  ;;  %v8447_v60 = vld [vmem:[%s15111_s4 + $0xd8] sm:$0xff] }
 0x5fd   : > { %7487 = vmatprep.mubr.f32.mxu1 %v7262_v15 }
 0x5fe   : > { %7488 = vmatmul.mubr.f32.gmra.mrb[26].mxu1 %v7261_v3  ;;  %10894 = vmatprep.subr.bf16.mxu1 %v10893_v59 }
 0x61f   : > { %v7059_v41 = vpop.permute.xlu0 %7058  ;;  %v6835_v63 = vpop.permute.xlu1 %6834 }
 0x620   : > { %7092 = vst.msk [vmem:[#allocation5 + $0x158] sm:$0xff] %vm6755_vm3, %v7059_v41  ;;  %v8438_v41 = vld [vmem:[%s15111_s4 + $0x90] sm:$0xff] }
 0x621   : > { %6868 = vst.msk [vmem:[#allocation5 + $0x168] sm:$0xff] %vm6852_vm12, %v6835_v63 }
 0x623   : > { %v7155_v6 = vpop.permute.xlu0 %7154 }
 0x624   : > { %7188 = vst.msk [vmem:[#allocation5 + $0x158] sm:$0xff] %vm6852_vm12, %v7155_v6  ;;  %v8439_v6 = vld [vmem:[%s15111_s4 + $0x98] sm:$0xff] }
 0x627   : > { %v6964_v36 = vpop.permute.xlu0 %6963 }
 0x628   : > { %6996 = vst.msk [vmem:[#allocation5 + $0x170] sm:$0xff] %vm6658_vm11, %v6964_v36  ;;  %v7267_v7 = vld [vmem:[#allocation5 + $0x168] sm:$0xff]  ;;  %v10897_v36 = vpack.c.bf16 %v8439_v6, %v8438_v41 }
 0x629   : > { %v10405_v46 = vpop.f32.mrb[20].mxu1 }
 0x62a   : > { %v10406_v52 = vpop.f32.mrb[21].mxu1 }
 0x62b   : > { %v13851_v53 = vadd.f32 %v10406_v52, %v10405_v46  ;;  %v7061_v34 = vpop.permute.xlu0 %7060  ;;  %v7265_v29 = vld [vmem:[#allocation5 + $0x158] sm:$0xff]  ;;  %v8422_v46 = vld [vmem:[%s15111_s4 + $0x10] sm:$0xff] }
 0x62c   : > { %7093 = vst.msk [vmem:[#allocation5 + $0x170] sm:$0xff] %vm6755_vm3, %v7061_v34  ;;  %7492 = vmatprep.mubr.f32.mxu1 %v7265_v29  ;;  %v8423_v52 = vld [vmem:[%s15111_s4 + $0x18] sm:$0xff]  ;;  %v7700_v34 = vld [vmem:[#allocation3] sm:$0xff] }
 0x62d   : > { %7493 = vmatmul.mubr.f32.gmra.mrb[28].mxu1 %v7264_v21  ;;  %v10899_v21 = vpack.c.bf16 %v8423_v52, %v8422_v46  ;;  %v8449_v46 = vld [vmem:[%s15111_s4 + $0xe8] sm:$0xff] }
 0x62f   : > { %v7157_v1 = vpop.permute.xlu0 %7156 }
 0x630   : > { %7189 = vst.msk [vmem:[#allocation5 + $0x170] sm:$0xff] %vm6852_vm12, %v7157_v1  ;;  %v8440_v1 = vld [vmem:[%s15111_s4 + $0xa0] sm:$0xff] }
 0x633   : > { %v13925_v29 = vpop.permute.xlu1 %7679 }
 0x637   : > { %v7268_v42 = vld [vmem:[#allocation5 + $0x170] sm:$0xff] }
 0x638   : > { %7497 = vmatprep.mubr.f32.mxu1 %v7268_v42  ;;  %v8441_v42 = vld [vmem:[%s15111_s4 + $0xa8] sm:$0xff] }
 0x639   : > { %7498 = vmatmul.mubr.f32.gmra.mrb[30].mxu1 %v7267_v7  ;;  %v10901_v7 = vpack.c.bf16 %v8441_v42, %v8440_v1  ;;  %v8433_v1 = vld [vmem:[%s15111_s4 + $0x68] sm:$0xff] }
 0x63a   : > { %10755 = vmatprep.mubr.msk.f32.mxu1 %vm15372_vm8, %v7224_v16  ;;  %vm15384_vm8 = vmmov %vm15368_vm0  ;;  %v8424_v16 = vld [vmem:[%s15111_s4 + $0x20] sm:$0xff] }
 0x63d   : > { %10756 = vmatmul.mubr.msk.f32.vlgmr.msra.gmra.mrb[32].mxu1 %vm15373_vm9, %v7227_v27  ;;  %vm15385_vm9 = vmmov %vm15368_vm0  ;;  %v8425_v27 = vld [vmem:[%s15111_s4 + $0x28] sm:$0xff] }
 0x63e   : > { %10758 = vmatprep.mubr.msk.f32.mxu1 %vm15374_vm1, %v7230_v10  ;;  %vm15386_vm1 = vmmov %vm15368_vm0  ;;  %v8442_v10 = vld [vmem:[%s15111_s4 + $0xb0] sm:$0xff] }
 0x641   : > { %10759 = vmatmul.mubr.msk.f32.gmra.mrb[34].mxu1 %vm15375_vm15, %v7233_v43  ;;  %vm15387_vm15 = vmmov %vm15368_vm0  ;;  %v7765_v43 = vpop.permute.xlu1 %7764 }
 0x642   : > { %10761 = vmatprep.mubr.msk.f32.mxu1 %vm15376_vm14, %v7236_v38  ;;  %9493 = vst.msk [vmem:[#allocation5 + $0xb8] sm:$0xff] %vm15387_vm15, %v13811_v40  ;;  %v8421_v40 = vld [vmem:[%s15111_s4 + $0x8] sm:$0xff]  ;;  %vm15388_vm14 = vmmov %vm15368_vm0  ;;  %v10903_v38 = vpack.c.bf16 %v8425_v27, %v8424_v16 }
 0x643   : > { %v10895_v63 = vpack.c.bf16 %v8421_v40, %v8420_v23  ;;  %7716 = vst.msk [vmem:[#allocation5] sm:$0xff] %vm15388_vm14, %v7700_v34  ;;  %v8431_v23 = vld [vmem:[%s15111_s4 + $0x58] sm:$0xff]  ;;  %vm15397_vm15 = vmmov %vm15368_vm0 }
 0x644   : > { %7812 = vst.msk [vmem:[#allocation5] sm:$0xff] %vm6658_vm11, %v7765_v43  ;;  %vm15398_vm14 = vmmov %vm15368_vm0 }
 0x645   : > { %10762 = vmatmul.mubr.msk.f32.gmra.mrb[36].mxu1 %vm15377_vm10, %v7239_v5  ;;  %v8443_v5 = vld [vmem:[%s15111_s4 + $0xb8] sm:$0xff]  ;;  %vm7648_vm10 = vcmask 130048  }
 0x646   : > { %10764 = vmatprep.mubr.msk.f32.mxu1 %vm15378_vm7, %v7242_v18  ;;  %10896 = vmatpush3.bf16.msra.mxu1 %v10895_v63  ;;  %vm7683_vm7 = vcmask 261248  }
 0x647   : > { %10898 = vmatprep.subr.bf16.mxu1 %v10897_v36  ;;  %v8448_v36 = vld [vmem:[%s15111_s4 + $0xe0] sm:$0xff] }
 0x648   : > { %v10917_v34 = vpack.c.bf16 %v8449_v46, %v8448_v36 }
 0x649   : > { %10765 = vmatmul.mubr.msk.f32.gmra.mrb[38].mxu1 %vm15379_vm4, %v13817_v9  ;;  %vm15389_vm4 = vmmov %vm15368_vm0 }
 0x64a   : > { %10767 = vmatprep.mubr.msk.f32.mxu1 %vm15380_vm5, %v7248_v12  ;;  %10900 = vmatpush3.bf16.msra.mxu1 %v10899_v21  ;;  %v10905_v12 = vpack.c.bf16 %v8443_v5, %v8442_v10  ;;  %vm15390_vm5 = vmmov %vm15368_vm0 }
 0x64b   : > { %10902 = vmatprep.subr.bf16.mxu1 %v10901_v7 }
 0x64d   : > { %10768 = vmatmul.mubr.msk.f32.gmra.mrb[40].mxu1 %vm15368_vm0, %v7251_v47 }
 0x64e   : > { %10770 = vmatprep.mubr.msk.f32.mxu1 %vm15381_vm6, %v7254_v22  ;;  %v13950_v22 = vld [vmem:[%s15113_s6 + $0x1] ss:$0 sm:$0xff]  ;;  %10904 = vmatpush3.bf16.msra.mxu1 %v10903_v38  ;;  %vm15391_vm6 = vmmov %vm15368_vm0 }
 0x64f   : > { %10906 = vmatprep.subr.bf16.mxu1 %v10905_v12  ;;  %v7425_v45 = vadd.f32 %v13779_v24, %v13950_v22  ;;  %v8428_v24 = vld [vmem:[%s15111_s4 + $0x40] sm:$0xff]  ;;  %v7440_v54 = vadd.f32 %v13798_v50, %v13950_v22  ;;  %v7450_v40 = vadd.f32 %v13815_v31, %v13950_v22  ;;  %v7445_v6 = vadd.f32 %v13807_v33, %v13950_v22 }
 0x650   : > { %v8432_v33 = vld [vmem:[%s15111_s4 + $0x60] sm:$0xff]  ;;  %v7460_v42 = vadd.f32 %v13827_v51, %v13950_v22  ;;  %v7455_v38 = vadd.f32 %v13821_v30, %v13950_v22  ;;  %v8450_v30 = vld [vmem:[%s15111_s4 + $0xf0] sm:$0xff] }
 0x651   : > { %10771 = vmatmul.mubr.msk.f32.gmra.mrb[42].mxu1 %vm15382_vm2, %v7257_v19  ;;  %v10919_v10 = vpack.c.bf16 %v8433_v1, %v8432_v33  ;;  %vm15392_vm2 = vmmov %vm15368_vm0 }
 0x652   : > { %10773 = vmatprep.mubr.msk.f32.mxu1 %vm15383_vm13, %v7260_v28  ;;  %v8426_v28 = vld [vmem:[%s15111_s4 + $0x30] sm:$0xff]  ;;  %vm15393_vm13 = vmmov %vm15368_vm0 }
 0x655   : > { %10774 = vmatmul.mubr.msk.f32.gmra.mrb[44].mxu1 %vm15384_vm8, %v7263_v11  ;;  %v7430_v11 = vadd.f32 %v13781_v26, %v13950_v22  ;;  %v13971_v26 = vpop.permute.xlu0 %7677  ;;  %vm15394_vm8 = vmmov %vm15368_vm0 }
 0x656   : > { %10776 = vmatprep.mubr.msk.f32.mxu1 %vm15385_vm9, %v7266_v37  ;;  %v7861_v37 = vpop.permute.xlu1 %7860  ;;  %vm15395_vm9 = vmmov %vm15368_vm0 }
 0x657   : > { %7908 = vst.msk [vmem:[#allocation5] sm:$0xff] %vm6755_vm3, %v7861_v37  ;;  %v8434_v37 = vld [vmem:[%s15111_s4 + $0x70] sm:$0xff] }
 0x659   : > { %10777 = vmatmul.mubr.msk.f32.gmra.mrb[46].mxu1 %vm15386_vm1, %v13824_v62  ;;  %v8453_v62 = vld [vmem:[%s15111_s4 + $0x108] sm:$0xff]  ;;  %vm15396_vm1 = vmmov %vm15368_vm0 }
 0x65a   : > { %v10925_v17 = vpack.c.bf16 %v8453_v62, %v8452_v58 }
 0x65c   : > { %10926 = vmatprep.subr.bf16.mxu0 %v10925_v17 }
 0x65d   : > { %10928 = vmatpush3.bf16.msra.mxu0 %v10925_v17 }
 0x65e   : > { %10930 = vmatprep.subr.bf16.mxu0 %v10929_v56 }
 0x661   : > { %v10408_v2 = vpop.f32.mrb[22].mxu1  ;;  %10932 = vmatpush3.bf16.msra.mxu0 %v10929_v56  ;;  %v10911_v56 = vpack.c.bf16 %v8429_v20, %v8428_v24 }
 0x662   : > { %v10409_v35 = vpop.f32.mrb[23].mxu1 }
 0x663   : > { %v13875_v44 = vadd.f32 %v10409_v35, %v10408_v2  ;;  %v10907_v2 = vpack.c.bf16 %v8427_v39, %v8426_v28  ;;  %v8451_v28 = vld [vmem:[%s15111_s4 + $0xf8] sm:$0xff] }
 0x665   : > { %10908 = vmatpush3.bf16.msra.mxu1 %v10907_v2  ;;  %v8435_v2 = vld [vmem:[%s15111_s4 + $0x78] sm:$0xff] }
 0x699   : > { %v10411_v8 = vpop.f32.mrb[24].mxu1 }
 0x69a   : > { %v10412_v9 = vpop.f32.mrb[25].mxu1 }
 0x69b   : > { %v13878_v48 = vadd.f32 %v10412_v9, %v10411_v8  ;;  %v8444_v8 = vld [vmem:[%s15111_s4 + $0xc0] sm:$0xff]  ;;  %v8445_v9 = vld [vmem:[%s15111_s4 + $0xc8] sm:$0xff] }
 0x69c   : > { %v10909_v62 = vpack.c.bf16 %v8445_v9, %v8444_v8 }
 0x69e   : > { %10910 = vmatprep.subr.bf16.mxu1 %v10909_v62  ;;  %v7465_v62 = vadd.f32 %v13829_v55, %v13950_v22 }
 0x69f   : > { %10912 = vmatpush3.bf16.msra.mxu1 %v10911_v56 }
 0x6d1   : > { %v10414_v25 = vpop.f32.mrb[26].mxu1 }
 0x6d2   : > { %v10415_v0 = vpop.f32.mrb[27].mxu1 }
 0x6d3   : > { %v13893_v14 = vadd.f32 %v10415_v0, %v10414_v25  ;;  %v7435_v0 = vadd.f32 %v13791_v32, %v13950_v22  ;;  %v8430_v32 = vld [vmem:[%s15111_s4 + $0x50] sm:$0xff] }
 0x6d4   : > { %v10915_v41 = vpack.c.bf16 %v8431_v23, %v8430_v32 }
 0x6d5   : > { %v7490_v23 = vadd.f32 %v13893_v14, %v13950_v22 }
 0x700   : > { %v10417_v61 = vpop.f32.mrb[28].mxu1 }
 0x701   : > { %v10418_v15 = vpop.f32.mrb[29].mxu1 }
 0x702   : > { %v13905_v3 = vadd.f32 %v10418_v15, %v10417_v61  ;;  %v10913_v61 = vpack.c.bf16 %v8447_v60, %v8446_v4  ;;  %v7475_v60 = vadd.f32 %v13851_v53, %v13950_v22 }
 0x704   : > { %10914 = vmatprep.subr.bf16.mxu1 %v10913_v61 }
 0x705   : > { %10916 = vmatpush3.bf16.msra.mxu1 %v10915_v41 }
 0x706   : > { %10918 = vmatprep.subr.bf16.mxu1 %v10917_v34 }
 0x709   : > { %10920 = vmatpush3.bf16.msra.mxu1 %v10919_v10  ;;  %v7495_v10 = vadd.f32 %v13905_v3, %v13950_v22 }
 0x70c   : > { %v10420_v18 = vpop.f32.mrb[30].mxu1 }
 0x70d   : > { %v10421_v47 = vpop.f32.mrb[31].mxu1 }
 0x70e   : > { %v13952_v19 = vadd.f32 %v10421_v47, %v10420_v18 }
 0x710   : > { %v10757_v35 = vpop.f32.mrb[32].mxu1  ;;  %v7500_v33 = vadd.f32 %v13952_v19, %v13950_v22 }
 0x711   : > { %v7575_v57 = vadd.f32 %v10757_v35, %v7430_v11  ;;  %v7569_v58 = vpop.f32.mrb[33].mxu1  ;;  %v10921_v11 = vpack.c.bf16 %v8451_v28, %v8450_v30  ;;  %v7470_v35 = vadd.f32 %v13837_v49, %v13950_v22 }
 0x712   : > { %v7570_v17 = vadd.f32 %v7569_v58, %v7425_v45 }
 0x713   : > { %7650 = vst.msk [vmem:[#allocation3 + $0x21] sm:$0xff] %vm7648_vm10, %v7575_v57  ;;  %v10923_v57 = vpack.c.bf16 %v8435_v2, %v8434_v37  ;;  %10922 = vmatprep.subr.bf16.mxu1 %v10921_v11 }
 0x714   : > { %7649 = vst.msk [vmem:[#allocation3 + $0x11] sm:$0xff] %vm7648_vm10, %v7570_v17  ;;  %v10760_v25 = vpop.f32.mrb[34].mxu1 }
 0x715   : > { %7685 = vst.msk [vmem:[#allocation3 + $0x21] sm:$0xff] %vm7683_vm7, %v13971_v26  ;;  %7684 = vst.msk [vmem:[#allocation3 + $0x11] sm:$0xff] %vm7683_vm7, %v13971_v26  ;;  %v7585_v50 = vadd.f32 %v10760_v25, %v7440_v54  ;;  %v7579_v59 = vpop.f32.mrb[35].mxu1  ;;  %10924 = vmatpush3.bf16.msra.mxu1 %v10923_v57 }
 0x716   : > { %v7580_v15 = vadd.f32 %v7579_v59, %v7435_v0 }
 0x717   : > { %7652 = vst.msk [vmem:[#allocation3 + $0x41] sm:$0xff] %vm7648_vm10, %v7585_v50 }
 0x718   : > { %7687 = vst.msk [vmem:[#allocation3 + $0x41] sm:$0xff] %vm7683_vm7, %v13971_v26  ;;  %v10763_v63 = vpop.f32.mrb[36].mxu1 }
 0x719   : > { %7651 = vst.msk [vmem:[#allocation3 + $0x31] sm:$0xff] %vm7648_vm10, %v7580_v15  ;;  %v7595_v31 = vadd.f32 %v10763_v63, %v7450_v40  ;;  %v7589_v52 = vpop.f32.mrb[37].mxu1  ;;  %v7485_v63 = vadd.f32 %v13878_v48, %v13950_v22 }
 0x71a   : > { %7686 = vst.msk [vmem:[#allocation3 + $0x31] sm:$0xff] %vm7683_vm7, %v13971_v26  ;;  %v7590_v21 = vadd.f32 %v7589_v52, %v7445_v6 }
 0x71b   : > { %7654 = vst.msk [vmem:[#allocation3 + $0x61] sm:$0xff] %vm7648_vm10, %v7595_v31 }
 0x71c   : > { %v14026_v7 = vld [vmem:[#allocation3 + $0x20] sm:$0xff]  ;;  %7689 = vst.msk [vmem:[#allocation3 + $0x61] sm:$0xff] %vm7683_vm7, %v13971_v26  ;;  %v10766_v43 = vpop.f32.mrb[38].mxu1  ;;  %v14037_v5 = vld [vmem:[#allocation3 + $0x12] sm:$0xff] }
 0x71d   : > { %v14028_v16 = vld [vmem:[#allocation3 + $0x22] sm:$0xff]  ;;  %7653 = vst.msk [vmem:[#allocation3 + $0x51] sm:$0xff] %vm7648_vm10, %v7590_v21  ;;  %v7924_v51 = vld [vmem:[#allocation3 + $0x10] sm:$0xff]  ;;  %v7605_v12 = vadd.f32 %v10766_v43, %v7460_v42  ;;  %v7599_v47 = vpop.f32.mrb[39].mxu1  ;;  %8084 = vrot.lane.b32.xlu0 %v14037_v5, %s11083_s27 }
 0x71e   : > { %v14030_v27 = vld [vmem:[#allocation3 + $0x21] sm:$0xff]  ;;  %v7733_v18 = vld [vmem:[#allocation3 + $0x11] sm:$0xff]  ;;  %8356 = vst.msk [vmem:[#allocation5 + $0x10] sm:$0xff] %vm15389_vm4, %v14028_v16  ;;  %7956 = vrot.lane.b32.xlu1 %v7924_v51, %s11085_s22  ;;  %v7600_v39 = vadd.f32 %v7599_v47, %v7455_v38  ;;  %vm15399_vm4 = vmmov %vm15368_vm0 }
 0x71f   : > { %8037 = vst.msk [vmem:[#allocation5 + $0x20] sm:$0xff] %vm15390_vm5, %v14030_v27  ;;  %v14067_v45 = vld [vmem:[#allocation3 + $0x42] sm:$0xff]  ;;  %vm15400_vm5 = vmmov %vm15368_vm0 }
 0x720   : > { %7718 = vst.msk [vmem:[#allocation5 + $0x30] sm:$0xff] %vm15368_vm0, %v14026_v7  ;;  %v14069_v8 = vld [vmem:[#allocation3 + $0x40] sm:$0xff]  ;;  %v10769_v58 = vpop.f32.mrb[40].mxu1 }
 0x721   : > { %7688 = vst.msk [vmem:[#allocation3 + $0x51] sm:$0xff] %vm7683_vm7, %v13971_v26  ;;  %v14071_v9 = vld [vmem:[#allocation3 + $0x41] sm:$0xff]  ;;  %v14078_v17 = vld [vmem:[#allocation3 + $0x32] sm:$0xff]  ;;  %v7615_v55 = vadd.f32 %v10769_v58, %v7470_v35  ;;  %v7609_v20 = vpop.f32.mrb[41].mxu1  ;;  %8180 = vrot.lane.b32.xlu0 %v14026_v7, %s11084_s15 }
 0x722   : > { %8036 = vst.msk [vmem:[#allocation5 + $0x8] sm:$0xff] %vm15391_vm6, %v7733_v18  ;;  %v14082_v49 = vld [vmem:[#allocation3 + $0x30] sm:$0xff]  ;;  %7766 = vrot.lane.b32.xlu1 %v7733_v18, %s11083_s27  ;;  %v7610_v54 = vadd.f32 %v7609_v20, %v7465_v62  ;;  %vm15401_vm6 = vmmov %vm15368_vm0 }
 0x723   : > { %7717 = vst.msk [vmem:[#allocation5 + $0x18] sm:$0xff] %vm15392_vm2, %v7924_v51  ;;  %v14084_v24 = vld [vmem:[#allocation3 + $0x31] sm:$0xff]  ;;  %v14104_v25 = vld [vmem:[#allocation3 + $0x62] sm:$0xff]  ;;  %vm15402_vm2 = vmmov %vm15368_vm0 }
 0x724   : > { %7656 = vst.msk [vmem:[#allocation3 + $0x81] sm:$0xff] %vm7648_vm10, %v7605_v12  ;;  %7655 = vst.msk [vmem:[#allocation3 + $0x71] sm:$0xff] %vm7648_vm10, %v7600_v39  ;;  %v14106_v0 = vld [vmem:[#allocation3 + $0x60] sm:$0xff]  ;;  %v10772_v4 = vpop.f32.mrb[42].mxu1 }
 0x725   : > { %7691 = vst.msk [vmem:[#allocation3 + $0x81] sm:$0xff] %vm7683_vm7, %v13971_v26  ;;  %7690 = vst.msk [vmem:[#allocation3 + $0x71] sm:$0xff] %vm7683_vm7, %v13971_v26  ;;  %v7480_v26 = vadd.f32 %v13875_v44, %v13950_v22  ;;  %v8374_v56 = vld [vmem:[#allocation5 + $0x10] sm:$0xff]  ;;  %v7619_v15 = vpop.f32.mrb[43].mxu1  ;;  %8276 = vrot.lane.b32.xlu0 %v14030_v27, %s11085_s22  ;;  %v14130_v53 = vld [vmem:[#allocation3 + $0x61] sm:$0xff] }
 0x726   : > { %8358 = vst.msk [vmem:[#allocation5 + $0x40] sm:$0xff] %vm15393_vm13, %v14067_v45  ;;  %10787 = vmatprep.mubr.msk.f32.mxu0 %vm15399_vm4, %v8374_v56  ;;  %7862 = vrot.lane.b32.xlu1 %v14037_v5, %s11084_s15  ;;  %vm15403_vm13 = vmmov %vm15368_vm0  ;;  %v7620_v32 = vadd.f32 %v7619_v15, %v7475_v60 }
 0x727   : > { %8039 = vst.msk [vmem:[#allocation5 + $0x50] sm:$0xff] %vm15394_vm8, %v14071_v9  ;;  %v7625_v61 = vadd.f32 %v10772_v4, %v7480_v26  ;;  %vm15404_vm8 = vmmov %vm15368_vm0 }
 0x728   : > { %7720 = vst.msk [vmem:[#allocation5 + $0x60] sm:$0xff] %vm15395_vm9, %v14069_v8  ;;  %v14112_v50 = vld [vmem:[#allocation3 + $0x52] sm:$0xff]  ;;  %v10775_v41 = vpop.f32.mrb[44].mxu1  ;;  %vm15405_vm9 = vmmov %vm15368_vm0 }
 0x729   : > { %8357 = vst.msk [vmem:[#allocation5 + $0x28] sm:$0xff] %vm15396_vm1, %v14078_v17  ;;  %v14116_v59 = vld [vmem:[#allocation3 + $0x50] sm:$0xff]  ;;  %v7635_v14 = vadd.f32 %v10775_v41, %v7490_v23  ;;  %v7629_v31 = vpop.f32.mrb[45].mxu1  ;;  %vm15406_vm1 = vmmov %vm15368_vm0  ;;  %8086 = vrot.lane.b32.xlu0 %v14028_v16, %s11083_s27 }
 0x72a   : > { %8038 = vst.msk [vmem:[#allocation5 + $0x38] sm:$0xff] %vm15397_vm15, %v14084_v24  ;;  %v14118_v44 = vld [vmem:[#allocation3 + $0x51] sm:$0xff]  ;;  %vm15407_vm15 = vmmov %vm15368_vm0  ;;  %v7630_v21 = vadd.f32 %v7629_v31, %v7485_v63  ;;  %7958 = vrot.lane.b32.xlu1 %v14026_v7, %s11085_s22 }
 0x72b   : > { %7719 = vst.msk [vmem:[#allocation5 + $0x48] sm:$0xff] %vm15398_vm14, %v14082_v49  ;;  %vm15408_vm14 = vmmov %vm15368_vm0 }
 0x72c   : > { %7658 = vst.msk [vmem:[#allocation3 + $0xc1] sm:$0xff] %vm7648_vm10, %v7615_v55  ;;  %7657 = vst.msk [vmem:[#allocation3 + $0xb1] sm:$0xff] %vm7648_vm10, %v7610_v54  ;;  %v14143_v40 = vld [vmem:[#allocation3 + $0x82] sm:$0xff]  ;;  %v14148_v36 = vld [vmem:[#allocation3 + $0x72] sm:$0xff]  ;;  %v10778_v7 = vpop.f32.mrb[46].mxu1 }
 0x72d   : > { %8360 = vst.msk [vmem:[#allocation5 + $0x70] sm:$0xff] %vm15400_vm5, %v14104_v25  ;;  %v14152_v46 = vld [vmem:[#allocation3 + $0x70] sm:$0xff]  ;;  %v8380_v52 = vld [vmem:[#allocation5 + $0x40] sm:$0xff]  ;;  %vm15409_vm4 = vmmov %vm15368_vm0  ;;  %v7645_v19 = vadd.f32 %v10778_v7, %v7500_v33  ;;  %v7639_v5 = vpop.f32.mrb[47].mxu1  ;;  %8182 = vrot.lane.b32.xlu0 %v14082_v49, %s11084_s15 }
 0x72e   : > { %7693 = vst.msk [vmem:[#allocation3 + $0xc1] sm:$0xff] %vm7683_vm7, %v13925_v29  ;;  %7692 = vst.msk [vmem:[#allocation3 + $0xb1] sm:$0xff] %vm7683_vm7, %v13925_v29  ;;  %v14161_v48 = vld [vmem:[#allocation3 + $0x71] sm:$0xff]  ;;  %v14165_v34 = vld [vmem:[#allocation3 + $0x81] sm:$0xff]  ;;  %v7640_v18 = vadd.f32 %v7639_v5, %v7495_v10  ;;  %7768 = vrot.lane.b32.xlu1 %v14030_v27, %s11083_s27 }
 0x72f   : > { %7722 = vst.msk [vmem:[#allocation5 + $0x90] sm:$0xff] %vm15368_vm0, %v14106_v0  ;;  %vm15410_vm5 = vmmov %vm15368_vm0 }
 0x730   : > { %8359 = vst.msk [vmem:[#allocation5 + $0x58] sm:$0xff] %vm15401_vm6, %v14112_v50  ;;  %v8377_v6 = vld [vmem:[#allocation5 + $0x28] sm:$0xff]  ;;  %vm15411_vm6 = vmmov %vm15368_vm0 }
 0x731   : > { %8040 = vst.msk [vmem:[#allocation5 + $0x68] sm:$0xff] %vm15402_vm2, %v14118_v44  ;;  %10788 = vmatmul.mubr.msk.f32.vlgmr.msra.gmra.mrb[64].mxu0 %vm15406_vm1, %v8377_v6  ;;  %vm15412_vm2 = vmmov %vm15368_vm0  ;;  %8278 = vrot.lane.b32.xlu0 %v14084_v24, %s11085_s22 }
 0x732   : > { %7721 = vst.msk [vmem:[#allocation5 + $0x78] sm:$0xff] %vm15403_vm13, %v14116_v59  ;;  %10790 = vmatprep.mubr.msk.f32.mxu0 %vm15409_vm4, %v8380_v52  ;;  %vm15413_vm13 = vmmov %vm15368_vm0  ;;  %7864 = vrot.lane.b32.xlu1 %v14028_v16, %s11084_s15 }
 0x733   : > { %8041 = vst.msk [vmem:[#allocation5 + $0x80] sm:$0xff] %vm15404_vm8, %v14130_v53  ;;  %vm15414_vm8 = vmmov %vm15368_vm0 }
 0x734   : > { %7660 = vst.msk [vmem:[#allocation3 + $0xe1] sm:$0xff] %vm7648_vm10, %v7625_v61  ;;  %7659 = vst.msk [vmem:[#allocation3 + $0xd1] sm:$0xff] %vm7648_vm10, %v7620_v32  ;;  %v8386_v3 = vld [vmem:[#allocation5 + $0x70] sm:$0xff] }
 0x735   : > { %8362 = vst.msk [vmem:[#allocation5 + $0xa0] sm:$0xff] %vm15405_vm9, %v14143_v40  ;;  %v14179_v1 = vld [vmem:[#allocation3 + $0xc2] sm:$0xff]  ;;  %v14190_v38 = vld [vmem:[#allocation3 + $0xb0] sm:$0xff]  ;;  %vm15415_vm9 = vmmov %vm15368_vm0  ;;  %8088 = vrot.lane.b32.xlu0 %v14078_v17, %s11083_s27 }
 0x736   : > { %7695 = vst.msk [vmem:[#allocation3 + $0xe1] sm:$0xff] %vm7683_vm7, %v13925_v29  ;;  %7694 = vst.msk [vmem:[#allocation3 + $0xd1] sm:$0xff] %vm7683_vm7, %v13925_v29  ;;  %v14181_v42 = vld [vmem:[#allocation3 + $0xc0] sm:$0xff]  ;;  %v14199_v22 = vld [vmem:[#allocation3 + $0xb1] sm:$0xff]  ;;  %7960 = vrot.lane.b32.xlu1 %v14082_v49, %s11085_s22 }
 0x737   : > { %8361 = vst.msk [vmem:[#allocation5 + $0x88] sm:$0xff] %vm15407_vm15, %v14148_v36  ;;  %v8383_v43 = vld [vmem:[#allocation5 + $0x58] sm:$0xff]  ;;  %v14201_v51 = vld [vmem:[#allocation3 + $0xc1] sm:$0xff]  ;;  %vm15416_vm1 = vmmov %vm15368_vm0 }
 0x738   : > { %7723 = vst.msk [vmem:[#allocation5 + $0xa8] sm:$0xff] %vm15408_vm14, %v14152_v46  ;;  %10791 = vmatmul.mubr.msk.f32.gmra.mrb[66].mxu0 %vm15413_vm13, %v8383_v43  ;;  %vm15417_vm15 = vmmov %vm15368_vm0 }
 0x739   : > { %8042 = vst.msk [vmem:[#allocation5 + $0x98] sm:$0xff] %vm15410_vm5, %v14161_v48  ;;  %10793 = vmatprep.mubr.msk.f32.mxu0 %vm15415_vm9, %v8386_v3  ;;  %vm15418_vm14 = vmmov %vm15368_vm0  ;;  %8184 = vrot.lane.b32.xlu0 %v14069_v8, %s11084_s15 }
 0x73a   : > { %8043 = vst.msk [vmem:[#allocation5 + $0xb0] sm:$0xff] %vm15368_vm0, %v14165_v34  ;;  %vm15419_vm4 = vmmov %vm15368_vm0  ;;  %7770 = vrot.lane.b32.xlu1 %v14084_v24, %s11083_s27 }
 0x73b   : > { %7662 = vst.msk [vmem:[#allocation3 + $0x101] sm:$0xff] %vm7648_vm10, %v7635_v14  ;;  %7661 = vst.msk [vmem:[#allocation3 + $0xf1] sm:$0xff] %vm7648_vm10, %v7630_v21 }
 0x73c   : > { %7697 = vst.msk [vmem:[#allocation3 + $0x101] sm:$0xff] %vm7683_vm7, %v13925_v29  ;;  %7696 = vst.msk [vmem:[#allocation3 + $0xf1] sm:$0xff] %vm7683_vm7, %v13925_v29  ;;  %v8392_v39 = vld [vmem:[#allocation5 + $0xa0] sm:$0xff] }
 0x73d   : > { %8364 = vst.msk [vmem:[#allocation5 + $0xd0] sm:$0xff] %vm15411_vm6, %v14179_v1  ;;  %v14213_v12 = vld [vmem:[#allocation3 + $0xe2] sm:$0xff]  ;;  %v14220_v27 = vld [vmem:[#allocation3 + $0xd2] sm:$0xff]  ;;  %vm15420_vm5 = vmmov %vm15368_vm0  ;;  %8280 = vrot.lane.b32.xlu0 %v14071_v9, %s11085_s22 }
 0x73e   : > { %7726 = vst.msk [vmem:[#allocation5 + $0xf0] sm:$0xff] %vm15412_vm2, %v14181_v42  ;;  %v14215_v47 = vld [vmem:[#allocation3 + $0xe0] sm:$0xff]  ;;  %v8389_v30 = vld [vmem:[#allocation5 + $0x88] sm:$0xff]  ;;  %v14224_v28 = vld [vmem:[#allocation3 + $0xd0] sm:$0xff]  ;;  %7866 = vrot.lane.b32.xlu1 %v14078_v17, %s11084_s15 }
 0x73f   : > { %7725 = vst.msk [vmem:[#allocation5 + $0xd8] sm:$0xff] %vm15414_vm8, %v14190_v38  ;;  %10794 = vmatmul.mubr.msk.f32.gmra.mrb[68].mxu0 %vm15420_vm5, %v8389_v30  ;;  %v14235_v11 = vld [vmem:[#allocation3 + $0xd1] sm:$0xff]  ;;  %v14237_v37 = vld [vmem:[#allocation3 + $0xe1] sm:$0xff]  ;;  %vm15422_vm6 = vmmov %vm15368_vm0 }
 0x740   : > { %8044 = vst.msk [vmem:[#allocation5 + $0xc8] sm:$0xff] %vm15416_vm1, %v14199_v22  ;;  %10796 = vmatprep.mubr.msk.f32.mxu0 %vm15422_vm6, %v8392_v39  ;;  %vm15423_vm2 = vmmov %vm15368_vm0  ;;  %v7740_v17 = vld [vmem:[#allocation3 + $0xa1] sm:$0xff] }
 0x741   : > { %8045 = vst.msk [vmem:[#allocation5 + $0xe0] sm:$0xff] %vm15417_vm15, %v14201_v51  ;;  %vm15425_vm13 = vmmov %vm15368_vm0  ;;  %8090 = vrot.lane.b32.xlu0 %v14067_v45, %s11083_s27 }
 0x742   : > { %7664 = vst.msk [vmem:[#allocation3 + $0x121] sm:$0xff] %vm7648_vm10, %v7645_v19  ;;  %7663 = vst.msk [vmem:[#allocation3 + $0x111] sm:$0xff] %vm7648_vm10, %v7640_v18  ;;  %7962 = vrot.lane.b32.xlu1 %v14069_v8, %s11085_s22  ;;  %v7708_v8 = vld [vmem:[#allocation3 + $0xa0] sm:$0xff] }
 0x743   : > { %7699 = vst.msk [vmem:[#allocation3 + $0x121] sm:$0xff] %vm7683_vm7, %v13925_v29  ;;  %7698 = vst.msk [vmem:[#allocation3 + $0x111] sm:$0xff] %vm7683_vm7, %v13925_v29  ;;  %v14248_v2 = vld [vmem:[#allocation3 + $0x102] sm:$0xff]  ;;  %v14252_v57 = vld [vmem:[#allocation3 + $0xf2] sm:$0xff] }
 0x744   : > { %8366 = vst.msk [vmem:[#allocation5 + $0x100] sm:$0xff] %vm15418_vm14, %v14213_v12  ;;  %vm15421_vm10 = vmmov %vm15368_vm0  ;;  %v8398_v29 = vld [vmem:[#allocation5 + $0xd0] sm:$0xff]  ;;  %v14250_v35 = vld [vmem:[#allocation3 + $0x100] sm:$0xff] }
 0x745   : > { %7728 = vst.msk [vmem:[#allocation5 + $0x120] sm:$0xff] %vm15419_vm4, %v14215_v47  ;;  %vm15424_vm7 = vmmov %vm15368_vm0  ;;  %v14256_v58 = vld [vmem:[#allocation3 + $0xf0] sm:$0xff]  ;;  %v14268_v62 = vld [vmem:[#allocation3 + $0x101] sm:$0xff]  ;;  %8186 = vrot.lane.b32.xlu0 %v14116_v59, %s11084_s15 }
 0x746   : > { %8365 = vst.msk [vmem:[#allocation5 + $0xe8] sm:$0xff] %vm15421_vm10, %v14220_v27  ;;  %v14258_v16 = vld [vmem:[#allocation3 + $0xf1] sm:$0xff]  ;;  %vm15426_vm8 = vmmov %vm15368_vm0  ;;  %7772 = vrot.lane.b32.xlu1 %v14071_v9, %s11083_s27 }
 0x747   : > { %7727 = vst.msk [vmem:[#allocation5 + $0x108] sm:$0xff] %vm15368_vm0, %v14224_v28  ;;  %vm15427_vm9 = vmmov %vm15368_vm0  ;;  %v8155_v9 = vld [vmem:[#allocation3 + $0x90] sm:$0xff] }
 0x748   : > { %8046 = vst.msk [vmem:[#allocation5 + $0xf8] sm:$0xff] %vm15423_vm2, %v14235_v11  ;;  %10797 = vmatmul.mubr.msk.f32.gmra.mrb[70].mxu0 %vm15427_vm9, %v13895_v13  ;;  %vm15428_vm1 = vmmov %vm15368_vm0 }
 0x749   : > { %8047 = vst.msk [vmem:[#allocation5 + $0x110] sm:$0xff] %vm15424_vm7, %v14237_v37  ;;  %vm15429_vm15 = vmmov %vm15368_vm0  ;;  %8282 = vrot.lane.b32.xlu0 %v14118_v44, %s11085_s22 }
 0x74a   : > { %8368 = vst.msk [vmem:[#allocation5 + $0x130] sm:$0xff] %vm15425_vm13, %v14248_v2  ;;  %vm15430_vm14 = vmmov %vm15368_vm0  ;;  %v14279_v55 = vld [vmem:[#allocation3 + $0x122] sm:$0xff]  ;;  %v14281_v54 = vld [vmem:[#allocation3 + $0x112] sm:$0xff]  ;;  %7868 = vrot.lane.b32.xlu1 %v14067_v45, %s11084_s15 }
 0x74b   : > { %7730 = vst.msk [vmem:[#allocation5 + $0x150] sm:$0xff] %vm15426_vm8, %v14250_v35  ;;  %vm15431_vm4 = vmmov %vm15368_vm0  ;;  %v8404_v13 = vld [vmem:[#allocation5 + $0x100] sm:$0xff]  ;;  %v14285_v26 = vld [vmem:[#allocation3 + $0x110] sm:$0xff] }
 0x74c   : > { %8367 = vst.msk [vmem:[#allocation5 + $0x118] sm:$0xff] %vm15428_vm1, %v14252_v57  ;;  %10799 = vmatprep.mubr.msk.f32.mxu0 %vm15431_vm4, %v8398_v29  ;;  %vm15432_vm5 = vmmov %vm15368_vm0  ;;  %v14292_v49 = vld [vmem:[#allocation3 + $0x111] sm:$0xff]  ;;  %v14294_v56 = vld [vmem:[#allocation3 + $0x121] sm:$0xff] }
 0x74d   : > { %8048 = vst.msk [vmem:[#allocation5 + $0x128] sm:$0xff] %vm15429_vm15, %v14258_v16  ;;  %v8401_v20 = vld [vmem:[#allocation5 + $0xe8] sm:$0xff]  ;;  %vm15433_vm10 = vmmov %vm15368_vm0  ;;  %8092 = vrot.lane.b32.xlu0 %v14112_v50, %s11083_s27  ;;  %v8154_v45 = vld [vmem:[#allocation3 + $0x80] sm:$0xff] }
 0x74e   : > { %7729 = vst.msk [vmem:[#allocation5 + $0x138] sm:$0xff] %vm15430_vm14, %v14256_v58  ;;  %10800 = vmatmul.mubr.msk.f32.gmra.mrb[72].mxu0 %vm15368_vm0, %v8401_v20  ;;  %vm15434_vm6 = vmmov %vm15368_vm0  ;;  %7964 = vrot.lane.b32.xlu1 %v14116_v59, %s11085_s22  ;;  %v8163_v20 = vld [vmem:[#allocation3 + $0x130] sm:$0xff] }
 0x74f   : > { %8049 = vst.msk [vmem:[#allocation5 + $0x140] sm:$0xff] %vm15432_vm5, %v14268_v62  ;;  %vm15435_vm2 = vmmov %vm15368_vm0 }
 0x750   : > { %8370 = vst.msk [vmem:[#allocation5 + $0x160] sm:$0xff] %vm15433_vm10, %v14279_v55  ;;  %vm15436_vm7 = vmmov %vm15368_vm0 }
 0x751   : > { %8369 = vst.msk [vmem:[#allocation5 + $0x148] sm:$0xff] %vm15434_vm6, %v14281_v54  ;;  %10802 = vmatprep.mubr.msk.f32.mxu0 %vm15436_vm7, %v8404_v13  ;;  %vm15437_vm13 = vmmov %vm15368_vm0  ;;  %v8410_v4 = vld [vmem:[#allocation5 + $0x130] sm:$0xff]  ;;  %8188 = vrot.lane.b32.xlu0 %v14106_v0, %s11084_s15 }
 0x752   : > { %7731 = vst.msk [vmem:[#allocation5 + $0x168] sm:$0xff] %vm15435_vm2, %v14285_v26  ;;  %vm15438_vm8 = vmmov %vm15368_vm0  ;;  %7774 = vrot.lane.b32.xlu1 %v14118_v44, %s11083_s27 }
 0x753   : > { %8050 = vst.msk [vmem:[#allocation5 + $0x158] sm:$0xff] %vm15437_vm13, %v14292_v49  ;;  %v8407_v60 = vld [vmem:[#allocation5 + $0x118] sm:$0xff]  ;;  %vm15439_vm9 = vmmov %vm15368_vm0 }
 0x754   : > { %8051 = vst.msk [vmem:[#allocation5 + $0x170] sm:$0xff] %vm15438_vm8, %v14294_v56  ;;  %10803 = vmatmul.mubr.msk.f32.gmra.mrb[74].mxu0 %vm15439_vm9, %v8407_v60  ;;  %vm15440_vm1 = vmmov %vm15368_vm0 }
 0x755   : > { %10805 = vmatprep.mubr.msk.f32.mxu0 %vm15440_vm1, %v8410_v4  ;;  %vm15441_vm15 = vmmov %vm15368_vm0  ;;  %8284 = vrot.lane.b32.xlu0 %v14130_v53, %s11085_s22 }
 0x756   : > { %vm15442_vm14 = vmmov %vm15368_vm0  ;;  %7870 = vrot.lane.b32.xlu1 %v14112_v50, %s11084_s15  ;;  %v8060_v50 = vld [vmem:[#allocation3 + $0xb2] sm:$0xff] }
 0x757   : > { %v8416_v24 = vld [vmem:[#allocation5 + $0x160] sm:$0xff]  ;;  %vm15443_vm4 = vmmov %vm15368_vm0 }
 0x758   : > { %v8413_v61 = vld [vmem:[#allocation5 + $0x148] sm:$0xff]  ;;  %7724 = vst.msk [vmem:[#allocation5 + $0xc0] sm:$0xff] %vm15443_vm4, %v7708_v8  ;;  %vm15444_vm5 = vmmov %vm15368_vm0 }
 0x759   : > { %10806 = vmatmul.mubr.msk.f32.gmra.mrb[76].mxu0 %vm15441_vm15, %v8413_v61  ;;  %8094 = vrot.lane.b32.xlu0 %v14104_v25, %s11083_s27  ;;  %vm15445_vm10 = vmmov %vm15368_vm0 }
 0x75a   : > { %10808 = vmatprep.mubr.msk.f32.mxu0 %vm15442_vm14, %v8416_v24  ;;  %7966 = vrot.lane.b32.xlu1 %v14106_v0, %s11085_s22  ;;  %v7836_v0 = vld [vmem:[#allocation3 + $0xa2] sm:$0xff]  ;;  %vm15446_vm6 = vmmov %vm15368_vm0 }
 0x75b   : > { %vm15447_vm2 = vmmov %vm15368_vm0 }
 0x75c   : > { %vm15448_vm7 = vmmov %vm15368_vm0 }
 0x75d   : > { %8190 = vrot.lane.b32.xlu0 %v14152_v46, %s11084_s15  ;;  %vm15449_vm13 = vmmov %vm15368_vm0 }
 0x75e   : > { %7776 = vrot.lane.b32.xlu1 %v14130_v53, %s11083_s27  ;;  %vm15450_vm8 = vmmov %vm15368_vm0 }
 0x75f   : > { %vm15451_vm9 = vmmov %vm15368_vm0 }
 0x760   : > { %vm15452_vm1 = vmmov %vm15368_vm0 }
 0x761   : > { %8286 = vrot.lane.b32.xlu0 %v14161_v48, %s11085_s22  ;;  %vm15453_vm15 = vmmov %vm15368_vm0 }
 0x762   : > { %7872 = vrot.lane.b32.xlu1 %v14104_v25, %s11084_s15  ;;  %v8251_v25 = vld [vmem:[#allocation3 + $0x91] sm:$0xff]  ;;  %vm15454_vm14 = vmmov %vm15368_vm0 }
 0x763   : > { %vm15455_vm4 = vmmov %vm15368_vm0 }
 0x765   : > { %8096 = vrot.lane.b32.xlu0 %v14148_v36, %s11083_s27 }
 0x766   : > { %7968 = vrot.lane.b32.xlu1 %v14152_v46, %s11085_s22 }
 0x769   : > { %8192 = vrot.lane.b32.xlu0 %v8154_v45, %s11084_s15 }
 0x76a   : > { %7778 = vrot.lane.b32.xlu1 %v14161_v48, %s11083_s27 }
 0x76d   : > { %8288 = vrot.lane.b32.xlu0 %v14165_v34, %s11085_s22 }
 0x76e   : > { %7874 = vrot.lane.b32.xlu1 %v14148_v36, %s11084_s15 }
 0x771   : > { %8098 = vrot.lane.b32.xlu0 %v14143_v40, %s11083_s27 }
 0x772   : > { %7970 = vrot.lane.b32.xlu1 %v8154_v45, %s11085_s22 }
 0x775   : > { %8194 = vrot.lane.b32.xlu0 %v8155_v9, %s11084_s15 }
 0x776   : > { %7780 = vrot.lane.b32.xlu1 %v7740_v17, %s11083_s27 }
 0x779   : > { %8290 = vrot.lane.b32.xlu0 %v8251_v25, %s11085_s22 }
 0x77a   : > { %7876 = vrot.lane.b32.xlu1 %v7836_v0, %s11084_s15 }
 0x77d   : > { %8100 = vrot.lane.b32.xlu0 %v8060_v50, %s11083_s27 }
 0x77e   : > { %7972 = vrot.lane.b32.xlu1 %v14190_v38, %s11085_s22 }
 0x781   : > { %8196 = vrot.lane.b32.xlu0 %v14181_v42, %s11084_s15 }
 0x782   : > { %7782 = vrot.lane.b32.xlu1 %v14199_v22, %s11083_s27 }
 0x785   : > { %8292 = vrot.lane.b32.xlu0 %v14201_v51, %s11085_s22 }
 0x786   : > { %7878 = vrot.lane.b32.xlu1 %v8060_v50, %s11084_s15 }
 0x789   : > { %8102 = vrot.lane.b32.xlu0 %v14179_v1, %s11083_s27 }
 0x78a   : > { %7974 = vrot.lane.b32.xlu1 %v14181_v42, %s11085_s22 }
 0x78d   : > { %8198 = vrot.lane.b32.xlu0 %v14224_v28, %s11084_s15 }
 0x78e   : > { %7784 = vrot.lane.b32.xlu1 %v14201_v51, %s11083_s27 }
 0x78f   : > { %v8085_v59 = vpop.permute.xlu0 %8084 }
 0x790   : > { %v7957_v44 = vpop.permute.xlu1 %7956  ;;  %8132 = vst.msk [vmem:[#allocation5 + $0x8] sm:$0xff] %vm6658_vm11, %v8085_v59 }
 0x791   : > { %8004 = vst.msk [vmem:[#allocation5] sm:$0xff] %vm6852_vm12, %v7957_v44  ;;  %8294 = vrot.lane.b32.xlu0 %v14235_v11, %s11085_s22 }
 0x792   : > { %7880 = vrot.lane.b32.xlu1 %v14179_v1, %s11084_s15 }
 0x793   : > { %v8181_v15 = vpop.permute.xlu0 %8180 }
 0x794   : > { %v7767_v53 = vpop.permute.xlu1 %7766  ;;  %8228 = vst.msk [vmem:[#allocation5 + $0x8] sm:$0xff] %vm6755_vm3, %v8181_v15 }
 0x795   : > { %7813 = vst.msk [vmem:[#allocation5 + $0x18] sm:$0xff] %vm6658_vm11, %v7767_v53  ;;  %8104 = vrot.lane.b32.xlu0 %v14220_v27, %s11083_s27 }
 0x796   : > { %7976 = vrot.lane.b32.xlu1 %v14224_v28, %s11085_s22 }
 0x797   : > { %v8277_v32 = vpop.permute.xlu0 %8276 }
 0x798   : > { %v7863_v23 = vpop.permute.xlu1 %7862  ;;  %8324 = vst.msk [vmem:[#allocation5 + $0x8] sm:$0xff] %vm6852_vm12, %v8277_v32  ;;  %v8372_v46 = vld [vmem:[#allocation5] sm:$0xff] }
 0x799   : > { %7909 = vst.msk [vmem:[#allocation5 + $0x18] sm:$0xff] %vm6755_vm3, %v7863_v23  ;;  %8200 = vrot.lane.b32.xlu0 %v14215_v47, %s11084_s15 }
 0x79a   : > { %7786 = vrot.lane.b32.xlu1 %v14235_v11, %s11083_s27 }
 0x79b   : > { %v8087_v40 = vpop.permute.xlu0 %8086 }
 0x79c   : > { %8133 = vst.msk [vmem:[#allocation5 + $0x20] sm:$0xff] %vm6658_vm11, %v8087_v40  ;;  %v7959_v41 = vpop.permute.xlu1 %7958 }
 0x79d   : > { %8005 = vst.msk [vmem:[#allocation5 + $0x18] sm:$0xff] %vm6852_vm12, %v7959_v41  ;;  %8296 = vrot.lane.b32.xlu0 %v14237_v37, %s11085_s22 }
 0x79e   : > { %7882 = vrot.lane.b32.xlu1 %v14220_v27, %s11084_s15 }
 0x79f   : > { %v8183_v63 = vpop.permute.xlu0 %8182  ;;  %v8373_v6 = vld [vmem:[#allocation5 + $0x8] sm:$0xff] }
 0x7a0   : > { %8229 = vst.msk [vmem:[#allocation5 + $0x20] sm:$0xff] %vm6755_vm3, %v8183_v63  ;;  %v7769_v36 = vpop.permute.xlu1 %7768  ;;  %8572 = vmatprep.mubr.f32.mxu1 %v8373_v6 }
 0x7a1   : > { %7814 = vst.msk [vmem:[#allocation5 + $0x30] sm:$0xff] %vm6658_vm11, %v7769_v36  ;;  %8106 = vrot.lane.b32.xlu0 %v14213_v12, %s11083_s27  ;;  %8573 = vmatmul.mubr.f32.vlgmr.msra.gmra.mrb[48].mxu1 %v8372_v46 }
 0x7a2   : > { %7978 = vrot.lane.b32.xlu1 %v14215_v47, %s11085_s22 }
 0x7a3   : > { %v8279_v14 = vpop.permute.xlu0 %8278 }
 0x7a4   : > { %8325 = vst.msk [vmem:[#allocation5 + $0x20] sm:$0xff] %vm6852_vm12, %v8279_v14  ;;  %v7865_v31 = vpop.permute.xlu1 %7864  ;;  %v8375_v1 = vld [vmem:[#allocation5 + $0x18] sm:$0xff] }
 0x7a5   : > { %7910 = vst.msk [vmem:[#allocation5 + $0x30] sm:$0xff] %vm6755_vm3, %v7865_v31  ;;  %8202 = vrot.lane.b32.xlu0 %v14256_v58, %s11084_s15 }
 0x7a6   : > { %7788 = vrot.lane.b32.xlu1 %v14237_v37, %s11083_s27  ;;  %v8162_v37 = vld [vmem:[#allocation3 + $0x120] sm:$0xff] }
 0x7a7   : > { %v8089_v52 = vpop.permute.xlu0 %8088 }
 0x7a8   : > { %8134 = vst.msk [vmem:[#allocation5 + $0x38] sm:$0xff] %vm6658_vm11, %v8089_v52  ;;  %v7961_v48 = vpop.permute.xlu1 %7960 }
 0x7a9   : > { %8006 = vst.msk [vmem:[#allocation5 + $0x30] sm:$0xff] %vm6852_vm12, %v7961_v48  ;;  %8298 = vrot.lane.b32.xlu0 %v14258_v16, %s11085_s22  ;;  %v8862_v48 = vld [vmem:[#allocation3 + $0x1] sm:$0xff] }
 0x7aa   : > { %7884 = vrot.lane.b32.xlu1 %v14213_v12, %s11084_s15 }
 0x7ab   : > { %v8185_v34 = vpop.permute.xlu0 %8184  ;;  %v8376_v21 = vld [vmem:[#allocation5 + $0x20] sm:$0xff] }
 0x7ac   : > { %8230 = vst.msk [vmem:[#allocation5 + $0x38] sm:$0xff] %vm6755_vm3, %v8185_v34  ;;  %v7771_v33 = vpop.permute.xlu1 %7770  ;;  %8577 = vmatprep.mubr.f32.mxu1 %v8376_v21 }
 0x7ad   : > { %7815 = vst.msk [vmem:[#allocation5 + $0x48] sm:$0xff] %vm6658_vm11, %v7771_v33  ;;  %8108 = vrot.lane.b32.xlu0 %v14252_v57, %s11083_s27  ;;  %8578 = vmatmul.mubr.f32.gmra.mrb[50].mxu1 %v8375_v1 }
 0x7ae   : > { %7980 = vrot.lane.b32.xlu1 %v14256_v58, %s11085_s22 }
 0x7af   : > { %v8281_v42 = vpop.permute.xlu0 %8280 }
 0x7b0   : > { %8326 = vst.msk [vmem:[#allocation5 + $0x38] sm:$0xff] %vm6852_vm12, %v8281_v42  ;;  %v7867_v7 = vpop.permute.xlu1 %7866  ;;  %v8378_v3 = vld [vmem:[#allocation5 + $0x30] sm:$0xff] }
 0x7b1   : > { %7911 = vst.msk [vmem:[#allocation5 + $0x48] sm:$0xff] %vm6755_vm3, %v7867_v7  ;;  %8204 = vrot.lane.b32.xlu0 %v14250_v35, %s11084_s15 }
 0x7b2   : > { %7790 = vrot.lane.b32.xlu1 %v14258_v16, %s11083_s27 }
 0x7b3   : > { %v8091_v10 = vpop.permute.xlu0 %8090 }
 0x7b4   : > { %8135 = vst.msk [vmem:[#allocation5 + $0x50] sm:$0xff] %vm6658_vm11, %v8091_v10  ;;  %v7963_v43 = vpop.permute.xlu1 %7962 }
 0x7b5   : > { %8007 = vst.msk [vmem:[#allocation5 + $0x48] sm:$0xff] %vm6852_vm12, %v7963_v43  ;;  %8300 = vrot.lane.b32.xlu0 %v14268_v62, %s11085_s22 }
 0x7b6   : > { %7886 = vrot.lane.b32.xlu1 %v14252_v57, %s11084_s15  ;;  %v9485_v57 = vld [vmem:[#allocation3 + $0x132] sm:$0xff] }
 0x7b7   : > { %v8187_v38 = vpop.permute.xlu0 %8186  ;;  %v8379_v19 = vld [vmem:[#allocation5 + $0x38] sm:$0xff] }
 0x7b8   : > { %8231 = vst.msk [vmem:[#allocation5 + $0x50] sm:$0xff] %vm6755_vm3, %v8187_v38  ;;  %v7773_v5 = vpop.permute.xlu1 %7772  ;;  %8582 = vmatprep.mubr.f32.mxu1 %v8379_v19 }
 0x7b9   : > { %7816 = vst.msk [vmem:[#allocation5 + $0x60] sm:$0xff] %vm6658_vm11, %v7773_v5  ;;  %8110 = vrot.lane.b32.xlu0 %v14248_v2, %s11083_s27  ;;  %8583 = vmatmul.mubr.f32.gmra.mrb[52].mxu1 %v8378_v3 }
 0x7ba   : > { %7982 = vrot.lane.b32.xlu1 %v14250_v35, %s11085_s22  ;;  %v8419_v35 = vld [vmem:[#allocation5 + $0x178] sm:$0xff] }
 0x7bb   : > { %v8283_v22 = vpop.permute.xlu0 %8282  ;;  %10809 = vmatmul.mubr.msk.f32.gmra.mrb[78].mxu0 %vm15444_vm5, %v8419_v35  ;;  %9501 = vst.msk [vmem:[#allocation5 + $0x178] sm:$0xff] %vm15445_vm10, %v9485_v57  ;;  %vm15456_vm5 = vmmov %vm15368_vm0 }
 0x7bc   : > { %8327 = vst.msk [vmem:[#allocation5 + $0x50] sm:$0xff] %vm6852_vm12, %v8283_v22  ;;  %v7869_v51 = vpop.permute.xlu1 %7868  ;;  %v8381_v28 = vld [vmem:[#allocation5 + $0x48] sm:$0xff]  ;;  %vm15457_vm10 = vmmov %vm15368_vm0 }
 0x7bd   : > { %7912 = vst.msk [vmem:[#allocation5 + $0x60] sm:$0xff] %vm6755_vm3, %v7869_v51  ;;  %8206 = vrot.lane.b32.xlu0 %v14285_v26, %s11084_s15 }
 0x7be   : > { %7792 = vrot.lane.b32.xlu1 %v14268_v62, %s11083_s27 }
 0x7bf   : > { %v8093_v18 = vpop.permute.xlu0 %8092 }
 0x7c0   : > { %8136 = vst.msk [vmem:[#allocation5 + $0x68] sm:$0xff] %vm6658_vm11, %v8093_v18  ;;  %v7965_v12 = vpop.permute.xlu1 %7964  ;;  %v8958_v18 = vld [vmem:[#allocation3 + $0x2] sm:$0xff] }
 0x7c1   : > { %8008 = vst.msk [vmem:[#allocation5 + $0x60] sm:$0xff] %vm6852_vm12, %v7965_v12  ;;  %8302 = vrot.lane.b32.xlu0 %v14292_v49, %s11085_s22 }
 0x7c2   : > { %7888 = vrot.lane.b32.xlu1 %v14248_v2, %s11084_s15 }
 0x7c3   : > { %v8189_v47 = vpop.permute.xlu0 %8188  ;;  %v8382_v30 = vld [vmem:[#allocation5 + $0x50] sm:$0xff] }
 0x7c4   : > { %8232 = vst.msk [vmem:[#allocation5 + $0x68] sm:$0xff] %vm6755_vm3, %v8189_v47  ;;  %v7775_v27 = vpop.permute.xlu1 %7774  ;;  %8587 = vmatprep.mubr.f32.mxu1 %v8382_v30 }
 0x7c5   : > { %7817 = vst.msk [vmem:[#allocation5 + $0x78] sm:$0xff] %vm6658_vm11, %v7775_v27  ;;  %8112 = vrot.lane.b32.xlu0 %v14281_v54, %s11083_s27  ;;  %8588 = vmatmul.mubr.f32.gmra.mrb[54].mxu1 %v8381_v28 }
 0x7c6   : > { %7984 = vrot.lane.b32.xlu1 %v14285_v26, %s11085_s22 }
 0x7c7   : > { %v8285_v39 = vpop.permute.xlu0 %8284 }
 0x7c8   : > { %8328 = vst.msk [vmem:[#allocation5 + $0x68] sm:$0xff] %vm6852_vm12, %v8285_v39  ;;  %v7871_v11 = vpop.permute.xlu1 %7870  ;;  %v8384_v13 = vld [vmem:[#allocation5 + $0x60] sm:$0xff] }
 0x7c9   : > { %7913 = vst.msk [vmem:[#allocation5 + $0x78] sm:$0xff] %vm6755_vm3, %v7871_v11  ;;  %8208 = vrot.lane.b32.xlu0 %v8162_v37, %s11084_s15 }
 0x7ca   : > { %7794 = vrot.lane.b32.xlu1 %v14292_v49, %s11083_s27  ;;  %v8259_v49 = vld [vmem:[#allocation3 + $0x131] sm:$0xff] }
 0x7cb   : > { %v8095_v29 = vpop.permute.xlu0 %8094 }
 0x7cc   : > { %8137 = vst.msk [vmem:[#allocation5 + $0x80] sm:$0xff] %vm6658_vm11, %v8095_v29  ;;  %v7967_v2 = vpop.permute.xlu1 %7966 }
 0x7cd   : > { %8009 = vst.msk [vmem:[#allocation5 + $0x78] sm:$0xff] %vm6852_vm12, %v7967_v2  ;;  %8304 = vrot.lane.b32.xlu0 %v14294_v56, %s11085_s22 }
 0x7ce   : > { %7890 = vrot.lane.b32.xlu1 %v14281_v54, %s11084_s15 }
 0x7cf   : > { %v8191_v58 = vpop.permute.xlu0 %8190  ;;  %v8385_v16 = vld [vmem:[#allocation5 + $0x68] sm:$0xff] }
 0x7d0   : > { %8233 = vst.msk [vmem:[#allocation5 + $0x80] sm:$0xff] %vm6755_vm3, %v8191_v58  ;;  %v7777_v62 = vpop.permute.xlu1 %7776  ;;  %8592 = vmatprep.mubr.f32.mxu1 %v8385_v16 }
 0x7d1   : > { %7818 = vst.msk [vmem:[#allocation5 + $0x90] sm:$0xff] %vm6658_vm11, %v7777_v62  ;;  %8114 = vrot.lane.b32.xlu0 %v14279_v55, %s11083_s27  ;;  %8593 = vmatmul.mubr.f32.gmra.mrb[56].mxu1 %v8384_v13 }
 0x7d2   : > { %7986 = vrot.lane.b32.xlu1 %v8162_v37, %s11085_s22 }
 0x7d3   : > { %v8287_v26 = vpop.permute.xlu0 %8286 }
 0x7d4   : > { %8329 = vst.msk [vmem:[#allocation5 + $0x80] sm:$0xff] %vm6852_vm12, %v8287_v26  ;;  %v7873_v54 = vpop.permute.xlu1 %7872  ;;  %v8387_v61 = vld [vmem:[#allocation5 + $0x78] sm:$0xff] }
 0x7d5   : > { %7914 = vst.msk [vmem:[#allocation5 + $0x90] sm:$0xff] %vm6755_vm3, %v7873_v54  ;;  %8210 = vrot.lane.b32.xlu0 %v8163_v20, %s11084_s15 }
 0x7d6   : > { %8894 = vrot.lane.b32.xlu1 %v8862_v48, %s11083_s27 }
 0x7d7   : > { %v8097_v56 = vpop.permute.xlu0 %8096 }
 0x7d8   : > { %8138 = vst.msk [vmem:[#allocation5 + $0x98] sm:$0xff] %vm6658_vm11, %v8097_v56  ;;  %v7969_v4 = vpop.permute.xlu1 %7968 }
 0x7d9   : > { %8010 = vst.msk [vmem:[#allocation5 + $0x90] sm:$0xff] %vm6852_vm12, %v7969_v4  ;;  %8306 = vrot.lane.b32.xlu0 %v8259_v49, %s11085_s22 }
 0x7da   : > { %8990 = vrot.lane.b32.xlu1 %v8958_v18, %s11084_s15 }
 0x7db   : > { %v8193_v55 = vpop.permute.xlu0 %8192  ;;  %v8388_v60 = vld [vmem:[#allocation5 + $0x80] sm:$0xff] }
 0x7dc   : > { %8234 = vst.msk [vmem:[#allocation5 + $0x98] sm:$0xff] %vm6755_vm3, %v8193_v55  ;;  %v7779_v24 = vpop.permute.xlu1 %7778  ;;  %8597 = vmatprep.mubr.f32.mxu1 %v8388_v60  ;;  %v9582_v55 = vld [vmem:[%s15112_s5 + $0x100] sm:$0xff]  ;;  %v9583_v60 = vld [vmem:[%s15112_s5 + $0x108] sm:$0xff] }
 0x7dd   : > { %7819 = vst.msk [vmem:[#allocation5 + $0xa8] sm:$0xff] %vm6658_vm11, %v7779_v24  ;;  %8598 = vmatmul.mubr.f32.gmra.mrb[58].mxu1 %v8387_v61  ;;  %v9584_v24 = vld [vmem:[%s15112_s5 + $0x110] sm:$0xff] }
 0x7df   : > { %v8289_v45 = vpop.permute.xlu0 %8288 }
 0x7e0   : > { %8330 = vst.msk [vmem:[#allocation5 + $0x98] sm:$0xff] %vm6852_vm12, %v8289_v45  ;;  %v7875_v8 = vpop.permute.xlu1 %7874  ;;  %v8390_v59 = vld [vmem:[#allocation5 + $0x90] sm:$0xff] }
 0x7e1   : > { %7915 = vst.msk [vmem:[#allocation5 + $0xa8] sm:$0xff] %vm6755_vm3, %v7875_v8  ;;  %v10965_v8 = vpack.c.bf16 %v9583_v60, %v9582_v55  ;;  %v9569_v55 = vld [vmem:[%s15112_s5 + $0x98] sm:$0xff]  ;;  %v9552_v60 = vld [vmem:[%s15112_s5 + $0x10] sm:$0xff] }
 0x7e3   : > { %v8099_v9 = vpop.permute.xlu0 %8098  ;;  %10966 = vmatprep.subr.bf16.mxu1 %v10965_v8 }
 0x7e4   : > { %8139 = vst.msk [vmem:[#allocation5 + $0xb0] sm:$0xff] %vm6658_vm11, %v8099_v9  ;;  %v7971_v17 = vpop.permute.xlu1 %7970  ;;  %v9585_v9 = vld [vmem:[%s15112_s5 + $0x118] sm:$0xff]  ;;  %10968 = vmatpush3.bf16.msra.mxu1 %v10965_v8 }
 0x7e5   : > { %8011 = vst.msk [vmem:[#allocation5 + $0xa8] sm:$0xff] %vm6852_vm12, %v7971_v17 }
 0x7e7   : > { %v8195_v25 = vpop.permute.xlu0 %8194  ;;  %v8391_v0 = vld [vmem:[#allocation5 + $0x98] sm:$0xff] }
 0x7e8   : > { %8235 = vst.msk [vmem:[#allocation5 + $0xb0] sm:$0xff] %vm6755_vm3, %v8195_v25  ;;  %v7781_v50 = vpop.permute.xlu1 %7780  ;;  %8602 = vmatprep.mubr.f32.mxu1 %v8391_v0  ;;  %v10969_v0 = vpack.c.bf16 %v9585_v9, %v9584_v24  ;;  %v9553_v24 = vld [vmem:[%s15112_s5 + $0x18] sm:$0xff] }
 0x7e9   : > { %7820 = vst.msk [vmem:[#allocation5 + $0xc0] sm:$0xff] %vm6658_vm11, %v7781_v50  ;;  %8603 = vmatmul.mubr.f32.gmra.mrb[60].mxu1 %v8390_v59  ;;  %v10939_v8 = vpack.c.bf16 %v9553_v24, %v9552_v60 }
 0x7ea   : > { %10970 = vmatprep.subr.bf16.mxu1 %v10969_v0 }
 0x7eb   : > { %v8291_v44 = vpop.permute.xlu0 %8290  ;;  %10972 = vmatpush3.bf16.msra.mxu1 %v10969_v0  ;;  %v9571_v0 = vld [vmem:[%s15112_s5 + $0xa8] sm:$0xff] }
 0x7ec   : > { %8331 = vst.msk [vmem:[#allocation5 + $0xb0] sm:$0xff] %vm6852_vm12, %v8291_v44  ;;  %v7877_v15 = vpop.permute.xlu1 %7876  ;;  %v8393_v63 = vld [vmem:[#allocation5 + $0xa8] sm:$0xff] }
 0x7ed   : > { %7916 = vst.msk [vmem:[#allocation5 + $0xc0] sm:$0xff] %vm6755_vm3, %v7877_v15 }
 0x7ef   : > { %v8101_v53 = vpop.permute.xlu0 %8100 }
 0x7f0   : > { %8140 = vst.msk [vmem:[#allocation5 + $0xc8] sm:$0xff] %vm6658_vm11, %v8101_v53  ;;  %v7973_v32 = vpop.permute.xlu1 %7972 }
 0x7f1   : > { %8012 = vst.msk [vmem:[#allocation5 + $0xc0] sm:$0xff] %vm6852_vm12, %v7973_v32 }
 0x7f3   : > { %v8197_v23 = vpop.permute.xlu0 %8196  ;;  %v8394_v40 = vld [vmem:[#allocation5 + $0xb0] sm:$0xff] }
 0x7f4   : > { %8236 = vst.msk [vmem:[#allocation5 + $0xc8] sm:$0xff] %vm6755_vm3, %v8197_v23  ;;  %v7783_v41 = vpop.permute.xlu1 %7782  ;;  %8607 = vmatprep.mubr.f32.mxu1 %v8394_v40 }
 0x7f5   : > { %7821 = vst.msk [vmem:[#allocation5 + $0xd8] sm:$0xff] %vm6658_vm11, %v7783_v41  ;;  %8608 = vmatmul.mubr.f32.gmra.mrb[62].mxu1 %v8393_v63 }
 0x7f7   : > { %v8293_v6 = vpop.permute.xlu0 %8292 }
 0x7f8   : > { %8332 = vst.msk [vmem:[#allocation5 + $0xc8] sm:$0xff] %vm6852_vm12, %v8293_v6  ;;  %v7879_v36 = vpop.permute.xlu1 %7878  ;;  %v8396_v42 = vld [vmem:[#allocation5 + $0xc0] sm:$0xff] }
 0x7f9   : > { %7917 = vst.msk [vmem:[#allocation5 + $0xd8] sm:$0xff] %vm6755_vm3, %v7879_v36 }
 0x7fb   : > { %v8103_v46 = vpop.permute.xlu0 %8102 }
 0x7fc   : > { %8141 = vst.msk [vmem:[#allocation5 + $0xe0] sm:$0xff] %vm6658_vm11, %v8103_v46  ;;  %v7975_v14 = vpop.permute.xlu1 %7974 }
 0x7fd   : > { %8013 = vst.msk [vmem:[#allocation5 + $0xd8] sm:$0xff] %vm6852_vm12, %v7975_v14 }
 0x7ff   : > { %v8199_v34 = vpop.permute.xlu0 %8198  ;;  %v8397_v21 = vld [vmem:[#allocation5 + $0xc8] sm:$0xff] }
 0x800   : > { %8237 = vst.msk [vmem:[#allocation5 + $0xe0] sm:$0xff] %vm6755_vm3, %v8199_v34  ;;  %v7785_v33 = vpop.permute.xlu1 %7784  ;;  %8612 = vmatprep.mubr.f32.mxu1 %v8397_v21 }
 0x801   : > { %7822 = vst.msk [vmem:[#allocation5 + $0xf0] sm:$0xff] %vm6658_vm11, %v7785_v33  ;;  %8613 = vmatmul.mubr.f32.gmra.mrb[64].mxu1 %v8396_v42 }
 0x803   : > { %v8295_v10 = vpop.permute.xlu0 %8294 }
 0x804   : > { %v14511_v31 = vpop.f32.mrb[64].mxu0  ;;  %8333 = vst.msk [vmem:[#allocation5 + $0xe0] sm:$0xff] %vm6852_vm12, %v8295_v10  ;;  %v7881_v43 = vpop.permute.xlu1 %7880  ;;  %v8399_v27 = vld [vmem:[#allocation5 + $0xd8] sm:$0xff] }
 0x805   : > { %v14514_v52 = vpop.f32.mrb[65].mxu0  ;;  %7918 = vst.msk [vmem:[#allocation5 + $0xf0] sm:$0xff] %vm6755_vm3, %v7881_v43 }
 0x807   : > { %v8105_v5 = vpop.permute.xlu0 %8104 }
 0x808   : > { %8142 = vst.msk [vmem:[#allocation5 + $0xf8] sm:$0xff] %vm6658_vm11, %v8105_v5  ;;  %v7977_v3 = vpop.permute.xlu1 %7976 }
 0x809   : > { %8014 = vst.msk [vmem:[#allocation5 + $0xf0] sm:$0xff] %vm6852_vm12, %v7977_v3 }
 0x80b   : > { %v14518_v1 = vpop.f32.mrb[66].mxu0  ;;  %v8201_v12 = vpop.permute.xlu0 %8200  ;;  %v8400_v47 = vld [vmem:[#allocation5 + $0xe0] sm:$0xff] }
 0x80c   : > { %v14521_v7 = vpop.f32.mrb[67].mxu0  ;;  %8238 = vst.msk [vmem:[#allocation5 + $0xf8] sm:$0xff] %vm6755_vm3, %v8201_v12  ;;  %v7787_v30 = vpop.permute.xlu1 %7786  ;;  %8617 = vmatprep.mubr.f32.mxu1 %v8400_v47 }
 0x80d   : > { %7823 = vst.msk [vmem:[#allocation5 + $0x108] sm:$0xff] %vm6658_vm11, %v7787_v30  ;;  %8618 = vmatmul.mubr.f32.gmra.mrb[66].mxu1 %v8399_v27  ;;  %v14595_v27 = vld [vmem:[%s15113_s6 + $0x2] ss:$0 sm:$0xff] }
 0x80f   : > { %v8297_v11 = vpop.permute.xlu0 %8296 }
 0x810   : > { %8334 = vst.msk [vmem:[#allocation5 + $0xf8] sm:$0xff] %vm6852_vm12, %v8297_v11  ;;  %v7883_v37 = vpop.permute.xlu1 %7882  ;;  %v8402_v26 = vld [vmem:[#allocation5 + $0xf0] sm:$0xff] }
 0x811   : > { %7919 = vst.msk [vmem:[#allocation5 + $0x108] sm:$0xff] %vm6755_vm3, %v7883_v37 }
 0x812   : > { %v14524_v38 = vpop.f32.mrb[68].mxu0 }
 0x813   : > { %v14527_v19 = vpop.f32.mrb[69].mxu0  ;;  %v8107_v35 = vpop.permute.xlu0 %8106 }
 0x814   : > { %8143 = vst.msk [vmem:[#allocation5 + $0x110] sm:$0xff] %vm6658_vm11, %v8107_v35  ;;  %v7979_v57 = vpop.permute.xlu1 %7978  ;;  %v8830_v35 = vld [vmem:[#allocation3] sm:$0xff] }
 0x815   : > { %8015 = vst.msk [vmem:[#allocation5 + $0x108] sm:$0xff] %vm6852_vm12, %v7979_v57 }
 0x816   : > { %8846 = vst.msk [vmem:[#allocation5] sm:$0xff] %vm15368_vm0, %v8830_v35 }
 0x817   : > { %v8203_v62 = vpop.permute.xlu0 %8202  ;;  %v8403_v13 = vld [vmem:[#allocation5 + $0xf8] sm:$0xff] }
 0x818   : > { %8239 = vst.msk [vmem:[#allocation5 + $0x110] sm:$0xff] %vm6755_vm3, %v8203_v62  ;;  %v7789_v20 = vpop.permute.xlu1 %7788  ;;  %8622 = vmatprep.mubr.f32.mxu1 %v8403_v13  ;;  %v9566_v62 = vld [vmem:[%s15112_s5 + $0x80] sm:$0xff]  ;;  %v9567_v13 = vld [vmem:[%s15112_s5 + $0x88] sm:$0xff] }
 0x819   : > { %7824 = vst.msk [vmem:[#allocation5 + $0x120] sm:$0xff] %vm6658_vm11, %v7789_v20  ;;  %8623 = vmatmul.mubr.f32.gmra.mrb[68].mxu1 %v8402_v26  ;;  %v10933_v20 = vpack.c.bf16 %v9567_v13, %v9566_v62  ;;  %v9550_v26 = vld [vmem:[%s15112_s5] sm:$0xff] }
 0x81a   : > { %v9578_v13 = vld [vmem:[%s15112_s5 + $0xe0] sm:$0xff] }
 0x81b   : > { %v14530_v22 = vpop.f32.mrb[70].mxu0  ;;  %v8299_v54 = vpop.permute.xlu0 %8298  ;;  %10934 = vmatprep.subr.bf16.mxu0 %v10933_v20  ;;  %v9579_v20 = vld [vmem:[%s15112_s5 + $0xe8] sm:$0xff] }
 0x81c   : > { %v14533_v51 = vpop.f32.mrb[71].mxu0  ;;  %8335 = vst.msk [vmem:[#allocation5 + $0x110] sm:$0xff] %vm6852_vm12, %v8299_v54  ;;  %v7885_v49 = vpop.permute.xlu1 %7884  ;;  %v8405_v25 = vld [vmem:[#allocation5 + $0x108] sm:$0xff] }
 0x81d   : > { %7920 = vst.msk [vmem:[#allocation5 + $0x120] sm:$0xff] %vm6755_vm3, %v7885_v49  ;;  %v9551_v54 = vld [vmem:[%s15112_s5 + $0x8] sm:$0xff]  ;;  %v9568_v49 = vld [vmem:[%s15112_s5 + $0x90] sm:$0xff] }
 0x81f   : > { %v8109_v56 = vpop.permute.xlu0 %8108 }
 0x820   : > { %8144 = vst.msk [vmem:[#allocation5 + $0x128] sm:$0xff] %vm6658_vm11, %v8109_v56  ;;  %v7981_v4 = vpop.permute.xlu1 %7980 }
 0x821   : > { %v14537_v28 = vpop.f32.mrb[72].mxu0  ;;  %8016 = vst.msk [vmem:[#allocation5 + $0x120] sm:$0xff] %vm6852_vm12, %v7981_v4  ;;  %v10935_v4 = vpack.c.bf16 %v9551_v54, %v9550_v26  ;;  %v9562_v26 = vld [vmem:[%s15112_s5 + $0x60] sm:$0xff]  ;;  %v10957_v54 = vpack.c.bf16 %v9579_v20, %v9578_v13 }
 0x822   : > { %v14540_v39 = vpop.f32.mrb[73].mxu0 }
 0x823   : > { %v8205_v61 = vpop.permute.xlu0 %8204  ;;  %v8406_v45 = vld [vmem:[#allocation5 + $0x110] sm:$0xff]  ;;  %10936 = vmatpush3.bf16.msra.mxu0 %v10935_v4  ;;  %v9581_v4 = vld [vmem:[%s15112_s5 + $0xf8] sm:$0xff] }
 0x824   : > { %8240 = vst.msk [vmem:[#allocation5 + $0x128] sm:$0xff] %vm6755_vm3, %v8205_v61  ;;  %v7791_v17 = vpop.permute.xlu1 %7790  ;;  %8627 = vmatprep.mubr.f32.mxu1 %v8406_v45  ;;  %v10937_v61 = vpack.c.bf16 %v9569_v55, %v9568_v49  ;;  %v9563_v49 = vld [vmem:[%s15112_s5 + $0x68] sm:$0xff] }
 0x825   : > { %7825 = vst.msk [vmem:[#allocation5 + $0x138] sm:$0xff] %vm6658_vm11, %v7791_v17  ;;  %8628 = vmatmul.mubr.f32.gmra.mrb[70].mxu1 %v8405_v25  ;;  %v9570_v25 = vld [vmem:[%s15112_s5 + $0xa0] sm:$0xff]  ;;  %v10959_v60 = vpack.c.bf16 %v9563_v49, %v9562_v26 }
 0x826   : > { %10938 = vmatprep.subr.bf16.mxu0 %v10937_v61  ;;  %v9564_v61 = vld [vmem:[%s15112_s5 + $0x70] sm:$0xff] }
 0x827   : > { %v14543_v29 = vpop.f32.mrb[74].mxu0  ;;  %v8301_v50 = vpop.permute.xlu0 %8300  ;;  %10940 = vmatpush3.bf16.msra.mxu0 %v10939_v8 }
 0x828   : > { %v14546_v2 = vpop.f32.mrb[75].mxu0  ;;  %8336 = vst.msk [vmem:[#allocation5 + $0x128] sm:$0xff] %vm6852_vm12, %v8301_v50  ;;  %v7887_v59 = vpop.permute.xlu1 %7886  ;;  %v8408_v40 = vld [vmem:[#allocation5 + $0x120] sm:$0xff] }
 0x829   : > { %7921 = vst.msk [vmem:[#allocation5 + $0x138] sm:$0xff] %vm6755_vm3, %v7887_v59  ;;  %v9554_v59 = vld [vmem:[%s15112_s5 + $0x20] sm:$0xff] }
 0x82b   : > { %v8111_v44 = vpop.permute.xlu0 %8110 }
 0x82c   : > { %v14549_v58 = vpop.f32.mrb[76].mxu0  ;;  %8145 = vst.msk [vmem:[#allocation5 + $0x140] sm:$0xff] %vm6658_vm11, %v8111_v44  ;;  %v7983_v15 = vpop.permute.xlu1 %7982  ;;  %v9555_v44 = vld [vmem:[%s15112_s5 + $0x28] sm:$0xff] }
 0x82d   : > { %v14552_v16 = vpop.f32.mrb[77].mxu0  ;;  %8017 = vst.msk [vmem:[#allocation5 + $0x138] sm:$0xff] %vm6852_vm12, %v7983_v15 }
 0x82f   : > { %v8207_v53 = vpop.permute.xlu0 %8206  ;;  %v8409_v32 = vld [vmem:[#allocation5 + $0x128] sm:$0xff] }
 0x830   : > { %8241 = vst.msk [vmem:[#allocation5 + $0x140] sm:$0xff] %vm6755_vm3, %v8207_v53  ;;  %v7793_v23 = vpop.permute.xlu1 %7792  ;;  %8632 = vmatprep.mubr.f32.mxu1 %v8409_v32  ;;  %v10943_v53 = vpack.c.bf16 %v9555_v44, %v9554_v59 }
 0x831   : > { %7826 = vst.msk [vmem:[#allocation5 + $0x150] sm:$0xff] %vm6658_vm11, %v7793_v23  ;;  %8633 = vmatmul.mubr.f32.gmra.mrb[72].mxu1 %v8408_v40  ;;  %v9572_v23 = vld [vmem:[%s15112_s5 + $0xb0] sm:$0xff]  ;;  %v9573_v40 = vld [vmem:[%s15112_s5 + $0xb8] sm:$0xff] }
 0x833   : > { %v8303_v41 = vpop.permute.xlu0 %8302 }
 0x834   : > { %8337 = vst.msk [vmem:[#allocation5 + $0x140] sm:$0xff] %vm6852_vm12, %v8303_v41  ;;  %v7889_v63 = vpop.permute.xlu1 %7888  ;;  %v8411_v34 = vld [vmem:[#allocation5 + $0x138] sm:$0xff]  ;;  %v9556_v41 = vld [vmem:[%s15112_s5 + $0x30] sm:$0xff] }
 0x835   : > { %7922 = vst.msk [vmem:[#allocation5 + $0x150] sm:$0xff] %vm6755_vm3, %v7889_v63  ;;  %v10945_v63 = vpack.c.bf16 %v9573_v40, %v9572_v23 }
 0x837   : > { %v8113_v6 = vpop.permute.xlu0 %8112 }
 0x838   : > { %8146 = vst.msk [vmem:[#allocation5 + $0x158] sm:$0xff] %vm6658_vm11, %v8113_v6  ;;  %v7985_v36 = vpop.permute.xlu1 %7984  ;;  %v9557_v6 = vld [vmem:[%s15112_s5 + $0x38] sm:$0xff] }
 0x839   : > { %8018 = vst.msk [vmem:[#allocation5 + $0x150] sm:$0xff] %vm6852_vm12, %v7985_v36  ;;  %v9574_v36 = vld [vmem:[%s15112_s5 + $0xc0] sm:$0xff] }
 0x83b   : > { %v8209_v46 = vpop.permute.xlu0 %8208  ;;  %v8412_v14 = vld [vmem:[#allocation5 + $0x140] sm:$0xff] }
 0x83c   : > { %8242 = vst.msk [vmem:[#allocation5 + $0x158] sm:$0xff] %vm6755_vm3, %v8209_v46  ;;  %v7795_v48 = vpop.permute.xlu1 %7794  ;;  %8637 = vmatprep.mubr.f32.mxu1 %v8412_v14  ;;  %v9575_v46 = vld [vmem:[%s15112_s5 + $0xc8] sm:$0xff] }
 0x83d   : > { %7827 = vst.msk [vmem:[#allocation5 + $0x168] sm:$0xff] %vm6658_vm11, %v7795_v48  ;;  %8638 = vmatmul.mubr.f32.gmra.mrb[74].mxu1 %v8411_v34  ;;  %v10947_v48 = vpack.c.bf16 %v9557_v6, %v9556_v41  ;;  %v10949_v34 = vpack.c.bf16 %v9575_v46, %v9574_v36 }
 0x83f   : > { %v8305_v21 = vpop.permute.xlu0 %8304 }
 0x840   : > { %8338 = vst.msk [vmem:[#allocation5 + $0x158] sm:$0xff] %vm6852_vm12, %v8305_v21  ;;  %v7891_v33 = vpop.permute.xlu1 %7890  ;;  %v8414_v3 = vld [vmem:[#allocation5 + $0x150] sm:$0xff]  ;;  %v9558_v21 = vld [vmem:[%s15112_s5 + $0x40] sm:$0xff] }
 0x841   : > { %7923 = vst.msk [vmem:[#allocation5 + $0x168] sm:$0xff] %vm6755_vm3, %v7891_v33  ;;  %v9559_v33 = vld [vmem:[%s15112_s5 + $0x48] sm:$0xff] }
 0x843   : > { %v8115_v42 = vpop.permute.xlu0 %8114 }
 0x844   : > { %8147 = vst.msk [vmem:[#allocation5 + $0x170] sm:$0xff] %vm6658_vm11, %v8115_v42  ;;  %v7987_v10 = vpop.permute.xlu1 %7986 }
 0x845   : > { %8019 = vst.msk [vmem:[#allocation5 + $0x168] sm:$0xff] %vm6852_vm12, %v7987_v10 }
 0x847   : > { %v8211_v43 = vpop.permute.xlu0 %8210  ;;  %v8415_v5 = vld [vmem:[#allocation5 + $0x158] sm:$0xff] }
 0x848   : > { %8243 = vst.msk [vmem:[#allocation5 + $0x170] sm:$0xff] %vm6755_vm3, %v8211_v43  ;;  %8642 = vmatprep.mubr.f32.mxu1 %v8415_v5  ;;  %v8895_v57 = vpop.permute.xlu1 %8894 }
 0x849   : > { %8643 = vmatmul.mubr.f32.gmra.mrb[76].mxu1 %v8414_v3  ;;  %8942 = vst.msk [vmem:[#allocation5] sm:$0xff] %vm6658_vm11, %v8895_v57  ;;  %v10951_v3 = vpack.c.bf16 %v9559_v33, %v9558_v21 }
 0x84b   : > { %v8307_v18 = vpop.permute.xlu0 %8306 }
 0x84c   : > { %8339 = vst.msk [vmem:[#allocation5 + $0x170] sm:$0xff] %vm6852_vm12, %v8307_v18  ;;  %v8417_v47 = vld [vmem:[#allocation5 + $0x168] sm:$0xff]  ;;  %v8991_v17 = vpop.permute.xlu1 %8990 }
 0x84d   : > { %9038 = vst.msk [vmem:[#allocation5] sm:$0xff] %vm6755_vm3, %v8991_v17 }
 0x853   : > { %v8418_v12 = vld [vmem:[#allocation5 + $0x170] sm:$0xff] }
 0x854   : > { %8647 = vmatprep.mubr.f32.mxu1 %v8418_v12  ;;  %v9577_v12 = vld [vmem:[%s15112_s5 + $0xd8] sm:$0xff] }
 0x855   : > { %8648 = vmatmul.mubr.f32.gmra.mrb[78].mxu1 %v8417_v47 }
 0x874   : > { %v10475_v30 = vpop.f32.mrb[48].mxu1 }
 0x875   : > { %v10476_v11 = vpop.f32.mrb[49].mxu1 }
 0x876   : > { %v10477_v37 = vadd.f32 %v10476_v11, %v10475_v30  ;;  %v9560_v11 = vld [vmem:[%s15112_s5 + $0x50] sm:$0xff] }
 0x878   : > { %v8575_v56 = vadd.f32 %v10477_v37, %v14595_v27  ;;  %v9561_v37 = vld [vmem:[%s15112_s5 + $0x58] sm:$0xff] }
 0x879   : > { %v10955_v57 = vpack.c.bf16 %v9561_v37, %v9560_v11 }
 0x87a   : > { %v8720_v45 = vadd.f32 %v14514_v52, %v8575_v56  ;;  %v10941_v52 = vpack.c.bf16 %v9571_v0, %v9570_v25  ;;  %v9580_v56 = vld [vmem:[%s15112_s5 + $0xf0] sm:$0xff] }
 0x87b   : > { %v10961_v24 = vpack.c.bf16 %v9581_v4, %v9580_v56 }
 0x87c   : > { %v8798_v9 = vmax.f32 %v8720_v45, 0.0  ;;  %10942 = vmatprep.subr.bf16.mxu0 %v10941_v52  ;;  %v9565_v45 = vld [vmem:[%s15112_s5 + $0x78] sm:$0xff] }
 0x87d   : > { %10944 = vmatpush3.bf16.msra.mxu0 %v10943_v53  ;;  %v10963_v0 = vpack.c.bf16 %v9565_v45, %v9564_v61 }
 0x87e   : > { %8814 = vst.msk [vmem:[#allocation3 + $0x11] sm:$0xff] %vm15446_vm6, %v8798_v9  ;;  %10946 = vmatprep.subr.bf16.mxu0 %v10945_v63  ;;  %vm15458_vm6 = vmmov %vm15368_vm0 }
 0x880   : > { %v10478_v50 = vpop.f32.mrb[50].mxu1 }
 0x881   : > { %v10479_v15 = vpop.f32.mrb[51].mxu1  ;;  %10948 = vmatpush3.bf16.msra.mxu0 %v10947_v48 }
 0x882   : > { %v10480_v32 = vadd.f32 %v10479_v15, %v10478_v50  ;;  %10950 = vmatprep.subr.bf16.mxu0 %v10949_v34 }
 0x884   : > { %v8580_v14 = vadd.f32 %v10480_v32, %v14595_v27 }
 0x885   : > { %v9182_v42 = vld [vmem:[#allocation3 + $0x12] sm:$0xff]  ;;  %10952 = vmatpush3.bf16.msra.mxu0 %v10951_v3 }
 0x886   : > { %v9054_v10 = vld [vmem:[#allocation3 + $0x10] sm:$0xff]  ;;  %v8725_v5 = vadd.f32 %v14511_v31, %v8580_v14  ;;  %9214 = vrot.lane.b32.xlu0 %v9182_v42, %s11083_s27 }
 0x887   : > { %v8863_v43 = vld [vmem:[#allocation3 + $0x11] sm:$0xff]  ;;  %9086 = vrot.lane.b32.xlu1 %v9054_v10, %s11085_s22  ;;  %8847 = vst.msk [vmem:[#allocation5 + $0x18] sm:$0xff] %vm15448_vm7, %v9054_v10  ;;  %vm15460_vm7 = vmmov %vm15368_vm0 }
 0x888   : > { %9166 = vst.msk [vmem:[#allocation5 + $0x8] sm:$0xff] %vm15447_vm2, %v8863_v43  ;;  %v8799_v18 = vmax.f32 %v8725_v5, 0.0  ;;  %v9576_v31 = vld [vmem:[%s15112_s5 + $0xd0] sm:$0xff]  ;;  %vm15459_vm2 = vmmov %vm15368_vm0 }
 0x889   : > { %v10953_v30 = vpack.c.bf16 %v9577_v12, %v9576_v31 }
 0x88a   : > { %8815 = vst.msk [vmem:[#allocation3 + $0x21] sm:$0xff] %vm15449_vm13, %v8799_v18  ;;  %vm15461_vm13 = vmmov %vm15368_vm0 }
 0x88b   : > { %8896 = vrot.lane.b32.xlu1 %v8863_v43, %s11083_s27  ;;  %10954 = vmatprep.subr.bf16.mxu0 %v10953_v30 }
 0x88c   : > { %v10481_v47 = vpop.f32.mrb[52].mxu1  ;;  %10956 = vmatpush3.bf16.msra.mxu0 %v10955_v57 }
 0x88d   : > { %v10482_v35 = vpop.f32.mrb[53].mxu1  ;;  %10958 = vmatprep.subr.bf16.mxu0 %v10957_v54 }
 0x88e   : > { %v10483_v62 = vadd.f32 %v10482_v35, %v10481_v47  ;;  %v14728_v63 = vpop.f32.mrb[78].mxu0 }
 0x88f   : > { %8992 = vrot.lane.b32.xlu1 %v9182_v42, %s11084_s15  ;;  %v14730_v6 = vpop.f32.mrb[79].mxu0 }
 0x890   : > { %v8585_v55 = vadd.f32 %v10483_v62, %v14595_v27  ;;  %10960 = vmatpush3.bf16.msra.mxu0 %v10959_v60 }
 0x891   : > { %v9278_v8 = vld [vmem:[#allocation3 + $0x20] sm:$0xff]  ;;  %10962 = vmatprep.subr.bf16.mxu0 %v10961_v24 }
 0x892   : > { %v9374_v9 = vld [vmem:[#allocation3 + $0x21] sm:$0xff]  ;;  %v8730_v25 = vadd.f32 %v14521_v7, %v8585_v55  ;;  %9310 = vrot.lane.b32.xlu0 %v9278_v8, %s11084_s15  ;;  %8848 = vst.msk [vmem:[#allocation5 + $0x30] sm:$0xff] %vm15451_vm9, %v9278_v8  ;;  %vm15463_vm9 = vmmov %vm15368_vm0 }
 0x893   : > { %v9183_v17 = vld [vmem:[#allocation3 + $0x22] sm:$0xff]  ;;  %9088 = vrot.lane.b32.xlu1 %v9278_v8, %s11085_s22  ;;  %9167 = vst.msk [vmem:[#allocation5 + $0x20] sm:$0xff] %vm15452_vm1, %v9374_v9  ;;  %vm15464_vm1 = vmmov %vm15368_vm0 }
 0x894   : > { %9486 = vst.msk [vmem:[#allocation5 + $0x10] sm:$0xff] %vm15450_vm8, %v9183_v17  ;;  %v8800_v50 = vmax.f32 %v8730_v25, 0.0  ;;  %10964 = vmatpush3.bf16.msra.mxu0 %v10963_v0  ;;  %vm15462_vm8 = vmmov %vm15368_vm0 }
 0x896   : > { %8816 = vst.msk [vmem:[#allocation3 + $0x31] sm:$0xff] %vm15453_vm15, %v8800_v50  ;;  %9406 = vrot.lane.b32.xlu0 %v9374_v9, %s11085_s22  ;;  %vm15465_vm15 = vmmov %vm15368_vm0 }
 0x897   : > { %8898 = vrot.lane.b32.xlu1 %v9374_v9, %s11083_s27 }
 0x898   : > { %v10484_v7 = vpop.f32.mrb[54].mxu1 }
 0x899   : > { %v10485_v52 = vpop.f32.mrb[55].mxu1 }
 0x89a   : > { %v10486_v44 = vadd.f32 %v10485_v52, %v10484_v7  ;;  %9216 = vrot.lane.b32.xlu0 %v9183_v17, %s11083_s27 }
 0x89b   : > { %v9504_v59 = vld [vmem:[#allocation5 + $0x10] sm:$0xff]  ;;  %8994 = vrot.lane.b32.xlu1 %v9183_v17, %s11084_s15  ;;  %v8838_v17 = vld [vmem:[#allocation3 + $0xa0] sm:$0xff] }
 0x89c   : > { %10819 = vmatprep.mubr.msk.f32.mxu1 %vm15454_vm14, %v9504_v59  ;;  %v8590_v15 = vadd.f32 %v10486_v44, %v14595_v27  ;;  %vm15466_vm14 = vmmov %vm15368_vm0 }
 0x89d   : > { %v9279_v53 = vld [vmem:[#allocation3 + $0x30] sm:$0xff] }
 0x89e   : > { %v9375_v32 = vld [vmem:[#allocation3 + $0x31] sm:$0xff]  ;;  %v8735_v40 = vadd.f32 %v14518_v1, %v8590_v15  ;;  %9312 = vrot.lane.b32.xlu0 %v9279_v53, %s11084_s15  ;;  %8849 = vst.msk [vmem:[#allocation5 + $0x48] sm:$0xff] %vm15456_vm5, %v9279_v53  ;;  %vm15468_vm5 = vmmov %vm15368_vm0 }
 0x89f   : > { %v9184_v23 = vld [vmem:[#allocation3 + $0x32] sm:$0xff]  ;;  %9090 = vrot.lane.b32.xlu1 %v9279_v53, %s11085_s22  ;;  %9168 = vst.msk [vmem:[#allocation5 + $0x38] sm:$0xff] %vm15457_vm10, %v9375_v32  ;;  %vm15469_vm10 = vmmov %vm15368_vm0  ;;  %v8870_v53 = vld [vmem:[#allocation3 + $0xa1] sm:$0xff] }
 0x8a0   : > { %9487 = vst.msk [vmem:[#allocation5 + $0x28] sm:$0xff] %vm15455_vm4, %v9184_v23  ;;  %v8801_v41 = vmax.f32 %v8735_v40, 0.0  ;;  %vm15467_vm4 = vmmov %vm15368_vm0 }
 0x8a2   : > { %8817 = vst.msk [vmem:[#allocation3 + $0x41] sm:$0xff] %vm15368_vm0, %v8801_v41  ;;  %9408 = vrot.lane.b32.xlu0 %v9375_v32, %s11085_s22 }
 0x8a3   : > { %8900 = vrot.lane.b32.xlu1 %v9375_v32, %s11083_s27 }
 0x8a4   : > { %v10487_v1 = vpop.f32.mrb[56].mxu1 }
 0x8a5   : > { %v10488_v36 = vpop.f32.mrb[57].mxu1 }
 0x8a6   : > { %v10489_v14 = vadd.f32 %v10488_v36, %v10487_v1  ;;  %9218 = vrot.lane.b32.xlu0 %v9184_v23, %s11083_s27  ;;  %v9525_v1 = vld [vmem:[#allocation5 + $0xb8] sm:$0xff] }
 0x8a7   : > { %v9507_v46 = vld [vmem:[#allocation5 + $0x28] sm:$0xff]  ;;  %8996 = vrot.lane.b32.xlu1 %v9184_v23, %s11084_s15 }
 0x8a8   : > { %10820 = vmatmul.mubr.msk.f32.vlgmr.msra.gmra.mrb[80].mxu1 %vm15458_vm6, %v9507_v46  ;;  %v8595_v48 = vadd.f32 %v10489_v14, %v14595_v27  ;;  %vm15470_vm6 = vmmov %vm15368_vm0  ;;  %v8966_v23 = vld [vmem:[#allocation3 + $0xa2] sm:$0xff]  ;;  %v9285_v46 = vld [vmem:[#allocation3 + $0x90] sm:$0xff] }
 0x8a9   : > { %v9280_v34 = vld [vmem:[#allocation3 + $0x40] sm:$0xff] }
 0x8aa   : > { %v9376_v21 = vld [vmem:[#allocation3 + $0x41] sm:$0xff]  ;;  %v8740_v42 = vadd.f32 %v14527_v19, %v8595_v48  ;;  %9314 = vrot.lane.b32.xlu0 %v9280_v34, %s11084_s15  ;;  %8850 = vst.msk [vmem:[#allocation5 + $0x60] sm:$0xff] %vm15460_vm7, %v9280_v34  ;;  %vm15472_vm7 = vmmov %vm15368_vm0 }
 0x8ab   : > { %v9185_v33 = vld [vmem:[#allocation3 + $0x42] sm:$0xff]  ;;  %9092 = vrot.lane.b32.xlu1 %v9280_v34, %s11085_s22  ;;  %9169 = vst.msk [vmem:[#allocation5 + $0x50] sm:$0xff] %vm15461_vm13, %v9376_v21  ;;  %vm15473_vm13 = vmmov %vm15368_vm0 }
 0x8ac   : > { %9488 = vst.msk [vmem:[#allocation5 + $0x40] sm:$0xff] %vm15459_vm2, %v9185_v33  ;;  %v8802_v10 = vmax.f32 %v8740_v42, 0.0  ;;  %vm15471_vm2 = vmmov %vm15368_vm0 }
 0x8ae   : > { %8818 = vst.msk [vmem:[#allocation3 + $0x51] sm:$0xff] %vm15462_vm8, %v8802_v10  ;;  %9410 = vrot.lane.b32.xlu0 %v9376_v21, %s11085_s22  ;;  %vm15474_vm8 = vmmov %vm15368_vm0 }
 0x8af   : > { %8902 = vrot.lane.b32.xlu1 %v9376_v21, %s11083_s27 }
 0x8b0   : > { %v10490_v43 = vpop.f32.mrb[58].mxu1 }
 0x8b1   : > { %v10491_v5 = vpop.f32.mrb[59].mxu1 }
 0x8b2   : > { %v10492_v3 = vadd.f32 %v10491_v5, %v10490_v43  ;;  %9220 = vrot.lane.b32.xlu0 %v9185_v33, %s11083_s27 }
 0x8b3   : > { %v9510_v19 = vld [vmem:[#allocation5 + $0x40] sm:$0xff]  ;;  %8998 = vrot.lane.b32.xlu1 %v9185_v33, %s11084_s15  ;;  %v9381_v33 = vld [vmem:[#allocation3 + $0x91] sm:$0xff] }
 0x8b4   : > { %10822 = vmatprep.mubr.msk.f32.mxu1 %vm15463_vm9, %v9510_v19  ;;  %v8600_v18 = vadd.f32 %v10492_v3, %v14595_v27  ;;  %vm15475_vm9 = vmmov %vm15368_vm0 }
 0x8b5   : > { %v9281_v31 = vld [vmem:[#allocation3 + $0x50] sm:$0xff] }
 0x8b6   : > { %v9377_v12 = vld [vmem:[#allocation3 + $0x51] sm:$0xff]  ;;  %v8745_v30 = vadd.f32 %v14524_v38, %v8600_v18  ;;  %9316 = vrot.lane.b32.xlu0 %v9281_v31, %s11084_s15  ;;  %8851 = vst.msk [vmem:[#allocation5 + $0x78] sm:$0xff] %vm15465_vm15, %v9281_v31  ;;  %vm15477_vm15 = vmmov %vm15368_vm0 }
 0x8b7   : > { %v9186_v47 = vld [vmem:[#allocation3 + $0x52] sm:$0xff]  ;;  %9094 = vrot.lane.b32.xlu1 %v9281_v31, %s11085_s22  ;;  %9170 = vst.msk [vmem:[#allocation5 + $0x68] sm:$0xff] %vm15466_vm14, %v9377_v12  ;;  %vm15478_vm14 = vmmov %vm15368_vm0 }
 0x8b8   : > { %9489 = vst.msk [vmem:[#allocation5 + $0x58] sm:$0xff] %vm15464_vm1, %v9186_v47  ;;  %v8803_v11 = vmax.f32 %v8745_v30, 0.0  ;;  %vm15476_vm1 = vmmov %vm15368_vm0 }
 0x8b9   : > { %8854 = vst.msk [vmem:[#allocation5 + $0xc0] sm:$0xff] %vm15477_vm15, %v8838_v17  ;;  %vm15489_vm15 = vmmov %vm15368_vm0 }
 0x8ba   : > { %8819 = vst.msk [vmem:[#allocation3 + $0x61] sm:$0xff] %vm15467_vm4, %v8803_v11  ;;  %9412 = vrot.lane.b32.xlu0 %v9377_v12, %s11085_s22  ;;  %vm15479_vm4 = vmmov %vm15368_vm0 }
 0x8bb   : > { %8904 = vrot.lane.b32.xlu1 %v9377_v12, %s11083_s27 }
 0x8bc   : > { %v10493_v37 = vpop.f32.mrb[60].mxu1 }
 0x8bd   : > { %v10494_v35 = vpop.f32.mrb[61].mxu1 }
 0x8be   : > { %v10495_v57 = vadd.f32 %v10494_v35, %v10493_v37  ;;  %9222 = vrot.lane.b32.xlu0 %v9186_v47, %s11083_s27 }
 0x8bf   : > { %v9513_v38 = vld [vmem:[#allocation5 + $0x58] sm:$0xff]  ;;  %9000 = vrot.lane.b32.xlu1 %v9186_v47, %s11084_s15 }
 0x8c0   : > { %10823 = vmatmul.mubr.msk.f32.gmra.mrb[82].mxu1 %vm15468_vm5, %v9513_v38  ;;  %v8605_v62 = vadd.f32 %v10495_v57, %v14595_v27  ;;  %vm15480_vm5 = vmmov %vm15368_vm0 }
 0x8c1   : > { %v9282_v13 = vld [vmem:[#allocation3 + $0x60] sm:$0xff] }
 0x8c2   : > { %v9378_v20 = vld [vmem:[#allocation3 + $0x61] sm:$0xff]  ;;  %v8750_v54 = vadd.f32 %v14533_v51, %v8605_v62  ;;  %9318 = vrot.lane.b32.xlu0 %v9282_v13, %s11084_s15  ;;  %8852 = vst.msk [vmem:[#allocation5 + $0x90] sm:$0xff] %vm15368_vm0, %v9282_v13 }
 0x8c3   : > { %v9187_v26 = vld [vmem:[#allocation3 + $0x62] sm:$0xff]  ;;  %9096 = vrot.lane.b32.xlu1 %v9282_v13, %s11085_s22  ;;  %9171 = vst.msk [vmem:[#allocation5 + $0x80] sm:$0xff] %vm15470_vm6, %v9378_v20  ;;  %vm15482_vm6 = vmmov %vm15368_vm0 }
 0x8c4   : > { %9490 = vst.msk [vmem:[#allocation5 + $0x70] sm:$0xff] %vm15469_vm10, %v9187_v26  ;;  %v8804_v49 = vmax.f32 %v8750_v54, 0.0  ;;  %vm15481_vm10 = vmmov %vm15368_vm0 }
 0x8c6   : > { %8820 = vst.msk [vmem:[#allocation3 + $0x71] sm:$0xff] %vm15471_vm2, %v8804_v49  ;;  %9414 = vrot.lane.b32.xlu0 %v9378_v20, %s11085_s22  ;;  %vm15483_vm2 = vmmov %vm15368_vm0 }
 0x8c7   : > { %8906 = vrot.lane.b32.xlu1 %v9378_v20, %s11083_s27 }
 0x8c8   : > { %v10496_v56 = vpop.f32.mrb[62].mxu1 }
 0x8c9   : > { %v10497_v4 = vpop.f32.mrb[63].mxu1 }
 0x8ca   : > { %v10498_v55 = vadd.f32 %v10497_v4, %v10496_v56  ;;  %9224 = vrot.lane.b32.xlu0 %v9187_v26, %s11083_s27 }
 0x8cb   : > { %v9516_v51 = vld [vmem:[#allocation5 + $0x70] sm:$0xff]  ;;  %9002 = vrot.lane.b32.xlu1 %v9187_v26, %s11084_s15 }
 0x8cc   : > { %10825 = vmatprep.mubr.msk.f32.mxu1 %vm15472_vm7, %v9516_v51  ;;  %v8610_v60 = vadd.f32 %v10498_v55, %v14595_v27  ;;  %vm15484_vm7 = vmmov %vm15368_vm0 }
 0x8cd   : > { %v9283_v24 = vld [vmem:[#allocation3 + $0x70] sm:$0xff] }
 0x8ce   : > { %v9379_v61 = vld [vmem:[#allocation3 + $0x71] sm:$0xff]  ;;  %v8755_v8 = vadd.f32 %v14530_v22, %v8610_v60  ;;  %9320 = vrot.lane.b32.xlu0 %v9283_v24, %s11084_s15  ;;  %8853 = vst.msk [vmem:[#allocation5 + $0xa8] sm:$0xff] %vm15474_vm8, %v9283_v24  ;;  %vm15486_vm8 = vmmov %vm15368_vm0 }
 0x8cf   : > { %v9188_v45 = vld [vmem:[#allocation3 + $0x72] sm:$0xff]  ;;  %9098 = vrot.lane.b32.xlu1 %v9283_v24, %s11085_s22  ;;  %9172 = vst.msk [vmem:[#allocation5 + $0x98] sm:$0xff] %vm15475_vm9, %v9379_v61  ;;  %vm15487_vm9 = vmmov %vm15368_vm0 }
 0x8d0   : > { %9491 = vst.msk [vmem:[#allocation5 + $0x88] sm:$0xff] %vm15473_vm13, %v9188_v45  ;;  %v8805_v9 = vmax.f32 %v8755_v8, 0.0  ;;  %vm15485_vm13 = vmmov %vm15368_vm0 }
 0x8d2   : > { %8821 = vst.msk [vmem:[#allocation3 + $0x81] sm:$0xff] %vm15476_vm1, %v8805_v9  ;;  %9416 = vrot.lane.b32.xlu0 %v9379_v61, %s11085_s22  ;;  %vm15488_vm1 = vmmov %vm15368_vm0 }
 0x8d3   : > { %8908 = vrot.lane.b32.xlu1 %v9379_v61, %s11083_s27 }
 0x8d4   : > { %v10499_v22 = vpop.f32.mrb[64].mxu1 }
 0x8d5   : > { %v10500_v25 = vpop.f32.mrb[65].mxu1 }
 0x8d6   : > { %v10501_v50 = vadd.f32 %v10500_v25, %v10499_v22  ;;  %9226 = vrot.lane.b32.xlu0 %v9188_v45, %s11083_s27 }
 0x8d7   : > { %v9519_v0 = vld [vmem:[#allocation5 + $0x88] sm:$0xff]  ;;  %9004 = vrot.lane.b32.xlu1 %v9188_v45, %s11084_s15 }
 0x8d8   : > { %10826 = vmatmul.mubr.msk.f32.gmra.mrb[84].mxu1 %vm15478_vm14, %v9519_v0  ;;  %v8615_v7 = vadd.f32 %v10501_v50, %v14595_v27  ;;  %vm15490_vm14 = vmmov %vm15368_vm0 }
 0x8d9   : > { %v9284_v52 = vld [vmem:[#allocation3 + $0x80] sm:$0xff] }
 0x8da   : > { %v9380_v59 = vld [vmem:[#allocation3 + $0x81] sm:$0xff]  ;;  %v8760_v15 = vadd.f32 %v14540_v39, %v8615_v7  ;;  %9322 = vrot.lane.b32.xlu0 %v9284_v52, %s11084_s15 }
 0x8db   : > { %v9189_v44 = vld [vmem:[#allocation3 + $0x82] sm:$0xff]  ;;  %9100 = vrot.lane.b32.xlu1 %v9284_v52, %s11085_s22  ;;  %9173 = vst.msk [vmem:[#allocation5 + $0xb0] sm:$0xff] %vm15480_vm5, %v9380_v59  ;;  %vm15492_vm5 = vmmov %vm15368_vm0 }
 0x8dc   : > { %9492 = vst.msk [vmem:[#allocation5 + $0xa0] sm:$0xff] %vm15479_vm4, %v9189_v44  ;;  %v8806_v32 = vmax.f32 %v8760_v15, 0.0  ;;  %vm15491_vm4 = vmmov %vm15368_vm0 }
 0x8de   : > { %8822 = vst.msk [vmem:[#allocation3 + $0xb1] sm:$0xff] %vm15481_vm10, %v8806_v32  ;;  %9418 = vrot.lane.b32.xlu0 %v9380_v59, %s11085_s22  ;;  %vm15493_vm10 = vmmov %vm15368_vm0 }
 0x8df   : > { %8910 = vrot.lane.b32.xlu1 %v8870_v53, %s11083_s27 }
 0x8e0   : > { %v10502_v40 = vpop.f32.mrb[66].mxu1 }
 0x8e1   : > { %v10503_v41 = vpop.f32.mrb[67].mxu1 }
 0x8e2   : > { %v10504_v36 = vadd.f32 %v10503_v41, %v10502_v40  ;;  %9228 = vrot.lane.b32.xlu0 %v9189_v44, %s11083_s27 }
 0x8e3   : > { %v9522_v39 = vld [vmem:[#allocation5 + $0xa0] sm:$0xff]  ;;  %9006 = vrot.lane.b32.xlu1 %v8966_v23, %s11084_s15 }
 0x8e4   : > { %10828 = vmatprep.mubr.msk.f32.mxu1 %vm15368_vm0, %v9522_v39  ;;  %v8620_v14 = vadd.f32 %v10504_v36, %v14595_v27 }
 0x8e5   : > { %10829 = vmatmul.mubr.msk.f32.gmra.mrb[86].mxu1 %vm15482_vm6, %v9525_v1  ;;  %v9062_v48 = vld [vmem:[#allocation3 + $0xb0] sm:$0xff]  ;;  %vm15494_vm6 = vmmov %vm15368_vm0 }
 0x8e6   : > { %v8871_v34 = vld [vmem:[#allocation3 + $0xb1] sm:$0xff]  ;;  %v8765_v21 = vadd.f32 %v14537_v28, %v8620_v14  ;;  %9324 = vrot.lane.b32.xlu0 %v9285_v46, %s11084_s15  ;;  %8855 = vst.msk [vmem:[#allocation5 + $0xd8] sm:$0xff] %vm15483_vm2, %v9062_v48  ;;  %vm15495_vm2 = vmmov %vm15368_vm0 }
 0x8e7   : > { %9102 = vrot.lane.b32.xlu1 %v9062_v48, %s11085_s22  ;;  %9174 = vst.msk [vmem:[#allocation5 + $0xc8] sm:$0xff] %vm15484_vm7, %v8871_v34  ;;  %v9190_v5 = vld [vmem:[#allocation3 + $0xb2] sm:$0xff]  ;;  %vm15496_vm7 = vmmov %vm15368_vm0 }
 0x8e8   : > { %v8807_v42 = vmax.f32 %v8765_v21, 0.0 }
 0x8ea   : > { %8823 = vst.msk [vmem:[#allocation3 + $0xc1] sm:$0xff] %vm15485_vm13, %v8807_v42  ;;  %9420 = vrot.lane.b32.xlu0 %v9381_v33, %s11085_s22  ;;  %vm15497_vm13 = vmmov %vm15368_vm0 }
 0x8eb   : > { %8912 = vrot.lane.b32.xlu1 %v8871_v34, %s11083_s27 }
 0x8ec   : > { %v10505_v10 = vpop.f32.mrb[68].mxu1 }
 0x8ed   : > { %v10506_v43 = vpop.f32.mrb[69].mxu1 }
 0x8ee   : > { %v10507_v28 = vadd.f32 %v10506_v43, %v10505_v10  ;;  %9230 = vrot.lane.b32.xlu0 %v9190_v5, %s11083_s27 }
 0x8ef   : > { %9008 = vrot.lane.b32.xlu1 %v9190_v5, %s11084_s15 }
 0x8f0   : > { %v8625_v19 = vadd.f32 %v10507_v28, %v14595_v27 }
 0x8f1   : > { %v9286_v3 = vld [vmem:[#allocation3 + $0xc0] sm:$0xff] }
 0x8f2   : > { %v9382_v18 = vld [vmem:[#allocation3 + $0xc1] sm:$0xff]  ;;  %v8770_v12 = vadd.f32 %v14546_v2, %v8625_v19  ;;  %9326 = vrot.lane.b32.xlu0 %v9286_v3, %s11084_s15  ;;  %8856 = vst.msk [vmem:[#allocation5 + $0xf0] sm:$0xff] %vm15487_vm9, %v9286_v3  ;;  %vm15499_vm9 = vmmov %vm15368_vm0 }
 0x8f3   : > { %v9191_v31 = vld [vmem:[#allocation3 + $0xc2] sm:$0xff]  ;;  %9104 = vrot.lane.b32.xlu1 %v9286_v3, %s11085_s22  ;;  %9175 = vst.msk [vmem:[#allocation5 + $0xe0] sm:$0xff] %vm15488_vm1, %v9382_v18  ;;  %vm15500_vm1 = vmmov %vm15368_vm0 }
 0x8f4   : > { %9494 = vst.msk [vmem:[#allocation5 + $0xd0] sm:$0xff] %vm15486_vm8, %v9191_v31  ;;  %v8808_v47 = vmax.f32 %v8770_v12, 0.0  ;;  %vm15498_vm8 = vmmov %vm15368_vm0 }
 0x8f6   : > { %8824 = vst.msk [vmem:[#allocation3 + $0xd1] sm:$0xff] %vm15489_vm15, %v8808_v47  ;;  %9422 = vrot.lane.b32.xlu0 %v9382_v18, %s11085_s22  ;;  %vm15501_vm15 = vmmov %vm15368_vm0 }
 0x8f7   : > { %8914 = vrot.lane.b32.xlu1 %v9382_v18, %s11083_s27 }
 0x8f8   : > { %v9215_v30 = vpop.permute.xlu0 %9214  ;;  %v10508_v11 = vpop.f32.mrb[70].mxu1 }
 0x8f9   : > { %9262 = vst.msk [vmem:[#allocation5 + $0x8] sm:$0xff] %vm6658_vm11, %v9215_v30  ;;  %v9087_v2 = vpop.permute.xlu1 %9086  ;;  %v10509_v37 = vpop.f32.mrb[71].mxu1 }
 0x8fa   : > { %9134 = vst.msk [vmem:[#allocation5] sm:$0xff] %vm6852_vm12, %v9087_v2  ;;  %v10510_v38 = vadd.f32 %v10509_v37, %v10508_v11  ;;  %9232 = vrot.lane.b32.xlu0 %v9191_v31, %s11083_s27 }
 0x8fb   : > { %v9528_v35 = vld [vmem:[#allocation5 + $0xd0] sm:$0xff]  ;;  %9010 = vrot.lane.b32.xlu1 %v9191_v31, %s11084_s15 }
 0x8fc   : > { %10831 = vmatprep.mubr.msk.f32.mxu1 %vm15490_vm14, %v9528_v35  ;;  %v8630_v57 = vadd.f32 %v10510_v38, %v14595_v27  ;;  %vm15502_vm14 = vmmov %vm15368_vm0 }
 0x8fd   : > { %v8897_v62 = vpop.permute.xlu1 %8896  ;;  %v9287_v13 = vld [vmem:[#allocation3 + $0xd0] sm:$0xff] }
 0x8fe   : > { %v9383_v20 = vld [vmem:[#allocation3 + $0xd1] sm:$0xff]  ;;  %v8775_v54 = vadd.f32 %v14543_v29, %v8630_v57  ;;  %8943 = vst.msk [vmem:[#allocation5 + $0x18] sm:$0xff] %vm6658_vm11, %v8897_v62  ;;  %9328 = vrot.lane.b32.xlu0 %v9287_v13, %s11084_s15 }
 0x8ff   : > { %v9192_v26 = vld [vmem:[#allocation3 + $0xd2] sm:$0xff]  ;;  %9106 = vrot.lane.b32.xlu1 %v9287_v13, %s11085_s22  ;;  %8857 = vst.msk [vmem:[#allocation5 + $0x108] sm:$0xff] %vm15492_vm5, %v9287_v13  ;;  %vm15504_vm5 = vmmov %vm15368_vm0 }
 0x900   : > { %9495 = vst.msk [vmem:[#allocation5 + $0xe8] sm:$0xff] %vm15491_vm4, %v9192_v26  ;;  %v8809_v49 = vmax.f32 %v8775_v54, 0.0  ;;  %vm15503_vm4 = vmmov %vm15368_vm0 }
 0x901   : > { %9176 = vst.msk [vmem:[#allocation5 + $0xf8] sm:$0xff] %vm15493_vm10, %v9383_v20  ;;  %v8993_v56 = vpop.permute.xlu1 %8992  ;;  %v9502_v23 = vld [vmem:[#allocation5] sm:$0xff]  ;;  %vm15505_vm10 = vmmov %vm15368_vm0 }
 0x902   : > { %8825 = vst.msk [vmem:[#allocation3 + $0xe1] sm:$0xff] %vm15368_vm0, %v8809_v49  ;;  %9424 = vrot.lane.b32.xlu0 %v9383_v20, %s11085_s22 }
 0x903   : > { %9039 = vst.msk [vmem:[#allocation5 + $0x18] sm:$0xff] %vm6755_vm3, %v8993_v56  ;;  %8916 = vrot.lane.b32.xlu1 %v9383_v20, %s11083_s27 }
 0x904   : > { %v9311_v29 = vpop.permute.xlu0 %9310  ;;  %v10511_v4 = vpop.f32.mrb[72].mxu1 }
 0x905   : > { %9358 = vst.msk [vmem:[#allocation5 + $0x8] sm:$0xff] %vm6755_vm3, %v9311_v29  ;;  %v9089_v51 = vpop.permute.xlu1 %9088  ;;  %v10512_v55 = vpop.f32.mrb[73].mxu1 }
 0x906   : > { %9135 = vst.msk [vmem:[#allocation5 + $0x18] sm:$0xff] %vm6852_vm12, %v9089_v51  ;;  %v10513_v24 = vadd.f32 %v10512_v55, %v10511_v4  ;;  %9234 = vrot.lane.b32.xlu0 %v9192_v26, %s11083_s27 }
 0x907   : > { %v9531_v60 = vld [vmem:[#allocation5 + $0xe8] sm:$0xff]  ;;  %9012 = vrot.lane.b32.xlu1 %v9192_v26, %s11084_s15 }
 0x908   : > { %10832 = vmatmul.mubr.msk.f32.gmra.mrb[88].mxu1 %vm15494_vm6, %v9531_v60  ;;  %v8635_v61 = vadd.f32 %v10513_v24, %v14595_v27  ;;  %v9407_v45 = vpop.permute.xlu0 %9406  ;;  %vm15506_vm6 = vmmov %vm15368_vm0 }
 0x909   : > { %9454 = vst.msk [vmem:[#allocation5 + $0x8] sm:$0xff] %vm6852_vm12, %v9407_v45  ;;  %v8899_v8 = vpop.permute.xlu1 %8898  ;;  %v9288_v9 = vld [vmem:[#allocation3 + $0xe0] sm:$0xff] }
 0x90a   : > { %v9384_v17 = vld [vmem:[#allocation3 + $0xe1] sm:$0xff]  ;;  %v8780_v25 = vadd.f32 %v14552_v16, %v8635_v61  ;;  %8944 = vst.msk [vmem:[#allocation5 + $0x30] sm:$0xff] %vm6658_vm11, %v8899_v8  ;;  %9330 = vrot.lane.b32.xlu0 %v9288_v9, %s11084_s15 }
 0x90b   : > { %v9193_v22 = vld [vmem:[#allocation3 + $0xe2] sm:$0xff]  ;;  %9108 = vrot.lane.b32.xlu1 %v9288_v9, %s11085_s22  ;;  %8858 = vst.msk [vmem:[#allocation5 + $0x120] sm:$0xff] %vm15496_vm7, %v9288_v9  ;;  %vm15508_vm7 = vmmov %vm15368_vm0 }
 0x90c   : > { %9496 = vst.msk [vmem:[#allocation5 + $0x100] sm:$0xff] %vm15495_vm2, %v9193_v22  ;;  %v8810_v0 = vmax.f32 %v8780_v25, 0.0  ;;  %v9217_v50 = vpop.permute.xlu0 %9216  ;;  %vm15507_vm2 = vmmov %vm15368_vm0 }
 0x90d   : > { %9177 = vst.msk [vmem:[#allocation5 + $0x110] sm:$0xff] %vm15497_vm13, %v9384_v17  ;;  %v8995_v7 = vpop.permute.xlu1 %8994  ;;  %v9505_v19 = vld [vmem:[#allocation5 + $0x18] sm:$0xff]  ;;  %vm15509_vm13 = vmmov %vm15368_vm0 }
 0x90e   : > { %9263 = vst.msk [vmem:[#allocation5 + $0x20] sm:$0xff] %vm6658_vm11, %v9217_v50  ;;  %9426 = vrot.lane.b32.xlu0 %v9384_v17, %s11085_s22 }
 0x90f   : > { %8826 = vst.msk [vmem:[#allocation3 + $0xf1] sm:$0xff] %vm15498_vm8, %v8810_v0  ;;  %8918 = vrot.lane.b32.xlu1 %v9384_v17, %s11083_s27  ;;  %vm15510_vm8 = vmmov %vm15368_vm0 }
 0x910   : > { %9040 = vst.msk [vmem:[#allocation5 + $0x30] sm:$0xff] %vm6755_vm3, %v8995_v7  ;;  %v9313_v16 = vpop.permute.xlu0 %9312  ;;  %v10514_v52 = vpop.f32.mrb[74].mxu1  ;;  %v9503_v59 = vld [vmem:[#allocation5 + $0x8] sm:$0xff] }
 0x911   : > { %9359 = vst.msk [vmem:[#allocation5 + $0x20] sm:$0xff] %vm6755_vm3, %v9313_v16  ;;  %v9091_v44 = vpop.permute.xlu1 %9090  ;;  %v10515_v15 = vpop.f32.mrb[75].mxu1  ;;  %9702 = vmatprep.mubr.f32.mxu0 %v9503_v59 }
 0x912   : > { %9136 = vst.msk [vmem:[#allocation5 + $0x30] sm:$0xff] %vm6852_vm12, %v9091_v44  ;;  %v10516_v32 = vadd.f32 %v10515_v15, %v10514_v52  ;;  %9236 = vrot.lane.b32.xlu0 %v9193_v22, %s11083_s27  ;;  %9703 = vmatmul.mubr.f32.vlgmr.msra.gmra.mrb[80].mxu0 %v9502_v23  ;;  %v9549_v15 = vld [vmem:[#allocation5 + $0x178] sm:$0xff] }
 0x913   : > { %v9534_v53 = vld [vmem:[#allocation5 + $0x100] sm:$0xff]  ;;  %9014 = vrot.lane.b32.xlu1 %v9193_v22, %s11084_s15 }
 0x914   : > { %10834 = vmatprep.mubr.msk.f32.mxu1 %vm15499_vm9, %v9534_v53  ;;  %v8640_v40 = vadd.f32 %v10516_v32, %v14595_v27  ;;  %v9409_v41 = vpop.permute.xlu0 %9408  ;;  %vm15511_vm9 = vmmov %vm15368_vm0 }
 0x915   : > { %9455 = vst.msk [vmem:[#allocation5 + $0x20] sm:$0xff] %vm6852_vm12, %v9409_v41  ;;  %v8901_v39 = vpop.permute.xlu1 %8900 }
 0x916   : > { %v9289_v1 = vld [vmem:[#allocation3 + $0xf0] sm:$0xff]  ;;  %v8785_v14 = vadd.f32 %v14549_v58, %v8640_v40  ;;  %8945 = vst.msk [vmem:[#allocation5 + $0x48] sm:$0xff] %vm6658_vm11, %v8901_v39 }
 0x917   : > { %v9385_v36 = vld [vmem:[#allocation3 + $0xf1] sm:$0xff]  ;;  %9332 = vrot.lane.b32.xlu0 %v9289_v1, %s11084_s15  ;;  %9110 = vrot.lane.b32.xlu1 %v9289_v1, %s11085_s22  ;;  %8859 = vst.msk [vmem:[#allocation5 + $0x138] sm:$0xff] %vm15501_vm15, %v9289_v1  ;;  %vm15513_vm15 = vmmov %vm15368_vm0 }
 0x918   : > { %v9194_v46 = vld [vmem:[#allocation3 + $0xf2] sm:$0xff]  ;;  %9178 = vst.msk [vmem:[#allocation5 + $0x128] sm:$0xff] %vm15502_vm14, %v9385_v36  ;;  %v8811_v48 = vmax.f32 %v8785_v14, 0.0  ;;  %v9219_v34 = vpop.permute.xlu0 %9218  ;;  %vm15514_vm14 = vmmov %vm15368_vm0 }
 0x919   : > { %9497 = vst.msk [vmem:[#allocation5 + $0x118] sm:$0xff] %vm15500_vm1, %v9194_v46  ;;  %v8997_v21 = vpop.permute.xlu1 %8996  ;;  %v9508_v54 = vld [vmem:[#allocation5 + $0x30] sm:$0xff]  ;;  %vm15512_vm1 = vmmov %vm15368_vm0 }
 0x91a   : > { %9264 = vst.msk [vmem:[#allocation5 + $0x38] sm:$0xff] %vm6658_vm11, %v9219_v34  ;;  %v9293_v40 = vld [vmem:[#allocation3 + $0x130] sm:$0xff] }
 0x91b   : > { %8827 = vst.msk [vmem:[#allocation3 + $0x101] sm:$0xff] %vm15503_vm4, %v8811_v48  ;;  %9428 = vrot.lane.b32.xlu0 %v9385_v36, %s11085_s22  ;;  %8920 = vrot.lane.b32.xlu1 %v9385_v36, %s11083_s27  ;;  %vm15515_vm4 = vmmov %vm15368_vm0  ;;  %v9389_v1 = vld [vmem:[#allocation3 + $0x131] sm:$0xff] }
 0x91c   : > { %9041 = vst.msk [vmem:[#allocation5 + $0x48] sm:$0xff] %vm6755_vm3, %v8997_v21  ;;  %v9315_v58 = vpop.permute.xlu0 %9314  ;;  %v10517_v33 = vpop.f32.mrb[76].mxu1  ;;  %v9506_v42 = vld [vmem:[#allocation5 + $0x20] sm:$0xff] }
 0x91d   : > { %9360 = vst.msk [vmem:[#allocation5 + $0x38] sm:$0xff] %vm6755_vm3, %v9315_v58  ;;  %v9093_v10 = vpop.permute.xlu1 %9092  ;;  %v10518_v43 = vpop.f32.mrb[77].mxu1  ;;  %9707 = vmatprep.mubr.f32.mxu0 %v9506_v42 }
 0x91e   : > { %9137 = vst.msk [vmem:[#allocation5 + $0x48] sm:$0xff] %vm6852_vm12, %v9093_v10  ;;  %v10519_v28 = vadd.f32 %v10518_v43, %v10517_v33  ;;  %9708 = vmatmul.mubr.f32.gmra.mrb[82].mxu0 %v9505_v19 }
 0x91f   : > { %9238 = vrot.lane.b32.xlu0 %v9194_v46, %s11083_s27  ;;  %9016 = vrot.lane.b32.xlu1 %v9194_v46, %s11084_s15 }
 0x920   : > { %v9537_v5 = vld [vmem:[#allocation5 + $0x118] sm:$0xff]  ;;  %v8645_v3 = vadd.f32 %v10519_v28, %v14595_v27  ;;  %v9411_v18 = vpop.permute.xlu0 %9410 }
 0x921   : > { %10835 = vmatmul.mubr.msk.f32.gmra.mrb[90].mxu1 %vm15504_vm5, %v9537_v5  ;;  %9456 = vst.msk [vmem:[#allocation5 + $0x38] sm:$0xff] %vm6852_vm12, %v9411_v18  ;;  %v8903_v31 = vpop.permute.xlu1 %8902  ;;  %vm15516_vm5 = vmmov %vm15368_vm0 }
 0x922   : > { %v9290_v12 = vld [vmem:[#allocation3 + $0x100] sm:$0xff]  ;;  %v8790_v11 = vadd.f32 %v14730_v6, %v8645_v3  ;;  %8946 = vst.msk [vmem:[#allocation5 + $0x60] sm:$0xff] %vm6658_vm11, %v8903_v31 }
 0x923   : > { %v9386_v47 = vld [vmem:[#allocation3 + $0x101] sm:$0xff]  ;;  %9334 = vrot.lane.b32.xlu0 %v9290_v12, %s11084_s15  ;;  %9112 = vrot.lane.b32.xlu1 %v9290_v12, %s11085_s22  ;;  %8860 = vst.msk [vmem:[#allocation5 + $0x150] sm:$0xff] %vm15368_vm0, %v9290_v12 }
 0x924   : > { %v9195_v30 = vld [vmem:[#allocation3 + $0x102] sm:$0xff]  ;;  %9179 = vst.msk [vmem:[#allocation5 + $0x140] sm:$0xff] %vm15506_vm6, %v9386_v47  ;;  %v8812_v2 = vmax.f32 %v8790_v11, 0.0  ;;  %v9221_v37 = vpop.permute.xlu0 %9220 }
 0x925   : > { %9498 = vst.msk [vmem:[#allocation5 + $0x130] sm:$0xff] %vm15505_vm10, %v9195_v30  ;;  %v8999_v35 = vpop.permute.xlu1 %8998  ;;  %v9511_v17 = vld [vmem:[#allocation5 + $0x48] sm:$0xff]  ;;  %vm15517_vm10 = vmmov %vm15368_vm0 }
 0x926   : > { %9265 = vst.msk [vmem:[#allocation5 + $0x50] sm:$0xff] %vm6658_vm11, %v9221_v37 }
 0x927   : > { %8828 = vst.msk [vmem:[#allocation3 + $0x111] sm:$0xff] %vm15507_vm2, %v8812_v2  ;;  %9430 = vrot.lane.b32.xlu0 %v9386_v47, %s11085_s22  ;;  %8922 = vrot.lane.b32.xlu1 %v9386_v47, %s11083_s27 }
 0x928   : > { %9042 = vst.msk [vmem:[#allocation5 + $0x60] sm:$0xff] %vm6755_vm3, %v8999_v35  ;;  %v9317_v6 = vpop.permute.xlu0 %9316  ;;  %v10520_v38 = vpop.f32.mrb[78].mxu1  ;;  %v9509_v57 = vld [vmem:[#allocation5 + $0x38] sm:$0xff] }
 0x929   : > { %9361 = vst.msk [vmem:[#allocation5 + $0x50] sm:$0xff] %vm6755_vm3, %v9317_v6  ;;  %v9095_v62 = vpop.permute.xlu1 %9094  ;;  %v10521_v13 = vpop.f32.mrb[79].mxu1  ;;  %9712 = vmatprep.mubr.f32.mxu0 %v9509_v57 }
 0x92a   : > { %9138 = vst.msk [vmem:[#allocation5 + $0x60] sm:$0xff] %vm6852_vm12, %v9095_v62  ;;  %v10522_v26 = vadd.f32 %v10521_v13, %v10520_v38  ;;  %9713 = vmatmul.mubr.f32.gmra.mrb[84].mxu0 %v9508_v54 }
 0x92b   : > { %9240 = vrot.lane.b32.xlu0 %v9195_v30, %s11083_s27  ;;  %9018 = vrot.lane.b32.xlu1 %v9195_v30, %s11084_s15 }
 0x92c   : > { %v9540_v20 = vld [vmem:[#allocation5 + $0x130] sm:$0xff]  ;;  %v8650_v49 = vadd.f32 %v10522_v26, %v14595_v27  ;;  %v9413_v56 = vpop.permute.xlu0 %9412 }
 0x92d   : > { %10837 = vmatprep.mubr.msk.f32.mxu1 %vm15508_vm7, %v9540_v20  ;;  %9457 = vst.msk [vmem:[#allocation5 + $0x50] sm:$0xff] %vm6852_vm12, %v9413_v56  ;;  %v8905_v29 = vpop.permute.xlu1 %8904 }
 0x92e   : > { %v9291_v4 = vld [vmem:[#allocation3 + $0x110] sm:$0xff]  ;;  %v8795_v60 = vadd.f32 %v14728_v63, %v8650_v49  ;;  %8947 = vst.msk [vmem:[#allocation5 + $0x78] sm:$0xff] %vm6658_vm11, %v8905_v29 }
 0x92f   : > { %v9387_v51 = vld [vmem:[#allocation3 + $0x111] sm:$0xff]  ;;  %9336 = vrot.lane.b32.xlu0 %v9291_v4, %s11084_s15  ;;  %9114 = vrot.lane.b32.xlu1 %v9291_v4, %s11085_s22  ;;  %8861 = vst.msk [vmem:[#allocation5 + $0x168] sm:$0xff] %vm15510_vm8, %v9291_v4 }
 0x930   : > { %v9196_v55 = vld [vmem:[#allocation3 + $0x112] sm:$0xff]  ;;  %9180 = vst.msk [vmem:[#allocation5 + $0x158] sm:$0xff] %vm15511_vm9, %v9387_v51  ;;  %v8813_v27 = vmax.f32 %v8795_v60, 0.0  ;;  %v9223_v24 = vpop.permute.xlu0 %9222 }
 0x931   : > { %9499 = vst.msk [vmem:[#allocation5 + $0x148] sm:$0xff] %vm15509_vm13, %v9196_v55  ;;  %v9001_v61 = vpop.permute.xlu1 %9000  ;;  %v9514_v23 = vld [vmem:[#allocation5 + $0x60] sm:$0xff] }
 0x932   : > { %9266 = vst.msk [vmem:[#allocation5 + $0x68] sm:$0xff] %vm6658_vm11, %v9223_v24 }
 0x933   : > { %8829 = vst.msk [vmem:[#allocation3 + $0x121] sm:$0xff] %vm15512_vm1, %v8813_v27  ;;  %9432 = vrot.lane.b32.xlu0 %v9387_v51, %s11085_s22  ;;  %8924 = vrot.lane.b32.xlu1 %v9387_v51, %s11083_s27 }
 0x934   : > { %9043 = vst.msk [vmem:[#allocation5 + $0x78] sm:$0xff] %vm6755_vm3, %v9001_v61  ;;  %v9319_v63 = vpop.permute.xlu0 %9318  ;;  %v9512_v45 = vld [vmem:[#allocation5 + $0x50] sm:$0xff] }
 0x935   : > { %9362 = vst.msk [vmem:[#allocation5 + $0x68] sm:$0xff] %vm6755_vm3, %v9319_v63  ;;  %v9097_v8 = vpop.permute.xlu1 %9096  ;;  %9717 = vmatprep.mubr.f32.mxu0 %v9512_v45 }
 0x936   : > { %9139 = vst.msk [vmem:[#allocation5 + $0x78] sm:$0xff] %vm6852_vm12, %v9097_v8  ;;  %9718 = vmatmul.mubr.f32.gmra.mrb[86].mxu0 %v9511_v17 }
 0x937   : > { %9242 = vrot.lane.b32.xlu0 %v9196_v55, %s11083_s27  ;;  %9020 = vrot.lane.b32.xlu1 %v9196_v55, %s11084_s15 }
 0x938   : > { %v9543_v9 = vld [vmem:[#allocation5 + $0x148] sm:$0xff]  ;;  %v9415_v22 = vpop.permute.xlu0 %9414 }
 0x939   : > { %10838 = vmatmul.mubr.msk.f32.gmra.mrb[92].mxu1 %vm15513_vm15, %v9543_v9  ;;  %9458 = vst.msk [vmem:[#allocation5 + $0x68] sm:$0xff] %vm6852_vm12, %v9415_v22  ;;  %v8907_v25 = vpop.permute.xlu1 %8906 }
 0x93a   : > { %v9292_v0 = vld [vmem:[#allocation3 + $0x120] sm:$0xff]  ;;  %8948 = vst.msk [vmem:[#allocation5 + $0x90] sm:$0xff] %vm6658_vm11, %v8907_v25 }
 0x93b   : > { %v9388_v50 = vld [vmem:[#allocation3 + $0x121] sm:$0xff]  ;;  %9338 = vrot.lane.b32.xlu0 %v9292_v0, %s11084_s15  ;;  %9116 = vrot.lane.b32.xlu1 %v9292_v0, %s11085_s22 }
 0x93c   : > { %v9484_v7 = vld [vmem:[#allocation3 + $0x122] sm:$0xff]  ;;  %9181 = vst.msk [vmem:[#allocation5 + $0x170] sm:$0xff] %vm15515_vm4, %v9388_v50  ;;  %v9225_v16 = vpop.permute.xlu0 %9224 }
 0x93d   : > { %9500 = vst.msk [vmem:[#allocation5 + $0x160] sm:$0xff] %vm15514_vm14, %v9484_v7  ;;  %v9003_v52 = vpop.permute.xlu1 %9002  ;;  %v9517_v21 = vld [vmem:[#allocation5 + $0x78] sm:$0xff] }
 0x93e   : > { %9267 = vst.msk [vmem:[#allocation5 + $0x80] sm:$0xff] %vm6658_vm11, %v9225_v16 }
 0x93f   : > { %9044 = vst.msk [vmem:[#allocation5 + $0x90] sm:$0xff] %vm6755_vm3, %v9003_v52  ;;  %9434 = vrot.lane.b32.xlu0 %v9388_v50, %s11085_s22 }
 0x940   : > { %v9321_v59 = vpop.permute.xlu0 %9320  ;;  %v9515_v44 = vld [vmem:[#allocation5 + $0x68] sm:$0xff] }
 0x941   : > { %9363 = vst.msk [vmem:[#allocation5 + $0x80] sm:$0xff] %vm6755_vm3, %v9321_v59  ;;  %v9099_v53 = vpop.permute.xlu1 %9098  ;;  %9722 = vmatprep.mubr.f32.mxu0 %v9515_v44 }
 0x942   : > { %9140 = vst.msk [vmem:[#allocation5 + $0x90] sm:$0xff] %vm6852_vm12, %v9099_v53  ;;  %9723 = vmatmul.mubr.f32.gmra.mrb[88].mxu0 %v9514_v23 }
 0x943   : > { %9244 = vrot.lane.b32.xlu0 %v9484_v7, %s11083_s27 }
 0x944   : > { %v9546_v32 = vld [vmem:[#allocation5 + $0x160] sm:$0xff]  ;;  %v9417_v41 = vpop.permute.xlu0 %9416 }
 0x945   : > { %10840 = vmatprep.mubr.msk.f32.mxu1 %vm15516_vm5, %v9546_v32  ;;  %9459 = vst.msk [vmem:[#allocation5 + $0x80] sm:$0xff] %vm6852_vm12, %v9417_v41  ;;  %v8909_v39 = vpop.permute.xlu1 %8908 }
 0x946   : > { %10841 = vmatmul.mubr.msk.f32.gmra.mrb[94].mxu1 %vm15517_vm10, %v9549_v15  ;;  %8949 = vst.msk [vmem:[#allocation5 + $0xa8] sm:$0xff] %vm6658_vm11, %v8909_v39 }
 0x947   : > { %9340 = vrot.lane.b32.xlu0 %v9293_v40, %s11084_s15 }
 0x948   : > { %v9227_v36 = vpop.permute.xlu0 %9226 }
 0x949   : > { %9268 = vst.msk [vmem:[#allocation5 + $0x98] sm:$0xff] %vm6658_vm11, %v9227_v36  ;;  %v9005_v46 = vpop.permute.xlu1 %9004  ;;  %v9520_v19 = vld [vmem:[#allocation5 + $0x90] sm:$0xff] }
 0x94a   : > { %9045 = vst.msk [vmem:[#allocation5 + $0xa8] sm:$0xff] %vm6755_vm3, %v9005_v46 }
 0x94b   : > { %9436 = vrot.lane.b32.xlu0 %v9389_v1, %s11085_s22  ;;  %s10274_s22 = sshll.u32 %s15519_s26, 6 }
 0x94c   : > { %v9323_v14 = vpop.permute.xlu0 %9322  ;;  %v9518_v48 = vld [vmem:[#allocation5 + $0x80] sm:$0xff]  ;;  %s15036_s29 = scalar_lea.vmem %s15114_s7, %s10274_s22 }
 0x94d   : > { %9364 = vst.msk [vmem:[#allocation5 + $0x98] sm:$0xff] %vm6755_vm3, %v9323_v14  ;;  %v9101_v34 = vpop.permute.xlu1 %9100  ;;  %9727 = vmatprep.mubr.f32.mxu0 %v9518_v48 }
 0x94e   : > { %9141 = vst.msk [vmem:[#allocation5 + $0xa8] sm:$0xff] %vm6852_vm12, %v9101_v34  ;;  %9728 = vmatmul.mubr.f32.gmra.mrb[90].mxu0 %v9517_v21 }
 0x950   : > { %v9419_v58 = vpop.permute.xlu0 %9418 }
 0x951   : > { %9460 = vst.msk [vmem:[#allocation5 + $0x98] sm:$0xff] %vm6852_vm12, %v9419_v58  ;;  %v8911_v33 = vpop.permute.xlu1 %8910 }
 0x952   : > { %8950 = vst.msk [vmem:[#allocation5 + $0xc0] sm:$0xff] %vm6658_vm11, %v8911_v33 }
 0x954   : > { %v9229_v42 = vpop.permute.xlu0 %9228 }
 0x955   : > { %9269 = vst.msk [vmem:[#allocation5 + $0xb0] sm:$0xff] %vm6658_vm11, %v9229_v42  ;;  %v9007_v10 = vpop.permute.xlu1 %9006  ;;  %v9523_v2 = vld [vmem:[#allocation5 + $0xa8] sm:$0xff] }
 0x956   : > { %9046 = vst.msk [vmem:[#allocation5 + $0xc0] sm:$0xff] %vm6755_vm3, %v9007_v10 }
 0x958   : > { %v9325_v43 = vpop.permute.xlu0 %9324  ;;  %v9521_v5 = vld [vmem:[#allocation5 + $0x98] sm:$0xff] }
 0x959   : > { %9365 = vst.msk [vmem:[#allocation5 + $0xb0] sm:$0xff] %vm6755_vm3, %v9325_v43  ;;  %v9103_v28 = vpop.permute.xlu1 %9102  ;;  %9732 = vmatprep.mubr.f32.mxu0 %v9521_v5 }
 0x95a   : > { %9142 = vst.msk [vmem:[#allocation5 + $0xc0] sm:$0xff] %vm6852_vm12, %v9103_v28  ;;  %9733 = vmatmul.mubr.f32.gmra.mrb[92].mxu0 %v9520_v19 }
 0x95c   : > { %v9421_v3 = vpop.permute.xlu0 %9420 }
 0x95d   : > { %9461 = vst.msk [vmem:[#allocation5 + $0xb0] sm:$0xff] %vm6852_vm12, %v9421_v3  ;;  %v8913_v18 = vpop.permute.xlu1 %8912 }
 0x95e   : > { %8951 = vst.msk [vmem:[#allocation5 + $0xd8] sm:$0xff] %vm6658_vm11, %v8913_v18 }
 0x960   : > { %v9231_v31 = vpop.permute.xlu0 %9230 }
 0x961   : > { %9270 = vst.msk [vmem:[#allocation5 + $0xc8] sm:$0xff] %vm6658_vm11, %v9231_v31  ;;  %v9009_v12 = vpop.permute.xlu1 %9008  ;;  %v9526_v20 = vld [vmem:[#allocation5 + $0xc0] sm:$0xff] }
 0x962   : > { %9047 = vst.msk [vmem:[#allocation5 + $0xd8] sm:$0xff] %vm6755_vm3, %v9009_v12 }
 0x964   : > { %v9327_v47 = vpop.permute.xlu0 %9326  ;;  %v9524_v30 = vld [vmem:[#allocation5 + $0xb0] sm:$0xff] }
 0x965   : > { %9366 = vst.msk [vmem:[#allocation5 + $0xc8] sm:$0xff] %vm6755_vm3, %v9327_v47  ;;  %v9105_v11 = vpop.permute.xlu1 %9104  ;;  %9737 = vmatprep.mubr.f32.mxu0 %v9524_v30 }
 0x966   : > { %9143 = vst.msk [vmem:[#allocation5 + $0xd8] sm:$0xff] %vm6852_vm12, %v9105_v11  ;;  %9738 = vmatmul.mubr.f32.gmra.mrb[94].mxu0 %v9523_v2 }
 0x968   : > { %v9423_v37 = vpop.permute.xlu0 %9422 }
 0x969   : > { %9462 = vst.msk [vmem:[#allocation5 + $0xc8] sm:$0xff] %vm6852_vm12, %v9423_v37  ;;  %v8915_v35 = vpop.permute.xlu1 %8914 }
 0x96a   : > { %8952 = vst.msk [vmem:[#allocation5 + $0xf0] sm:$0xff] %vm6658_vm11, %v8915_v35 }
 0x96c   : > { %v9233_v6 = vpop.permute.xlu0 %9232 }
 0x96d   : > { %9271 = vst.msk [vmem:[#allocation5 + $0xe0] sm:$0xff] %vm6658_vm11, %v9233_v6  ;;  %v9011_v38 = vpop.permute.xlu1 %9010  ;;  %v9529_v27 = vld [vmem:[#allocation5 + $0xd8] sm:$0xff] }
 0x96e   : > { %9048 = vst.msk [vmem:[#allocation5 + $0xf0] sm:$0xff] %vm6755_vm3, %v9011_v38  ;;  %v15020_v38 = vld [vmem:[%s15113_s6 + $0x3] ss:$0 sm:$0xff] }
 0x970   : > { %v9329_v57 = vpop.permute.xlu0 %9328  ;;  %v9527_v62 = vld [vmem:[#allocation5 + $0xc8] sm:$0xff] }
 0x971   : > { %9367 = vst.msk [vmem:[#allocation5 + $0xe0] sm:$0xff] %vm6755_vm3, %v9329_v57  ;;  %v9107_v13 = vpop.permute.xlu1 %9106  ;;  %9742 = vmatprep.mubr.f32.mxu0 %v9527_v62 }
 0x972   : > { %9144 = vst.msk [vmem:[#allocation5 + $0xf0] sm:$0xff] %vm6852_vm12, %v9107_v13  ;;  %9743 = vmatmul.mubr.f32.gmra.mrb[96].mxu0 %v9526_v20 }
 0x974   : > { %v9425_v26 = vpop.permute.xlu0 %9424 }
 0x975   : > { %9463 = vst.msk [vmem:[#allocation5 + $0xe0] sm:$0xff] %vm6852_vm12, %v9425_v26  ;;  %v8917_v54 = vpop.permute.xlu1 %8916 }
 0x976   : > { %8953 = vst.msk [vmem:[#allocation5 + $0x108] sm:$0xff] %vm6658_vm11, %v8917_v54 }
 0x978   : > { %v9235_v49 = vpop.permute.xlu0 %9234 }
 0x979   : > { %9272 = vst.msk [vmem:[#allocation5 + $0xf8] sm:$0xff] %vm6658_vm11, %v9235_v49  ;;  %v9013_v56 = vpop.permute.xlu1 %9012  ;;  %v9532_v22 = vld [vmem:[#allocation5 + $0xf0] sm:$0xff] }
 0x97a   : > { %9049 = vst.msk [vmem:[#allocation5 + $0x108] sm:$0xff] %vm6755_vm3, %v9013_v56 }
 0x97b   : > { %v14967_v29 = vpop.f32.mrb[80].mxu1 }
 0x97c   : > { %v14969_v4 = vpop.f32.mrb[81].mxu1  ;;  %v9331_v51 = vpop.permute.xlu0 %9330  ;;  %v9530_v55 = vld [vmem:[#allocation5 + $0xe0] sm:$0xff] }
 0x97d   : > { %9368 = vst.msk [vmem:[#allocation5 + $0xf8] sm:$0xff] %vm6755_vm3, %v9331_v51  ;;  %v9109_v60 = vpop.permute.xlu1 %9108  ;;  %9747 = vmatprep.mubr.f32.mxu0 %v9530_v55 }
 0x97e   : > { %9145 = vst.msk [vmem:[#allocation5 + $0x108] sm:$0xff] %vm6852_vm12, %v9109_v60  ;;  %9748 = vmatmul.mubr.f32.gmra.mrb[98].mxu0 %v9529_v27 }
 0x980   : > { %v9427_v24 = vpop.permute.xlu0 %9426 }
 0x981   : > { %9464 = vst.msk [vmem:[#allocation5 + $0xf8] sm:$0xff] %vm6852_vm12, %v9427_v24  ;;  %v8919_v61 = vpop.permute.xlu1 %8918 }
 0x982   : > { %8954 = vst.msk [vmem:[#allocation5 + $0x120] sm:$0xff] %vm6658_vm11, %v8919_v61 }
 0x984   : > { %v9237_v63 = vpop.permute.xlu0 %9236 }
 0x985   : > { %9273 = vst.msk [vmem:[#allocation5 + $0x110] sm:$0xff] %vm6658_vm11, %v9237_v63  ;;  %v9015_v45 = vpop.permute.xlu1 %9014  ;;  %v9535_v53 = vld [vmem:[#allocation5 + $0x108] sm:$0xff] }
 0x986   : > { %9050 = vst.msk [vmem:[#allocation5 + $0x120] sm:$0xff] %vm6755_vm3, %v9015_v45 }
 0x988   : > { %v9533_v9 = vld [vmem:[#allocation5 + $0xf8] sm:$0xff] }
 0x989   : > { %v9333_v8 = vpop.permute.xlu0 %9332  ;;  %v9111_v17 = vpop.permute.xlu1 %9110  ;;  %9752 = vmatprep.mubr.f32.mxu0 %v9533_v9 }
 0x98a   : > { %9369 = vst.msk [vmem:[#allocation5 + $0x110] sm:$0xff] %vm6755_vm3, %v9333_v8  ;;  %9753 = vmatmul.mubr.f32.gmra.mrb[100].mxu0 %v9532_v22 }
 0x98b   : > { %9146 = vst.msk [vmem:[#allocation5 + $0x120] sm:$0xff] %vm6852_vm12, %v9111_v17 }
 0x98d   : > { %v9429_v25 = vpop.permute.xlu0 %9428  ;;  %v8921_v0 = vpop.permute.xlu1 %8920 }
 0x98e   : > { %9465 = vst.msk [vmem:[#allocation5 + $0x110] sm:$0xff] %vm6852_vm12, %v9429_v25 }
 0x98f   : > { %8955 = vst.msk [vmem:[#allocation5 + $0x138] sm:$0xff] %vm6658_vm11, %v8921_v0 }
 0x991   : > { %v9239_v50 = vpop.permute.xlu0 %9238  ;;  %v9017_v7 = vpop.permute.xlu1 %9016 }
 0x992   : > { %9274 = vst.msk [vmem:[#allocation5 + $0x128] sm:$0xff] %vm6658_vm11, %v9239_v50  ;;  %v9538_v46 = vld [vmem:[#allocation5 + $0x120] sm:$0xff] }
 0x993   : > { %9051 = vst.msk [vmem:[#allocation5 + $0x138] sm:$0xff] %vm6755_vm3, %v9017_v7  ;;  %v14983_v16 = vpop.f32.mrb[82].mxu1 }
 0x994   : > { %v14985_v52 = vpop.f32.mrb[83].mxu1 }
 0x995   : > { %v9335_v59 = vpop.permute.xlu0 %9334  ;;  %v9536_v44 = vld [vmem:[#allocation5 + $0x110] sm:$0xff]  ;;  %v9113_v15 = vpop.permute.xlu1 %9112 }
 0x996   : > { %9370 = vst.msk [vmem:[#allocation5 + $0x128] sm:$0xff] %vm6755_vm3, %v9335_v59  ;;  %9757 = vmatprep.mubr.f32.mxu0 %v9536_v44 }
 0x997   : > { %9147 = vst.msk [vmem:[#allocation5 + $0x138] sm:$0xff] %vm6852_vm12, %v9113_v15  ;;  %9758 = vmatmul.mubr.f32.gmra.mrb[102].mxu0 %v9535_v53 }
 0x999   : > { %v9431_v32 = vpop.permute.xlu0 %9430  ;;  %v8923_v23 = vpop.permute.xlu1 %8922 }
 0x99a   : > { %9466 = vst.msk [vmem:[#allocation5 + $0x128] sm:$0xff] %vm6852_vm12, %v9431_v32 }
 0x99b   : > { %8956 = vst.msk [vmem:[#allocation5 + $0x150] sm:$0xff] %vm6658_vm11, %v8923_v23 }
 0x99d   : > { %v9241_v40 = vpop.permute.xlu0 %9240  ;;  %v9019_v41 = vpop.permute.xlu1 %9018 }
 0x99e   : > { %9275 = vst.msk [vmem:[#allocation5 + $0x140] sm:$0xff] %vm6658_vm11, %v9241_v40  ;;  %v9541_v5 = vld [vmem:[#allocation5 + $0x138] sm:$0xff] }
 0x99f   : > { %9052 = vst.msk [vmem:[#allocation5 + $0x150] sm:$0xff] %vm6755_vm3, %v9019_v41 }
 0x9a1   : > { %v9337_v39 = vpop.permute.xlu0 %9336  ;;  %v9539_v1 = vld [vmem:[#allocation5 + $0x128] sm:$0xff]  ;;  %v9115_v36 = vpop.permute.xlu1 %9114 }
 0x9a2   : > { %9371 = vst.msk [vmem:[#allocation5 + $0x140] sm:$0xff] %vm6755_vm3, %v9337_v39  ;;  %9762 = vmatprep.mubr.f32.mxu0 %v9539_v1 }
 0x9a3   : > { %9148 = vst.msk [vmem:[#allocation5 + $0x150] sm:$0xff] %vm6852_vm12, %v9115_v36  ;;  %9763 = vmatmul.mubr.f32.gmra.mrb[104].mxu0 %v9538_v46 }
 0x9a5   : > { %v9433_v14 = vpop.permute.xlu0 %9432  ;;  %v8925_v48 = vpop.permute.xlu1 %8924 }
 0x9a6   : > { %9467 = vst.msk [vmem:[#allocation5 + $0x140] sm:$0xff] %vm6852_vm12, %v9433_v14 }
 0x9a7   : > { %8957 = vst.msk [vmem:[#allocation5 + $0x168] sm:$0xff] %vm6658_vm11, %v8925_v48 }
 0x9a9   : > { %v9243_v34 = vpop.permute.xlu0 %9242  ;;  %v9021_v21 = vpop.permute.xlu1 %9020 }
 0x9aa   : > { %9276 = vst.msk [vmem:[#allocation5 + $0x158] sm:$0xff] %vm6658_vm11, %v9243_v34  ;;  %v9544_v47 = vld [vmem:[#allocation5 + $0x150] sm:$0xff] }
 0x9ab   : > { %9053 = vst.msk [vmem:[#allocation5 + $0x168] sm:$0xff] %vm6755_vm3, %v9021_v21  ;;  %v14999_v58 = vpop.f32.mrb[84].mxu1 }
 0x9ac   : > { %v15001_v33 = vpop.f32.mrb[85].mxu1 }
 0x9ad   : > { %v9339_v42 = vpop.permute.xlu0 %9338  ;;  %v9542_v10 = vld [vmem:[#allocation5 + $0x140] sm:$0xff]  ;;  %v9117_v43 = vpop.permute.xlu1 %9116 }
 0x9ae   : > { %9372 = vst.msk [vmem:[#allocation5 + $0x158] sm:$0xff] %vm6755_vm3, %v9339_v42  ;;  %9767 = vmatprep.mubr.f32.mxu0 %v9542_v10 }
 0x9af   : > { %9149 = vst.msk [vmem:[#allocation5 + $0x168] sm:$0xff] %vm6852_vm12, %v9117_v43  ;;  %9768 = vmatmul.mubr.f32.gmra.mrb[106].mxu0 %v9541_v5 }
 0x9b1   : > { %v9435_v28 = vpop.permute.xlu0 %9434 }
 0x9b2   : > { %9468 = vst.msk [vmem:[#allocation5 + $0x158] sm:$0xff] %vm6852_vm12, %v9435_v28 }
 0x9b5   : > { %v9245_v19 = vpop.permute.xlu0 %9244 }
 0x9b6   : > { %9277 = vst.msk [vmem:[#allocation5 + $0x170] sm:$0xff] %vm6658_vm11, %v9245_v19  ;;  %v9547_v2 = vld [vmem:[#allocation5 + $0x168] sm:$0xff]  ;;  %vm10040_vm11 = vcmask 97280  }
 0x9b8   : > { %v15007_v3 = vpop.f32.mrb[86].mxu1 }
 0x9b9   : > { %v9341_v18 = vpop.permute.xlu0 %9340  ;;  %v9545_v31 = vld [vmem:[#allocation5 + $0x158] sm:$0xff]  ;;  %v15009_v12 = vpop.f32.mrb[87].mxu1 }
 0x9ba   : > { %9373 = vst.msk [vmem:[#allocation5 + $0x170] sm:$0xff] %vm6755_vm3, %v9341_v18  ;;  %9772 = vmatprep.mubr.f32.mxu0 %v9545_v31 }
 0x9bb   : > { %9773 = vmatmul.mubr.f32.gmra.mrb[108].mxu0 %v9544_v47 }
 0x9bd   : > { %v9437_v30 = vpop.permute.xlu0 %9436 }
 0x9be   : > { %9469 = vst.msk [vmem:[#allocation5 + $0x170] sm:$0xff] %vm6852_vm12, %v9437_v30 }
 0x9c5   : > { %v9548_v11 = vld [vmem:[#allocation5 + $0x170] sm:$0xff] }
 0x9c6   : > { %9777 = vmatprep.mubr.f32.mxu0 %v9548_v11 }
 0x9c7   : > { %9778 = vmatmul.mubr.f32.gmra.mrb[110].mxu0 %v9547_v2 }
 0x9db   : > { %v15013_v37 = vpop.f32.mrb[88].mxu1 }
 0x9dc   : > { %v15015_v35 = vpop.f32.mrb[89].mxu1 }
 0x9e5   : > { %v10575_v6 = vpop.f32.mrb[80].mxu0 }
 0x9e6   : > { %v10576_v57 = vpop.f32.mrb[81].mxu0 }
 0x9e7   : > { %v10577_v62 = vadd.f32 %v10576_v57, %v10575_v6 }
 0x9e9   : > { %v9705_v13 = vadd.f32 %v10577_v62, %v15020_v38 }
 0x9eb   : > { %v9850_v20 = vadd.f32 %v14969_v4, %v9705_v13 }
 0x9ed   : > { %v10255_v26 = vmul.f32 -1.442695, %v9850_v20 }
 0x9ef   : > { %10996 = vpow2.f32 %v10255_v26 }
 0x9f1   : > { %v10578_v54 = vpop.f32.mrb[82].mxu0 }
 0x9f2   : > { %v10579_v56 = vpop.f32.mrb[83].mxu0 }
 0x9f3   : > { %v10580_v55 = vadd.f32 %v10579_v56, %v10578_v54 }
 0x9f4   : > { %v15024_v49 = vpop.f32.mrb[90].mxu1 }
 0x9f5   : > { %v15026_v51 = vpop.f32.mrb[91].mxu1  ;;  %v9710_v60 = vadd.f32 %v10580_v55, %v15020_v38 }
 0x9f7   : > { %v9855_v27 = vadd.f32 %v14967_v29, %v9710_v60 }
 0x9f9   : > { %v10997_v24 = vpop.eup %10996  ;;  %v10256_v61 = vmul.f32 -1.442695, %v9855_v27 }
 0x9fa   : > { %v9976_v63 = vadd.f32 1.0, %v10997_v24 }
 0x9fb   : > { %10998 = vpow2.f32 %v10256_v61 }
 0x9fc   : > { %11000 = vrcp.f32 %v9976_v63 }
 0x9fd   : > { %v10581_v4 = vpop.f32.mrb[84].mxu0 }
 0x9fe   : > { %v10582_v45 = vpop.f32.mrb[85].mxu0 }
 0x9ff   : > { %v10583_v8 = vadd.f32 %v10582_v45, %v10581_v4 }
 0xa01   : > { %v9715_v9 = vadd.f32 %v10583_v8, %v15020_v38 }
 0xa03   : > { %v9860_v17 = vadd.f32 %v14985_v52, %v9715_v9 }
 0xa05   : > { %v10999_v22 = vpop.eup %10998  ;;  %v10257_v25 = vmul.f32 -1.442695, %v9860_v17 }
 0xa06   : > { %v11001_v0 = vpop.eup %11000  ;;  %v9977_v29 = vadd.f32 1.0, %v10999_v22 }
 0xa07   : > { %v10024_v50 = vmul.f32 255.0, %v11001_v0  ;;  %11002 = vpow2.f32 %v10257_v25 }
 0xa08   : > { %11004 = vrcp.f32 %v9977_v29 }
 0xa09   : > { %10041 = vst.msk [vmem:[%s15036_s29] sm:$0xff] %vm10040_vm11, %v10024_v50  ;;  %v10584_v7 = vpop.f32.mrb[86].mxu0 }
 0xa0a   : > { %v10585_v52 = vpop.f32.mrb[87].mxu0 }
 0xa0b   : > { %v10586_v15 = vadd.f32 %v10585_v52, %v10584_v7 }
 0xa0c   : > { %v15040_v59 = vpop.f32.mrb[92].mxu1 }
 0xa0d   : > { %v15042_v44 = vpop.f32.mrb[93].mxu1  ;;  %v9720_v53 = vadd.f32 %v10586_v15, %v15020_v38 }
 0xa0f   : > { %v9865_v32 = vadd.f32 %v14983_v16, %v9720_v53 }
 0xa11   : > { %v11003_v23 = vpop.eup %11002  ;;  %v10258_v40 = vmul.f32 -1.442695, %v9865_v32 }
 0xa12   : > { %v11005_v41 = vpop.eup %11004  ;;  %v9978_v39 = vadd.f32 1.0, %v11003_v23 }
 0xa13   : > { %v10025_v1 = vmul.f32 255.0, %v11005_v41  ;;  %11006 = vpow2.f32 %v10258_v40 }
 0xa14   : > { %11008 = vrcp.f32 %v9978_v39 }
 0xa15   : > { %10042 = vst.msk [vmem:[%s15036_s29 + $0x8] sm:$0xff] %vm10040_vm11, %v10025_v1  ;;  %v10587_v36 = vpop.f32.mrb[88].mxu0 }
 0xa16   : > { %v10588_v46 = vpop.f32.mrb[89].mxu0 }
 0xa17   : > { %v10589_v14 = vadd.f32 %v10588_v46, %v10587_v36 }
 0xa19   : > { %v15048_v48 = vpop.f32.mrb[94].mxu1  ;;  %v9725_v34 = vadd.f32 %v10589_v14, %v15020_v38 }
 0xa1a   : > { %v15051_v21 = vpop.f32.mrb[95].mxu1 }
 0xa1b   : > { %v9870_v16 = vadd.f32 %v15001_v33, %v9725_v34 }
 0xa1d   : > { %v11007_v42 = vpop.eup %11006  ;;  %v10259_v10 = vmul.f32 -1.442695, %v9870_v16 }
 0xa1e   : > { %v11009_v43 = vpop.eup %11008  ;;  %v9979_v5 = vadd.f32 1.0, %v11007_v42 }
 0xa1f   : > { %v10026_v28 = vmul.f32 255.0, %v11009_v43  ;;  %11010 = vpow2.f32 %v10259_v10 }
 0xa20   : > { %11012 = vrcp.f32 %v9979_v5 }
 0xa21   : > { %v10590_v19 = vpop.f32.mrb[90].mxu0  ;;  %10043 = vst.msk [vmem:[%s15036_s29 + $0x10] sm:$0xff] %vm10040_vm11, %v10026_v28 }
 0xa22   : > { %v10591_v18 = vpop.f32.mrb[91].mxu0 }
 0xa23   : > { %v10592_v31 = vadd.f32 %v10591_v18, %v10590_v19 }
 0xa25   : > { %v9730_v47 = vadd.f32 %v10592_v31, %v15020_v38 }
 0xa27   : > { %v9875_v30 = vadd.f32 %v14999_v58, %v9730_v47 }
 0xa29   : > { %v10260_v11 = vmul.f32 -1.442695, %v9875_v30  ;;  %v11011_v2 = vpop.eup %11010 }
 0xa2a   : > { %v11013_v33 = vpop.eup %11012  ;;  %v9980_v6 = vadd.f32 1.0, %v11011_v2 }
 0xa2b   : > { %11014 = vpow2.f32 %v10260_v11  ;;  %v10027_v57 = vmul.f32 255.0, %v11013_v33 }
 0xa2c   : > { %11016 = vrcp.f32 %v9980_v6 }
 0xa2d   : > { %v10593_v62 = vpop.f32.mrb[92].mxu0  ;;  %10044 = vst.msk [vmem:[%s15036_s29 + $0x18] sm:$0xff] %vm10040_vm11, %v10027_v57 }
 0xa2e   : > { %v10594_v13 = vpop.f32.mrb[93].mxu0 }
 0xa2f   : > { %v10595_v20 = vadd.f32 %v10594_v13, %v10593_v62 }
 0xa31   : > { %v9735_v26 = vadd.f32 %v10595_v20, %v15020_v38 }
 0xa33   : > { %v9880_v54 = vadd.f32 %v15009_v12, %v9735_v26 }
 0xa35   : > { %v11015_v56 = vpop.eup %11014  ;;  %v10261_v55 = vmul.f32 -1.442695, %v9880_v54 }
 0xa36   : > { %v9981_v58 = vadd.f32 1.0, %v11015_v56  ;;  %v11017_v60 = vpop.eup %11016 }
 0xa37   : > { %11018 = vpow2.f32 %v10261_v55  ;;  %v10028_v27 = vmul.f32 255.0, %v11017_v60 }
 0xa38   : > { %11020 = vrcp.f32 %v9981_v58 }
 0xa39   : > { %v10596_v24 = vpop.f32.mrb[94].mxu0  ;;  %10045 = vst.msk [vmem:[%s15036_s29 + $0x20] sm:$0xff] %vm10040_vm11, %v10028_v27 }
 0xa3a   : > { %v10597_v61 = vpop.f32.mrb[95].mxu0 }
 0xa3b   : > { %v10598_v63 = vadd.f32 %v10597_v61, %v10596_v24 }
 0xa3d   : > { %v9740_v4 = vadd.f32 %v10598_v63, %v15020_v38 }
 0xa3f   : > { %v9885_v45 = vadd.f32 %v15007_v3, %v9740_v4 }
 0xa41   : > { %v11019_v8 = vpop.eup %11018  ;;  %v10262_v9 = vmul.f32 -1.442695, %v9885_v45 }
 0xa42   : > { %v11021_v12 = vpop.eup %11020  ;;  %v9982_v17 = vadd.f32 1.0, %v11019_v8 }
 0xa43   : > { %v10029_v22 = vmul.f32 255.0, %v11021_v12  ;;  %11022 = vpow2.f32 %v10262_v9 }
 0xa44   : > { %11024 = vrcp.f32 %v9982_v17 }
 0xa45   : > { %10046 = vst.msk [vmem:[%s15036_s29 + $0x28] sm:$0xff] %vm10040_vm11, %v10029_v22  ;;  %v10599_v25 = vpop.f32.mrb[96].mxu0 }
 0xa46   : > { %v10600_v0 = vpop.f32.mrb[97].mxu0 }
 0xa47   : > { %v10601_v29 = vadd.f32 %v10600_v0, %v10599_v25 }
 0xa49   : > { %v9745_v50 = vadd.f32 %v10601_v29, %v15020_v38 }
 0xa4b   : > { %v9890_v7 = vadd.f32 %v15015_v35, %v9745_v50 }
 0xa4d   : > { %v11023_v52 = vpop.eup %11022  ;;  %v10263_v15 = vmul.f32 -1.442695, %v9890_v7 }
 0xa4e   : > { %v11025_v3 = vpop.eup %11024  ;;  %v9983_v53 = vadd.f32 1.0, %v11023_v52 }
 0xa4f   : > { %v10030_v32 = vmul.f32 255.0, %v11025_v3  ;;  %11026 = vpow2.f32 %v10263_v15 }
 0xa50   : > { %11028 = vrcp.f32 %v9983_v53 }
 0xa51   : > { %10047 = vst.msk [vmem:[%s15036_s29 + $0x30] sm:$0xff] %vm10040_vm11, %v10030_v32  ;;  %v10602_v23 = vpop.f32.mrb[98].mxu0 }
 0xa52   : > { %v10603_v40 = vpop.f32.mrb[99].mxu0 }
 0xa53   : > { %v10604_v41 = vadd.f32 %v10603_v40, %v10602_v23 }
 0xa55   : > { %v9750_v39 = vadd.f32 %v10604_v41, %v15020_v38 }
 0xa57   : > { %v9895_v1 = vadd.f32 %v15013_v37, %v9750_v39 }
 0xa59   : > { %v11027_v36 = vpop.eup %11026  ;;  %v10264_v46 = vmul.f32 -1.442695, %v9895_v1 }
 0xa5a   : > { %v11029_v35 = vpop.eup %11028  ;;  %v9984_v14 = vadd.f32 1.0, %v11027_v36 }
 0xa5b   : > { %v10031_v34 = vmul.f32 255.0, %v11029_v35  ;;  %11030 = vpow2.f32 %v10264_v46 }
 0xa5c   : > { %11032 = vrcp.f32 %v9984_v14 }
 0xa5d   : > { %10048 = vst.msk [vmem:[%s15036_s29 + $0x38] sm:$0xff] %vm10040_vm11, %v10031_v34  ;;  %v10605_v16 = vpop.f32.mrb[100].mxu0 }
 0xa5e   : > { %v10606_v42 = vpop.f32.mrb[101].mxu0 }
 0xa5f   : > { %v10607_v10 = vadd.f32 %v10606_v42, %v10605_v16 }
 0xa61   : > { %v9755_v43 = vadd.f32 %v10607_v10, %v15020_v38 }
 0xa63   : > { %v9900_v5 = vadd.f32 %v15026_v51, %v9755_v43 }
 0xa65   : > { %v11031_v28 = vpop.eup %11030  ;;  %v10265_v19 = vmul.f32 -1.442695, %v9900_v5 }
 0xa66   : > { %v11033_v37 = vpop.eup %11032  ;;  %v9985_v18 = vadd.f32 1.0, %v11031_v28 }
 0xa67   : > { %v10032_v31 = vmul.f32 255.0, %v11033_v37  ;;  %11034 = vpow2.f32 %v10265_v19 }
 0xa68   : > { %11036 = vrcp.f32 %v9985_v18 }
 0xa69   : > { %10049 = vst.msk [vmem:[%s15036_s29 + $0x40] sm:$0xff] %vm10040_vm11, %v10032_v31 }
 0xa6a   : > { %v10608_v47 = vpop.f32.mrb[102].mxu0 }
 0xa6b   : > { %v10609_v30 = vpop.f32.mrb[103].mxu0 }
 0xa6c   : > { %v10610_v11 = vadd.f32 %v10609_v30, %v10608_v47 }
 0xa6e   : > { %v9760_v2 = vadd.f32 %v10610_v11, %v15020_v38 }
 0xa70   : > { %v9905_v33 = vadd.f32 %v15024_v49, %v9760_v2 }
 0xa71   : > { %v11035_v6 = vpop.eup %11034 }
 0xa72   : > { %v10266_v57 = vmul.f32 -1.442695, %v9905_v33  ;;  %v11037_v51 = vpop.eup %11036  ;;  %v9986_v62 = vadd.f32 1.0, %v11035_v6 }
 0xa73   : > { %v10033_v13 = vmul.f32 255.0, %v11037_v51 }
 0xa74   : > { %11038 = vpow2.f32 %v10266_v57 }
 0xa75   : > { %11040 = vrcp.f32 %v9986_v62  ;;  %10050 = vst.msk [vmem:[%s15036_s29 + $0x48] sm:$0xff] %vm10040_vm11, %v10033_v13 }
 0xa76   : > { %v10611_v20 = vpop.f32.mrb[104].mxu0 }
 0xa77   : > { %v10612_v26 = vpop.f32.mrb[105].mxu0 }
 0xa78   : > { %v10613_v54 = vadd.f32 %v10612_v26, %v10611_v20 }
 0xa7a   : > { %v9765_v56 = vadd.f32 %v10613_v54, %v15020_v38 }
 0xa7c   : > { %v9910_v55 = vadd.f32 %v15042_v44, %v9765_v56 }
 0xa7e   : > { %v11039_v58 = vpop.eup %11038  ;;  %v10267_v60 = vmul.f32 -1.442695, %v9910_v55 }
 0xa7f   : > { %v11041_v49 = vpop.eup %11040  ;;  %v9987_v27 = vadd.f32 1.0, %v11039_v58 }
 0xa80   : > { %v10034_v24 = vmul.f32 255.0, %v11041_v49  ;;  %11042 = vpow2.f32 %v10267_v60 }
 0xa81   : > { %11044 = vrcp.f32 %v9987_v27 }
 0xa82   : > { %10051 = vst.msk [vmem:[%s15036_s29 + $0x50] sm:$0xff] %vm10040_vm11, %v10034_v24  ;;  %v10614_v61 = vpop.f32.mrb[106].mxu0 }
 0xa83   : > { %v10615_v63 = vpop.f32.mrb[107].mxu0 }
 0xa84   : > { %v10616_v4 = vadd.f32 %v10615_v63, %v10614_v61 }
 0xa86   : > { %v9770_v45 = vadd.f32 %v10616_v4, %v15020_v38 }
 0xa88   : > { %v9915_v8 = vadd.f32 %v15040_v59, %v9770_v45 }
 0xa8a   : > { %v11043_v9 = vpop.eup %11042  ;;  %v10268_v12 = vmul.f32 -1.442695, %v9915_v8 }
 0xa8b   : > { %v11045_v44 = vpop.eup %11044  ;;  %v9988_v17 = vadd.f32 1.0, %v11043_v9 }
 0xa8c   : > { %v10035_v22 = vmul.f32 255.0, %v11045_v44  ;;  %11046 = vpow2.f32 %v10268_v12 }
 0xa8d   : > { %11048 = vrcp.f32 %v9988_v17 }
 0xa8e   : > { %10052 = vst.msk [vmem:[%s15036_s29 + $0x58] sm:$0xff] %vm10040_vm11, %v10035_v22  ;;  %v10617_v25 = vpop.f32.mrb[108].mxu0 }
 0xa8f   : > { %v10618_v0 = vpop.f32.mrb[109].mxu0 }
 0xa90   : > { %v10619_v29 = vadd.f32 %v10618_v0, %v10617_v25 }
 0xa92   : > { %v9775_v50 = vadd.f32 %v10619_v29, %v15020_v38 }
 0xa94   : > { %v9920_v7 = vadd.f32 %v15051_v21, %v9775_v50 }
 0xa96   : > { %v11047_v52 = vpop.eup %11046  ;;  %v10269_v15 = vmul.f32 -1.442695, %v9920_v7 }
 0xa97   : > { %v11049_v59 = vpop.eup %11048  ;;  %v9989_v3 = vadd.f32 1.0, %v11047_v52 }
 0xa98   : > { %v10036_v53 = vmul.f32 255.0, %v11049_v59  ;;  %11050 = vpow2.f32 %v10269_v15 }
 0xa99   : > { %11052 = vrcp.f32 %v9989_v3 }
 0xa9a   : > { %10053 = vst.msk [vmem:[%s15036_s29 + $0x60] sm:$0xff] %vm10040_vm11, %v10036_v53  ;;  %v10620_v32 = vpop.f32.mrb[110].mxu0 }
 0xa9b   : > { %v10621_v23 = vpop.f32.mrb[111].mxu0 }
 0xa9c   : > { %v10622_v40 = vadd.f32 %v10621_v23, %v10620_v32 }
 0xa9e   : > { %v9780_v41 = vadd.f32 %v10622_v40, %v15020_v38 }
 0xaa0   : > { %v9925_v39 = vadd.f32 %v15048_v48, %v9780_v41 }
 0xaa2   : > { %v11051_v1 = vpop.eup %11050  ;;  %v10270_v21 = vmul.f32 -1.442695, %v9925_v39 }
 0xaa3   : > { %v11053_v36 = vpop.eup %11052  ;;  %v9990_v46 = vadd.f32 1.0, %v11051_v1 }
 0xaa4   : > { %v10037_v35 = vmul.f32 255.0, %v11053_v36  ;;  %11054 = vpow2.f32 %v10270_v21 }
 0xaa5   : > { %11056 = vrcp.f32 %v9990_v46 }
 0xaa6   : > { %10054 = vst.msk [vmem:[%s15036_s29 + $0x68] sm:$0xff] %vm10040_vm11, %v10037_v35 }
 0xaae   : > { %v11055_v14 = vpop.eup %11054 }
 0xaaf   : > { %v11057_v34 = vpop.eup %11056  ;;  %v9991_v16 = vadd.f32 1.0, %v11055_v14 }
 0xab0   : > { %v10038_v42 = vmul.f32 255.0, %v11057_v34 }
 0xab1   : > { %11058 = vrcp.f32 %v9991_v16 }
 0xab2   : > { %10055 = vst.msk [vmem:[%s15036_s29 + $0x70] sm:$0xff] %vm10040_vm11, %v10038_v42 }
 0xabb   : > { %v11059_v38 = vpop.eup %11058 }
 0xabc   : > { %v10039_v10 = vmul.f32 255.0, %v11059_v38 }
 0xabe   : > { %10056 = vst.msk [vmem:[%s15036_s29 + $0x78] sm:$0xff] %vm10040_vm11, %v10039_v10 }
 0xabf PF: > { %s17_s24 = sadd.s32 1, %s11070_s24  }
 0xac0   : > { %p14_p4 = scmp.ge.s32.totalorder %s17_s24, 4  }
 0xac2   :  { %16 = sbr.rel (!%p14_p4) target bundleno = 1 (0x1), region = 87 }

</bundles_post_ra>
